<compile_context>
chip_gen: v7x
topology: tpu7x:2x2x1
jax: 0.10.0
libtpu: 0.0.40
codegen_flags: <defaults>
</compile_context>

<pallas_src>
import jax
import jax.numpy as jnp
from jax import lax
from jax.experimental import pallas as pl
from jax.experimental.pallas import tpu as pltpu


# ----------------------------------------------------------------------------
# Small helpers
# ----------------------------------------------------------------------------
def _pick_h_block(h, w, target_rows=128):
    """Even divisor of h so a conv block has ~<= target_rows matmul rows."""
    hb = min(h, max(2, target_rows // max(w, 1)))
    hb -= hb % 2
    hb = max(hb, 2)
    while hb > 2 and h % hb != 0:
        hb -= 2
    return hb


def _num_batch_chunks_auto(batch):
    """2 grid chunks only on dual-TensorCore chips (v7x) with an even batch."""
    try:
        kind = jax.devices()[0].device_kind.lower()
    except Exception:
        return 1
    dual_core = ("v7" in kind) or ("7x" in kind)
    return 2 if (dual_core and batch >= 2 and batch % 2 == 0) else 1


# ----------------------------------------------------------------------------
# Fused forward builder
# ----------------------------------------------------------------------------
def build_image_encoder(image_size, channels, linear_features, batch,
                        num_batch_chunks=None, use_bf16_matmul=False):
    """Returns (pack_params, forward).

    pack_params(conv_params, lin_w, lin_b) -> tuple of kernel-layout weights
        (call ONCE; hoists all weight repacking out of the per-call path).
    forward(x_nchw, packed) -> (N, linear_features)
    """
    n_conv = len(channels) - 1
    spatial = [tuple(image_size)]
    for _ in range(n_conv):
        h, w = spatial[-1]
        assert h % 2 == 0 and w % 2 == 0, "spatial dims must stay even"
        spatial.append((h // 2, w // 2))
    hf, wf = spatial[-1]
    cf = channels[-1]
    lf = linear_features
    h_block = [_pick_h_block(spatial[i][0], spatial[i][1]) for i in range(n_conv)]

    if num_batch_chunks is None:
        num_batch_chunks = _num_batch_chunks_auto(batch)
    assert batch % num_batch_chunks == 0
    nb = batch // num_batch_chunks                     # images per grid step

    mm_dtype = jnp.bfloat16 if use_bf16_matmul else jnp.float32

    # ------------------------------------------------------------------ kernel
    def kernel(*refs):
        x_ref = refs[0]
        conv_w = [refs[1 + 2 * i] for i in range(n_conv)]   # (9, Cin, Cout)
        conv_b = [refs[2 + 2 * i] for i in range(n_conv)]   # (1, Cout)
        weff_ref = refs[1 + 2 * n_conv]                      # (hf*wf, cf, lf)
        blin_ref = refs[2 + 2 * n_conv]                      # (1, lf)
        o_ref = refs[3 + 2 * n_conv]                         # (1, nb, lf)
        pads = refs[4 + 2 * n_conv: 4 + 2 * n_conv + n_conv + 1]
        convs = refs[4 + 2 * n_conv + n_conv + 1:]

        # Zero ONLY the 1-pixel borders (interiors are fully rewritten per
        # image).  Done unconditionally once per grid step, so it is correct
        # on every TensorCore under 'parallel' semantics.
        for i in range(n_conv):
            h, w = spatial[i]
            c = channels[i]
            p = pads[i]
            p[0:1, :, :] = jnp.zeros((1, w + 2, c), jnp.float32)
            p[h + 1:h + 2, :, :] = jnp.zeros((1, w + 2, c), jnp.float32)
            p[:, 0:1, :] = jnp.zeros((h + 2, 1, c), jnp.float32)
            p[:, w + 1:w + 2, :] = jnp.zeros((h + 2, 1, c), jnp.float32)

        for n in range(nb):                                  # images in chunk
            ih, iw = spatial[0]
            pads[0][1:1 + ih, 1:1 + iw, :] = x_ref[n]        # stage input

            for i in range(n_conv):
                h, w = spatial[i]
                cin, cout = channels[i], channels[i + 1]
                hn, wn = h // 2, w // 2
                hb = h_block[i]
                src, dst, cbuf = pads[i], pads[i + 1], convs[i]
                w_l, b_l = conv_w[i], conv_b[i]

                for r0 in range(0, h, hb):
                    # Conv2d 3x3 'same': 9 accumulating MXU matmuls over
                    # shifted windows of the zero-bordered buffer (no im2col
                    # stores, K << 128 either way).
                    acc = jnp.zeros((hb * w, cout), jnp.float32)
                    for kh in range(3):
                        for kw in range(3):
                            win = src[r0 + kh:r0 + kh + hb, kw:kw + w, :]
                            win = win.reshape(hb * w, cin).astype(mm_dtype)
                            wt = w_l[kh * 3 + kw].astype(mm_dtype)
                            acc = acc + jnp.dot(
                                win, wt, preferred_element_type=jnp.float32)
                    acc = jnp.maximum(acc + b_l[...], 0.0)    # bias + ReLU
                    cbuf[...] = acc.reshape(hb, w, cout)

                    # MaxPool2d(2): W via stride-2 ref loads, H via a
                    # leading-dims-only reshape (no size-2 sublane dim).
                    pw = jnp.maximum(cbuf[:, pl.ds(0, wn, stride=2), :],
                                     cbuf[:, pl.ds(1, wn, stride=2), :])
                    ph = jnp.max(pw.reshape(hb // 2, 2, wn, cout), axis=1)
                    dst[1 + r0 // 2:1 + r0 // 2 + hb // 2, 1:1 + wn, :] = ph

            # Flatten (NCHW ordering folded into w_eff host-side) + Linear +
            # ReLU as hf*wf accumulating matmuls read from the last buffer.
            feat = pads[n_conv]
            out = jnp.zeros((1, lf), jnp.float32)
            for hh in range(hf):
                for ww in range(wf):
                    v = feat[1 + hh, 1 + ww:2 + ww, :].astype(mm_dtype)
                    wt = weff_ref[hh * wf + ww].astype(mm_dtype)
                    out = out + jnp.dot(v, wt,
                                        preferred_element_type=jnp.float32)
            out = jnp.maximum(out + blin_ref[...], 0.0)
            o_ref[0, n:n + 1, :] = out.astype(o_ref.dtype)

    # ----------------------------------------------------------- specs / call
    in_specs = [pl.BlockSpec((nb,) + spatial[0] + (channels[0],),
                             lambda i: (i, 0, 0, 0))]
    for li in range(n_conv):
        cin, cout = channels[li], channels[li + 1]
        in_specs.append(pl.BlockSpec((9, cin, cout), lambda i: (0, 0, 0)))
        in_specs.append(pl.BlockSpec((1, cout), lambda i: (0, 0)))
    in_specs.append(pl.BlockSpec((hf * wf, cf, lf), lambda i: (0, 0, 0)))
    in_specs.append(pl.BlockSpec((1, lf), lambda i: (0, 0)))

    out_spec = pl.BlockSpec((1, nb, lf), lambda i: (i, 0, 0))

    scratch = [pltpu.VMEM((spatial[i][0] + 2, spatial[i][1] + 2, channels[i]),
                          jnp.float32) for i in range(n_conv + 1)]
    scratch += [pltpu.VMEM((h_block[i], spatial[i][1], channels[i + 1]),
                           jnp.float32) for i in range(n_conv)]

    call = pl.pallas_call(
        kernel,
        out_shape=jax.ShapeDtypeStruct((num_batch_chunks, nb, lf), jnp.float32),
        grid=(num_batch_chunks,),
        in_specs=in_specs,
        out_specs=out_spec,
        scratch_shapes=scratch,
        compiler_params=pltpu.CompilerParams(
            dimension_semantics=("parallel",)),
    )

    # --------------------------------------------------------------- wrappers
    def pack_params(conv_params, lin_w, lin_b):
        """One-time repack of PyTorch-layout weights into kernel layout."""
        packed = []
        for (w_oihw, b) in conv_params:
            cout, cin = int(w_oihw.shape[0]), int(w_oihw.shape[1])
            # (Cout, Cin, kh, kw) -> (kh, kw, Cin, Cout) -> (9, Cin, Cout)
            wk = jnp.transpose(jnp.asarray(w_oihw, jnp.float32),
                               (2, 3, 1, 0)).reshape(9, cin, cout)
            packed.append(wk)
            packed.append(jnp.asarray(b, jnp.float32).reshape(1, cout))
        # Fold nn.Flatten's NCHW ordering into the linear weight:
        # w_eff[h*wf + w, c, l] = lin_w[l, c*hf*wf + h*wf + w]
        w_eff = jnp.transpose(
            jnp.asarray(lin_w, jnp.float32).reshape(lf, cf, hf, wf),
            (2, 3, 1, 0)).reshape(hf * wf, cf, lf)
        packed.append(w_eff)
        packed.append(jnp.asarray(lin_b, jnp.float32).reshape(1, lf))
        return tuple(packed)

    @jax.jit
    def forward(x_nchw, packed):
        assert x_nchw.shape[0] == batch
        # Single tiny layout op outside the kernel: NCHW -> NHWC.
        x_nhwc = jnp.transpose(x_nchw, (0, 2, 3, 1)).astype(jnp.float32)
        out = call(x_nhwc, *packed)
        return out.reshape(batch, lf)

    return pack_params, forward


# ----------------------------------------------------------------------------
# Parameter init (deterministic, synthetic) + pure-JAX reference
# ----------------------------------------------------------------------------
def init_params(key, image_size, channels, linear_features):
    h, w = image_size
    conv_params = []
    for i in range(len(channels) - 1):
        cin, cout = channels[i], channels[i + 1]
        key, k1, k2 = jax.random.split(key, 3)
        w_oihw = 0.1 * jax.random.normal(k1, (cout, cin, 3, 3), jnp.float32)
        b = 0.1 * jax.random.normal(k2, (cout,), jnp.float32)
        conv_params.append((w_oihw, b))
        h, w = h // 2, w // 2
    in_features = channels[-1] * h * w
    key, k1, k2 = jax.random.split(key, 3)
    lin_w = 0.1 * jax.random.normal(k1, (linear_features, in_features),
                                    jnp.float32)   # PyTorch layout (out, in)
    lin_b = 0.1 * jax.random.normal(k2, (linear_features,), jnp.float32)
    return conv_params, lin_w, lin_b


def reference_forward(x_nchw, conv_params, lin_w, lin_b):
    x = x_nchw
    for w_oihw, b in conv_params:
        x = lax.conv_general_dilated(
            x, w_oihw, (1, 1), 'SAME',
            dimension_numbers=('NCHW', 'OIHW', 'NCHW'),
            precision=lax.Precision.HIGHEST)
        x = jnp.maximum(x + b[None, :, None, None], 0.0)
        x = lax.reduce_window(x, -jnp.inf, lax.max,
                              (1, 1, 2, 2), (1, 1, 2, 2), 'VALID')
    x = x.reshape(x.shape[0], -1)
    y = jnp.dot(x, lin_w.T, precision=lax.Precision.HIGHEST) + lin_b
    return jnp.maximum(y, 0.0)


if __name__ == "__main__":
    # Small forward-consistent config: 3 conv blocks, 16x16 -> 2x2 spatial.
    image_size = (16, 16)
    channels = [3, 8, 16, 16]
    linear_features = 32
    N = 2

    key = jax.random.PRNGKey(0)
    key, kx = jax.random.split(key)
    x = jax.random.normal(kx, (N, channels[0], *image_size), jnp.float32)
    conv_params, lin_w, lin_b = init_params(key, image_size, channels,
                                            linear_features)

    pack_params, forward = build_image_encoder(image_size, channels,
                                               linear_features, batch=N)
    packed = pack_params(conv_params, lin_w, lin_b)   # one-time weight repack

    out = jax.block_until_ready(forward(x, packed))
    assert out.shape == (N, linear_features), out.shape

    ref = reference_forward(x, conv_params, lin_w, lin_b)
    err = float(jnp.max(jnp.abs(out - ref)))
    assert jnp.allclose(out, ref, rtol=1e-3, atol=1e-3), err

    print("KERNEL_OK")
</pallas_src>

<mosaic_0001>
module attributes {stable_mosaic.version = 11 : i64} {
  func.func @kernel(%arg0: i32, %arg1: memref<2x16x16x3xf32, #tpu.memory_space<vmem>>, %arg2: memref<9x3x8xf32, #tpu.memory_space<vmem>>, %arg3: memref<1x8xf32, #tpu.memory_space<vmem>>, %arg4: memref<9x8x16xf32, #tpu.memory_space<vmem>>, %arg5: memref<1x16xf32, #tpu.memory_space<vmem>>, %arg6: memref<9x16x16xf32, #tpu.memory_space<vmem>>, %arg7: memref<1x16xf32, #tpu.memory_space<vmem>>, %arg8: memref<4x16x32xf32, #tpu.memory_space<vmem>>, %arg9: memref<1x32xf32, #tpu.memory_space<vmem>>, %arg10: memref<1x2x32xf32, #tpu.memory_space<vmem>>, %arg11: memref<18x18x3xf32, #tpu.memory_space<vmem>>, %arg12: memref<10x10x8xf32, #tpu.memory_space<vmem>>, %arg13: memref<6x6x16xf32, #tpu.memory_space<vmem>>, %arg14: memref<4x4x16xf32, #tpu.memory_space<vmem>>, %arg15: memref<8x16x8xf32, #tpu.memory_space<vmem>>, %arg16: memref<8x8x16xf32, #tpu.memory_space<vmem>>, %arg17: memref<4x4x16xf32, #tpu.memory_space<vmem>>) attributes {dimension_semantics = [#tpu.dimension_semantics<parallel>], iteration_bounds = array<i64: 1>, scalar_prefetch = 0 : i64, scratch_operands = 7 : i64, tpu.core_type = #tpu.core_type<tc>, window_params = [{transform_indices = @transform_0, window_bounds = array<i64: 2, 16, 16, 3>}, {pipeline_mode = #tpu.pipeline_mode<synchronous>, transform_indices = @transform_1, window_bounds = array<i64: 9, 3, 8>}, {pipeline_mode = #tpu.pipeline_mode<synchronous>, transform_indices = @transform_2, window_bounds = array<i64: 1, 8>}, {pipeline_mode = #tpu.pipeline_mode<synchronous>, transform_indices = @transform_3, window_bounds = array<i64: 9, 8, 16>}, {pipeline_mode = #tpu.pipeline_mode<synchronous>, transform_indices = @transform_4, window_bounds = array<i64: 1, 16>}, {pipeline_mode = #tpu.pipeline_mode<synchronous>, transform_indices = @transform_5, window_bounds = array<i64: 9, 16, 16>}, {pipeline_mode = #tpu.pipeline_mode<synchronous>, transform_indices = @transform_6, window_bounds = array<i64: 1, 16>}, {pipeline_mode = #tpu.pipeline_mode<synchronous>, transform_indices = @transform_7, window_bounds = array<i64: 4, 16, 32>}, {pipeline_mode = #tpu.pipeline_mode<synchronous>, transform_indices = @transform_8, window_bounds = array<i64: 1, 32>}, {transform_indices = @transform_9, window_bounds = array<i64: 1, 2, 32>}]} {
    %cst = arith.constant 0.000000e+00 : f32
    %0 = vector.broadcast %cst : f32 to vector<1x18x3xf32>
    %c0 = arith.constant 0 : index
    %c0_0 = arith.constant 0 : index
    %c0_1 = arith.constant 0 : index
    %1 = vector.load %arg11[%c0, %c0_0, %c0_1] : memref<18x18x3xf32, #tpu.memory_space<vmem>>, vector<1x18x3xf32>
    tpu.vector_store %arg11[%c0, %c0_0, %c0_1], %0 {strides = array<i32>} : memref<18x18x3xf32, #tpu.memory_space<vmem>>, vector<1x18x3xf32>,
    %cst_2 = arith.constant 0.000000e+00 : f32
    %2 = vector.broadcast %cst_2 : f32 to vector<1x18x3xf32>
    %c17 = arith.constant 17 : index
    %c0_3 = arith.constant 0 : index
    %c0_4 = arith.constant 0 : index
    %3 = vector.load %arg11[%c17, %c0_3, %c0_4] : memref<18x18x3xf32, #tpu.memory_space<vmem>>, vector<1x18x3xf32>
    tpu.vector_store %arg11[%c17, %c0_3, %c0_4], %2 {strides = array<i32>} : memref<18x18x3xf32, #tpu.memory_space<vmem>>, vector<1x18x3xf32>,
    %cst_5 = arith.constant 0.000000e+00 : f32
    %4 = vector.broadcast %cst_5 : f32 to vector<18x1x3xf32>
    %c0_6 = arith.constant 0 : index
    %c0_7 = arith.constant 0 : index
    %c0_8 = arith.constant 0 : index
    %5 = vector.load %arg11[%c0_6, %c0_7, %c0_8] : memref<18x18x3xf32, #tpu.memory_space<vmem>>, vector<18x1x3xf32>
    tpu.vector_store %arg11[%c0_6, %c0_7, %c0_8], %4 {strides = array<i32>} : memref<18x18x3xf32, #tpu.memory_space<vmem>>, vector<18x1x3xf32>,
    %cst_9 = arith.constant 0.000000e+00 : f32
    %6 = vector.broadcast %cst_9 : f32 to vector<18x1x3xf32>
    %c0_10 = arith.constant 0 : index
    %c17_11 = arith.constant 17 : index
    %c0_12 = arith.constant 0 : index
    %7 = vector.load %arg11[%c0_10, %c17_11, %c0_12] : memref<18x18x3xf32, #tpu.memory_space<vmem>>, vector<18x1x3xf32>
    tpu.vector_store %arg11[%c0_10, %c17_11, %c0_12], %6 {strides = array<i32>} : memref<18x18x3xf32, #tpu.memory_space<vmem>>, vector<18x1x3xf32>,
    %cst_13 = arith.constant 0.000000e+00 : f32
    %8 = vector.broadcast %cst_13 : f32 to vector<1x10x8xf32>
    %c0_14 = arith.constant 0 : index
    %c0_15 = arith.constant 0 : index
    %c0_16 = arith.constant 0 : index
    %9 = vector.load %arg12[%c0_14, %c0_15, %c0_16] : memref<10x10x8xf32, #tpu.memory_space<vmem>>, vector<1x10x8xf32>
    tpu.vector_store %arg12[%c0_14, %c0_15, %c0_16], %8 {strides = array<i32>} : memref<10x10x8xf32, #tpu.memory_space<vmem>>, vector<1x10x8xf32>,
    %cst_17 = arith.constant 0.000000e+00 : f32
    %10 = vector.broadcast %cst_17 : f32 to vector<1x10x8xf32>
    %c9 = arith.constant 9 : index
    %c0_18 = arith.constant 0 : index
    %c0_19 = arith.constant 0 : index
    %11 = vector.load %arg12[%c9, %c0_18, %c0_19] : memref<10x10x8xf32, #tpu.memory_space<vmem>>, vector<1x10x8xf32>
    tpu.vector_store %arg12[%c9, %c0_18, %c0_19], %10 {strides = array<i32>} : memref<10x10x8xf32, #tpu.memory_space<vmem>>, vector<1x10x8xf32>,
    %cst_20 = arith.constant 0.000000e+00 : f32
    %12 = vector.broadcast %cst_20 : f32 to vector<10x1x8xf32>
    %c0_21 = arith.constant 0 : index
    %c0_22 = arith.constant 0 : index
    %c0_23 = arith.constant 0 : index
    %13 = vector.load %arg12[%c0_21, %c0_22, %c0_23] : memref<10x10x8xf32, #tpu.memory_space<vmem>>, vector<10x1x8xf32>
    tpu.vector_store %arg12[%c0_21, %c0_22, %c0_23], %12 {strides = array<i32>} : memref<10x10x8xf32, #tpu.memory_space<vmem>>, vector<10x1x8xf32>,
    %cst_24 = arith.constant 0.000000e+00 : f32
    %14 = vector.broadcast %cst_24 : f32 to vector<10x1x8xf32>
    %c0_25 = arith.constant 0 : index
    %c9_26 = arith.constant 9 : index
    %c0_27 = arith.constant 0 : index
    %15 = vector.load %arg12[%c0_25, %c9_26, %c0_27] : memref<10x10x8xf32, #tpu.memory_space<vmem>>, vector<10x1x8xf32>
    tpu.vector_store %arg12[%c0_25, %c9_26, %c0_27], %14 {strides = array<i32>} : memref<10x10x8xf32, #tpu.memory_space<vmem>>, vector<10x1x8xf32>,
    %cst_28 = arith.constant 0.000000e+00 : f32
    %16 = vector.broadcast %cst_28 : f32 to vector<1x6x16xf32>
    %c0_29 = arith.constant 0 : index
    %c0_30 = arith.constant 0 : index
    %c0_31 = arith.constant 0 : index
    %17 = vector.load %arg13[%c0_29, %c0_30, %c0_31] : memref<6x6x16xf32, #tpu.memory_space<vmem>>, vector<1x6x16xf32>
    tpu.vector_store %arg13[%c0_29, %c0_30, %c0_31], %16 {strides = array<i32>} : memref<6x6x16xf32, #tpu.memory_space<vmem>>, vector<1x6x16xf32>,
    %cst_32 = arith.constant 0.000000e+00 : f32
    %18 = vector.broadcast %cst_32 : f32 to vector<1x6x16xf32>
    %c5 = arith.constant 5 : index
    %c0_33 = arith.constant 0 : index
    %c0_34 = arith.constant 0 : index
    %19 = vector.load %arg13[%c5, %c0_33, %c0_34] : memref<6x6x16xf32, #tpu.memory_space<vmem>>, vector<1x6x16xf32>
    tpu.vector_store %arg13[%c5, %c0_33, %c0_34], %18 {strides = array<i32>} : memref<6x6x16xf32, #tpu.memory_space<vmem>>, vector<1x6x16xf32>,
    %cst_35 = arith.constant 0.000000e+00 : f32
    %20 = vector.broadcast %cst_35 : f32 to vector<6x1x16xf32>
    %c0_36 = arith.constant 0 : index
    %c0_37 = arith.constant 0 : index
    %c0_38 = arith.constant 0 : index
    %21 = vector.load %arg13[%c0_36, %c0_37, %c0_38] : memref<6x6x16xf32, #tpu.memory_space<vmem>>, vector<6x1x16xf32>
    tpu.vector_store %arg13[%c0_36, %c0_37, %c0_38], %20 {strides = array<i32>} : memref<6x6x16xf32, #tpu.memory_space<vmem>>, vector<6x1x16xf32>,
    %cst_39 = arith.constant 0.000000e+00 : f32
    %22 = vector.broadcast %cst_39 : f32 to vector<6x1x16xf32>
    %c0_40 = arith.constant 0 : index
    %c5_41 = arith.constant 5 : index
    %c0_42 = arith.constant 0 : index
    %23 = vector.load %arg13[%c0_40, %c5_41, %c0_42] : memref<6x6x16xf32, #tpu.memory_space<vmem>>, vector<6x1x16xf32>
    tpu.vector_store %arg13[%c0_40, %c5_41, %c0_42], %22 {strides = array<i32>} : memref<6x6x16xf32, #tpu.memory_space<vmem>>, vector<6x1x16xf32>,
    %c0_43 = arith.constant 0 : index
    %c0_44 = arith.constant 0 : index
    %c0_45 = arith.constant 0 : index
    %c0_46 = arith.constant 0 : index
    %24 = vector.load %arg1[%c0_43, %c0_44, %c0_45, %c0_46] : memref<2x16x16x3xf32, #tpu.memory_space<vmem>>, vector<1x16x16x3xf32>
    %25 = vector.shape_cast %24 : vector<1x16x16x3xf32> to vector<16x16x3xf32>
    %c1 = arith.constant 1 : index
    %c1_47 = arith.constant 1 : index
    %c0_48 = arith.constant 0 : index
    %26 = vector.load %arg11[%c1, %c1_47, %c0_48] : memref<18x18x3xf32, #tpu.memory_space<vmem>>, vector<16x16x3xf32>
    tpu.vector_store %arg11[%c1, %c1_47, %c0_48], %25 {strides = array<i32>} : memref<18x18x3xf32, #tpu.memory_space<vmem>>, vector<16x16x3xf32>,
    %cst_49 = arith.constant 0.000000e+00 : f32
    %27 = vector.broadcast %cst_49 : f32 to vector<128x8xf32>
    %c0_50 = arith.constant 0 : index
    %c0_51 = arith.constant 0 : index
    %c0_52 = arith.constant 0 : index
    %28 = vector.load %arg11[%c0_50, %c0_51, %c0_52] : memref<18x18x3xf32, #tpu.memory_space<vmem>>, vector<8x16x3xf32>
    %29 = vector.shape_cast %28 : vector<8x16x3xf32> to vector<128x3xf32>
    %c0_53 = arith.constant 0 : index
    %c0_54 = arith.constant 0 : index
    %c0_55 = arith.constant 0 : index
    %30 = vector.load %arg2[%c0_53, %c0_54, %c0_55] : memref<9x3x8xf32, #tpu.memory_space<vmem>>, vector<1x3x8xf32>
    %31 = vector.shape_cast %30 : vector<1x3x8xf32> to vector<3x8xf32>
    %cst_56 = arith.constant dense<0.000000e+00> : vector<128x8xf32>
    %32 = tpu.matmul %29, %31, %cst_56 {dimension_numbers = #tpu.dot_dimension_numbers<[1], [0], [0], [1], [0, 0, 1, 1], [], []>} : vector<128x3xf32>, vector<3x8xf32>, vector<128x8xf32> -> vector<128x8xf32>
    %33 = arith.addf %27, %32 : vector<128x8xf32>
    %c0_57 = arith.constant 0 : index
    %c1_58 = arith.constant 1 : index
    %c0_59 = arith.constant 0 : index
    %34 = vector.load %arg11[%c0_57, %c1_58, %c0_59] : memref<18x18x3xf32, #tpu.memory_space<vmem>>, vector<8x16x3xf32>
    %35 = vector.shape_cast %34 : vector<8x16x3xf32> to vector<128x3xf32>
    %c1_60 = arith.constant 1 : index
    %c0_61 = arith.constant 0 : index
    %c0_62 = arith.constant 0 : index
    %36 = vector.load %arg2[%c1_60, %c0_61, %c0_62] : memref<9x3x8xf32, #tpu.memory_space<vmem>>, vector<1x3x8xf32>
    %37 = vector.shape_cast %36 : vector<1x3x8xf32> to vector<3x8xf32>
    %cst_63 = arith.constant dense<0.000000e+00> : vector<128x8xf32>
    %38 = tpu.matmul %35, %37, %cst_63 {dimension_numbers = #tpu.dot_dimension_numbers<[1], [0], [0], [1], [0, 0, 1, 1], [], []>} : vector<128x3xf32>, vector<3x8xf32>, vector<128x8xf32> -> vector<128x8xf32>
    %39 = arith.addf %33, %38 : vector<128x8xf32>
    %c0_64 = arith.constant 0 : index
    %c2 = arith.constant 2 : index
    %c0_65 = arith.constant 0 : index
    %40 = vector.load %arg11[%c0_64, %c2, %c0_65] : memref<18x18x3xf32, #tpu.memory_space<vmem>>, vector<8x16x3xf32>
    %41 = vector.shape_cast %40 : vector<8x16x3xf32> to vector<128x3xf32>
    %c2_66 = arith.constant 2 : index
    %c0_67 = arith.constant 0 : index
    %c0_68 = arith.constant 0 : index
    %42 = vector.load %arg2[%c2_66, %c0_67, %c0_68] : memref<9x3x8xf32, #tpu.memory_space<vmem>>, vector<1x3x8xf32>
    %43 = vector.shape_cast %42 : vector<1x3x8xf32> to vector<3x8xf32>
    %cst_69 = arith.constant dense<0.000000e+00> : vector<128x8xf32>
    %44 = tpu.matmul %41, %43, %cst_69 {dimension_numbers = #tpu.dot_dimension_numbers<[1], [0], [0], [1], [0, 0, 1, 1], [], []>} : vector<128x3xf32>, vector<3x8xf32>, vector<128x8xf32> -> vector<128x8xf32>
    %45 = arith.addf %39, %44 : vector<128x8xf32>
    %c1_70 = arith.constant 1 : index
    %c0_71 = arith.constant 0 : index
    %c0_72 = arith.constant 0 : index
    %46 = vector.load %arg11[%c1_70, %c0_71, %c0_72] : memref<18x18x3xf32, #tpu.memory_space<vmem>>, vector<8x16x3xf32>
    %47 = vector.shape_cast %46 : vector<8x16x3xf32> to vector<128x3xf32>
    %c3 = arith.constant 3 : index
    %c0_73 = arith.constant 0 : index
    %c0_74 = arith.constant 0 : index
    %48 = vector.load %arg2[%c3, %c0_73, %c0_74] : memref<9x3x8xf32, #tpu.memory_space<vmem>>, vector<1x3x8xf32>
    %49 = vector.shape_cast %48 : vector<1x3x8xf32> to vector<3x8xf32>
    %cst_75 = arith.constant dense<0.000000e+00> : vector<128x8xf32>
    %50 = tpu.matmul %47, %49, %cst_75 {dimension_numbers = #tpu.dot_dimension_numbers<[1], [0], [0], [1], [0, 0, 1, 1], [], []>} : vector<128x3xf32>, vector<3x8xf32>, vector<128x8xf32> -> vector<128x8xf32>
    %51 = arith.addf %45, %50 : vector<128x8xf32>
    %c1_76 = arith.constant 1 : index
    %c1_77 = arith.constant 1 : index
    %c0_78 = arith.constant 0 : index
    %52 = vector.load %arg11[%c1_76, %c1_77, %c0_78] : memref<18x18x3xf32, #tpu.memory_space<vmem>>, vector<8x16x3xf32>
    %53 = vector.shape_cast %52 : vector<8x16x3xf32> to vector<128x3xf32>
    %c4 = arith.constant 4 : index
    %c0_79 = arith.constant 0 : index
    %c0_80 = arith.constant 0 : index
    %54 = vector.load %arg2[%c4, %c0_79, %c0_80] : memref<9x3x8xf32, #tpu.memory_space<vmem>>, vector<1x3x8xf32>
    %55 = vector.shape_cast %54 : vector<1x3x8xf32> to vector<3x8xf32>
    %cst_81 = arith.constant dense<0.000000e+00> : vector<128x8xf32>
    %56 = tpu.matmul %53, %55, %cst_81 {dimension_numbers = #tpu.dot_dimension_numbers<[1], [0], [0], [1], [0, 0, 1, 1], [], []>} : vector<128x3xf32>, vector<3x8xf32>, vector<128x8xf32> -> vector<128x8xf32>
    %57 = arith.addf %51, %56 : vector<128x8xf32>
    %c1_82 = arith.constant 1 : index
    %c2_83 = arith.constant 2 : index
    %c0_84 = arith.constant 0 : index
    %58 = vector.load %arg11[%c1_82, %c2_83, %c0_84] : memref<18x18x3xf32, #tpu.memory_space<vmem>>, vector<8x16x3xf32>
    %59 = vector.shape_cast %58 : vector<8x16x3xf32> to vector<128x3xf32>
    %c5_85 = arith.constant 5 : index
    %c0_86 = arith.constant 0 : index
    %c0_87 = arith.constant 0 : index
    %60 = vector.load %arg2[%c5_85, %c0_86, %c0_87] : memref<9x3x8xf32, #tpu.memory_space<vmem>>, vector<1x3x8xf32>
    %61 = vector.shape_cast %60 : vector<1x3x8xf32> to vector<3x8xf32>
    %cst_88 = arith.constant dense<0.000000e+00> : vector<128x8xf32>
    %62 = tpu.matmul %59, %61, %cst_88 {dimension_numbers = #tpu.dot_dimension_numbers<[1], [0], [0], [1], [0, 0, 1, 1], [], []>} : vector<128x3xf32>, vector<3x8xf32>, vector<128x8xf32> -> vector<128x8xf32>
    %63 = arith.addf %57, %62 : vector<128x8xf32>
    %c2_89 = arith.constant 2 : index
    %c0_90 = arith.constant 0 : index
    %c0_91 = arith.constant 0 : index
    %64 = vector.load %arg11[%c2_89, %c0_90, %c0_91] : memref<18x18x3xf32, #tpu.memory_space<vmem>>, vector<8x16x3xf32>
    %65 = vector.shape_cast %64 : vector<8x16x3xf32> to vector<128x3xf32>
    %c6 = arith.constant 6 : index
    %c0_92 = arith.constant 0 : index
    %c0_93 = arith.constant 0 : index
    %66 = vector.load %arg2[%c6, %c0_92, %c0_93] : memref<9x3x8xf32, #tpu.memory_space<vmem>>, vector<1x3x8xf32>
    %67 = vector.shape_cast %66 : vector<1x3x8xf32> to vector<3x8xf32>
    %cst_94 = arith.constant dense<0.000000e+00> : vector<128x8xf32>
    %68 = tpu.matmul %65, %67, %cst_94 {dimension_numbers = #tpu.dot_dimension_numbers<[1], [0], [0], [1], [0, 0, 1, 1], [], []>} : vector<128x3xf32>, vector<3x8xf32>, vector<128x8xf32> -> vector<128x8xf32>
    %69 = arith.addf %63, %68 : vector<128x8xf32>
    %c2_95 = arith.constant 2 : index
    %c1_96 = arith.constant 1 : index
    %c0_97 = arith.constant 0 : index
    %70 = vector.load %arg11[%c2_95, %c1_96, %c0_97] : memref<18x18x3xf32, #tpu.memory_space<vmem>>, vector<8x16x3xf32>
    %71 = vector.shape_cast %70 : vector<8x16x3xf32> to vector<128x3xf32>
    %c7 = arith.constant 7 : index
    %c0_98 = arith.constant 0 : index
    %c0_99 = arith.constant 0 : index
    %72 = vector.load %arg2[%c7, %c0_98, %c0_99] : memref<9x3x8xf32, #tpu.memory_space<vmem>>, vector<1x3x8xf32>
    %73 = vector.shape_cast %72 : vector<1x3x8xf32> to vector<3x8xf32>
    %cst_100 = arith.constant dense<0.000000e+00> : vector<128x8xf32>
    %74 = tpu.matmul %71, %73, %cst_100 {dimension_numbers = #tpu.dot_dimension_numbers<[1], [0], [0], [1], [0, 0, 1, 1], [], []>} : vector<128x3xf32>, vector<3x8xf32>, vector<128x8xf32> -> vector<128x8xf32>
    %75 = arith.addf %69, %74 : vector<128x8xf32>
    %c2_101 = arith.constant 2 : index
    %c2_102 = arith.constant 2 : index
    %c0_103 = arith.constant 0 : index
    %76 = vector.load %arg11[%c2_101, %c2_102, %c0_103] : memref<18x18x3xf32, #tpu.memory_space<vmem>>, vector<8x16x3xf32>
    %77 = vector.shape_cast %76 : vector<8x16x3xf32> to vector<128x3xf32>
    %c8 = arith.constant 8 : index
    %c0_104 = arith.constant 0 : index
    %c0_105 = arith.constant 0 : index
    %78 = vector.load %arg2[%c8, %c0_104, %c0_105] : memref<9x3x8xf32, #tpu.memory_space<vmem>>, vector<1x3x8xf32>
    %79 = vector.shape_cast %78 : vector<1x3x8xf32> to vector<3x8xf32>
    %cst_106 = arith.constant dense<0.000000e+00> : vector<128x8xf32>
    %80 = tpu.matmul %77, %79, %cst_106 {dimension_numbers = #tpu.dot_dimension_numbers<[1], [0], [0], [1], [0, 0, 1, 1], [], []>} : vector<128x3xf32>, vector<3x8xf32>, vector<128x8xf32> -> vector<128x8xf32>
    %81 = arith.addf %75, %80 : vector<128x8xf32>
    %c0_107 = arith.constant 0 : index
    %c0_108 = arith.constant 0 : index
    %82 = vector.load %arg3[%c0_107, %c0_108] : memref<1x8xf32, #tpu.memory_space<vmem>>, vector<1x8xf32>
    %83 = vector.broadcast %82 : vector<1x8xf32> to vector<128x8xf32>
    %84 = arith.addf %81, %83 : vector<128x8xf32>
    %cst_109 = arith.constant 0.000000e+00 : f32
    %85 = vector.broadcast %cst_109 : f32 to vector<128x8xf32>
    %86 = arith.maximumf %84, %85 : vector<128x8xf32>
    %87 = vector.shape_cast %86 : vector<128x8xf32> to vector<8x16x8xf32>
    %c0_110 = arith.constant 0 : index
    %c0_111 = arith.constant 0 : index
    %c0_112 = arith.constant 0 : index
    %88 = vector.load %arg15[%c0_110, %c0_111, %c0_112] : memref<8x16x8xf32, #tpu.memory_space<vmem>>, vector<8x16x8xf32>
    tpu.vector_store %arg15[%c0_110, %c0_111, %c0_112], %87 {strides = array<i32>} : memref<8x16x8xf32, #tpu.memory_space<vmem>>, vector<8x16x8xf32>,
    %c0_113 = arith.constant 0 : index
    %c0_114 = arith.constant 0 : index
    %c0_115 = arith.constant 0 : index
    %89 = tpu.strided_load %arg15[%c0_113, %c0_114, %c0_115] {strides = array<i32: 1, 2, 1>} : memref<8x16x8xf32, #tpu.memory_space<vmem>>, vector<8x8x8xf32>
    %c0_116 = arith.constant 0 : index
    %c1_117 = arith.constant 1 : index
    %c0_118 = arith.constant 0 : index
    %90 = tpu.strided_load %arg15[%c0_116, %c1_117, %c0_118] {strides = array<i32: 1, 2, 1>} : memref<8x16x8xf32, #tpu.memory_space<vmem>>, vector<8x8x8xf32>
    %91 = arith.maximumf %89, %90 : vector<8x8x8xf32>
    %92 = vector.shape_cast %91 : vector<8x8x8xf32> to vector<4x2x8x8xf32>
    %cst_119 = arith.constant dense<0xFF800000> : vector<4x8x8xf32>
    %93 = vector.multi_reduction <maximumf>, %92, %cst_119 [1] : vector<4x2x8x8xf32> to vector<4x8x8xf32>
    %c1_120 = arith.constant 1 : index
    %c1_121 = arith.constant 1 : index
    %c0_122 = arith.constant 0 : index
    %94 = vector.load %arg12[%c1_120, %c1_121, %c0_122] : memref<10x10x8xf32, #tpu.memory_space<vmem>>, vector<4x8x8xf32>
    tpu.vector_store %arg12[%c1_120, %c1_121, %c0_122], %93 {strides = array<i32>} : memref<10x10x8xf32, #tpu.memory_space<vmem>>, vector<4x8x8xf32>,
    %cst_123 = arith.constant 0.000000e+00 : f32
    %95 = vector.broadcast %cst_123 : f32 to vector<128x8xf32>
    %c8_124 = arith.constant 8 : index
    %c0_125 = arith.constant 0 : index
    %c0_126 = arith.constant 0 : index
    %96 = vector.load %arg11[%c8_124, %c0_125, %c0_126] : memref<18x18x3xf32, #tpu.memory_space<vmem>>, vector<8x16x3xf32>
    %97 = vector.shape_cast %96 : vector<8x16x3xf32> to vector<128x3xf32>
    %c0_127 = arith.constant 0 : index
    %c0_128 = arith.constant 0 : index
    %c0_129 = arith.constant 0 : index
    %98 = vector.load %arg2[%c0_127, %c0_128, %c0_129] : memref<9x3x8xf32, #tpu.memory_space<vmem>>, vector<1x3x8xf32>
    %99 = vector.shape_cast %98 : vector<1x3x8xf32> to vector<3x8xf32>
    %cst_130 = arith.constant dense<0.000000e+00> : vector<128x8xf32>
    %100 = tpu.matmul %97, %99, %cst_130 {dimension_numbers = #tpu.dot_dimension_numbers<[1], [0], [0], [1], [0, 0, 1, 1], [], []>} : vector<128x3xf32>, vector<3x8xf32>, vector<128x8xf32> -> vector<128x8xf32>
    %101 = arith.addf %95, %100 : vector<128x8xf32>
    %c8_131 = arith.constant 8 : index
    %c1_132 = arith.constant 1 : index
    %c0_133 = arith.constant 0 : index
    %102 = vector.load %arg11[%c8_131, %c1_132, %c0_133] : memref<18x18x3xf32, #tpu.memory_space<vmem>>, vector<8x16x3xf32>
    %103 = vector.shape_cast %102 : vector<8x16x3xf32> to vector<128x3xf32>
    %c1_134 = arith.constant 1 : index
    %c0_135 = arith.constant 0 : index
    %c0_136 = arith.constant 0 : index
    %104 = vector.load %arg2[%c1_134, %c0_135, %c0_136] : memref<9x3x8xf32, #tpu.memory_space<vmem>>, vector<1x3x8xf32>
    %105 = vector.shape_cast %104 : vector<1x3x8xf32> to vector<3x8xf32>
    %cst_137 = arith.constant dense<0.000000e+00> : vector<128x8xf32>
    %106 = tpu.matmul %103, %105, %cst_137 {dimension_numbers = #tpu.dot_dimension_numbers<[1], [0], [0], [1], [0, 0, 1, 1], [], []>} : vector<128x3xf32>, vector<3x8xf32>, vector<128x8xf32> -> vector<128x8xf32>
    %107 = arith.addf %101, %106 : vector<128x8xf32>
    %c8_138 = arith.constant 8 : index
    %c2_139 = arith.constant 2 : index
    %c0_140 = arith.constant 0 : index
    %108 = vector.load %arg11[%c8_138, %c2_139, %c0_140] : memref<18x18x3xf32, #tpu.memory_space<vmem>>, vector<8x16x3xf32>
    %109 = vector.shape_cast %108 : vector<8x16x3xf32> to vector<128x3xf32>
    %c2_141 = arith.constant 2 : index
    %c0_142 = arith.constant 0 : index
    %c0_143 = arith.constant 0 : index
    %110 = vector.load %arg2[%c2_141, %c0_142, %c0_143] : memref<9x3x8xf32, #tpu.memory_space<vmem>>, vector<1x3x8xf32>
    %111 = vector.shape_cast %110 : vector<1x3x8xf32> to vector<3x8xf32>
    %cst_144 = arith.constant dense<0.000000e+00> : vector<128x8xf32>
    %112 = tpu.matmul %109, %111, %cst_144 {dimension_numbers = #tpu.dot_dimension_numbers<[1], [0], [0], [1], [0, 0, 1, 1], [], []>} : vector<128x3xf32>, vector<3x8xf32>, vector<128x8xf32> -> vector<128x8xf32>
    %113 = arith.addf %107, %112 : vector<128x8xf32>
    %c9_145 = arith.constant 9 : index
    %c0_146 = arith.constant 0 : index
    %c0_147 = arith.constant 0 : index
    %114 = vector.load %arg11[%c9_145, %c0_146, %c0_147] : memref<18x18x3xf32, #tpu.memory_space<vmem>>, vector<8x16x3xf32>
    %115 = vector.shape_cast %114 : vector<8x16x3xf32> to vector<128x3xf32>
    %c3_148 = arith.constant 3 : index
    %c0_149 = arith.constant 0 : index
    %c0_150 = arith.constant 0 : index
    %116 = vector.load %arg2[%c3_148, %c0_149, %c0_150] : memref<9x3x8xf32, #tpu.memory_space<vmem>>, vector<1x3x8xf32>
    %117 = vector.shape_cast %116 : vector<1x3x8xf32> to vector<3x8xf32>
    %cst_151 = arith.constant dense<0.000000e+00> : vector<128x8xf32>
    %118 = tpu.matmul %115, %117, %cst_151 {dimension_numbers = #tpu.dot_dimension_numbers<[1], [0], [0], [1], [0, 0, 1, 1], [], []>} : vector<128x3xf32>, vector<3x8xf32>, vector<128x8xf32> -> vector<128x8xf32>
    %119 = arith.addf %113, %118 : vector<128x8xf32>
    %c9_152 = arith.constant 9 : index
    %c1_153 = arith.constant 1 : index
    %c0_154 = arith.constant 0 : index
    %120 = vector.load %arg11[%c9_152, %c1_153, %c0_154] : memref<18x18x3xf32, #tpu.memory_space<vmem>>, vector<8x16x3xf32>
    %121 = vector.shape_cast %120 : vector<8x16x3xf32> to vector<128x3xf32>
    %c4_155 = arith.constant 4 : index
    %c0_156 = arith.constant 0 : index
    %c0_157 = arith.constant 0 : index
    %122 = vector.load %arg2[%c4_155, %c0_156, %c0_157] : memref<9x3x8xf32, #tpu.memory_space<vmem>>, vector<1x3x8xf32>
    %123 = vector.shape_cast %122 : vector<1x3x8xf32> to vector<3x8xf32>
    %cst_158 = arith.constant dense<0.000000e+00> : vector<128x8xf32>
    %124 = tpu.matmul %121, %123, %cst_158 {dimension_numbers = #tpu.dot_dimension_numbers<[1], [0], [0], [1], [0, 0, 1, 1], [], []>} : vector<128x3xf32>, vector<3x8xf32>, vector<128x8xf32> -> vector<128x8xf32>
    %125 = arith.addf %119, %124 : vector<128x8xf32>
    %c9_159 = arith.constant 9 : index
    %c2_160 = arith.constant 2 : index
    %c0_161 = arith.constant 0 : index
    %126 = vector.load %arg11[%c9_159, %c2_160, %c0_161] : memref<18x18x3xf32, #tpu.memory_space<vmem>>, vector<8x16x3xf32>
    %127 = vector.shape_cast %126 : vector<8x16x3xf32> to vector<128x3xf32>
    %c5_162 = arith.constant 5 : index
    %c0_163 = arith.constant 0 : index
    %c0_164 = arith.constant 0 : index
    %128 = vector.load %arg2[%c5_162, %c0_163, %c0_164] : memref<9x3x8xf32, #tpu.memory_space<vmem>>, vector<1x3x8xf32>
    %129 = vector.shape_cast %128 : vector<1x3x8xf32> to vector<3x8xf32>
    %cst_165 = arith.constant dense<0.000000e+00> : vector<128x8xf32>
    %130 = tpu.matmul %127, %129, %cst_165 {dimension_numbers = #tpu.dot_dimension_numbers<[1], [0], [0], [1], [0, 0, 1, 1], [], []>} : vector<128x3xf32>, vector<3x8xf32>, vector<128x8xf32> -> vector<128x8xf32>
    %131 = arith.addf %125, %130 : vector<128x8xf32>
    %c10 = arith.constant 10 : index
    %c0_166 = arith.constant 0 : index
    %c0_167 = arith.constant 0 : index
    %132 = vector.load %arg11[%c10, %c0_166, %c0_167] : memref<18x18x3xf32, #tpu.memory_space<vmem>>, vector<8x16x3xf32>
    %133 = vector.shape_cast %132 : vector<8x16x3xf32> to vector<128x3xf32>
    %c6_168 = arith.constant 6 : index
    %c0_169 = arith.constant 0 : index
    %c0_170 = arith.constant 0 : index
    %134 = vector.load %arg2[%c6_168, %c0_169, %c0_170] : memref<9x3x8xf32, #tpu.memory_space<vmem>>, vector<1x3x8xf32>
    %135 = vector.shape_cast %134 : vector<1x3x8xf32> to vector<3x8xf32>
    %cst_171 = arith.constant dense<0.000000e+00> : vector<128x8xf32>
    %136 = tpu.matmul %133, %135, %cst_171 {dimension_numbers = #tpu.dot_dimension_numbers<[1], [0], [0], [1], [0, 0, 1, 1], [], []>} : vector<128x3xf32>, vector<3x8xf32>, vector<128x8xf32> -> vector<128x8xf32>
    %137 = arith.addf %131, %136 : vector<128x8xf32>
    %c10_172 = arith.constant 10 : index
    %c1_173 = arith.constant 1 : index
    %c0_174 = arith.constant 0 : index
    %138 = vector.load %arg11[%c10_172, %c1_173, %c0_174] : memref<18x18x3xf32, #tpu.memory_space<vmem>>, vector<8x16x3xf32>
    %139 = vector.shape_cast %138 : vector<8x16x3xf32> to vector<128x3xf32>
    %c7_175 = arith.constant 7 : index
    %c0_176 = arith.constant 0 : index
    %c0_177 = arith.constant 0 : index
    %140 = vector.load %arg2[%c7_175, %c0_176, %c0_177] : memref<9x3x8xf32, #tpu.memory_space<vmem>>, vector<1x3x8xf32>
    %141 = vector.shape_cast %140 : vector<1x3x8xf32> to vector<3x8xf32>
    %cst_178 = arith.constant dense<0.000000e+00> : vector<128x8xf32>
    %142 = tpu.matmul %139, %141, %cst_178 {dimension_numbers = #tpu.dot_dimension_numbers<[1], [0], [0], [1], [0, 0, 1, 1], [], []>} : vector<128x3xf32>, vector<3x8xf32>, vector<128x8xf32> -> vector<128x8xf32>
    %143 = arith.addf %137, %142 : vector<128x8xf32>
    %c10_179 = arith.constant 10 : index
    %c2_180 = arith.constant 2 : index
    %c0_181 = arith.constant 0 : index
    %144 = vector.load %arg11[%c10_179, %c2_180, %c0_181] : memref<18x18x3xf32, #tpu.memory_space<vmem>>, vector<8x16x3xf32>
    %145 = vector.shape_cast %144 : vector<8x16x3xf32> to vector<128x3xf32>
    %c8_182 = arith.constant 8 : index
    %c0_183 = arith.constant 0 : index
    %c0_184 = arith.constant 0 : index
    %146 = vector.load %arg2[%c8_182, %c0_183, %c0_184] : memref<9x3x8xf32, #tpu.memory_space<vmem>>, vector<1x3x8xf32>
    %147 = vector.shape_cast %146 : vector<1x3x8xf32> to vector<3x8xf32>
    %cst_185 = arith.constant dense<0.000000e+00> : vector<128x8xf32>
    %148 = tpu.matmul %145, %147, %cst_185 {dimension_numbers = #tpu.dot_dimension_numbers<[1], [0], [0], [1], [0, 0, 1, 1], [], []>} : vector<128x3xf32>, vector<3x8xf32>, vector<128x8xf32> -> vector<128x8xf32>
    %149 = arith.addf %143, %148 : vector<128x8xf32>
    %c0_186 = arith.constant 0 : index
    %c0_187 = arith.constant 0 : index
    %150 = vector.load %arg3[%c0_186, %c0_187] : memref<1x8xf32, #tpu.memory_space<vmem>>, vector<1x8xf32>
    %151 = vector.broadcast %150 : vector<1x8xf32> to vector<128x8xf32>
    %152 = arith.addf %149, %151 : vector<128x8xf32>
    %cst_188 = arith.constant 0.000000e+00 : f32
    %153 = vector.broadcast %cst_188 : f32 to vector<128x8xf32>
    %154 = arith.maximumf %152, %153 : vector<128x8xf32>
    %155 = vector.shape_cast %154 : vector<128x8xf32> to vector<8x16x8xf32>
    %c0_189 = arith.constant 0 : index
    %c0_190 = arith.constant 0 : index
    %c0_191 = arith.constant 0 : index
    %156 = vector.load %arg15[%c0_189, %c0_190, %c0_191] : memref<8x16x8xf32, #tpu.memory_space<vmem>>, vector<8x16x8xf32>
    tpu.vector_store %arg15[%c0_189, %c0_190, %c0_191], %155 {strides = array<i32>} : memref<8x16x8xf32, #tpu.memory_space<vmem>>, vector<8x16x8xf32>,
    %c0_192 = arith.constant 0 : index
    %c0_193 = arith.constant 0 : index
    %c0_194 = arith.constant 0 : index
    %157 = tpu.strided_load %arg15[%c0_192, %c0_193, %c0_194] {strides = array<i32: 1, 2, 1>} : memref<8x16x8xf32, #tpu.memory_space<vmem>>, vector<8x8x8xf32>
    %c0_195 = arith.constant 0 : index
    %c1_196 = arith.constant 1 : index
    %c0_197 = arith.constant 0 : index
    %158 = tpu.strided_load %arg15[%c0_195, %c1_196, %c0_197] {strides = array<i32: 1, 2, 1>} : memref<8x16x8xf32, #tpu.memory_space<vmem>>, vector<8x8x8xf32>
    %159 = arith.maximumf %157, %158 : vector<8x8x8xf32>
    %160 = vector.shape_cast %159 : vector<8x8x8xf32> to vector<4x2x8x8xf32>
    %cst_198 = arith.constant dense<0xFF800000> : vector<4x8x8xf32>
    %161 = vector.multi_reduction <maximumf>, %160, %cst_198 [1] : vector<4x2x8x8xf32> to vector<4x8x8xf32>
    %c5_199 = arith.constant 5 : index
    %c1_200 = arith.constant 1 : index
    %c0_201 = arith.constant 0 : index
    %162 = vector.load %arg12[%c5_199, %c1_200, %c0_201] : memref<10x10x8xf32, #tpu.memory_space<vmem>>, vector<4x8x8xf32>
    tpu.vector_store %arg12[%c5_199, %c1_200, %c0_201], %161 {strides = array<i32>} : memref<10x10x8xf32, #tpu.memory_space<vmem>>, vector<4x8x8xf32>,
    %cst_202 = arith.constant 0.000000e+00 : f32
    %163 = vector.broadcast %cst_202 : f32 to vector<64x16xf32>
    %c0_203 = arith.constant 0 : index
    %c0_204 = arith.constant 0 : index
    %c0_205 = arith.constant 0 : index
    %164 = vector.load %arg12[%c0_203, %c0_204, %c0_205] : memref<10x10x8xf32, #tpu.memory_space<vmem>>, vector<8x8x8xf32>
    %165 = vector.shape_cast %164 : vector<8x8x8xf32> to vector<64x8xf32>
    %c0_206 = arith.constant 0 : index
    %c0_207 = arith.constant 0 : index
    %c0_208 = arith.constant 0 : index
    %166 = vector.load %arg4[%c0_206, %c0_207, %c0_208] : memref<9x8x16xf32, #tpu.memory_space<vmem>>, vector<1x8x16xf32>
    %167 = vector.shape_cast %166 : vector<1x8x16xf32> to vector<8x16xf32>
    %cst_209 = arith.constant dense<0.000000e+00> : vector<64x16xf32>
    %168 = tpu.matmul %165, %167, %cst_209 {dimension_numbers = #tpu.dot_dimension_numbers<[1], [0], [0], [1], [0, 0, 1, 1], [], []>} : vector<64x8xf32>, vector<8x16xf32>, vector<64x16xf32> -> vector<64x16xf32>
    %169 = arith.addf %163, %168 : vector<64x16xf32>
    %c0_210 = arith.constant 0 : index
    %c1_211 = arith.constant 1 : index
    %c0_212 = arith.constant 0 : index
    %170 = vector.load %arg12[%c0_210, %c1_211, %c0_212] : memref<10x10x8xf32, #tpu.memory_space<vmem>>, vector<8x8x8xf32>
    %171 = vector.shape_cast %170 : vector<8x8x8xf32> to vector<64x8xf32>
    %c1_213 = arith.constant 1 : index
    %c0_214 = arith.constant 0 : index
    %c0_215 = arith.constant 0 : index
    %172 = vector.load %arg4[%c1_213, %c0_214, %c0_215] : memref<9x8x16xf32, #tpu.memory_space<vmem>>, vector<1x8x16xf32>
    %173 = vector.shape_cast %172 : vector<1x8x16xf32> to vector<8x16xf32>
    %cst_216 = arith.constant dense<0.000000e+00> : vector<64x16xf32>
    %174 = tpu.matmul %171, %173, %cst_216 {dimension_numbers = #tpu.dot_dimension_numbers<[1], [0], [0], [1], [0, 0, 1, 1], [], []>} : vector<64x8xf32>, vector<8x16xf32>, vector<64x16xf32> -> vector<64x16xf32>
    %175 = arith.addf %169, %174 : vector<64x16xf32>
    %c0_217 = arith.constant 0 : index
    %c2_218 = arith.constant 2 : index
    %c0_219 = arith.constant 0 : index
    %176 = vector.load %arg12[%c0_217, %c2_218, %c0_219] : memref<10x10x8xf32, #tpu.memory_space<vmem>>, vector<8x8x8xf32>
    %177 = vector.shape_cast %176 : vector<8x8x8xf32> to vector<64x8xf32>
    %c2_220 = arith.constant 2 : index
    %c0_221 = arith.constant 0 : index
    %c0_222 = arith.constant 0 : index
    %178 = vector.load %arg4[%c2_220, %c0_221, %c0_222] : memref<9x8x16xf32, #tpu.memory_space<vmem>>, vector<1x8x16xf32>
    %179 = vector.shape_cast %178 : vector<1x8x16xf32> to vector<8x16xf32>
    %cst_223 = arith.constant dense<0.000000e+00> : vector<64x16xf32>
    %180 = tpu.matmul %177, %179, %cst_223 {dimension_numbers = #tpu.dot_dimension_numbers<[1], [0], [0], [1], [0, 0, 1, 1], [], []>} : vector<64x8xf32>, vector<8x16xf32>, vector<64x16xf32> -> vector<64x16xf32>
    %181 = arith.addf %175, %180 : vector<64x16xf32>
    %c1_224 = arith.constant 1 : index
    %c0_225 = arith.constant 0 : index
    %c0_226 = arith.constant 0 : index
    %182 = vector.load %arg12[%c1_224, %c0_225, %c0_226] : memref<10x10x8xf32, #tpu.memory_space<vmem>>, vector<8x8x8xf32>
    %183 = vector.shape_cast %182 : vector<8x8x8xf32> to vector<64x8xf32>
    %c3_227 = arith.constant 3 : index
    %c0_228 = arith.constant 0 : index
    %c0_229 = arith.constant 0 : index
    %184 = vector.load %arg4[%c3_227, %c0_228, %c0_229] : memref<9x8x16xf32, #tpu.memory_space<vmem>>, vector<1x8x16xf32>
    %185 = vector.shape_cast %184 : vector<1x8x16xf32> to vector<8x16xf32>
    %cst_230 = arith.constant dense<0.000000e+00> : vector<64x16xf32>
    %186 = tpu.matmul %183, %185, %cst_230 {dimension_numbers = #tpu.dot_dimension_numbers<[1], [0], [0], [1], [0, 0, 1, 1], [], []>} : vector<64x8xf32>, vector<8x16xf32>, vector<64x16xf32> -> vector<64x16xf32>
    %187 = arith.addf %181, %186 : vector<64x16xf32>
    %c1_231 = arith.constant 1 : index
    %c1_232 = arith.constant 1 : index
    %c0_233 = arith.constant 0 : index
    %188 = vector.load %arg12[%c1_231, %c1_232, %c0_233] : memref<10x10x8xf32, #tpu.memory_space<vmem>>, vector<8x8x8xf32>
    %189 = vector.shape_cast %188 : vector<8x8x8xf32> to vector<64x8xf32>
    %c4_234 = arith.constant 4 : index
    %c0_235 = arith.constant 0 : index
    %c0_236 = arith.constant 0 : index
    %190 = vector.load %arg4[%c4_234, %c0_235, %c0_236] : memref<9x8x16xf32, #tpu.memory_space<vmem>>, vector<1x8x16xf32>
    %191 = vector.shape_cast %190 : vector<1x8x16xf32> to vector<8x16xf32>
    %cst_237 = arith.constant dense<0.000000e+00> : vector<64x16xf32>
    %192 = tpu.matmul %189, %191, %cst_237 {dimension_numbers = #tpu.dot_dimension_numbers<[1], [0], [0], [1], [0, 0, 1, 1], [], []>} : vector<64x8xf32>, vector<8x16xf32>, vector<64x16xf32> -> vector<64x16xf32>
    %193 = arith.addf %187, %192 : vector<64x16xf32>
    %c1_238 = arith.constant 1 : index
    %c2_239 = arith.constant 2 : index
    %c0_240 = arith.constant 0 : index
    %194 = vector.load %arg12[%c1_238, %c2_239, %c0_240] : memref<10x10x8xf32, #tpu.memory_space<vmem>>, vector<8x8x8xf32>
    %195 = vector.shape_cast %194 : vector<8x8x8xf32> to vector<64x8xf32>
    %c5_241 = arith.constant 5 : index
    %c0_242 = arith.constant 0 : index
    %c0_243 = arith.constant 0 : index
    %196 = vector.load %arg4[%c5_241, %c0_242, %c0_243] : memref<9x8x16xf32, #tpu.memory_space<vmem>>, vector<1x8x16xf32>
    %197 = vector.shape_cast %196 : vector<1x8x16xf32> to vector<8x16xf32>
    %cst_244 = arith.constant dense<0.000000e+00> : vector<64x16xf32>
    %198 = tpu.matmul %195, %197, %cst_244 {dimension_numbers = #tpu.dot_dimension_numbers<[1], [0], [0], [1], [0, 0, 1, 1], [], []>} : vector<64x8xf32>, vector<8x16xf32>, vector<64x16xf32> -> vector<64x16xf32>
    %199 = arith.addf %193, %198 : vector<64x16xf32>
    %c2_245 = arith.constant 2 : index
    %c0_246 = arith.constant 0 : index
    %c0_247 = arith.constant 0 : index
    %200 = vector.load %arg12[%c2_245, %c0_246, %c0_247] : memref<10x10x8xf32, #tpu.memory_space<vmem>>, vector<8x8x8xf32>
    %201 = vector.shape_cast %200 : vector<8x8x8xf32> to vector<64x8xf32>
    %c6_248 = arith.constant 6 : index
    %c0_249 = arith.constant 0 : index
    %c0_250 = arith.constant 0 : index
    %202 = vector.load %arg4[%c6_248, %c0_249, %c0_250] : memref<9x8x16xf32, #tpu.memory_space<vmem>>, vector<1x8x16xf32>
    %203 = vector.shape_cast %202 : vector<1x8x16xf32> to vector<8x16xf32>
    %cst_251 = arith.constant dense<0.000000e+00> : vector<64x16xf32>
    %204 = tpu.matmul %201, %203, %cst_251 {dimension_numbers = #tpu.dot_dimension_numbers<[1], [0], [0], [1], [0, 0, 1, 1], [], []>} : vector<64x8xf32>, vector<8x16xf32>, vector<64x16xf32> -> vector<64x16xf32>
    %205 = arith.addf %199, %204 : vector<64x16xf32>
    %c2_252 = arith.constant 2 : index
    %c1_253 = arith.constant 1 : index
    %c0_254 = arith.constant 0 : index
    %206 = vector.load %arg12[%c2_252, %c1_253, %c0_254] : memref<10x10x8xf32, #tpu.memory_space<vmem>>, vector<8x8x8xf32>
    %207 = vector.shape_cast %206 : vector<8x8x8xf32> to vector<64x8xf32>
    %c7_255 = arith.constant 7 : index
    %c0_256 = arith.constant 0 : index
    %c0_257 = arith.constant 0 : index
    %208 = vector.load %arg4[%c7_255, %c0_256, %c0_257] : memref<9x8x16xf32, #tpu.memory_space<vmem>>, vector<1x8x16xf32>
    %209 = vector.shape_cast %208 : vector<1x8x16xf32> to vector<8x16xf32>
    %cst_258 = arith.constant dense<0.000000e+00> : vector<64x16xf32>
    %210 = tpu.matmul %207, %209, %cst_258 {dimension_numbers = #tpu.dot_dimension_numbers<[1], [0], [0], [1], [0, 0, 1, 1], [], []>} : vector<64x8xf32>, vector<8x16xf32>, vector<64x16xf32> -> vector<64x16xf32>
    %211 = arith.addf %205, %210 : vector<64x16xf32>
    %c2_259 = arith.constant 2 : index
    %c2_260 = arith.constant 2 : index
    %c0_261 = arith.constant 0 : index
    %212 = vector.load %arg12[%c2_259, %c2_260, %c0_261] : memref<10x10x8xf32, #tpu.memory_space<vmem>>, vector<8x8x8xf32>
    %213 = vector.shape_cast %212 : vector<8x8x8xf32> to vector<64x8xf32>
    %c8_262 = arith.constant 8 : index
    %c0_263 = arith.constant 0 : index
    %c0_264 = arith.constant 0 : index
    %214 = vector.load %arg4[%c8_262, %c0_263, %c0_264] : memref<9x8x16xf32, #tpu.memory_space<vmem>>, vector<1x8x16xf32>
    %215 = vector.shape_cast %214 : vector<1x8x16xf32> to vector<8x16xf32>
    %cst_265 = arith.constant dense<0.000000e+00> : vector<64x16xf32>
    %216 = tpu.matmul %213, %215, %cst_265 {dimension_numbers = #tpu.dot_dimension_numbers<[1], [0], [0], [1], [0, 0, 1, 1], [], []>} : vector<64x8xf32>, vector<8x16xf32>, vector<64x16xf32> -> vector<64x16xf32>
    %217 = arith.addf %211, %216 : vector<64x16xf32>
    %c0_266 = arith.constant 0 : index
    %c0_267 = arith.constant 0 : index
    %218 = vector.load %arg5[%c0_266, %c0_267] : memref<1x16xf32, #tpu.memory_space<vmem>>, vector<1x16xf32>
    %219 = vector.broadcast %218 : vector<1x16xf32> to vector<64x16xf32>
    %220 = arith.addf %217, %219 : vector<64x16xf32>
    %cst_268 = arith.constant 0.000000e+00 : f32
    %221 = vector.broadcast %cst_268 : f32 to vector<64x16xf32>
    %222 = arith.maximumf %220, %221 : vector<64x16xf32>
    %223 = vector.shape_cast %222 : vector<64x16xf32> to vector<8x8x16xf32>
    %c0_269 = arith.constant 0 : index
    %c0_270 = arith.constant 0 : index
    %c0_271 = arith.constant 0 : index
    %224 = vector.load %arg16[%c0_269, %c0_270, %c0_271] : memref<8x8x16xf32, #tpu.memory_space<vmem>>, vector<8x8x16xf32>
    tpu.vector_store %arg16[%c0_269, %c0_270, %c0_271], %223 {strides = array<i32>} : memref<8x8x16xf32, #tpu.memory_space<vmem>>, vector<8x8x16xf32>,
    %c0_272 = arith.constant 0 : index
    %c0_273 = arith.constant 0 : index
    %c0_274 = arith.constant 0 : index
    %225 = tpu.strided_load %arg16[%c0_272, %c0_273, %c0_274] {strides = array<i32: 1, 2, 1>} : memref<8x8x16xf32, #tpu.memory_space<vmem>>, vector<8x4x16xf32>
    %c0_275 = arith.constant 0 : index
    %c1_276 = arith.constant 1 : index
    %c0_277 = arith.constant 0 : index
    %226 = tpu.strided_load %arg16[%c0_275, %c1_276, %c0_277] {strides = array<i32: 1, 2, 1>} : memref<8x8x16xf32, #tpu.memory_space<vmem>>, vector<8x4x16xf32>
    %227 = arith.maximumf %225, %226 : vector<8x4x16xf32>
    %228 = vector.shape_cast %227 : vector<8x4x16xf32> to vector<4x2x4x16xf32>
    %cst_278 = arith.constant dense<0xFF800000> : vector<4x4x16xf32>
    %229 = vector.multi_reduction <maximumf>, %228, %cst_278 [1] : vector<4x2x4x16xf32> to vector<4x4x16xf32>
    %c1_279 = arith.constant 1 : index
    %c1_280 = arith.constant 1 : index
    %c0_281 = arith.constant 0 : index
    %230 = vector.load %arg13[%c1_279, %c1_280, %c0_281] : memref<6x6x16xf32, #tpu.memory_space<vmem>>, vector<4x4x16xf32>
    tpu.vector_store %arg13[%c1_279, %c1_280, %c0_281], %229 {strides = array<i32>} : memref<6x6x16xf32, #tpu.memory_space<vmem>>, vector<4x4x16xf32>,
    %cst_282 = arith.constant 0.000000e+00 : f32
    %231 = vector.broadcast %cst_282 : f32 to vector<16x16xf32>
    %c0_283 = arith.constant 0 : index
    %c0_284 = arith.constant 0 : index
    %c0_285 = arith.constant 0 : index
    %232 = vector.load %arg13[%c0_283, %c0_284, %c0_285] : memref<6x6x16xf32, #tpu.memory_space<vmem>>, vector<4x4x16xf32>
    %233 = vector.shape_cast %232 : vector<4x4x16xf32> to vector<16x16xf32>
    %c0_286 = arith.constant 0 : index
    %c0_287 = arith.constant 0 : index
    %c0_288 = arith.constant 0 : index
    %234 = vector.load %arg6[%c0_286, %c0_287, %c0_288] : memref<9x16x16xf32, #tpu.memory_space<vmem>>, vector<1x16x16xf32>
    %235 = vector.shape_cast %234 : vector<1x16x16xf32> to vector<16x16xf32>
    %cst_289 = arith.constant dense<0.000000e+00> : vector<16x16xf32>
    %236 = tpu.matmul %233, %235, %cst_289 {dimension_numbers = #tpu.dot_dimension_numbers<[1], [0], [0], [1], [0, 0, 1, 1], [], []>} : vector<16x16xf32>, vector<16x16xf32>, vector<16x16xf32> -> vector<16x16xf32>
    %237 = arith.addf %231, %236 : vector<16x16xf32>
    %c0_290 = arith.constant 0 : index
    %c1_291 = arith.constant 1 : index
    %c0_292 = arith.constant 0 : index
    %238 = vector.load %arg13[%c0_290, %c1_291, %c0_292] : memref<6x6x16xf32, #tpu.memory_space<vmem>>, vector<4x4x16xf32>
    %239 = vector.shape_cast %238 : vector<4x4x16xf32> to vector<16x16xf32>
    %c1_293 = arith.constant 1 : index
    %c0_294 = arith.constant 0 : index
    %c0_295 = arith.constant 0 : index
    %240 = vector.load %arg6[%c1_293, %c0_294, %c0_295] : memref<9x16x16xf32, #tpu.memory_space<vmem>>, vector<1x16x16xf32>
    %241 = vector.shape_cast %240 : vector<1x16x16xf32> to vector<16x16xf32>
    %cst_296 = arith.constant dense<0.000000e+00> : vector<16x16xf32>
    %242 = tpu.matmul %239, %241, %cst_296 {dimension_numbers = #tpu.dot_dimension_numbers<[1], [0], [0], [1], [0, 0, 1, 1], [], []>} : vector<16x16xf32>, vector<16x16xf32>, vector<16x16xf32> -> vector<16x16xf32>
    %243 = arith.addf %237, %242 : vector<16x16xf32>
    %c0_297 = arith.constant 0 : index
    %c2_298 = arith.constant 2 : index
    %c0_299 = arith.constant 0 : index
    %244 = vector.load %arg13[%c0_297, %c2_298, %c0_299] : memref<6x6x16xf32, #tpu.memory_space<vmem>>, vector<4x4x16xf32>
    %245 = vector.shape_cast %244 : vector<4x4x16xf32> to vector<16x16xf32>
    %c2_300 = arith.constant 2 : index
    %c0_301 = arith.constant 0 : index
    %c0_302 = arith.constant 0 : index
    %246 = vector.load %arg6[%c2_300, %c0_301, %c0_302] : memref<9x16x16xf32, #tpu.memory_space<vmem>>, vector<1x16x16xf32>
    %247 = vector.shape_cast %246 : vector<1x16x16xf32> to vector<16x16xf32>
    %cst_303 = arith.constant dense<0.000000e+00> : vector<16x16xf32>
    %248 = tpu.matmul %245, %247, %cst_303 {dimension_numbers = #tpu.dot_dimension_numbers<[1], [0], [0], [1], [0, 0, 1, 1], [], []>} : vector<16x16xf32>, vector<16x16xf32>, vector<16x16xf32> -> vector<16x16xf32>
    %249 = arith.addf %243, %248 : vector<16x16xf32>
    %c1_304 = arith.constant 1 : index
    %c0_305 = arith.constant 0 : index
    %c0_306 = arith.constant 0 : index
    %250 = vector.load %arg13[%c1_304, %c0_305, %c0_306] : memref<6x6x16xf32, #tpu.memory_space<vmem>>, vector<4x4x16xf32>
    %251 = vector.shape_cast %250 : vector<4x4x16xf32> to vector<16x16xf32>
    %c3_307 = arith.constant 3 : index
    %c0_308 = arith.constant 0 : index
    %c0_309 = arith.constant 0 : index
    %252 = vector.load %arg6[%c3_307, %c0_308, %c0_309] : memref<9x16x16xf32, #tpu.memory_space<vmem>>, vector<1x16x16xf32>
    %253 = vector.shape_cast %252 : vector<1x16x16xf32> to vector<16x16xf32>
    %cst_310 = arith.constant dense<0.000000e+00> : vector<16x16xf32>
    %254 = tpu.matmul %251, %253, %cst_310 {dimension_numbers = #tpu.dot_dimension_numbers<[1], [0], [0], [1], [0, 0, 1, 1], [], []>} : vector<16x16xf32>, vector<16x16xf32>, vector<16x16xf32> -> vector<16x16xf32>
    %255 = arith.addf %249, %254 : vector<16x16xf32>
    %c1_311 = arith.constant 1 : index
    %c1_312 = arith.constant 1 : index
    %c0_313 = arith.constant 0 : index
    %256 = vector.load %arg13[%c1_311, %c1_312, %c0_313] : memref<6x6x16xf32, #tpu.memory_space<vmem>>, vector<4x4x16xf32>
    %257 = vector.shape_cast %256 : vector<4x4x16xf32> to vector<16x16xf32>
    %c4_314 = arith.constant 4 : index
    %c0_315 = arith.constant 0 : index
    %c0_316 = arith.constant 0 : index
    %258 = vector.load %arg6[%c4_314, %c0_315, %c0_316] : memref<9x16x16xf32, #tpu.memory_space<vmem>>, vector<1x16x16xf32>
    %259 = vector.shape_cast %258 : vector<1x16x16xf32> to vector<16x16xf32>
    %cst_317 = arith.constant dense<0.000000e+00> : vector<16x16xf32>
    %260 = tpu.matmul %257, %259, %cst_317 {dimension_numbers = #tpu.dot_dimension_numbers<[1], [0], [0], [1], [0, 0, 1, 1], [], []>} : vector<16x16xf32>, vector<16x16xf32>, vector<16x16xf32> -> vector<16x16xf32>
    %261 = arith.addf %255, %260 : vector<16x16xf32>
    %c1_318 = arith.constant 1 : index
    %c2_319 = arith.constant 2 : index
    %c0_320 = arith.constant 0 : index
    %262 = vector.load %arg13[%c1_318, %c2_319, %c0_320] : memref<6x6x16xf32, #tpu.memory_space<vmem>>, vector<4x4x16xf32>
    %263 = vector.shape_cast %262 : vector<4x4x16xf32> to vector<16x16xf32>
    %c5_321 = arith.constant 5 : index
    %c0_322 = arith.constant 0 : index
    %c0_323 = arith.constant 0 : index
    %264 = vector.load %arg6[%c5_321, %c0_322, %c0_323] : memref<9x16x16xf32, #tpu.memory_space<vmem>>, vector<1x16x16xf32>
    %265 = vector.shape_cast %264 : vector<1x16x16xf32> to vector<16x16xf32>
    %cst_324 = arith.constant dense<0.000000e+00> : vector<16x16xf32>
    %266 = tpu.matmul %263, %265, %cst_324 {dimension_numbers = #tpu.dot_dimension_numbers<[1], [0], [0], [1], [0, 0, 1, 1], [], []>} : vector<16x16xf32>, vector<16x16xf32>, vector<16x16xf32> -> vector<16x16xf32>
    %267 = arith.addf %261, %266 : vector<16x16xf32>
    %c2_325 = arith.constant 2 : index
    %c0_326 = arith.constant 0 : index
    %c0_327 = arith.constant 0 : index
    %268 = vector.load %arg13[%c2_325, %c0_326, %c0_327] : memref<6x6x16xf32, #tpu.memory_space<vmem>>, vector<4x4x16xf32>
    %269 = vector.shape_cast %268 : vector<4x4x16xf32> to vector<16x16xf32>
    %c6_328 = arith.constant 6 : index
    %c0_329 = arith.constant 0 : index
    %c0_330 = arith.constant 0 : index
    %270 = vector.load %arg6[%c6_328, %c0_329, %c0_330] : memref<9x16x16xf32, #tpu.memory_space<vmem>>, vector<1x16x16xf32>
    %271 = vector.shape_cast %270 : vector<1x16x16xf32> to vector<16x16xf32>
    %cst_331 = arith.constant dense<0.000000e+00> : vector<16x16xf32>
    %272 = tpu.matmul %269, %271, %cst_331 {dimension_numbers = #tpu.dot_dimension_numbers<[1], [0], [0], [1], [0, 0, 1, 1], [], []>} : vector<16x16xf32>, vector<16x16xf32>, vector<16x16xf32> -> vector<16x16xf32>
    %273 = arith.addf %267, %272 : vector<16x16xf32>
    %c2_332 = arith.constant 2 : index
    %c1_333 = arith.constant 1 : index
    %c0_334 = arith.constant 0 : index
    %274 = vector.load %arg13[%c2_332, %c1_333, %c0_334] : memref<6x6x16xf32, #tpu.memory_space<vmem>>, vector<4x4x16xf32>
    %275 = vector.shape_cast %274 : vector<4x4x16xf32> to vector<16x16xf32>
    %c7_335 = arith.constant 7 : index
    %c0_336 = arith.constant 0 : index
    %c0_337 = arith.constant 0 : index
    %276 = vector.load %arg6[%c7_335, %c0_336, %c0_337] : memref<9x16x16xf32, #tpu.memory_space<vmem>>, vector<1x16x16xf32>
    %277 = vector.shape_cast %276 : vector<1x16x16xf32> to vector<16x16xf32>
    %cst_338 = arith.constant dense<0.000000e+00> : vector<16x16xf32>
    %278 = tpu.matmul %275, %277, %cst_338 {dimension_numbers = #tpu.dot_dimension_numbers<[1], [0], [0], [1], [0, 0, 1, 1], [], []>} : vector<16x16xf32>, vector<16x16xf32>, vector<16x16xf32> -> vector<16x16xf32>
    %279 = arith.addf %273, %278 : vector<16x16xf32>
    %c2_339 = arith.constant 2 : index
    %c2_340 = arith.constant 2 : index
    %c0_341 = arith.constant 0 : index
    %280 = vector.load %arg13[%c2_339, %c2_340, %c0_341] : memref<6x6x16xf32, #tpu.memory_space<vmem>>, vector<4x4x16xf32>
    %281 = vector.shape_cast %280 : vector<4x4x16xf32> to vector<16x16xf32>
    %c8_342 = arith.constant 8 : index
    %c0_343 = arith.constant 0 : index
    %c0_344 = arith.constant 0 : index
    %282 = vector.load %arg6[%c8_342, %c0_343, %c0_344] : memref<9x16x16xf32, #tpu.memory_space<vmem>>, vector<1x16x16xf32>
    %283 = vector.shape_cast %282 : vector<1x16x16xf32> to vector<16x16xf32>
    %cst_345 = arith.constant dense<0.000000e+00> : vector<16x16xf32>
    %284 = tpu.matmul %281, %283, %cst_345 {dimension_numbers = #tpu.dot_dimension_numbers<[1], [0], [0], [1], [0, 0, 1, 1], [], []>} : vector<16x16xf32>, vector<16x16xf32>, vector<16x16xf32> -> vector<16x16xf32>
    %285 = arith.addf %279, %284 : vector<16x16xf32>
    %c0_346 = arith.constant 0 : index
    %c0_347 = arith.constant 0 : index
    %286 = vector.load %arg7[%c0_346, %c0_347] : memref<1x16xf32, #tpu.memory_space<vmem>>, vector<1x16xf32>
    %287 = vector.broadcast %286 : vector<1x16xf32> to vector<16x16xf32>
    %288 = arith.addf %285, %287 : vector<16x16xf32>
    %cst_348 = arith.constant 0.000000e+00 : f32
    %289 = vector.broadcast %cst_348 : f32 to vector<16x16xf32>
    %290 = arith.maximumf %288, %289 : vector<16x16xf32>
    %291 = vector.shape_cast %290 : vector<16x16xf32> to vector<4x4x16xf32>
    %c0_349 = arith.constant 0 : index
    %c0_350 = arith.constant 0 : index
    %c0_351 = arith.constant 0 : index
    %292 = vector.load %arg17[%c0_349, %c0_350, %c0_351] : memref<4x4x16xf32, #tpu.memory_space<vmem>>, vector<4x4x16xf32>
    tpu.vector_store %arg17[%c0_349, %c0_350, %c0_351], %291 {strides = array<i32>} : memref<4x4x16xf32, #tpu.memory_space<vmem>>, vector<4x4x16xf32>,
    %c0_352 = arith.constant 0 : index
    %c0_353 = arith.constant 0 : index
    %c0_354 = arith.constant 0 : index
    %293 = tpu.strided_load %arg17[%c0_352, %c0_353, %c0_354] {strides = array<i32: 1, 2, 1>} : memref<4x4x16xf32, #tpu.memory_space<vmem>>, vector<4x2x16xf32>
    %c0_355 = arith.constant 0 : index
    %c1_356 = arith.constant 1 : index
    %c0_357 = arith.constant 0 : index
    %294 = tpu.strided_load %arg17[%c0_355, %c1_356, %c0_357] {strides = array<i32: 1, 2, 1>} : memref<4x4x16xf32, #tpu.memory_space<vmem>>, vector<4x2x16xf32>
    %295 = arith.maximumf %293, %294 : vector<4x2x16xf32>
    %296 = vector.shape_cast %295 : vector<4x2x16xf32> to vector<2x2x2x16xf32>
    %cst_358 = arith.constant dense<0xFF800000> : vector<2x2x16xf32>
    %297 = vector.multi_reduction <maximumf>, %296, %cst_358 [1] : vector<2x2x2x16xf32> to vector<2x2x16xf32>
    %c1_359 = arith.constant 1 : index
    %c1_360 = arith.constant 1 : index
    %c0_361 = arith.constant 0 : index
    %298 = vector.load %arg14[%c1_359, %c1_360, %c0_361] : memref<4x4x16xf32, #tpu.memory_space<vmem>>, vector<2x2x16xf32>
    tpu.vector_store %arg14[%c1_359, %c1_360, %c0_361], %297 {strides = array<i32>} : memref<4x4x16xf32, #tpu.memory_space<vmem>>, vector<2x2x16xf32>,
    %cst_362 = arith.constant 0.000000e+00 : f32
    %299 = vector.broadcast %cst_362 : f32 to vector<1x32xf32>
    %c1_363 = arith.constant 1 : index
    %c1_364 = arith.constant 1 : index
    %c0_365 = arith.constant 0 : index
    %300 = vector.load %arg14[%c1_363, %c1_364, %c0_365] : memref<4x4x16xf32, #tpu.memory_space<vmem>>, vector<1x1x16xf32>
    %301 = vector.shape_cast %300 : vector<1x1x16xf32> to vector<1x16xf32>
    %c0_366 = arith.constant 0 : index
    %c0_367 = arith.constant 0 : index
    %c0_368 = arith.constant 0 : index
    %302 = vector.load %arg8[%c0_366, %c0_367, %c0_368] : memref<4x16x32xf32, #tpu.memory_space<vmem>>, vector<1x16x32xf32>
    %303 = vector.shape_cast %302 : vector<1x16x32xf32> to vector<16x32xf32>
    %cst_369 = arith.constant dense<0.000000e+00> : vector<1x32xf32>
    %304 = tpu.matmul %301, %303, %cst_369 {dimension_numbers = #tpu.dot_dimension_numbers<[1], [0], [0], [1], [0, 0, 1, 1], [], []>} : vector<1x16xf32>, vector<16x32xf32>, vector<1x32xf32> -> vector<1x32xf32>
    %305 = arith.addf %299, %304 : vector<1x32xf32>
    %c1_370 = arith.constant 1 : index
    %c2_371 = arith.constant 2 : index
    %c0_372 = arith.constant 0 : index
    %306 = vector.load %arg14[%c1_370, %c2_371, %c0_372] : memref<4x4x16xf32, #tpu.memory_space<vmem>>, vector<1x1x16xf32>
    %307 = vector.shape_cast %306 : vector<1x1x16xf32> to vector<1x16xf32>
    %c1_373 = arith.constant 1 : index
    %c0_374 = arith.constant 0 : index
    %c0_375 = arith.constant 0 : index
    %308 = vector.load %arg8[%c1_373, %c0_374, %c0_375] : memref<4x16x32xf32, #tpu.memory_space<vmem>>, vector<1x16x32xf32>
    %309 = vector.shape_cast %308 : vector<1x16x32xf32> to vector<16x32xf32>
    %cst_376 = arith.constant dense<0.000000e+00> : vector<1x32xf32>
    %310 = tpu.matmul %307, %309, %cst_376 {dimension_numbers = #tpu.dot_dimension_numbers<[1], [0], [0], [1], [0, 0, 1, 1], [], []>} : vector<1x16xf32>, vector<16x32xf32>, vector<1x32xf32> -> vector<1x32xf32>
    %311 = arith.addf %305, %310 : vector<1x32xf32>
    %c2_377 = arith.constant 2 : index
    %c1_378 = arith.constant 1 : index
    %c0_379 = arith.constant 0 : index
    %312 = vector.load %arg14[%c2_377, %c1_378, %c0_379] : memref<4x4x16xf32, #tpu.memory_space<vmem>>, vector<1x1x16xf32>
    %313 = vector.shape_cast %312 : vector<1x1x16xf32> to vector<1x16xf32>
    %c2_380 = arith.constant 2 : index
    %c0_381 = arith.constant 0 : index
    %c0_382 = arith.constant 0 : index
    %314 = vector.load %arg8[%c2_380, %c0_381, %c0_382] : memref<4x16x32xf32, #tpu.memory_space<vmem>>, vector<1x16x32xf32>
    %315 = vector.shape_cast %314 : vector<1x16x32xf32> to vector<16x32xf32>
    %cst_383 = arith.constant dense<0.000000e+00> : vector<1x32xf32>
    %316 = tpu.matmul %313, %315, %cst_383 {dimension_numbers = #tpu.dot_dimension_numbers<[1], [0], [0], [1], [0, 0, 1, 1], [], []>} : vector<1x16xf32>, vector<16x32xf32>, vector<1x32xf32> -> vector<1x32xf32>
    %317 = arith.addf %311, %316 : vector<1x32xf32>
    %c2_384 = arith.constant 2 : index
    %c2_385 = arith.constant 2 : index
    %c0_386 = arith.constant 0 : index
    %318 = vector.load %arg14[%c2_384, %c2_385, %c0_386] : memref<4x4x16xf32, #tpu.memory_space<vmem>>, vector<1x1x16xf32>
    %319 = vector.shape_cast %318 : vector<1x1x16xf32> to vector<1x16xf32>
    %c3_387 = arith.constant 3 : index
    %c0_388 = arith.constant 0 : index
    %c0_389 = arith.constant 0 : index
    %320 = vector.load %arg8[%c3_387, %c0_388, %c0_389] : memref<4x16x32xf32, #tpu.memory_space<vmem>>, vector<1x16x32xf32>
    %321 = vector.shape_cast %320 : vector<1x16x32xf32> to vector<16x32xf32>
    %cst_390 = arith.constant dense<0.000000e+00> : vector<1x32xf32>
    %322 = tpu.matmul %319, %321, %cst_390 {dimension_numbers = #tpu.dot_dimension_numbers<[1], [0], [0], [1], [0, 0, 1, 1], [], []>} : vector<1x16xf32>, vector<16x32xf32>, vector<1x32xf32> -> vector<1x32xf32>
    %323 = arith.addf %317, %322 : vector<1x32xf32>
    %c0_391 = arith.constant 0 : index
    %c0_392 = arith.constant 0 : index
    %324 = vector.load %arg9[%c0_391, %c0_392] : memref<1x32xf32, #tpu.memory_space<vmem>>, vector<1x32xf32>
    %325 = arith.addf %323, %324 : vector<1x32xf32>
    %cst_393 = arith.constant 0.000000e+00 : f32
    %326 = vector.broadcast %cst_393 : f32 to vector<1x32xf32>
    %327 = arith.maximumf %325, %326 : vector<1x32xf32>
    %c0_394 = arith.constant 0 : index
    %c0_395 = arith.constant 0 : index
    %c0_396 = arith.constant 0 : index
    %328 = vector.load %arg10[%c0_394, %c0_395, %c0_396] : memref<1x2x32xf32, #tpu.memory_space<vmem>>, vector<1x1x32xf32>
    %329 = vector.shape_cast %328 : vector<1x1x32xf32> to vector<1x32xf32>
    %330 = vector.shape_cast %327 : vector<1x32xf32> to vector<1x1x32xf32>
    tpu.vector_store %arg10[%c0_394, %c0_395, %c0_396], %330 {strides = array<i32>} : memref<1x2x32xf32, #tpu.memory_space<vmem>>, vector<1x1x32xf32>,
    %c1_397 = arith.constant 1 : index
    %c0_398 = arith.constant 0 : index
    %c0_399 = arith.constant 0 : index
    %c0_400 = arith.constant 0 : index
    %331 = vector.load %arg1[%c1_397, %c0_398, %c0_399, %c0_400] : memref<2x16x16x3xf32, #tpu.memory_space<vmem>>, vector<1x16x16x3xf32>
    %332 = vector.shape_cast %331 : vector<1x16x16x3xf32> to vector<16x16x3xf32>
    %c1_401 = arith.constant 1 : index
    %c1_402 = arith.constant 1 : index
    %c0_403 = arith.constant 0 : index
    %333 = vector.load %arg11[%c1_401, %c1_402, %c0_403] : memref<18x18x3xf32, #tpu.memory_space<vmem>>, vector<16x16x3xf32>
    tpu.vector_store %arg11[%c1_401, %c1_402, %c0_403], %332 {strides = array<i32>} : memref<18x18x3xf32, #tpu.memory_space<vmem>>, vector<16x16x3xf32>,
    %cst_404 = arith.constant 0.000000e+00 : f32
    %334 = vector.broadcast %cst_404 : f32 to vector<128x8xf32>
    %c0_405 = arith.constant 0 : index
    %c0_406 = arith.constant 0 : index
    %c0_407 = arith.constant 0 : index
    %335 = vector.load %arg11[%c0_405, %c0_406, %c0_407] : memref<18x18x3xf32, #tpu.memory_space<vmem>>, vector<8x16x3xf32>
    %336 = vector.shape_cast %335 : vector<8x16x3xf32> to vector<128x3xf32>
    %c0_408 = arith.constant 0 : index
    %c0_409 = arith.constant 0 : index
    %c0_410 = arith.constant 0 : index
    %337 = vector.load %arg2[%c0_408, %c0_409, %c0_410] : memref<9x3x8xf32, #tpu.memory_space<vmem>>, vector<1x3x8xf32>
    %338 = vector.shape_cast %337 : vector<1x3x8xf32> to vector<3x8xf32>
    %cst_411 = arith.constant dense<0.000000e+00> : vector<128x8xf32>
    %339 = tpu.matmul %336, %338, %cst_411 {dimension_numbers = #tpu.dot_dimension_numbers<[1], [0], [0], [1], [0, 0, 1, 1], [], []>} : vector<128x3xf32>, vector<3x8xf32>, vector<128x8xf32> -> vector<128x8xf32>
    %340 = arith.addf %334, %339 : vector<128x8xf32>
    %c0_412 = arith.constant 0 : index
    %c1_413 = arith.constant 1 : index
    %c0_414 = arith.constant 0 : index
    %341 = vector.load %arg11[%c0_412, %c1_413, %c0_414] : memref<18x18x3xf32, #tpu.memory_space<vmem>>, vector<8x16x3xf32>
    %342 = vector.shape_cast %341 : vector<8x16x3xf32> to vector<128x3xf32>
    %c1_415 = arith.constant 1 : index
    %c0_416 = arith.constant 0 : index
    %c0_417 = arith.constant 0 : index
    %343 = vector.load %arg2[%c1_415, %c0_416, %c0_417] : memref<9x3x8xf32, #tpu.memory_space<vmem>>, vector<1x3x8xf32>
    %344 = vector.shape_cast %343 : vector<1x3x8xf32> to vector<3x8xf32>
    %cst_418 = arith.constant dense<0.000000e+00> : vector<128x8xf32>
    %345 = tpu.matmul %342, %344, %cst_418 {dimension_numbers = #tpu.dot_dimension_numbers<[1], [0], [0], [1], [0, 0, 1, 1], [], []>} : vector<128x3xf32>, vector<3x8xf32>, vector<128x8xf32> -> vector<128x8xf32>
    %346 = arith.addf %340, %345 : vector<128x8xf32>
    %c0_419 = arith.constant 0 : index
    %c2_420 = arith.constant 2 : index
    %c0_421 = arith.constant 0 : index
    %347 = vector.load %arg11[%c0_419, %c2_420, %c0_421] : memref<18x18x3xf32, #tpu.memory_space<vmem>>, vector<8x16x3xf32>
    %348 = vector.shape_cast %347 : vector<8x16x3xf32> to vector<128x3xf32>
    %c2_422 = arith.constant 2 : index
    %c0_423 = arith.constant 0 : index
    %c0_424 = arith.constant 0 : index
    %349 = vector.load %arg2[%c2_422, %c0_423, %c0_424] : memref<9x3x8xf32, #tpu.memory_space<vmem>>, vector<1x3x8xf32>
    %350 = vector.shape_cast %349 : vector<1x3x8xf32> to vector<3x8xf32>
    %cst_425 = arith.constant dense<0.000000e+00> : vector<128x8xf32>
    %351 = tpu.matmul %348, %350, %cst_425 {dimension_numbers = #tpu.dot_dimension_numbers<[1], [0], [0], [1], [0, 0, 1, 1], [], []>} : vector<128x3xf32>, vector<3x8xf32>, vector<128x8xf32> -> vector<128x8xf32>
    %352 = arith.addf %346, %351 : vector<128x8xf32>
    %c1_426 = arith.constant 1 : index
    %c0_427 = arith.constant 0 : index
    %c0_428 = arith.constant 0 : index
    %353 = vector.load %arg11[%c1_426, %c0_427, %c0_428] : memref<18x18x3xf32, #tpu.memory_space<vmem>>, vector<8x16x3xf32>
    %354 = vector.shape_cast %353 : vector<8x16x3xf32> to vector<128x3xf32>
    %c3_429 = arith.constant 3 : index
    %c0_430 = arith.constant 0 : index
    %c0_431 = arith.constant 0 : index
    %355 = vector.load %arg2[%c3_429, %c0_430, %c0_431] : memref<9x3x8xf32, #tpu.memory_space<vmem>>, vector<1x3x8xf32>
    %356 = vector.shape_cast %355 : vector<1x3x8xf32> to vector<3x8xf32>
    %cst_432 = arith.constant dense<0.000000e+00> : vector<128x8xf32>
    %357 = tpu.matmul %354, %356, %cst_432 {dimension_numbers = #tpu.dot_dimension_numbers<[1], [0], [0], [1], [0, 0, 1, 1], [], []>} : vector<128x3xf32>, vector<3x8xf32>, vector<128x8xf32> -> vector<128x8xf32>
    %358 = arith.addf %352, %357 : vector<128x8xf32>
    %c1_433 = arith.constant 1 : index
    %c1_434 = arith.constant 1 : index
    %c0_435 = arith.constant 0 : index
    %359 = vector.load %arg11[%c1_433, %c1_434, %c0_435] : memref<18x18x3xf32, #tpu.memory_space<vmem>>, vector<8x16x3xf32>
    %360 = vector.shape_cast %359 : vector<8x16x3xf32> to vector<128x3xf32>
    %c4_436 = arith.constant 4 : index
    %c0_437 = arith.constant 0 : index
    %c0_438 = arith.constant 0 : index
    %361 = vector.load %arg2[%c4_436, %c0_437, %c0_438] : memref<9x3x8xf32, #tpu.memory_space<vmem>>, vector<1x3x8xf32>
    %362 = vector.shape_cast %361 : vector<1x3x8xf32> to vector<3x8xf32>
    %cst_439 = arith.constant dense<0.000000e+00> : vector<128x8xf32>
    %363 = tpu.matmul %360, %362, %cst_439 {dimension_numbers = #tpu.dot_dimension_numbers<[1], [0], [0], [1], [0, 0, 1, 1], [], []>} : vector<128x3xf32>, vector<3x8xf32>, vector<128x8xf32> -> vector<128x8xf32>
    %364 = arith.addf %358, %363 : vector<128x8xf32>
    %c1_440 = arith.constant 1 : index
    %c2_441 = arith.constant 2 : index
    %c0_442 = arith.constant 0 : index
    %365 = vector.load %arg11[%c1_440, %c2_441, %c0_442] : memref<18x18x3xf32, #tpu.memory_space<vmem>>, vector<8x16x3xf32>
    %366 = vector.shape_cast %365 : vector<8x16x3xf32> to vector<128x3xf32>
    %c5_443 = arith.constant 5 : index
    %c0_444 = arith.constant 0 : index
    %c0_445 = arith.constant 0 : index
    %367 = vector.load %arg2[%c5_443, %c0_444, %c0_445] : memref<9x3x8xf32, #tpu.memory_space<vmem>>, vector<1x3x8xf32>
    %368 = vector.shape_cast %367 : vector<1x3x8xf32> to vector<3x8xf32>
    %cst_446 = arith.constant dense<0.000000e+00> : vector<128x8xf32>
    %369 = tpu.matmul %366, %368, %cst_446 {dimension_numbers = #tpu.dot_dimension_numbers<[1], [0], [0], [1], [0, 0, 1, 1], [], []>} : vector<128x3xf32>, vector<3x8xf32>, vector<128x8xf32> -> vector<128x8xf32>
    %370 = arith.addf %364, %369 : vector<128x8xf32>
    %c2_447 = arith.constant 2 : index
    %c0_448 = arith.constant 0 : index
    %c0_449 = arith.constant 0 : index
    %371 = vector.load %arg11[%c2_447, %c0_448, %c0_449] : memref<18x18x3xf32, #tpu.memory_space<vmem>>, vector<8x16x3xf32>
    %372 = vector.shape_cast %371 : vector<8x16x3xf32> to vector<128x3xf32>
    %c6_450 = arith.constant 6 : index
    %c0_451 = arith.constant 0 : index
    %c0_452 = arith.constant 0 : index
    %373 = vector.load %arg2[%c6_450, %c0_451, %c0_452] : memref<9x3x8xf32, #tpu.memory_space<vmem>>, vector<1x3x8xf32>
    %374 = vector.shape_cast %373 : vector<1x3x8xf32> to vector<3x8xf32>
    %cst_453 = arith.constant dense<0.000000e+00> : vector<128x8xf32>
    %375 = tpu.matmul %372, %374, %cst_453 {dimension_numbers = #tpu.dot_dimension_numbers<[1], [0], [0], [1], [0, 0, 1, 1], [], []>} : vector<128x3xf32>, vector<3x8xf32>, vector<128x8xf32> -> vector<128x8xf32>
    %376 = arith.addf %370, %375 : vector<128x8xf32>
    %c2_454 = arith.constant 2 : index
    %c1_455 = arith.constant 1 : index
    %c0_456 = arith.constant 0 : index
    %377 = vector.load %arg11[%c2_454, %c1_455, %c0_456] : memref<18x18x3xf32, #tpu.memory_space<vmem>>, vector<8x16x3xf32>
    %378 = vector.shape_cast %377 : vector<8x16x3xf32> to vector<128x3xf32>
    %c7_457 = arith.constant 7 : index
    %c0_458 = arith.constant 0 : index
    %c0_459 = arith.constant 0 : index
    %379 = vector.load %arg2[%c7_457, %c0_458, %c0_459] : memref<9x3x8xf32, #tpu.memory_space<vmem>>, vector<1x3x8xf32>
    %380 = vector.shape_cast %379 : vector<1x3x8xf32> to vector<3x8xf32>
    %cst_460 = arith.constant dense<0.000000e+00> : vector<128x8xf32>
    %381 = tpu.matmul %378, %380, %cst_460 {dimension_numbers = #tpu.dot_dimension_numbers<[1], [0], [0], [1], [0, 0, 1, 1], [], []>} : vector<128x3xf32>, vector<3x8xf32>, vector<128x8xf32> -> vector<128x8xf32>
    %382 = arith.addf %376, %381 : vector<128x8xf32>
    %c2_461 = arith.constant 2 : index
    %c2_462 = arith.constant 2 : index
    %c0_463 = arith.constant 0 : index
    %383 = vector.load %arg11[%c2_461, %c2_462, %c0_463] : memref<18x18x3xf32, #tpu.memory_space<vmem>>, vector<8x16x3xf32>
    %384 = vector.shape_cast %383 : vector<8x16x3xf32> to vector<128x3xf32>
    %c8_464 = arith.constant 8 : index
    %c0_465 = arith.constant 0 : index
    %c0_466 = arith.constant 0 : index
    %385 = vector.load %arg2[%c8_464, %c0_465, %c0_466] : memref<9x3x8xf32, #tpu.memory_space<vmem>>, vector<1x3x8xf32>
    %386 = vector.shape_cast %385 : vector<1x3x8xf32> to vector<3x8xf32>
    %cst_467 = arith.constant dense<0.000000e+00> : vector<128x8xf32>
    %387 = tpu.matmul %384, %386, %cst_467 {dimension_numbers = #tpu.dot_dimension_numbers<[1], [0], [0], [1], [0, 0, 1, 1], [], []>} : vector<128x3xf32>, vector<3x8xf32>, vector<128x8xf32> -> vector<128x8xf32>
    %388 = arith.addf %382, %387 : vector<128x8xf32>
    %c0_468 = arith.constant 0 : index
    %c0_469 = arith.constant 0 : index
    %389 = vector.load %arg3[%c0_468, %c0_469] : memref<1x8xf32, #tpu.memory_space<vmem>>, vector<1x8xf32>
    %390 = vector.broadcast %389 : vector<1x8xf32> to vector<128x8xf32>
    %391 = arith.addf %388, %390 : vector<128x8xf32>
    %cst_470 = arith.constant 0.000000e+00 : f32
    %392 = vector.broadcast %cst_470 : f32 to vector<128x8xf32>
    %393 = arith.maximumf %391, %392 : vector<128x8xf32>
    %394 = vector.shape_cast %393 : vector<128x8xf32> to vector<8x16x8xf32>
    %c0_471 = arith.constant 0 : index
    %c0_472 = arith.constant 0 : index
    %c0_473 = arith.constant 0 : index
    %395 = vector.load %arg15[%c0_471, %c0_472, %c0_473] : memref<8x16x8xf32, #tpu.memory_space<vmem>>, vector<8x16x8xf32>
    tpu.vector_store %arg15[%c0_471, %c0_472, %c0_473], %394 {strides = array<i32>} : memref<8x16x8xf32, #tpu.memory_space<vmem>>, vector<8x16x8xf32>,
    %c0_474 = arith.constant 0 : index
    %c0_475 = arith.constant 0 : index
    %c0_476 = arith.constant 0 : index
    %396 = tpu.strided_load %arg15[%c0_474, %c0_475, %c0_476] {strides = array<i32: 1, 2, 1>} : memref<8x16x8xf32, #tpu.memory_space<vmem>>, vector<8x8x8xf32>
    %c0_477 = arith.constant 0 : index
    %c1_478 = arith.constant 1 : index
    %c0_479 = arith.constant 0 : index
    %397 = tpu.strided_load %arg15[%c0_477, %c1_478, %c0_479] {strides = array<i32: 1, 2, 1>} : memref<8x16x8xf32, #tpu.memory_space<vmem>>, vector<8x8x8xf32>
    %398 = arith.maximumf %396, %397 : vector<8x8x8xf32>
    %399 = vector.shape_cast %398 : vector<8x8x8xf32> to vector<4x2x8x8xf32>
    %cst_480 = arith.constant dense<0xFF800000> : vector<4x8x8xf32>
    %400 = vector.multi_reduction <maximumf>, %399, %cst_480 [1] : vector<4x2x8x8xf32> to vector<4x8x8xf32>
    %c1_481 = arith.constant 1 : index
    %c1_482 = arith.constant 1 : index
    %c0_483 = arith.constant 0 : index
    %401 = vector.load %arg12[%c1_481, %c1_482, %c0_483] : memref<10x10x8xf32, #tpu.memory_space<vmem>>, vector<4x8x8xf32>
    tpu.vector_store %arg12[%c1_481, %c1_482, %c0_483], %400 {strides = array<i32>} : memref<10x10x8xf32, #tpu.memory_space<vmem>>, vector<4x8x8xf32>,
    %cst_484 = arith.constant 0.000000e+00 : f32
    %402 = vector.broadcast %cst_484 : f32 to vector<128x8xf32>
    %c8_485 = arith.constant 8 : index
    %c0_486 = arith.constant 0 : index
    %c0_487 = arith.constant 0 : index
    %403 = vector.load %arg11[%c8_485, %c0_486, %c0_487] : memref<18x18x3xf32, #tpu.memory_space<vmem>>, vector<8x16x3xf32>
    %404 = vector.shape_cast %403 : vector<8x16x3xf32> to vector<128x3xf32>
    %c0_488 = arith.constant 0 : index
    %c0_489 = arith.constant 0 : index
    %c0_490 = arith.constant 0 : index
    %405 = vector.load %arg2[%c0_488, %c0_489, %c0_490] : memref<9x3x8xf32, #tpu.memory_space<vmem>>, vector<1x3x8xf32>
    %406 = vector.shape_cast %405 : vector<1x3x8xf32> to vector<3x8xf32>
    %cst_491 = arith.constant dense<0.000000e+00> : vector<128x8xf32>
    %407 = tpu.matmul %404, %406, %cst_491 {dimension_numbers = #tpu.dot_dimension_numbers<[1], [0], [0], [1], [0, 0, 1, 1], [], []>} : vector<128x3xf32>, vector<3x8xf32>, vector<128x8xf32> -> vector<128x8xf32>
    %408 = arith.addf %402, %407 : vector<128x8xf32>
    %c8_492 = arith.constant 8 : index
    %c1_493 = arith.constant 1 : index
    %c0_494 = arith.constant 0 : index
    %409 = vector.load %arg11[%c8_492, %c1_493, %c0_494] : memref<18x18x3xf32, #tpu.memory_space<vmem>>, vector<8x16x3xf32>
    %410 = vector.shape_cast %409 : vector<8x16x3xf32> to vector<128x3xf32>
    %c1_495 = arith.constant 1 : index
    %c0_496 = arith.constant 0 : index
    %c0_497 = arith.constant 0 : index
    %411 = vector.load %arg2[%c1_495, %c0_496, %c0_497] : memref<9x3x8xf32, #tpu.memory_space<vmem>>, vector<1x3x8xf32>
    %412 = vector.shape_cast %411 : vector<1x3x8xf32> to vector<3x8xf32>
    %cst_498 = arith.constant dense<0.000000e+00> : vector<128x8xf32>
    %413 = tpu.matmul %410, %412, %cst_498 {dimension_numbers = #tpu.dot_dimension_numbers<[1], [0], [0], [1], [0, 0, 1, 1], [], []>} : vector<128x3xf32>, vector<3x8xf32>, vector<128x8xf32> -> vector<128x8xf32>
    %414 = arith.addf %408, %413 : vector<128x8xf32>
    %c8_499 = arith.constant 8 : index
    %c2_500 = arith.constant 2 : index
    %c0_501 = arith.constant 0 : index
    %415 = vector.load %arg11[%c8_499, %c2_500, %c0_501] : memref<18x18x3xf32, #tpu.memory_space<vmem>>, vector<8x16x3xf32>
    %416 = vector.shape_cast %415 : vector<8x16x3xf32> to vector<128x3xf32>
    %c2_502 = arith.constant 2 : index
    %c0_503 = arith.constant 0 : index
    %c0_504 = arith.constant 0 : index
    %417 = vector.load %arg2[%c2_502, %c0_503, %c0_504] : memref<9x3x8xf32, #tpu.memory_space<vmem>>, vector<1x3x8xf32>
    %418 = vector.shape_cast %417 : vector<1x3x8xf32> to vector<3x8xf32>
    %cst_505 = arith.constant dense<0.000000e+00> : vector<128x8xf32>
    %419 = tpu.matmul %416, %418, %cst_505 {dimension_numbers = #tpu.dot_dimension_numbers<[1], [0], [0], [1], [0, 0, 1, 1], [], []>} : vector<128x3xf32>, vector<3x8xf32>, vector<128x8xf32> -> vector<128x8xf32>
    %420 = arith.addf %414, %419 : vector<128x8xf32>
    %c9_506 = arith.constant 9 : index
    %c0_507 = arith.constant 0 : index
    %c0_508 = arith.constant 0 : index
    %421 = vector.load %arg11[%c9_506, %c0_507, %c0_508] : memref<18x18x3xf32, #tpu.memory_space<vmem>>, vector<8x16x3xf32>
    %422 = vector.shape_cast %421 : vector<8x16x3xf32> to vector<128x3xf32>
    %c3_509 = arith.constant 3 : index
    %c0_510 = arith.constant 0 : index
    %c0_511 = arith.constant 0 : index
    %423 = vector.load %arg2[%c3_509, %c0_510, %c0_511] : memref<9x3x8xf32, #tpu.memory_space<vmem>>, vector<1x3x8xf32>
    %424 = vector.shape_cast %423 : vector<1x3x8xf32> to vector<3x8xf32>
    %cst_512 = arith.constant dense<0.000000e+00> : vector<128x8xf32>
    %425 = tpu.matmul %422, %424, %cst_512 {dimension_numbers = #tpu.dot_dimension_numbers<[1], [0], [0], [1], [0, 0, 1, 1], [], []>} : vector<128x3xf32>, vector<3x8xf32>, vector<128x8xf32> -> vector<128x8xf32>
    %426 = arith.addf %420, %425 : vector<128x8xf32>
    %c9_513 = arith.constant 9 : index
    %c1_514 = arith.constant 1 : index
    %c0_515 = arith.constant 0 : index
    %427 = vector.load %arg11[%c9_513, %c1_514, %c0_515] : memref<18x18x3xf32, #tpu.memory_space<vmem>>, vector<8x16x3xf32>
    %428 = vector.shape_cast %427 : vector<8x16x3xf32> to vector<128x3xf32>
    %c4_516 = arith.constant 4 : index
    %c0_517 = arith.constant 0 : index
    %c0_518 = arith.constant 0 : index
    %429 = vector.load %arg2[%c4_516, %c0_517, %c0_518] : memref<9x3x8xf32, #tpu.memory_space<vmem>>, vector<1x3x8xf32>
    %430 = vector.shape_cast %429 : vector<1x3x8xf32> to vector<3x8xf32>
    %cst_519 = arith.constant dense<0.000000e+00> : vector<128x8xf32>
    %431 = tpu.matmul %428, %430, %cst_519 {dimension_numbers = #tpu.dot_dimension_numbers<[1], [0], [0], [1], [0, 0, 1, 1], [], []>} : vector<128x3xf32>, vector<3x8xf32>, vector<128x8xf32> -> vector<128x8xf32>
    %432 = arith.addf %426, %431 : vector<128x8xf32>
    %c9_520 = arith.constant 9 : index
    %c2_521 = arith.constant 2 : index
    %c0_522 = arith.constant 0 : index
    %433 = vector.load %arg11[%c9_520, %c2_521, %c0_522] : memref<18x18x3xf32, #tpu.memory_space<vmem>>, vector<8x16x3xf32>
    %434 = vector.shape_cast %433 : vector<8x16x3xf32> to vector<128x3xf32>
    %c5_523 = arith.constant 5 : index
    %c0_524 = arith.constant 0 : index
    %c0_525 = arith.constant 0 : index
    %435 = vector.load %arg2[%c5_523, %c0_524, %c0_525] : memref<9x3x8xf32, #tpu.memory_space<vmem>>, vector<1x3x8xf32>
    %436 = vector.shape_cast %435 : vector<1x3x8xf32> to vector<3x8xf32>
    %cst_526 = arith.constant dense<0.000000e+00> : vector<128x8xf32>
    %437 = tpu.matmul %434, %436, %cst_526 {dimension_numbers = #tpu.dot_dimension_numbers<[1], [0], [0], [1], [0, 0, 1, 1], [], []>} : vector<128x3xf32>, vector<3x8xf32>, vector<128x8xf32> -> vector<128x8xf32>
    %438 = arith.addf %432, %437 : vector<128x8xf32>
    %c10_527 = arith.constant 10 : index
    %c0_528 = arith.constant 0 : index
    %c0_529 = arith.constant 0 : index
    %439 = vector.load %arg11[%c10_527, %c0_528, %c0_529] : memref<18x18x3xf32, #tpu.memory_space<vmem>>, vector<8x16x3xf32>
    %440 = vector.shape_cast %439 : vector<8x16x3xf32> to vector<128x3xf32>
    %c6_530 = arith.constant 6 : index
    %c0_531 = arith.constant 0 : index
    %c0_532 = arith.constant 0 : index
    %441 = vector.load %arg2[%c6_530, %c0_531, %c0_532] : memref<9x3x8xf32, #tpu.memory_space<vmem>>, vector<1x3x8xf32>
    %442 = vector.shape_cast %441 : vector<1x3x8xf32> to vector<3x8xf32>
    %cst_533 = arith.constant dense<0.000000e+00> : vector<128x8xf32>
    %443 = tpu.matmul %440, %442, %cst_533 {dimension_numbers = #tpu.dot_dimension_numbers<[1], [0], [0], [1], [0, 0, 1, 1], [], []>} : vector<128x3xf32>, vector<3x8xf32>, vector<128x8xf32> -> vector<128x8xf32>
    %444 = arith.addf %438, %443 : vector<128x8xf32>
    %c10_534 = arith.constant 10 : index
    %c1_535 = arith.constant 1 : index
    %c0_536 = arith.constant 0 : index
    %445 = vector.load %arg11[%c10_534, %c1_535, %c0_536] : memref<18x18x3xf32, #tpu.memory_space<vmem>>, vector<8x16x3xf32>
    %446 = vector.shape_cast %445 : vector<8x16x3xf32> to vector<128x3xf32>
    %c7_537 = arith.constant 7 : index
    %c0_538 = arith.constant 0 : index
    %c0_539 = arith.constant 0 : index
    %447 = vector.load %arg2[%c7_537, %c0_538, %c0_539] : memref<9x3x8xf32, #tpu.memory_space<vmem>>, vector<1x3x8xf32>
    %448 = vector.shape_cast %447 : vector<1x3x8xf32> to vector<3x8xf32>
    %cst_540 = arith.constant dense<0.000000e+00> : vector<128x8xf32>
    %449 = tpu.matmul %446, %448, %cst_540 {dimension_numbers = #tpu.dot_dimension_numbers<[1], [0], [0], [1], [0, 0, 1, 1], [], []>} : vector<128x3xf32>, vector<3x8xf32>, vector<128x8xf32> -> vector<128x8xf32>
    %450 = arith.addf %444, %449 : vector<128x8xf32>
    %c10_541 = arith.constant 10 : index
    %c2_542 = arith.constant 2 : index
    %c0_543 = arith.constant 0 : index
    %451 = vector.load %arg11[%c10_541, %c2_542, %c0_543] : memref<18x18x3xf32, #tpu.memory_space<vmem>>, vector<8x16x3xf32>
    %452 = vector.shape_cast %451 : vector<8x16x3xf32> to vector<128x3xf32>
    %c8_544 = arith.constant 8 : index
    %c0_545 = arith.constant 0 : index
    %c0_546 = arith.constant 0 : index
    %453 = vector.load %arg2[%c8_544, %c0_545, %c0_546] : memref<9x3x8xf32, #tpu.memory_space<vmem>>, vector<1x3x8xf32>
    %454 = vector.shape_cast %453 : vector<1x3x8xf32> to vector<3x8xf32>
    %cst_547 = arith.constant dense<0.000000e+00> : vector<128x8xf32>
    %455 = tpu.matmul %452, %454, %cst_547 {dimension_numbers = #tpu.dot_dimension_numbers<[1], [0], [0], [1], [0, 0, 1, 1], [], []>} : vector<128x3xf32>, vector<3x8xf32>, vector<128x8xf32> -> vector<128x8xf32>
    %456 = arith.addf %450, %455 : vector<128x8xf32>
    %c0_548 = arith.constant 0 : index
    %c0_549 = arith.constant 0 : index
    %457 = vector.load %arg3[%c0_548, %c0_549] : memref<1x8xf32, #tpu.memory_space<vmem>>, vector<1x8xf32>
    %458 = vector.broadcast %457 : vector<1x8xf32> to vector<128x8xf32>
    %459 = arith.addf %456, %458 : vector<128x8xf32>
    %cst_550 = arith.constant 0.000000e+00 : f32
    %460 = vector.broadcast %cst_550 : f32 to vector<128x8xf32>
    %461 = arith.maximumf %459, %460 : vector<128x8xf32>
    %462 = vector.shape_cast %461 : vector<128x8xf32> to vector<8x16x8xf32>
    %c0_551 = arith.constant 0 : index
    %c0_552 = arith.constant 0 : index
    %c0_553 = arith.constant 0 : index
    %463 = vector.load %arg15[%c0_551, %c0_552, %c0_553] : memref<8x16x8xf32, #tpu.memory_space<vmem>>, vector<8x16x8xf32>
    tpu.vector_store %arg15[%c0_551, %c0_552, %c0_553], %462 {strides = array<i32>} : memref<8x16x8xf32, #tpu.memory_space<vmem>>, vector<8x16x8xf32>,
    %c0_554 = arith.constant 0 : index
    %c0_555 = arith.constant 0 : index
    %c0_556 = arith.constant 0 : index
    %464 = tpu.strided_load %arg15[%c0_554, %c0_555, %c0_556] {strides = array<i32: 1, 2, 1>} : memref<8x16x8xf32, #tpu.memory_space<vmem>>, vector<8x8x8xf32>
    %c0_557 = arith.constant 0 : index
    %c1_558 = arith.constant 1 : index
    %c0_559 = arith.constant 0 : index
    %465 = tpu.strided_load %arg15[%c0_557, %c1_558, %c0_559] {strides = array<i32: 1, 2, 1>} : memref<8x16x8xf32, #tpu.memory_space<vmem>>, vector<8x8x8xf32>
    %466 = arith.maximumf %464, %465 : vector<8x8x8xf32>
    %467 = vector.shape_cast %466 : vector<8x8x8xf32> to vector<4x2x8x8xf32>
    %cst_560 = arith.constant dense<0xFF800000> : vector<4x8x8xf32>
    %468 = vector.multi_reduction <maximumf>, %467, %cst_560 [1] : vector<4x2x8x8xf32> to vector<4x8x8xf32>
    %c5_561 = arith.constant 5 : index
    %c1_562 = arith.constant 1 : index
    %c0_563 = arith.constant 0 : index
    %469 = vector.load %arg12[%c5_561, %c1_562, %c0_563] : memref<10x10x8xf32, #tpu.memory_space<vmem>>, vector<4x8x8xf32>
    tpu.vector_store %arg12[%c5_561, %c1_562, %c0_563], %468 {strides = array<i32>} : memref<10x10x8xf32, #tpu.memory_space<vmem>>, vector<4x8x8xf32>,
    %cst_564 = arith.constant 0.000000e+00 : f32
    %470 = vector.broadcast %cst_564 : f32 to vector<64x16xf32>
    %c0_565 = arith.constant 0 : index
    %c0_566 = arith.constant 0 : index
    %c0_567 = arith.constant 0 : index
    %471 = vector.load %arg12[%c0_565, %c0_566, %c0_567] : memref<10x10x8xf32, #tpu.memory_space<vmem>>, vector<8x8x8xf32>
    %472 = vector.shape_cast %471 : vector<8x8x8xf32> to vector<64x8xf32>
    %c0_568 = arith.constant 0 : index
    %c0_569 = arith.constant 0 : index
    %c0_570 = arith.constant 0 : index
    %473 = vector.load %arg4[%c0_568, %c0_569, %c0_570] : memref<9x8x16xf32, #tpu.memory_space<vmem>>, vector<1x8x16xf32>
    %474 = vector.shape_cast %473 : vector<1x8x16xf32> to vector<8x16xf32>
    %cst_571 = arith.constant dense<0.000000e+00> : vector<64x16xf32>
    %475 = tpu.matmul %472, %474, %cst_571 {dimension_numbers = #tpu.dot_dimension_numbers<[1], [0], [0], [1], [0, 0, 1, 1], [], []>} : vector<64x8xf32>, vector<8x16xf32>, vector<64x16xf32> -> vector<64x16xf32>
    %476 = arith.addf %470, %475 : vector<64x16xf32>
    %c0_572 = arith.constant 0 : index
    %c1_573 = arith.constant 1 : index
    %c0_574 = arith.constant 0 : index
    %477 = vector.load %arg12[%c0_572, %c1_573, %c0_574] : memref<10x10x8xf32, #tpu.memory_space<vmem>>, vector<8x8x8xf32>
    %478 = vector.shape_cast %477 : vector<8x8x8xf32> to vector<64x8xf32>
    %c1_575 = arith.constant 1 : index
    %c0_576 = arith.constant 0 : index
    %c0_577 = arith.constant 0 : index
    %479 = vector.load %arg4[%c1_575, %c0_576, %c0_577] : memref<9x8x16xf32, #tpu.memory_space<vmem>>, vector<1x8x16xf32>
    %480 = vector.shape_cast %479 : vector<1x8x16xf32> to vector<8x16xf32>
    %cst_578 = arith.constant dense<0.000000e+00> : vector<64x16xf32>
    %481 = tpu.matmul %478, %480, %cst_578 {dimension_numbers = #tpu.dot_dimension_numbers<[1], [0], [0], [1], [0, 0, 1, 1], [], []>} : vector<64x8xf32>, vector<8x16xf32>, vector<64x16xf32> -> vector<64x16xf32>
    %482 = arith.addf %476, %481 : vector<64x16xf32>
    %c0_579 = arith.constant 0 : index
    %c2_580 = arith.constant 2 : index
    %c0_581 = arith.constant 0 : index
    %483 = vector.load %arg12[%c0_579, %c2_580, %c0_581] : memref<10x10x8xf32, #tpu.memory_space<vmem>>, vector<8x8x8xf32>
    %484 = vector.shape_cast %483 : vector<8x8x8xf32> to vector<64x8xf32>
    %c2_582 = arith.constant 2 : index
    %c0_583 = arith.constant 0 : index
    %c0_584 = arith.constant 0 : index
    %485 = vector.load %arg4[%c2_582, %c0_583, %c0_584] : memref<9x8x16xf32, #tpu.memory_space<vmem>>, vector<1x8x16xf32>
    %486 = vector.shape_cast %485 : vector<1x8x16xf32> to vector<8x16xf32>
    %cst_585 = arith.constant dense<0.000000e+00> : vector<64x16xf32>
    %487 = tpu.matmul %484, %486, %cst_585 {dimension_numbers = #tpu.dot_dimension_numbers<[1], [0], [0], [1], [0, 0, 1, 1], [], []>} : vector<64x8xf32>, vector<8x16xf32>, vector<64x16xf32> -> vector<64x16xf32>
    %488 = arith.addf %482, %487 : vector<64x16xf32>
    %c1_586 = arith.constant 1 : index
    %c0_587 = arith.constant 0 : index
    %c0_588 = arith.constant 0 : index
    %489 = vector.load %arg12[%c1_586, %c0_587, %c0_588] : memref<10x10x8xf32, #tpu.memory_space<vmem>>, vector<8x8x8xf32>
    %490 = vector.shape_cast %489 : vector<8x8x8xf32> to vector<64x8xf32>
    %c3_589 = arith.constant 3 : index
    %c0_590 = arith.constant 0 : index
    %c0_591 = arith.constant 0 : index
    %491 = vector.load %arg4[%c3_589, %c0_590, %c0_591] : memref<9x8x16xf32, #tpu.memory_space<vmem>>, vector<1x8x16xf32>
    %492 = vector.shape_cast %491 : vector<1x8x16xf32> to vector<8x16xf32>
    %cst_592 = arith.constant dense<0.000000e+00> : vector<64x16xf32>
    %493 = tpu.matmul %490, %492, %cst_592 {dimension_numbers = #tpu.dot_dimension_numbers<[1], [0], [0], [1], [0, 0, 1, 1], [], []>} : vector<64x8xf32>, vector<8x16xf32>, vector<64x16xf32> -> vector<64x16xf32>
    %494 = arith.addf %488, %493 : vector<64x16xf32>
    %c1_593 = arith.constant 1 : index
    %c1_594 = arith.constant 1 : index
    %c0_595 = arith.constant 0 : index
    %495 = vector.load %arg12[%c1_593, %c1_594, %c0_595] : memref<10x10x8xf32, #tpu.memory_space<vmem>>, vector<8x8x8xf32>
    %496 = vector.shape_cast %495 : vector<8x8x8xf32> to vector<64x8xf32>
    %c4_596 = arith.constant 4 : index
    %c0_597 = arith.constant 0 : index
    %c0_598 = arith.constant 0 : index
    %497 = vector.load %arg4[%c4_596, %c0_597, %c0_598] : memref<9x8x16xf32, #tpu.memory_space<vmem>>, vector<1x8x16xf32>
    %498 = vector.shape_cast %497 : vector<1x8x16xf32> to vector<8x16xf32>
    %cst_599 = arith.constant dense<0.000000e+00> : vector<64x16xf32>
    %499 = tpu.matmul %496, %498, %cst_599 {dimension_numbers = #tpu.dot_dimension_numbers<[1], [0], [0], [1], [0, 0, 1, 1], [], []>} : vector<64x8xf32>, vector<8x16xf32>, vector<64x16xf32> -> vector<64x16xf32>
    %500 = arith.addf %494, %499 : vector<64x16xf32>
    %c1_600 = arith.constant 1 : index
    %c2_601 = arith.constant 2 : index
    %c0_602 = arith.constant 0 : index
    %501 = vector.load %arg12[%c1_600, %c2_601, %c0_602] : memref<10x10x8xf32, #tpu.memory_space<vmem>>, vector<8x8x8xf32>
    %502 = vector.shape_cast %501 : vector<8x8x8xf32> to vector<64x8xf32>
    %c5_603 = arith.constant 5 : index
    %c0_604 = arith.constant 0 : index
    %c0_605 = arith.constant 0 : index
    %503 = vector.load %arg4[%c5_603, %c0_604, %c0_605] : memref<9x8x16xf32, #tpu.memory_space<vmem>>, vector<1x8x16xf32>
    %504 = vector.shape_cast %503 : vector<1x8x16xf32> to vector<8x16xf32>
    %cst_606 = arith.constant dense<0.000000e+00> : vector<64x16xf32>
    %505 = tpu.matmul %502, %504, %cst_606 {dimension_numbers = #tpu.dot_dimension_numbers<[1], [0], [0], [1], [0, 0, 1, 1], [], []>} : vector<64x8xf32>, vector<8x16xf32>, vector<64x16xf32> -> vector<64x16xf32>
    %506 = arith.addf %500, %505 : vector<64x16xf32>
    %c2_607 = arith.constant 2 : index
    %c0_608 = arith.constant 0 : index
    %c0_609 = arith.constant 0 : index
    %507 = vector.load %arg12[%c2_607, %c0_608, %c0_609] : memref<10x10x8xf32, #tpu.memory_space<vmem>>, vector<8x8x8xf32>
    %508 = vector.shape_cast %507 : vector<8x8x8xf32> to vector<64x8xf32>
    %c6_610 = arith.constant 6 : index
    %c0_611 = arith.constant 0 : index
    %c0_612 = arith.constant 0 : index
    %509 = vector.load %arg4[%c6_610, %c0_611, %c0_612] : memref<9x8x16xf32, #tpu.memory_space<vmem>>, vector<1x8x16xf32>
    %510 = vector.shape_cast %509 : vector<1x8x16xf32> to vector<8x16xf32>
    %cst_613 = arith.constant dense<0.000000e+00> : vector<64x16xf32>
    %511 = tpu.matmul %508, %510, %cst_613 {dimension_numbers = #tpu.dot_dimension_numbers<[1], [0], [0], [1], [0, 0, 1, 1], [], []>} : vector<64x8xf32>, vector<8x16xf32>, vector<64x16xf32> -> vector<64x16xf32>
    %512 = arith.addf %506, %511 : vector<64x16xf32>
    %c2_614 = arith.constant 2 : index
    %c1_615 = arith.constant 1 : index
    %c0_616 = arith.constant 0 : index
    %513 = vector.load %arg12[%c2_614, %c1_615, %c0_616] : memref<10x10x8xf32, #tpu.memory_space<vmem>>, vector<8x8x8xf32>
    %514 = vector.shape_cast %513 : vector<8x8x8xf32> to vector<64x8xf32>
    %c7_617 = arith.constant 7 : index
    %c0_618 = arith.constant 0 : index
    %c0_619 = arith.constant 0 : index
    %515 = vector.load %arg4[%c7_617, %c0_618, %c0_619] : memref<9x8x16xf32, #tpu.memory_space<vmem>>, vector<1x8x16xf32>
    %516 = vector.shape_cast %515 : vector<1x8x16xf32> to vector<8x16xf32>
    %cst_620 = arith.constant dense<0.000000e+00> : vector<64x16xf32>
    %517 = tpu.matmul %514, %516, %cst_620 {dimension_numbers = #tpu.dot_dimension_numbers<[1], [0], [0], [1], [0, 0, 1, 1], [], []>} : vector<64x8xf32>, vector<8x16xf32>, vector<64x16xf32> -> vector<64x16xf32>
    %518 = arith.addf %512, %517 : vector<64x16xf32>
    %c2_621 = arith.constant 2 : index
    %c2_622 = arith.constant 2 : index
    %c0_623 = arith.constant 0 : index
    %519 = vector.load %arg12[%c2_621, %c2_622, %c0_623] : memref<10x10x8xf32, #tpu.memory_space<vmem>>, vector<8x8x8xf32>
    %520 = vector.shape_cast %519 : vector<8x8x8xf32> to vector<64x8xf32>
    %c8_624 = arith.constant 8 : index
    %c0_625 = arith.constant 0 : index
    %c0_626 = arith.constant 0 : index
    %521 = vector.load %arg4[%c8_624, %c0_625, %c0_626] : memref<9x8x16xf32, #tpu.memory_space<vmem>>, vector<1x8x16xf32>
    %522 = vector.shape_cast %521 : vector<1x8x16xf32> to vector<8x16xf32>
    %cst_627 = arith.constant dense<0.000000e+00> : vector<64x16xf32>
    %523 = tpu.matmul %520, %522, %cst_627 {dimension_numbers = #tpu.dot_dimension_numbers<[1], [0], [0], [1], [0, 0, 1, 1], [], []>} : vector<64x8xf32>, vector<8x16xf32>, vector<64x16xf32> -> vector<64x16xf32>
    %524 = arith.addf %518, %523 : vector<64x16xf32>
    %c0_628 = arith.constant 0 : index
    %c0_629 = arith.constant 0 : index
    %525 = vector.load %arg5[%c0_628, %c0_629] : memref<1x16xf32, #tpu.memory_space<vmem>>, vector<1x16xf32>
    %526 = vector.broadcast %525 : vector<1x16xf32> to vector<64x16xf32>
    %527 = arith.addf %524, %526 : vector<64x16xf32>
    %cst_630 = arith.constant 0.000000e+00 : f32
    %528 = vector.broadcast %cst_630 : f32 to vector<64x16xf32>
    %529 = arith.maximumf %527, %528 : vector<64x16xf32>
    %530 = vector.shape_cast %529 : vector<64x16xf32> to vector<8x8x16xf32>
    %c0_631 = arith.constant 0 : index
    %c0_632 = arith.constant 0 : index
    %c0_633 = arith.constant 0 : index
    %531 = vector.load %arg16[%c0_631, %c0_632, %c0_633] : memref<8x8x16xf32, #tpu.memory_space<vmem>>, vector<8x8x16xf32>
    tpu.vector_store %arg16[%c0_631, %c0_632, %c0_633], %530 {strides = array<i32>} : memref<8x8x16xf32, #tpu.memory_space<vmem>>, vector<8x8x16xf32>,
    %c0_634 = arith.constant 0 : index
    %c0_635 = arith.constant 0 : index
    %c0_636 = arith.constant 0 : index
    %532 = tpu.strided_load %arg16[%c0_634, %c0_635, %c0_636] {strides = array<i32: 1, 2, 1>} : memref<8x8x16xf32, #tpu.memory_space<vmem>>, vector<8x4x16xf32>
    %c0_637 = arith.constant 0 : index
    %c1_638 = arith.constant 1 : index
    %c0_639 = arith.constant 0 : index
    %533 = tpu.strided_load %arg16[%c0_637, %c1_638, %c0_639] {strides = array<i32: 1, 2, 1>} : memref<8x8x16xf32, #tpu.memory_space<vmem>>, vector<8x4x16xf32>
    %534 = arith.maximumf %532, %533 : vector<8x4x16xf32>
    %535 = vector.shape_cast %534 : vector<8x4x16xf32> to vector<4x2x4x16xf32>
    %cst_640 = arith.constant dense<0xFF800000> : vector<4x4x16xf32>
    %536 = vector.multi_reduction <maximumf>, %535, %cst_640 [1] : vector<4x2x4x16xf32> to vector<4x4x16xf32>
    %c1_641 = arith.constant 1 : index
    %c1_642 = arith.constant 1 : index
    %c0_643 = arith.constant 0 : index
    %537 = vector.load %arg13[%c1_641, %c1_642, %c0_643] : memref<6x6x16xf32, #tpu.memory_space<vmem>>, vector<4x4x16xf32>
    tpu.vector_store %arg13[%c1_641, %c1_642, %c0_643], %536 {strides = array<i32>} : memref<6x6x16xf32, #tpu.memory_space<vmem>>, vector<4x4x16xf32>,
    %cst_644 = arith.constant 0.000000e+00 : f32
    %538 = vector.broadcast %cst_644 : f32 to vector<16x16xf32>
    %c0_645 = arith.constant 0 : index
    %c0_646 = arith.constant 0 : index
    %c0_647 = arith.constant 0 : index
    %539 = vector.load %arg13[%c0_645, %c0_646, %c0_647] : memref<6x6x16xf32, #tpu.memory_space<vmem>>, vector<4x4x16xf32>
    %540 = vector.shape_cast %539 : vector<4x4x16xf32> to vector<16x16xf32>
    %c0_648 = arith.constant 0 : index
    %c0_649 = arith.constant 0 : index
    %c0_650 = arith.constant 0 : index
    %541 = vector.load %arg6[%c0_648, %c0_649, %c0_650] : memref<9x16x16xf32, #tpu.memory_space<vmem>>, vector<1x16x16xf32>
    %542 = vector.shape_cast %541 : vector<1x16x16xf32> to vector<16x16xf32>
    %cst_651 = arith.constant dense<0.000000e+00> : vector<16x16xf32>
    %543 = tpu.matmul %540, %542, %cst_651 {dimension_numbers = #tpu.dot_dimension_numbers<[1], [0], [0], [1], [0, 0, 1, 1], [], []>} : vector<16x16xf32>, vector<16x16xf32>, vector<16x16xf32> -> vector<16x16xf32>
    %544 = arith.addf %538, %543 : vector<16x16xf32>
    %c0_652 = arith.constant 0 : index
    %c1_653 = arith.constant 1 : index
    %c0_654 = arith.constant 0 : index
    %545 = vector.load %arg13[%c0_652, %c1_653, %c0_654] : memref<6x6x16xf32, #tpu.memory_space<vmem>>, vector<4x4x16xf32>
    %546 = vector.shape_cast %545 : vector<4x4x16xf32> to vector<16x16xf32>
    %c1_655 = arith.constant 1 : index
    %c0_656 = arith.constant 0 : index
    %c0_657 = arith.constant 0 : index
    %547 = vector.load %arg6[%c1_655, %c0_656, %c0_657] : memref<9x16x16xf32, #tpu.memory_space<vmem>>, vector<1x16x16xf32>
    %548 = vector.shape_cast %547 : vector<1x16x16xf32> to vector<16x16xf32>
    %cst_658 = arith.constant dense<0.000000e+00> : vector<16x16xf32>
    %549 = tpu.matmul %546, %548, %cst_658 {dimension_numbers = #tpu.dot_dimension_numbers<[1], [0], [0], [1], [0, 0, 1, 1], [], []>} : vector<16x16xf32>, vector<16x16xf32>, vector<16x16xf32> -> vector<16x16xf32>
    %550 = arith.addf %544, %549 : vector<16x16xf32>
    %c0_659 = arith.constant 0 : index
    %c2_660 = arith.constant 2 : index
    %c0_661 = arith.constant 0 : index
    %551 = vector.load %arg13[%c0_659, %c2_660, %c0_661] : memref<6x6x16xf32, #tpu.memory_space<vmem>>, vector<4x4x16xf32>
    %552 = vector.shape_cast %551 : vector<4x4x16xf32> to vector<16x16xf32>
    %c2_662 = arith.constant 2 : index
    %c0_663 = arith.constant 0 : index
    %c0_664 = arith.constant 0 : index
    %553 = vector.load %arg6[%c2_662, %c0_663, %c0_664] : memref<9x16x16xf32, #tpu.memory_space<vmem>>, vector<1x16x16xf32>
    %554 = vector.shape_cast %553 : vector<1x16x16xf32> to vector<16x16xf32>
    %cst_665 = arith.constant dense<0.000000e+00> : vector<16x16xf32>
    %555 = tpu.matmul %552, %554, %cst_665 {dimension_numbers = #tpu.dot_dimension_numbers<[1], [0], [0], [1], [0, 0, 1, 1], [], []>} : vector<16x16xf32>, vector<16x16xf32>, vector<16x16xf32> -> vector<16x16xf32>
    %556 = arith.addf %550, %555 : vector<16x16xf32>
    %c1_666 = arith.constant 1 : index
    %c0_667 = arith.constant 0 : index
    %c0_668 = arith.constant 0 : index
    %557 = vector.load %arg13[%c1_666, %c0_667, %c0_668] : memref<6x6x16xf32, #tpu.memory_space<vmem>>, vector<4x4x16xf32>
    %558 = vector.shape_cast %557 : vector<4x4x16xf32> to vector<16x16xf32>
    %c3_669 = arith.constant 3 : index
    %c0_670 = arith.constant 0 : index
    %c0_671 = arith.constant 0 : index
    %559 = vector.load %arg6[%c3_669, %c0_670, %c0_671] : memref<9x16x16xf32, #tpu.memory_space<vmem>>, vector<1x16x16xf32>
    %560 = vector.shape_cast %559 : vector<1x16x16xf32> to vector<16x16xf32>
    %cst_672 = arith.constant dense<0.000000e+00> : vector<16x16xf32>
    %561 = tpu.matmul %558, %560, %cst_672 {dimension_numbers = #tpu.dot_dimension_numbers<[1], [0], [0], [1], [0, 0, 1, 1], [], []>} : vector<16x16xf32>, vector<16x16xf32>, vector<16x16xf32> -> vector<16x16xf32>
    %562 = arith.addf %556, %561 : vector<16x16xf32>
    %c1_673 = arith.constant 1 : index
    %c1_674 = arith.constant 1 : index
    %c0_675 = arith.constant 0 : index
    %563 = vector.load %arg13[%c1_673, %c1_674, %c0_675] : memref<6x6x16xf32, #tpu.memory_space<vmem>>, vector<4x4x16xf32>
    %564 = vector.shape_cast %563 : vector<4x4x16xf32> to vector<16x16xf32>
    %c4_676 = arith.constant 4 : index
    %c0_677 = arith.constant 0 : index
    %c0_678 = arith.constant 0 : index
    %565 = vector.load %arg6[%c4_676, %c0_677, %c0_678] : memref<9x16x16xf32, #tpu.memory_space<vmem>>, vector<1x16x16xf32>
    %566 = vector.shape_cast %565 : vector<1x16x16xf32> to vector<16x16xf32>
    %cst_679 = arith.constant dense<0.000000e+00> : vector<16x16xf32>
    %567 = tpu.matmul %564, %566, %cst_679 {dimension_numbers = #tpu.dot_dimension_numbers<[1], [0], [0], [1], [0, 0, 1, 1], [], []>} : vector<16x16xf32>, vector<16x16xf32>, vector<16x16xf32> -> vector<16x16xf32>
    %568 = arith.addf %562, %567 : vector<16x16xf32>
    %c1_680 = arith.constant 1 : index
    %c2_681 = arith.constant 2 : index
    %c0_682 = arith.constant 0 : index
    %569 = vector.load %arg13[%c1_680, %c2_681, %c0_682] : memref<6x6x16xf32, #tpu.memory_space<vmem>>, vector<4x4x16xf32>
    %570 = vector.shape_cast %569 : vector<4x4x16xf32> to vector<16x16xf32>
    %c5_683 = arith.constant 5 : index
    %c0_684 = arith.constant 0 : index
    %c0_685 = arith.constant 0 : index
    %571 = vector.load %arg6[%c5_683, %c0_684, %c0_685] : memref<9x16x16xf32, #tpu.memory_space<vmem>>, vector<1x16x16xf32>
    %572 = vector.shape_cast %571 : vector<1x16x16xf32> to vector<16x16xf32>
    %cst_686 = arith.constant dense<0.000000e+00> : vector<16x16xf32>
    %573 = tpu.matmul %570, %572, %cst_686 {dimension_numbers = #tpu.dot_dimension_numbers<[1], [0], [0], [1], [0, 0, 1, 1], [], []>} : vector<16x16xf32>, vector<16x16xf32>, vector<16x16xf32> -> vector<16x16xf32>
    %574 = arith.addf %568, %573 : vector<16x16xf32>
    %c2_687 = arith.constant 2 : index
    %c0_688 = arith.constant 0 : index
    %c0_689 = arith.constant 0 : index
    %575 = vector.load %arg13[%c2_687, %c0_688, %c0_689] : memref<6x6x16xf32, #tpu.memory_space<vmem>>, vector<4x4x16xf32>
    %576 = vector.shape_cast %575 : vector<4x4x16xf32> to vector<16x16xf32>
    %c6_690 = arith.constant 6 : index
    %c0_691 = arith.constant 0 : index
    %c0_692 = arith.constant 0 : index
    %577 = vector.load %arg6[%c6_690, %c0_691, %c0_692] : memref<9x16x16xf32, #tpu.memory_space<vmem>>, vector<1x16x16xf32>
    %578 = vector.shape_cast %577 : vector<1x16x16xf32> to vector<16x16xf32>
    %cst_693 = arith.constant dense<0.000000e+00> : vector<16x16xf32>
    %579 = tpu.matmul %576, %578, %cst_693 {dimension_numbers = #tpu.dot_dimension_numbers<[1], [0], [0], [1], [0, 0, 1, 1], [], []>} : vector<16x16xf32>, vector<16x16xf32>, vector<16x16xf32> -> vector<16x16xf32>
    %580 = arith.addf %574, %579 : vector<16x16xf32>
    %c2_694 = arith.constant 2 : index
    %c1_695 = arith.constant 1 : index
    %c0_696 = arith.constant 0 : index
    %581 = vector.load %arg13[%c2_694, %c1_695, %c0_696] : memref<6x6x16xf32, #tpu.memory_space<vmem>>, vector<4x4x16xf32>
    %582 = vector.shape_cast %581 : vector<4x4x16xf32> to vector<16x16xf32>
    %c7_697 = arith.constant 7 : index
    %c0_698 = arith.constant 0 : index
    %c0_699 = arith.constant 0 : index
    %583 = vector.load %arg6[%c7_697, %c0_698, %c0_699] : memref<9x16x16xf32, #tpu.memory_space<vmem>>, vector<1x16x16xf32>
    %584 = vector.shape_cast %583 : vector<1x16x16xf32> to vector<16x16xf32>
    %cst_700 = arith.constant dense<0.000000e+00> : vector<16x16xf32>
    %585 = tpu.matmul %582, %584, %cst_700 {dimension_numbers = #tpu.dot_dimension_numbers<[1], [0], [0], [1], [0, 0, 1, 1], [], []>} : vector<16x16xf32>, vector<16x16xf32>, vector<16x16xf32> -> vector<16x16xf32>
    %586 = arith.addf %580, %585 : vector<16x16xf32>
    %c2_701 = arith.constant 2 : index
    %c2_702 = arith.constant 2 : index
    %c0_703 = arith.constant 0 : index
    %587 = vector.load %arg13[%c2_701, %c2_702, %c0_703] : memref<6x6x16xf32, #tpu.memory_space<vmem>>, vector<4x4x16xf32>
    %588 = vector.shape_cast %587 : vector<4x4x16xf32> to vector<16x16xf32>
    %c8_704 = arith.constant 8 : index
    %c0_705 = arith.constant 0 : index
    %c0_706 = arith.constant 0 : index
    %589 = vector.load %arg6[%c8_704, %c0_705, %c0_706] : memref<9x16x16xf32, #tpu.memory_space<vmem>>, vector<1x16x16xf32>
    %590 = vector.shape_cast %589 : vector<1x16x16xf32> to vector<16x16xf32>
    %cst_707 = arith.constant dense<0.000000e+00> : vector<16x16xf32>
    %591 = tpu.matmul %588, %590, %cst_707 {dimension_numbers = #tpu.dot_dimension_numbers<[1], [0], [0], [1], [0, 0, 1, 1], [], []>} : vector<16x16xf32>, vector<16x16xf32>, vector<16x16xf32> -> vector<16x16xf32>
    %592 = arith.addf %586, %591 : vector<16x16xf32>
    %c0_708 = arith.constant 0 : index
    %c0_709 = arith.constant 0 : index
    %593 = vector.load %arg7[%c0_708, %c0_709] : memref<1x16xf32, #tpu.memory_space<vmem>>, vector<1x16xf32>
    %594 = vector.broadcast %593 : vector<1x16xf32> to vector<16x16xf32>
    %595 = arith.addf %592, %594 : vector<16x16xf32>
    %cst_710 = arith.constant 0.000000e+00 : f32
    %596 = vector.broadcast %cst_710 : f32 to vector<16x16xf32>
    %597 = arith.maximumf %595, %596 : vector<16x16xf32>
    %598 = vector.shape_cast %597 : vector<16x16xf32> to vector<4x4x16xf32>
    %c0_711 = arith.constant 0 : index
    %c0_712 = arith.constant 0 : index
    %c0_713 = arith.constant 0 : index
    %599 = vector.load %arg17[%c0_711, %c0_712, %c0_713] : memref<4x4x16xf32, #tpu.memory_space<vmem>>, vector<4x4x16xf32>
    tpu.vector_store %arg17[%c0_711, %c0_712, %c0_713], %598 {strides = array<i32>} : memref<4x4x16xf32, #tpu.memory_space<vmem>>, vector<4x4x16xf32>,
    %c0_714 = arith.constant 0 : index
    %c0_715 = arith.constant 0 : index
    %c0_716 = arith.constant 0 : index
    %600 = tpu.strided_load %arg17[%c0_714, %c0_715, %c0_716] {strides = array<i32: 1, 2, 1>} : memref<4x4x16xf32, #tpu.memory_space<vmem>>, vector<4x2x16xf32>
    %c0_717 = arith.constant 0 : index
    %c1_718 = arith.constant 1 : index
    %c0_719 = arith.constant 0 : index
    %601 = tpu.strided_load %arg17[%c0_717, %c1_718, %c0_719] {strides = array<i32: 1, 2, 1>} : memref<4x4x16xf32, #tpu.memory_space<vmem>>, vector<4x2x16xf32>
    %602 = arith.maximumf %600, %601 : vector<4x2x16xf32>
    %603 = vector.shape_cast %602 : vector<4x2x16xf32> to vector<2x2x2x16xf32>
    %cst_720 = arith.constant dense<0xFF800000> : vector<2x2x16xf32>
    %604 = vector.multi_reduction <maximumf>, %603, %cst_720 [1] : vector<2x2x2x16xf32> to vector<2x2x16xf32>
    %c1_721 = arith.constant 1 : index
    %c1_722 = arith.constant 1 : index
    %c0_723 = arith.constant 0 : index
    %605 = vector.load %arg14[%c1_721, %c1_722, %c0_723] : memref<4x4x16xf32, #tpu.memory_space<vmem>>, vector<2x2x16xf32>
    tpu.vector_store %arg14[%c1_721, %c1_722, %c0_723], %604 {strides = array<i32>} : memref<4x4x16xf32, #tpu.memory_space<vmem>>, vector<2x2x16xf32>,
    %cst_724 = arith.constant 0.000000e+00 : f32
    %606 = vector.broadcast %cst_724 : f32 to vector<1x32xf32>
    %c1_725 = arith.constant 1 : index
    %c1_726 = arith.constant 1 : index
    %c0_727 = arith.constant 0 : index
    %607 = vector.load %arg14[%c1_725, %c1_726, %c0_727] : memref<4x4x16xf32, #tpu.memory_space<vmem>>, vector<1x1x16xf32>
    %608 = vector.shape_cast %607 : vector<1x1x16xf32> to vector<1x16xf32>
    %c0_728 = arith.constant 0 : index
    %c0_729 = arith.constant 0 : index
    %c0_730 = arith.constant 0 : index
    %609 = vector.load %arg8[%c0_728, %c0_729, %c0_730] : memref<4x16x32xf32, #tpu.memory_space<vmem>>, vector<1x16x32xf32>
    %610 = vector.shape_cast %609 : vector<1x16x32xf32> to vector<16x32xf32>
    %cst_731 = arith.constant dense<0.000000e+00> : vector<1x32xf32>
    %611 = tpu.matmul %608, %610, %cst_731 {dimension_numbers = #tpu.dot_dimension_numbers<[1], [0], [0], [1], [0, 0, 1, 1], [], []>} : vector<1x16xf32>, vector<16x32xf32>, vector<1x32xf32> -> vector<1x32xf32>
    %612 = arith.addf %606, %611 : vector<1x32xf32>
    %c1_732 = arith.constant 1 : index
    %c2_733 = arith.constant 2 : index
    %c0_734 = arith.constant 0 : index
    %613 = vector.load %arg14[%c1_732, %c2_733, %c0_734] : memref<4x4x16xf32, #tpu.memory_space<vmem>>, vector<1x1x16xf32>
    %614 = vector.shape_cast %613 : vector<1x1x16xf32> to vector<1x16xf32>
    %c1_735 = arith.constant 1 : index
    %c0_736 = arith.constant 0 : index
    %c0_737 = arith.constant 0 : index
    %615 = vector.load %arg8[%c1_735, %c0_736, %c0_737] : memref<4x16x32xf32, #tpu.memory_space<vmem>>, vector<1x16x32xf32>
    %616 = vector.shape_cast %615 : vector<1x16x32xf32> to vector<16x32xf32>
    %cst_738 = arith.constant dense<0.000000e+00> : vector<1x32xf32>
    %617 = tpu.matmul %614, %616, %cst_738 {dimension_numbers = #tpu.dot_dimension_numbers<[1], [0], [0], [1], [0, 0, 1, 1], [], []>} : vector<1x16xf32>, vector<16x32xf32>, vector<1x32xf32> -> vector<1x32xf32>
    %618 = arith.addf %612, %617 : vector<1x32xf32>
    %c2_739 = arith.constant 2 : index
    %c1_740 = arith.constant 1 : index
    %c0_741 = arith.constant 0 : index
    %619 = vector.load %arg14[%c2_739, %c1_740, %c0_741] : memref<4x4x16xf32, #tpu.memory_space<vmem>>, vector<1x1x16xf32>
    %620 = vector.shape_cast %619 : vector<1x1x16xf32> to vector<1x16xf32>
    %c2_742 = arith.constant 2 : index
    %c0_743 = arith.constant 0 : index
    %c0_744 = arith.constant 0 : index
    %621 = vector.load %arg8[%c2_742, %c0_743, %c0_744] : memref<4x16x32xf32, #tpu.memory_space<vmem>>, vector<1x16x32xf32>
    %622 = vector.shape_cast %621 : vector<1x16x32xf32> to vector<16x32xf32>
    %cst_745 = arith.constant dense<0.000000e+00> : vector<1x32xf32>
    %623 = tpu.matmul %620, %622, %cst_745 {dimension_numbers = #tpu.dot_dimension_numbers<[1], [0], [0], [1], [0, 0, 1, 1], [], []>} : vector<1x16xf32>, vector<16x32xf32>, vector<1x32xf32> -> vector<1x32xf32>
    %624 = arith.addf %618, %623 : vector<1x32xf32>
    %c2_746 = arith.constant 2 : index
    %c2_747 = arith.constant 2 : index
    %c0_748 = arith.constant 0 : index
    %625 = vector.load %arg14[%c2_746, %c2_747, %c0_748] : memref<4x4x16xf32, #tpu.memory_space<vmem>>, vector<1x1x16xf32>
    %626 = vector.shape_cast %625 : vector<1x1x16xf32> to vector<1x16xf32>
    %c3_749 = arith.constant 3 : index
    %c0_750 = arith.constant 0 : index
    %c0_751 = arith.constant 0 : index
    %627 = vector.load %arg8[%c3_749, %c0_750, %c0_751] : memref<4x16x32xf32, #tpu.memory_space<vmem>>, vector<1x16x32xf32>
    %628 = vector.shape_cast %627 : vector<1x16x32xf32> to vector<16x32xf32>
    %cst_752 = arith.constant dense<0.000000e+00> : vector<1x32xf32>
    %629 = tpu.matmul %626, %628, %cst_752 {dimension_numbers = #tpu.dot_dimension_numbers<[1], [0], [0], [1], [0, 0, 1, 1], [], []>} : vector<1x16xf32>, vector<16x32xf32>, vector<1x32xf32> -> vector<1x32xf32>
    %630 = arith.addf %624, %629 : vector<1x32xf32>
    %c0_753 = arith.constant 0 : index
    %c0_754 = arith.constant 0 : index
    %631 = vector.load %arg9[%c0_753, %c0_754] : memref<1x32xf32, #tpu.memory_space<vmem>>, vector<1x32xf32>
    %632 = arith.addf %630, %631 : vector<1x32xf32>
    %cst_755 = arith.constant 0.000000e+00 : f32
    %633 = vector.broadcast %cst_755 : f32 to vector<1x32xf32>
    %634 = arith.maximumf %632, %633 : vector<1x32xf32>
    %c0_756 = arith.constant 0 : index
    %c1_757 = arith.constant 1 : index
    %c0_758 = arith.constant 0 : index
    %635 = vector.load %arg10[%c0_756, %c1_757, %c0_758] : memref<1x2x32xf32, #tpu.memory_space<vmem>>, vector<1x1x32xf32>
    %636 = vector.shape_cast %635 : vector<1x1x32xf32> to vector<1x32xf32>
    %637 = vector.shape_cast %634 : vector<1x32xf32> to vector<1x1x32xf32>
    tpu.vector_store %arg10[%c0_756, %c1_757, %c0_758], %637 {strides = array<i32>} : memref<1x2x32xf32, #tpu.memory_space<vmem>>, vector<1x1x32xf32>,
    return
  }
  func.func @transform_0(%arg0: i32) -> (i32, i32, i32, i32) {
    %c0_i32 = arith.constant 0 : i32
    %c0_i32_0 = arith.constant 0 : i32
    %c0_i32_1 = arith.constant 0 : i32
    %c0_i32_2 = arith.constant 0 : i32
    return %arg0, %c0_i32, %c0_i32_0, %c0_i32_1 : i32, i32, i32, i32
  }
  func.func @transform_1(%arg0: i32) -> (i32, i32, i32) {
    %c0_i32 = arith.constant 0 : i32
    %c0_i32_0 = arith.constant 0 : i32
    %c0_i32_1 = arith.constant 0 : i32
    %c0_i32_2 = arith.constant 0 : i32
    return %c0_i32, %c0_i32_0, %c0_i32_1 : i32, i32, i32
  }
  func.func @transform_2(%arg0: i32) -> (i32, i32) {
    %c0_i32 = arith.constant 0 : i32
    %c0_i32_0 = arith.constant 0 : i32
    %c0_i32_1 = arith.constant 0 : i32
    return %c0_i32, %c0_i32_0 : i32, i32
  }
  func.func @transform_3(%arg0: i32) -> (i32, i32, i32) {
    %c0_i32 = arith.constant 0 : i32
    %c0_i32_0 = arith.constant 0 : i32
    %c0_i32_1 = arith.constant 0 : i32
    %c0_i32_2 = arith.constant 0 : i32
    return %c0_i32, %c0_i32_0, %c0_i32_1 : i32, i32, i32
  }
  func.func @transform_4(%arg0: i32) -> (i32, i32) {
    %c0_i32 = arith.constant 0 : i32
    %c0_i32_0 = arith.constant 0 : i32
    %c0_i32_1 = arith.constant 0 : i32
    return %c0_i32, %c0_i32_0 : i32, i32
  }
  func.func @transform_5(%arg0: i32) -> (i32, i32, i32) {
    %c0_i32 = arith.constant 0 : i32
    %c0_i32_0 = arith.constant 0 : i32
    %c0_i32_1 = arith.constant 0 : i32
    %c0_i32_2 = arith.constant 0 : i32
    return %c0_i32, %c0_i32_0, %c0_i32_1 : i32, i32, i32
  }
  func.func @transform_6(%arg0: i32) -> (i32, i32) {
    %c0_i32 = arith.constant 0 : i32
    %c0_i32_0 = arith.constant 0 : i32
    %c0_i32_1 = arith.constant 0 : i32
    return %c0_i32, %c0_i32_0 : i32, i32
  }
  func.func @transform_7(%arg0: i32) -> (i32, i32, i32) {
    %c0_i32 = arith.constant 0 : i32
    %c0_i32_0 = arith.constant 0 : i32
    %c0_i32_1 = arith.constant 0 : i32
    %c0_i32_2 = arith.constant 0 : i32
    return %c0_i32, %c0_i32_0, %c0_i32_1 : i32, i32, i32
  }
  func.func @transform_8(%arg0: i32) -> (i32, i32) {
    %c0_i32 = arith.constant 0 : i32
    %c0_i32_0 = arith.constant 0 : i32
    %c0_i32_1 = arith.constant 0 : i32
    return %c0_i32, %c0_i32_0 : i32, i32
  }
  func.func @transform_9(%arg0: i32) -> (i32, i32, i32) {
    %c0_i32 = arith.constant 0 : i32
    %c0_i32_0 = arith.constant 0 : i32
    %c0_i32_1 = arith.constant 0 : i32
    return %arg0, %c0_i32, %c0_i32_0 : i32, i32, i32
  }
}

</mosaic_0001>

<bundles_post_ra>
// kernel: forward.1
= control target key start
LH: loop header
LB: loop body
LE: loop exit
PB: predicated region body
PF: predicated region fallthrough
CT: control target
= control target key end

     0   :  { %vm272_vm0 = vcmask 1042432   ;;  %vm33_vm1 = vcmask 23552   ;;  %vm36_vm2 = vcmask 17408   ;;  %v21046_v5 = vmov 0.0   ;;  %s21036_s0 = inlined_call_operand.vmem [shape: f32[2,16,16,3], index: 0, kind: input, shape index: {}]   ;;  %s21037_s1 = inlined_call_operand.vmem [shape: f32[9,3,8], index: 1, kind: input, shape index: {}]   ;;  %s21038_s2 = inlined_call_operand.vmem [shape: f32[1,8], index: 2, kind: input, shape index: {}]   ;;  %s21039_s3 = inlined_call_operand.vmem [shape: f32[9,8,16], index: 3, kind: input, shape index: {}]   ;;  %s21040_s4 = inlined_call_operand.vmem [shape: f32[1,16], index: 4, kind: input, shape index: {}]   ;;  %s21041_s5 = inlined_call_operand.vmem [shape: f32[9,16,16], index: 5, kind: input, shape index: {}]   ;;  %s21042_s6 = inlined_call_operand.vmem [shape: f32[1,16], index: 6, kind: input, shape index: {}]   ;;  %s21043_s7 = inlined_call_operand.vmem [shape: f32[4,16,32], index: 7, kind: input, shape index: {}]   ;;  %s21044_s8 = inlined_call_operand.vmem [shape: f32[1,32], index: 8, kind: input, shape index: {}]   ;;  %s21045_s9 = inlined_call_operand.hbm [shape: f32[1,2,32], index: 9, kind: output, shape index: {}]  }
   0x1   :  { %v13950_v0 = vld [vmem:[%s21037_s1 + $0x4] sm:$0x7]  ;;  %v18021_v2 = vld [vmem:[%s21037_s1] sm:$0x7]  ;;  %v138_v3 = vld [vmem:[%s21036_s0 + $0x70] sm:$0xff]  ;;  %34 = vst.msk [vmem:[#allocation2] sm:$0xff] %vm33_vm1, %v21046_v5 }
   0x2   :  { %v14112_v1 = vld [vmem:[%s21037_s1 + $0x4] sm:$0x7]  ;;  %15752 = vmatprep.subr.msk.mxu0 %vm272_vm0, %v13950_v0  ;;  %v139_v4 = vld [vmem:[%s21036_s0 + $0x78] sm:$0xff]  ;;  %35 = vst.msk [vmem:[#allocation2 + $0x8] sm:$0xff] %vm33_vm1, %v21046_v5  ;;  %39 = vst.msk [vmem:[#allocation2 + $0x198] sm:$0xff] %vm33_vm1, %v21046_v5  ;;  %vm42_vm3 = vcmask 16384  }
   0x3   :  { %15986 = vmatprep.subr.msk.mxu1 %vm272_vm0, %v14112_v1  ;;  %15753 = vmatpush3.msk.msra.mxu0 %vm272_vm0, %v13950_v0  ;;  %40 = vst.msk [vmem:[#allocation2 + $0x1a0] sm:$0xff] %vm33_vm1, %v21046_v5  ;;  %171 = vst.msk [vmem:[#allocation2 + $0xc1] sm:$0xff] %vm33_vm1, %v138_v3  ;;  %v124_v6 = vld [vmem:[%s21036_s0] sm:$0xff]  ;;  %v125_v8 = vld [vmem:[%s21036_s0 + $0x8] sm:$0xff] }
   0x4   :  { %15987 = vmatpush3.msk.msra.mxu1 %vm272_vm0, %v14112_v1  ;;  %37 = vst.msk [vmem:[#allocation2 + $0x10] sm:$0x3] %vm36_vm2, %v21046_v5  ;;  %41 = vst.msk [vmem:[#allocation2 + $0x1a8] sm:$0x3] %vm36_vm2, %v21046_v5  ;;  %v140_v7 = vld [vmem:[%s21036_s0 + $0x80] sm:$0xff]  ;;  %15778 = vmatprep.subr.msk.mxu0 %vm272_vm0, %v18021_v2  ;;  %v141_v9 = vld [vmem:[%s21036_s0 + $0x88] sm:$0xff] }
   0x5   :  { %172 = vst.msk [vmem:[#allocation2 + $0xc9] sm:$0xff] %vm33_vm1, %v139_v4  ;;  %157 = vst.msk [vmem:[#allocation2 + $0x19] sm:$0xff] %vm33_vm1, %v124_v6  ;;  %v126_v10 = vld [vmem:[%s21036_s0 + $0x10] sm:$0xff]  ;;  %v127_v12 = vld [vmem:[%s21036_s0 + $0x18] sm:$0xff] }
   0x6   :  { %173 = vst.msk [vmem:[#allocation2 + $0xd9] sm:$0xff] %vm33_vm1, %v140_v7  ;;  %158 = vst.msk [vmem:[#allocation2 + $0x21] sm:$0xff] %vm33_vm1, %v125_v8  ;;  %v142_v11 = vld [vmem:[%s21036_s0 + $0x90] sm:$0xff]  ;;  %v143_v13 = vld [vmem:[%s21036_s0 + $0x98] sm:$0xff] }
   0x7   :  { %43 = vst.msk [vmem:[#allocation2] sm:$0x1] %vm42_vm3, %v21046_v5  ;;  %44 = vst.msk [vmem:[#allocation2 + $0x18] sm:$0x1] %vm42_vm3, %v21046_v5  ;;  %v128_v14 = vld [vmem:[%s21036_s0 + $0x20] sm:$0xff]  ;;  %v129_v16 = vld [vmem:[%s21036_s0 + $0x28] sm:$0xff] }
   0x8   :  { %45 = vst.msk [vmem:[#allocation2 + $0x30] sm:$0x1] %vm42_vm3, %v21046_v5  ;;  %46 = vst.msk [vmem:[#allocation2 + $0x48] sm:$0x1] %vm42_vm3, %v21046_v5  ;;  %v144_v15 = vld [vmem:[%s21036_s0 + $0xa0] sm:$0xff]  ;;  %v145_v17 = vld [vmem:[%s21036_s0 + $0xa8] sm:$0xff] }
   0x9   :  { %47 = vst.msk [vmem:[#allocation2 + $0x60] sm:$0x1] %vm42_vm3, %v21046_v5  ;;  %48 = vst.msk [vmem:[#allocation2 + $0x78] sm:$0x1] %vm42_vm3, %v21046_v5  ;;  %v2356_v18 = vld [vmem:[%s21037_s1] sm:$0x7] }
   0xa   :  { %49 = vst.msk [vmem:[#allocation2 + $0x90] sm:$0x1] %vm42_vm3, %v21046_v5  ;;  %50 = vst.msk [vmem:[#allocation2 + $0xa8] sm:$0x1] %vm42_vm3, %v21046_v5  ;;  %v130_v19 = vld [vmem:[%s21036_s0 + $0x30] sm:$0xff]  ;;  %16012 = vmatprep.subr.msk.mxu1 %vm272_vm0, %v2356_v18  ;;  %v131_v21 = vld [vmem:[%s21036_s0 + $0x38] sm:$0xff] }
   0xb   :  { %51 = vst.msk [vmem:[#allocation2 + $0xc0] sm:$0x1] %vm42_vm3, %v21046_v5  ;;  %52 = vst.msk [vmem:[#allocation2 + $0xd8] sm:$0x1] %vm42_vm3, %v21046_v5  ;;  %v146_v20 = vld [vmem:[%s21036_s0 + $0xb0] sm:$0xff]  ;;  %v147_v22 = vld [vmem:[%s21036_s0 + $0xb8] sm:$0xff] }
   0xc   :  { %53 = vst.msk [vmem:[#allocation2 + $0xf0] sm:$0x1] %vm42_vm3, %v21046_v5  ;;  %54 = vst.msk [vmem:[#allocation2 + $0x108] sm:$0x1] %vm42_vm3, %v21046_v5  ;;  %v132_v23 = vld [vmem:[%s21036_s0 + $0x40] sm:$0xff]  ;;  %v133_v25 = vld [vmem:[%s21036_s0 + $0x48] sm:$0xff] }
   0xd   :  { %55 = vst.msk [vmem:[#allocation2 + $0x120] sm:$0x1] %vm42_vm3, %v21046_v5  ;;  %56 = vst.msk [vmem:[#allocation2 + $0x138] sm:$0x1] %vm42_vm3, %v21046_v5  ;;  %v148_v24 = vld [vmem:[%s21036_s0 + $0xc0] sm:$0xff]  ;;  %v149_v26 = vld [vmem:[%s21036_s0 + $0xc8] sm:$0xff] }
   0xe   :  { %57 = vst.msk [vmem:[#allocation2 + $0x150] sm:$0x1] %vm42_vm3, %v21046_v5  ;;  %58 = vst.msk [vmem:[#allocation2 + $0x168] sm:$0x1] %vm42_vm3, %v21046_v5  ;;  %v206_v27 = vld [vmem:[#allocation2 + $0x1] sm:$0xff]  ;;  %v207_v29 = vld [vmem:[#allocation2 + $0x9] sm:$0xff] }
   0xf   :  { %59 = vst.msk [vmem:[#allocation2 + $0x180] sm:$0x1] %vm42_vm3, %v21046_v5  ;;  %60 = vst.msk [vmem:[#allocation2 + $0x198] sm:$0x1] %vm42_vm3, %v21046_v5  ;;  %v18198_v28 = vld [vmem:[#allocation2 + $0xc1] sm:$0xff]  ;;  %15754 = vmatprep.mubr.msk.f32.mxu0 %vm33_vm1, %v206_v27  ;;  %v18206_v30 = vld [vmem:[#allocation2 + $0xc9] sm:$0xff] }
  0x10   :  { %61 = vst.msk [vmem:[#allocation2 + $0x11] sm:$0x1] %vm42_vm3, %v21046_v5  ;;  %62 = vst.msk [vmem:[#allocation2 + $0x29] sm:$0x1] %vm42_vm3, %v21046_v5  ;;  %15988 = vmatprep.mubr.msk.f32.mxu1 %vm33_vm1, %v18198_v28  ;;  %v18208_v31 = vld [vmem:[#allocation2 + $0x19] sm:$0xff]  ;;  %15755 = vmatmul.mubr.msk.f32.vlgmr.msra.gmra.mrb[0].mxu0 %vm33_vm1, %v207_v29  ;;  %v18219_v33 = vld [vmem:[#allocation2 + $0x21] sm:$0xff] }
  0x11   :  { %63 = vst.msk [vmem:[#allocation2 + $0x41] sm:$0x1] %vm42_vm3, %v21046_v5  ;;  %64 = vst.msk [vmem:[#allocation2 + $0x59] sm:$0x1] %vm42_vm3, %v21046_v5  ;;  %v18210_v32 = vld [vmem:[#allocation2 + $0xd9] sm:$0xff]  ;;  %15989 = vmatmul.mubr.msk.f32.vlgmr.msra.gmra.mrb[0].mxu1 %vm33_vm1, %v18206_v30  ;;  %15779 = vmatpush3.msk.msra.mxu0 %vm272_vm0, %v18021_v2  ;;  %v134_v41 = vld [vmem:[%s21036_s0 + $0x50] sm:$0xff] }
  0x12   :  { %65 = vst.msk [vmem:[#allocation2 + $0x71] sm:$0x1] %vm42_vm3, %v21046_v5  ;;  %66 = vst.msk [vmem:[#allocation2 + $0x89] sm:$0x1] %vm42_vm3, %v21046_v5  ;;  %15757 = vmatprep.mubr.msk.f32.mxu0 %vm33_vm1, %v18208_v31  ;;  %15991 = vmatprep.mubr.msk.f32.mxu1 %vm33_vm1, %v18210_v32  ;;  %v150_v42 = vld [vmem:[%s21036_s0 + $0xd0] sm:$0xff]  ;;  %v135_v43 = vld [vmem:[%s21036_s0 + $0x58] sm:$0xff] }
  0x13   :  { %67 = vst.msk [vmem:[#allocation2 + $0xa1] sm:$0x1] %vm42_vm3, %v21046_v5  ;;  %68 = vst.msk [vmem:[#allocation2 + $0xb9] sm:$0x1] %vm42_vm3, %v21046_v5  ;;  %16013 = vmatpush3.msk.msra.mxu1 %vm272_vm0, %v2356_v18  ;;  %v151_v44 = vld [vmem:[%s21036_s0 + $0xd8] sm:$0xff]  ;;  %v136_v45 = vld [vmem:[%s21036_s0 + $0x60] sm:$0xff] }
  0x14   :  { %69 = vst.msk [vmem:[#allocation2 + $0xd1] sm:$0x1] %vm42_vm3, %v21046_v5  ;;  %70 = vst.msk [vmem:[#allocation2 + $0xe9] sm:$0x1] %vm42_vm3, %v21046_v5  ;;  %15758 = vmatmul.mubr.msk.f32.gmra.mrb[2].mxu0 %vm33_vm1, %v18219_v33  ;;  %v152_v46 = vld [vmem:[%s21036_s0 + $0xe0] sm:$0xff]  ;;  %v137_v47 = vld [vmem:[%s21036_s0 + $0x68] sm:$0xff] }
  0x15   :  { %71 = vst.msk [vmem:[#allocation2 + $0x101] sm:$0x1] %vm42_vm3, %v21046_v5  ;;  %72 = vst.msk [vmem:[#allocation2 + $0x119] sm:$0x1] %vm42_vm3, %v21046_v5  ;;  %v153_v48 = vld [vmem:[%s21036_s0 + $0xe8] sm:$0xff]  ;;  %v189_v6 = vld [vmem:[#allocation2] sm:$0xff] }
  0x16   :  { %73 = vst.msk [vmem:[#allocation2 + $0x131] sm:$0x1] %vm42_vm3, %v21046_v5  ;;  %74 = vst.msk [vmem:[#allocation2 + $0x149] sm:$0x1] %vm42_vm3, %v21046_v5  ;;  %v13985_v51 = vld [vmem:[%s21037_s1 + $0x8] sm:$0x7] }
  0x17   :  { %75 = vst.msk [vmem:[#allocation2 + $0x161] sm:$0x1] %vm42_vm3, %v21046_v5  ;;  %76 = vst.msk [vmem:[#allocation2 + $0x179] sm:$0x1] %vm42_vm3, %v21046_v5  ;;  %15804 = vmatprep.subr.msk.mxu0 %vm272_vm0, %v13985_v51  ;;  %v14147_v60 = vld [vmem:[%s21037_s1 + $0x8] sm:$0x7] }
  0x18   :  { %77 = vst.msk [vmem:[#allocation2 + $0x191] sm:$0x1] %vm42_vm3, %v21046_v5  ;;  %78 = vst.msk [vmem:[#allocation2 + $0x1a9] sm:$0x1] %vm42_vm3, %v21046_v5  ;;  %16038 = vmatprep.subr.msk.mxu1 %vm272_vm0, %v14147_v60  ;;  %v18362_v7 = vld [vmem:[#allocation2 + $0xc0] sm:$0xff]  ;;  %v190_v8 = vld [vmem:[#allocation2 + $0x8] sm:$0xff] }
  0x19   :  { %174 = vst.msk [vmem:[#allocation2 + $0xe1] sm:$0xff] %vm33_vm1, %v141_v9  ;;  %159 = vst.msk [vmem:[#allocation2 + $0x31] sm:$0xff] %vm33_vm1, %v126_v10  ;;  %v18371_v9 = vld [vmem:[#allocation2 + $0xc8] sm:$0xff]  ;;  %v18373_v10 = vld [vmem:[#allocation2 + $0x18] sm:$0xff] }
  0x1a   :  { %175 = vst.msk [vmem:[#allocation2 + $0xf1] sm:$0xff] %vm33_vm1, %v142_v11  ;;  %160 = vst.msk [vmem:[#allocation2 + $0x39] sm:$0xff] %vm33_vm1, %v127_v12  ;;  %v18375_v11 = vld [vmem:[#allocation2 + $0xd8] sm:$0xff]  ;;  %v18383_v12 = vld [vmem:[%s21037_s1 + $0xc] sm:$0x7] }
  0x1b   :  { %176 = vst.msk [vmem:[#allocation2 + $0xf9] sm:$0xff] %vm33_vm1, %v143_v13  ;;  %161 = vst.msk [vmem:[#allocation2 + $0x49] sm:$0xff] %vm33_vm1, %v128_v14  ;;  %v18388_v13 = vld [vmem:[%s21037_s1 + $0xc] sm:$0x7]  ;;  %v18393_v14 = vld [vmem:[#allocation2 + $0x20] sm:$0xff] }
  0x1c   :  { %177 = vst.msk [vmem:[#allocation2 + $0x109] sm:$0xff] %vm33_vm1, %v144_v15  ;;  %162 = vst.msk [vmem:[#allocation2 + $0x51] sm:$0xff] %vm33_vm1, %v129_v16  ;;  %v154_v18 = vld [vmem:[%s21036_s0 + $0xf0] sm:$0xff] }
  0x1d   :  { %178 = vst.msk [vmem:[#allocation2 + $0x111] sm:$0xff] %vm33_vm1, %v145_v17  ;;  %163 = vst.msk [vmem:[#allocation2 + $0x61] sm:$0xff] %vm33_vm1, %v130_v19  ;;  %v155_v19 = vld [vmem:[%s21036_s0 + $0xf8] sm:$0xff] }
  0x1e   :  { %179 = vst.msk [vmem:[#allocation2 + $0x121] sm:$0xff] %vm33_vm1, %v146_v20  ;;  %164 = vst.msk [vmem:[#allocation2 + $0x69] sm:$0xff] %vm33_vm1, %v131_v21  ;;  %v18419_v20 = vld [vmem:[#allocation2 + $0x1a] sm:$0xff] }
  0x1f   :  { %180 = vst.msk [vmem:[#allocation2 + $0x129] sm:$0xff] %vm33_vm1, %v147_v22  ;;  %165 = vst.msk [vmem:[#allocation2 + $0x79] sm:$0xff] %vm33_vm1, %v132_v23  ;;  %v14400_v21 = vld [vmem:[%s21036_s0 + $0x100] sm:$0xff] }
  0x20   :  { %21101 = vst [vmem:[#allocation12_spill] sm:$0xff] %v18198_v28  ;;  %181 = vst.msk [vmem:[#allocation2 + $0x139] sm:$0xff] %vm33_vm1, %v148_v24  ;;  %v18221_v34 = vld [vmem:[#allocation2 + $0xe1] sm:$0xff]  ;;  %v18225_v35 = vld [vmem:[#allocation2 + $0x31] sm:$0xff] }
  0x21   :  { %166 = vst.msk [vmem:[#allocation2 + $0x81] sm:$0xff] %vm33_vm1, %v133_v25  ;;  %182 = vst.msk [vmem:[#allocation2 + $0x141] sm:$0xff] %vm33_vm1, %v149_v26  ;;  %v18227_v36 = vld [vmem:[#allocation2 + $0xf1] sm:$0xff]  ;;  %15992 = vmatmul.mubr.msk.f32.gmra.mrb[2].mxu1 %vm33_vm1, %v18221_v34  ;;  %v18234_v37 = vld [vmem:[#allocation2 + $0x39] sm:$0xff]  ;;  %15760 = vmatprep.mubr.msk.f32.mxu0 %vm33_vm1, %v18225_v35 }
  0x22   :  { %21102 = vst [vmem:[#allocation13_spill] sm:$0xff] %v18206_v30  ;;  %15994 = vmatprep.mubr.msk.f32.mxu1 %vm33_vm1, %v18227_v36  ;;  %v18240_v38 = vld [vmem:[#allocation2 + $0xf9] sm:$0xff]  ;;  %v18242_v39 = vld [vmem:[#allocation2 + $0x49] sm:$0xff]  ;;  %167 = vst.msk [vmem:[#allocation2 + $0x91] sm:$0xff] %vm33_vm1, %v134_v41  ;;  %15761 = vmatmul.mubr.msk.f32.gmra.mrb[4].mxu0 %vm33_vm1, %v18234_v37 }
  0x23   :  { %v18244_v40 = vld [vmem:[#allocation2 + $0x109] sm:$0xff]  ;;  %183 = vst.msk [vmem:[#allocation2 + $0x151] sm:$0xff] %vm33_vm1, %v150_v42  ;;  %168 = vst.msk [vmem:[#allocation2 + $0x99] sm:$0xff] %vm33_vm1, %v135_v43  ;;  %15763 = vmatprep.mubr.msk.f32.mxu0 %vm33_vm1, %v18242_v39  ;;  %v18284_v49 = vld [vmem:[#allocation2 + $0x51] sm:$0xff] }
  0x24   :  { %184 = vst.msk [vmem:[#allocation2 + $0x159] sm:$0xff] %vm33_vm1, %v151_v44  ;;  %169 = vst.msk [vmem:[#allocation2 + $0xa9] sm:$0xff] %vm33_vm1, %v136_v45  ;;  %v18286_v50 = vld [vmem:[#allocation2 + $0x111] sm:$0xff]  ;;  %v18293_v52 = vld [vmem:[#allocation2 + $0x61] sm:$0xff] }
  0x25   :  { %15995 = vmatmul.mubr.msk.f32.gmra.mrb[4].mxu1 %vm33_vm1, %v18240_v38  ;;  %185 = vst.msk [vmem:[#allocation2 + $0x169] sm:$0xff] %vm33_vm1, %v152_v46  ;;  %170 = vst.msk [vmem:[#allocation2 + $0xb1] sm:$0xff] %vm33_vm1, %v137_v47  ;;  %v18295_v53 = vld [vmem:[#allocation2 + $0x121] sm:$0xff]  ;;  %v18306_v54 = vld [vmem:[#allocation2 + $0x69] sm:$0xff] }
  0x26   :  { %15997 = vmatprep.mubr.msk.f32.mxu1 %vm33_vm1, %v18244_v40  ;;  %186 = vst.msk [vmem:[#allocation2 + $0x171] sm:$0xff] %vm33_vm1, %v153_v48  ;;  %15764 = vmatmul.mubr.msk.f32.gmra.mrb[6].mxu0 %vm33_vm1, %v18284_v49  ;;  %v18308_v55 = vld [vmem:[#allocation2 + $0x129] sm:$0xff]  ;;  %v18310_v56 = vld [vmem:[#allocation2 + $0x79] sm:$0xff]  ;;  %187 = vst.msk [vmem:[#allocation2 + $0x181] sm:$0xff] %vm33_vm1, %v154_v18 }
  0x27   :  { %15766 = vmatprep.mubr.msk.f32.mxu0 %vm33_vm1, %v18293_v52  ;;  %v18312_v57 = vld [vmem:[#allocation2 + $0x139] sm:$0xff]  ;;  %v18399_v16 = vld [vmem:[#allocation2 + $0x30] sm:$0xff]  ;;  %21107 = vst [vmem:[#allocation18_spill] sm:$0xff] %v18419_v20  ;;  %188 = vst.msk [vmem:[#allocation2 + $0x189] sm:$0xff] %vm33_vm1, %v155_v19 }
  0x28   :  { %v18322_v58 = vld [vmem:[#allocation2 + $0x81] sm:$0xff]  ;;  %v18401_v17 = vld [vmem:[#allocation2 + $0xf0] sm:$0xff] }
  0x29   :  { %15998 = vmatmul.mubr.msk.f32.gmra.mrb[6].mxu1 %vm33_vm1, %v18286_v50  ;;  %v18324_v59 = vld [vmem:[#allocation2 + $0x141] sm:$0xff]  ;;  %v18329_v61 = vld [vmem:[#allocation2 + $0x91] sm:$0xff] }
  0x2a   :  { %16000 = vmatprep.mubr.msk.f32.mxu1 %vm33_vm1, %v18295_v53  ;;  %15767 = vmatmul.mubr.msk.f32.gmra.mrb[8].mxu0 %vm33_vm1, %v18306_v54  ;;  %v18331_v62 = vld [vmem:[#allocation2 + $0x151] sm:$0xff]  ;;  %v18342_v63 = vld [vmem:[#allocation2 + $0x99] sm:$0xff] }
  0x2b   :  { %15769 = vmatprep.mubr.msk.f32.mxu0 %vm33_vm1, %v18310_v56  ;;  %v18344_v0 = vld [vmem:[#allocation2 + $0x159] sm:$0xff]  ;;  %v18346_v1 = vld [vmem:[#allocation2 + $0xa9] sm:$0xff] }
  0x2c   :  { %21103 = vst [vmem:[#allocation14_spill] sm:$0xff] %v18346_v1  ;;  %v18348_v2 = vld [vmem:[#allocation2 + $0x169] sm:$0xff]  ;;  %v18358_v3 = vld [vmem:[#allocation2 + $0xb1] sm:$0xff]  ;;  %v18395_v15 = vld [vmem:[#allocation2 + $0xe0] sm:$0xff] }
  0x2d   :  { %16001 = vmatmul.mubr.msk.f32.gmra.mrb[8].mxu1 %vm33_vm1, %v18308_v55  ;;  %21104 = vst [vmem:[#allocation15_spill] sm:$0xff] %v18348_v2  ;;  %21105 = vst [vmem:[#allocation16_spill] sm:$0xff] %v18358_v3  ;;  %v18360_v4 = vld [vmem:[#allocation2 + $0x171] sm:$0xff] }
  0x2e   :  { %16003 = vmatprep.mubr.msk.f32.mxu1 %vm33_vm1, %v18312_v57  ;;  %15770 = vmatmul.mubr.msk.f32.gmra.mrb[10].mxu0 %vm33_vm1, %v18322_v58  ;;  %21106 = vst [vmem:[#allocation17_spill] sm:$0xff] %v18360_v4 }
  0x2f   :  { %15772 = vmatprep.mubr.msk.f32.mxu0 %vm33_vm1, %v18329_v61 }
  0x31   :  { %16004 = vmatmul.mubr.msk.f32.gmra.mrb[10].mxu1 %vm33_vm1, %v18324_v59 }
  0x32   :  { %16006 = vmatprep.mubr.msk.f32.mxu1 %vm33_vm1, %v18331_v62  ;;  %15773 = vmatmul.mubr.msk.f32.gmra.mrb[12].mxu0 %vm33_vm1, %v18342_v63 }
  0x33   :  { %15775 = vmatprep.mubr.msk.f32.mxu0 %vm33_vm1, %v18346_v1 }
  0x35   :  { %16007 = vmatmul.mubr.msk.f32.gmra.mrb[12].mxu1 %vm33_vm1, %v18344_v0 }
  0x36   :  { %16009 = vmatprep.mubr.msk.f32.mxu1 %vm33_vm1, %v18348_v2  ;;  %15776 = vmatmul.mubr.msk.f32.gmra.mrb[14].mxu0 %vm33_vm1, %v18358_v3 }
  0x37   :  { %15780 = vmatprep.mubr.msk.f32.mxu0 %vm33_vm1, %v189_v6 }
  0x39   :  { %16010 = vmatmul.mubr.msk.f32.gmra.mrb[14].mxu1 %vm33_vm1, %v18360_v4 }
  0x3a   :  { %16014 = vmatprep.mubr.msk.f32.mxu1 %vm33_vm1, %v18362_v7  ;;  %15781 = vmatmul.mubr.msk.f32.vlgmr.msra.gmra.mrb[0].mxu0 %vm33_vm1, %v190_v8 }
  0x3b   :  { %15805 = vmatpush3.msk.msra.mxu0 %vm272_vm0, %v13985_v51  ;;  %15783 = vmatprep.mubr.msk.f32.mxu0 %vm33_vm1, %v18373_v10 }
  0x3c   :  { %15830 = vmatprep.subr.msk.mxu0 %vm272_vm0, %v18383_v12 }
  0x3d   :  { %16015 = vmatmul.mubr.msk.f32.vlgmr.msra.gmra.mrb[0].mxu1 %vm33_vm1, %v18371_v9 }
  0x3e   :  { %16017 = vmatprep.mubr.msk.f32.mxu1 %vm33_vm1, %v18375_v11  ;;  %16039 = vmatpush3.msk.msra.mxu1 %vm272_vm0, %v14147_v60 }
  0x3f   :  { %16064 = vmatprep.subr.msk.mxu1 %vm272_vm0, %v18388_v13  ;;  %15784 = vmatmul.mubr.msk.f32.gmra.mrb[2].mxu0 %vm33_vm1, %v18393_v14 }
  0x41   :  { %16018 = vmatmul.mubr.msk.f32.gmra.mrb[2].mxu1 %vm33_vm1, %v18395_v15 }
  0x42   :  { %14 = vsyncpa [#allocation10], 0  ;;  %15786 = vmatprep.mubr.msk.f32.mxu0 %vm33_vm1, %v18399_v16  ;;  %16020 = vmatprep.mubr.msk.f32.mxu1 %vm33_vm1, %v18401_v17  ;;  %v18429_v22 = vld [vmem:[#allocation2 + $0x38] sm:$0xff]  ;;  %7103 = vst.msk [vmem:[#allocation2 + $0x19] sm:$0xff] %vm33_vm1, %v14400_v21  ;;  %v18434_v24 = vld [vmem:[#allocation2 + $0x48] sm:$0xff]  ;;  %vm79_vm4 = vcmask 64512  }
  0x43   :  { %v18431_v23 = vld [vmem:[#allocation2 + $0xf8] sm:$0xff]  ;;  %v18436_v25 = vld [vmem:[#allocation2 + $0x108] sm:$0xff]  ;;  %15787 = vmatmul.mubr.msk.f32.gmra.mrb[4].mxu0 %vm33_vm1, %v18429_v22  ;;  %v18446_v26 = vld [vmem:[#allocation2 + $0x50] sm:$0xff]  ;;  %vm81_vm5 = vcmask 58368   ;;  %vm86_vm6 = vcmask 57344   ;;  %vm107_vm7 = vcmask 128000  }
  0x44   :  { %15789 = vmatprep.mubr.msk.f32.mxu0 %vm33_vm1, %v18434_v24  ;;  %v18448_v27 = vld [vmem:[#allocation2 + $0x110] sm:$0xff]  ;;  %v18450_v29 = vld [vmem:[#allocation2 + $0x60] sm:$0xff]  ;;  %v18462_v42 = vld [vmem:[#allocation2 + $0x68] sm:$0xff]  ;;  %vm111_vm8 = vcmask 122880   ;;  %vm5797_vm9 = vcmask 130048   ;;  %vm5845_vm10 = vcmask 125952  }
  0x45   :  { %16021 = vmatmul.mubr.msk.f32.gmra.mrb[4].mxu1 %vm33_vm1, %v18431_v23  ;;  %v18452_v41 = vld [vmem:[#allocation2 + $0x120] sm:$0xff]  ;;  %v18464_v43 = vld [vmem:[#allocation2 + $0x128] sm:$0xff]  ;;  %v18466_v44 = vld [vmem:[#allocation2 + $0x78] sm:$0xff]  ;;  %vm17958_vm11 = vmmov 0   ;;  %vm6745_vm12 = vcmask 123904   ;;  %vm7068_vm13 = vcmask 253952  }
  0x46   :  { %16023 = vmatprep.mubr.msk.f32.mxu1 %vm33_vm1, %v18436_v25  ;;  %v18468_v45 = vld [vmem:[#allocation2 + $0x138] sm:$0xff]  ;;  %v18478_v46 = vld [vmem:[#allocation2 + $0x80] sm:$0xff]  ;;  %v18482_v48 = vld [vmem:[#allocation2 + $0x90] sm:$0xff] }
  0x47   :  { %15790 = vmatmul.mubr.msk.f32.gmra.mrb[6].mxu0 %vm33_vm1, %v18446_v26  ;;  %v18480_v47 = vld [vmem:[#allocation2 + $0x140] sm:$0xff]  ;;  %v18484_v51 = vld [vmem:[#allocation2 + $0x150] sm:$0xff]  ;;  %v18494_v60 = vld [vmem:[#allocation2 + $0x98] sm:$0xff] }
  0x48   :  { %15792 = vmatprep.mubr.msk.f32.mxu0 %vm33_vm1, %v18450_v29  ;;  %v18496_v6 = vld [vmem:[#allocation2 + $0x158] sm:$0xff]  ;;  %v18498_v8 = vld [vmem:[#allocation2 + $0xa8] sm:$0xff]  ;;  %v18510_v19 = vld [vmem:[#allocation2 + $0xb0] sm:$0xff] }
  0x49   :  { %16024 = vmatmul.mubr.msk.f32.gmra.mrb[6].mxu1 %vm33_vm1, %v18448_v27  ;;  %v18500_v18 = vld [vmem:[#allocation2 + $0x168] sm:$0xff]  ;;  %v18512_v21 = vld [vmem:[#allocation2 + $0x170] sm:$0xff]  ;;  %v18525_v3 = vld [vmem:[#allocation2 + $0xda] sm:$0xff] }
  0x4a   :  { %16026 = vmatprep.mubr.msk.f32.mxu1 %vm33_vm1, %v18452_v41  ;;  %v617_v5 = vld [vmem:[#allocation2 + $0x2] sm:$0xff]  ;;  %v618_v28 = vld [vmem:[#allocation2 + $0xa] sm:$0xff]  ;;  %21110 = vst [vmem:[#allocation21_spill] sm:$0xff] %v18525_v3  ;;  %v18552_v1 = vld [vmem:[#allocation2 + $0xf2] sm:$0xff] }
  0x4b   :  { %15793 = vmatmul.mubr.msk.f32.gmra.mrb[8].mxu0 %vm33_vm1, %v18462_v42  ;;  %v18514_v30 = vld [vmem:[#allocation2 + $0xc2] sm:$0xff]  ;;  %v18523_v4 = vld [vmem:[#allocation2 + $0xca] sm:$0xff]  ;;  %21114 = vst [vmem:[#allocation25_spill] sm:$0xff] %v18552_v1 }
  0x4c   :  { %15795 = vmatprep.mubr.msk.f32.mxu0 %vm33_vm1, %v18466_v44  ;;  %21108 = vst [vmem:[#allocation19_spill] sm:$0xff] %v18514_v30  ;;  %21109 = vst [vmem:[#allocation20_spill] sm:$0xff] %v18523_v4  ;;  %v18533_v2 = vld [vmem:[%s21037_s1 + $0x10] sm:$0x7] }
  0x4d   :  { %16027 = vmatmul.mubr.msk.f32.gmra.mrb[8].mxu1 %vm33_vm1, %v18464_v43 }
  0x4e   :  { %16029 = vmatprep.mubr.msk.f32.mxu1 %vm33_vm1, %v18468_v45 }
  0x4f   :  { %15796 = vmatmul.mubr.msk.f32.gmra.mrb[10].mxu0 %vm33_vm1, %v18478_v46 }
  0x50   :  { %15798 = vmatprep.mubr.msk.f32.mxu0 %vm33_vm1, %v18482_v48 }
  0x51   :  { %16030 = vmatmul.mubr.msk.f32.gmra.mrb[10].mxu1 %vm33_vm1, %v18480_v47 }
  0x52   :  { %16032 = vmatprep.mubr.msk.f32.mxu1 %vm33_vm1, %v18484_v51 }
  0x53   :  { %15799 = vmatmul.mubr.msk.f32.gmra.mrb[12].mxu0 %vm33_vm1, %v18494_v60 }
  0x54   :  { %15801 = vmatprep.mubr.msk.f32.mxu0 %vm33_vm1, %v18498_v8 }
  0x55   :  { %16033 = vmatmul.mubr.msk.f32.gmra.mrb[12].mxu1 %vm33_vm1, %v18496_v6 }
  0x56   :  { %16035 = vmatprep.mubr.msk.f32.mxu1 %vm33_vm1, %v18500_v18 }
  0x57   :  { %15802 = vmatmul.mubr.msk.f32.gmra.mrb[14].mxu0 %vm33_vm1, %v18510_v19 }
  0x58   :  { %15806 = vmatprep.mubr.msk.f32.mxu0 %vm33_vm1, %v617_v5  ;;  %v18538_v5 = vld [vmem:[%s21037_s1 + $0x10] sm:$0x7] }
  0x59   :  { %16036 = vmatmul.mubr.msk.f32.gmra.mrb[14].mxu1 %vm33_vm1, %v18512_v21 }
  0x5a   :  { %16040 = vmatprep.mubr.msk.f32.mxu1 %vm33_vm1, %v18514_v30  ;;  %v18546_v30 = vld [vmem:[#allocation2 + $0xe2] sm:$0xff] }
  0x5b   :  { %15807 = vmatmul.mubr.msk.f32.vlgmr.msra.gmra.mrb[0].mxu0 %vm33_vm1, %v618_v28  ;;  %v18544_v28 = vld [vmem:[#allocation2 + $0x22] sm:$0xff]  ;;  %21112 = vst [vmem:[#allocation23_spill] sm:$0xff] %v18546_v30 }
  0x5c   :  { %15831 = vmatpush3.msk.msra.mxu0 %vm272_vm0, %v18383_v12  ;;  %15809 = vmatprep.mubr.msk.f32.mxu0 %vm33_vm1, %v18419_v20  ;;  %21111 = vst [vmem:[#allocation22_spill] sm:$0xff] %v18544_v28  ;;  %v18568_v12 = vld [vmem:[#allocation2 + $0x3a] sm:$0xff]  ;;  %v18574_v20 = vld [vmem:[#allocation2 + $0x10a] sm:$0xff] }
  0x5d   :  { %16041 = vmatmul.mubr.msk.f32.vlgmr.msra.gmra.mrb[0].mxu1 %vm33_vm1, %v18523_v4  ;;  %v18550_v4 = vld [vmem:[#allocation2 + $0x32] sm:$0xff]  ;;  %15856 = vmatprep.subr.msk.mxu0 %vm272_vm0, %v18533_v2  ;;  %21115 = vst [vmem:[#allocation26_spill] sm:$0xff] %v18568_v12  ;;  %21118 = vst [vmem:[#allocation29_spill] sm:$0xff] %v18574_v20 }
  0x5e   :  { %16043 = vmatprep.mubr.msk.f32.mxu1 %vm33_vm1, %v18525_v3  ;;  %21113 = vst [vmem:[#allocation24_spill] sm:$0xff] %v18550_v4  ;;  %16065 = vmatpush3.msk.msra.mxu1 %vm272_vm0, %v18388_v13  ;;  %v18570_v13 = vld [vmem:[#allocation2 + $0xfa] sm:$0xff]  ;;  %v18572_v3 = vld [vmem:[#allocation2 + $0x4a] sm:$0xff] }
  0x5f   :  { %16090 = vmatprep.subr.msk.mxu1 %vm272_vm0, %v18538_v5  ;;  %15810 = vmatmul.mubr.msk.f32.gmra.mrb[2].mxu0 %vm33_vm1, %v18544_v28  ;;  %21116 = vst [vmem:[#allocation27_spill] sm:$0xff] %v18570_v13  ;;  %21117 = vst [vmem:[#allocation28_spill] sm:$0xff] %v18572_v3  ;;  %v18590_v28 = vld [vmem:[#allocation2 + $0x122] sm:$0xff] }
  0x60   :  { %15812 = vmatprep.mubr.msk.f32.mxu0 %vm33_vm1, %v18550_v4  ;;  %v18586_v4 = vld [vmem:[#allocation2 + $0x112] sm:$0xff]  ;;  %21122 = vst [vmem:[#allocation33_spill] sm:$0xff] %v18590_v28 }
  0x61   :  { %16044 = vmatmul.mubr.msk.f32.gmra.mrb[2].mxu1 %vm33_vm1, %v18546_v30  ;;  %21120 = vst [vmem:[#allocation31_spill] sm:$0xff] %v18586_v4  ;;  %v18588_v30 = vld [vmem:[#allocation2 + $0x62] sm:$0xff] }
  0x62   :  { %16046 = vmatprep.mubr.msk.f32.mxu1 %vm33_vm1, %v18552_v1  ;;  %v18584_v1 = vld [vmem:[#allocation2 + $0x52] sm:$0xff]  ;;  %21121 = vst [vmem:[#allocation32_spill] sm:$0xff] %v18588_v30 }
  0x63   :  { %15813 = vmatmul.mubr.msk.f32.gmra.mrb[4].mxu0 %vm33_vm1, %v18568_v12  ;;  %21119 = vst [vmem:[#allocation30_spill] sm:$0xff] %v18584_v1  ;;  %v18606_v12 = vld [vmem:[#allocation2 + $0x13a] sm:$0xff] }
  0x64   :  { %15815 = vmatprep.mubr.msk.f32.mxu0 %vm33_vm1, %v18572_v3  ;;  %v18602_v3 = vld [vmem:[#allocation2 + $0x12a] sm:$0xff]  ;;  %21126 = vst [vmem:[#allocation37_spill] sm:$0xff] %v18606_v12 }
  0x65   :  { %16047 = vmatmul.mubr.msk.f32.gmra.mrb[4].mxu1 %vm33_vm1, %v18570_v13  ;;  %21124 = vst [vmem:[#allocation35_spill] sm:$0xff] %v18602_v3  ;;  %v18604_v13 = vld [vmem:[#allocation2 + $0x7a] sm:$0xff] }
  0x66   :  { %16049 = vmatprep.mubr.msk.f32.mxu1 %vm33_vm1, %v18574_v20  ;;  %v18600_v20 = vld [vmem:[#allocation2 + $0x6a] sm:$0xff]  ;;  %21125 = vst [vmem:[#allocation36_spill] sm:$0xff] %v18604_v13 }
  0x67   :  { %15816 = vmatmul.mubr.msk.f32.gmra.mrb[6].mxu0 %vm33_vm1, %v18584_v1  ;;  %21123 = vst [vmem:[#allocation34_spill] sm:$0xff] %v18600_v20  ;;  %v18622_v1 = vld [vmem:[#allocation2 + $0x152] sm:$0xff] }
  0x68   :  { %15818 = vmatprep.mubr.msk.f32.mxu0 %vm33_vm1, %v18588_v30  ;;  %v18618_v30 = vld [vmem:[#allocation2 + $0x142] sm:$0xff]  ;;  %21128 = vst [vmem:[#allocation39_spill] sm:$0xff] %v18622_v1 }
  0x69   :  { %16050 = vmatmul.mubr.msk.f32.gmra.mrb[6].mxu1 %vm33_vm1, %v18586_v4  ;;  %v18620_v4 = vld [vmem:[#allocation2 + $0x92] sm:$0xff] }
  0x6a   :  { %16052 = vmatprep.mubr.msk.f32.mxu1 %vm33_vm1, %v18590_v28  ;;  %v18616_v28 = vld [vmem:[#allocation2 + $0x82] sm:$0xff]  ;;  %21127 = vst [vmem:[#allocation38_spill] sm:$0xff] %v18620_v4 }
  0x6b   :  { %15819 = vmatmul.mubr.msk.f32.gmra.mrb[8].mxu0 %vm33_vm1, %v18600_v20  ;;  %v18638_v20 = vld [vmem:[#allocation2 + $0x16a] sm:$0xff] }
  0x6c   :  { %15821 = vmatprep.mubr.msk.f32.mxu0 %vm33_vm1, %v18604_v13  ;;  %v18634_v13 = vld [vmem:[#allocation2 + $0x15a] sm:$0xff]  ;;  %21129 = vst [vmem:[#allocation40_spill] sm:$0xff] %v18638_v20 }
  0x6d   :  { %16053 = vmatmul.mubr.msk.f32.gmra.mrb[8].mxu1 %vm33_vm1, %v18602_v3  ;;  %v18636_v3 = vld [vmem:[#allocation2 + $0xaa] sm:$0xff] }
  0x6e   :  { %16055 = vmatprep.mubr.msk.f32.mxu1 %vm33_vm1, %v18606_v12  ;;  %v18632_v12 = vld [vmem:[#allocation2 + $0x9a] sm:$0xff] }
  0x6f   :  { %15822 = vmatmul.mubr.msk.f32.gmra.mrb[10].mxu0 %vm33_vm1, %v18616_v28 }
  0x70   :  { %15824 = vmatprep.mubr.msk.f32.mxu0 %vm33_vm1, %v18620_v4  ;;  %v18650_v4 = vld [vmem:[#allocation2 + $0x172] sm:$0xff] }
  0x71   :  { %16056 = vmatmul.mubr.msk.f32.gmra.mrb[10].mxu1 %vm33_vm1, %v18618_v30  ;;  %21130 = vst [vmem:[#allocation41_spill] sm:$0xff] %v18650_v4 }
  0x72   :  { %16058 = vmatprep.mubr.msk.f32.mxu1 %vm33_vm1, %v18622_v1  ;;  %v18648_v1 = vld [vmem:[#allocation2 + $0xb2] sm:$0xff] }
  0x73   :  { %15825 = vmatmul.mubr.msk.f32.gmra.mrb[12].mxu0 %vm33_vm1, %v18632_v12 }
  0x74   :  { %15827 = vmatprep.mubr.msk.f32.mxu0 %vm33_vm1, %v18636_v3 }
  0x75   :  { %16059 = vmatmul.mubr.msk.f32.gmra.mrb[12].mxu1 %vm33_vm1, %v18634_v13 }
  0x76   :  { %16061 = vmatprep.mubr.msk.f32.mxu1 %vm33_vm1, %v18638_v20  ;;  %v14039_v20 = vld [vmem:[%s21037_s1 + $0x14] sm:$0x7] }
  0x77   :  { %15828 = vmatmul.mubr.msk.f32.gmra.mrb[14].mxu0 %vm33_vm1, %v18648_v1 }
  0x78   :  { %15832 = vmatprep.mubr.msk.f32.mxu0 %vm33_vm1, %v18373_v10  ;;  %v18730_v10 = vld [vmem:[#allocation2 + $0x188] sm:$0xff] }
  0x79   :  { %16062 = vmatmul.mubr.msk.f32.gmra.mrb[14].mxu1 %vm33_vm1, %v18650_v4  ;;  %v14201_v4 = vld [vmem:[%s21037_s1 + $0x14] sm:$0x7] }
  0x7a   :  { %16066 = vmatprep.mubr.msk.f32.mxu1 %vm33_vm1, %v18375_v11 }
  0x7b   :  { %15833 = vmatmul.mubr.msk.f32.vlgmr.msra.gmra.mrb[0].mxu0 %vm33_vm1, %v18393_v14  ;;  %v14057_v14 = vld [vmem:[%s21037_s1 + $0x18] sm:$0x7] }
  0x7c   :  { %15857 = vmatpush3.msk.msra.mxu0 %vm272_vm0, %v18533_v2  ;;  %15835 = vmatprep.mubr.msk.f32.mxu0 %vm33_vm1, %v18399_v16  ;;  %v18720_v2 = vld [vmem:[#allocation2 + $0x180] sm:$0xff] }
  0x7d   :  { %16067 = vmatmul.mubr.msk.f32.vlgmr.msra.gmra.mrb[0].mxu1 %vm33_vm1, %v18395_v15  ;;  %15882 = vmatprep.subr.msk.mxu0 %vm272_vm0, %v14039_v20 }
  0x7e   :  { %16069 = vmatprep.mubr.msk.f32.mxu1 %vm33_vm1, %v18401_v17  ;;  %16091 = vmatpush3.msk.msra.mxu1 %vm272_vm0, %v18538_v5  ;;  %v14219_v5 = vld [vmem:[%s21037_s1 + $0x18] sm:$0x7] }
  0x7f   :  { %16116 = vmatprep.subr.msk.mxu1 %vm272_vm0, %v14201_v4  ;;  %15836 = vmatmul.mubr.msk.f32.gmra.mrb[2].mxu0 %vm33_vm1, %v18429_v22 }
  0x80   :  { %15838 = vmatprep.mubr.msk.f32.mxu0 %vm33_vm1, %v18434_v24 }
  0x81   :  { %16070 = vmatmul.mubr.msk.f32.gmra.mrb[2].mxu1 %vm33_vm1, %v18431_v23 }
  0x82   :  { %16072 = vmatprep.mubr.msk.f32.mxu1 %vm33_vm1, %v18436_v25 }
  0x83   :  { %15839 = vmatmul.mubr.msk.f32.gmra.mrb[4].mxu0 %vm33_vm1, %v18446_v26 }
  0x84   :  { %15841 = vmatprep.mubr.msk.f32.mxu0 %vm33_vm1, %v18450_v29 }
  0x85   :  { %16073 = vmatmul.mubr.msk.f32.gmra.mrb[4].mxu1 %vm33_vm1, %v18448_v27 }
  0x86   :  { %16075 = vmatprep.mubr.msk.f32.mxu1 %vm33_vm1, %v18452_v41 }
  0x87   :  { %15842 = vmatmul.mubr.msk.f32.gmra.mrb[6].mxu0 %vm33_vm1, %v18462_v42 }
  0x88   :  { %15844 = vmatprep.mubr.msk.f32.mxu0 %vm33_vm1, %v18466_v44 }
  0x89   :  { %16076 = vmatmul.mubr.msk.f32.gmra.mrb[6].mxu1 %vm33_vm1, %v18464_v43 }
  0x8a   :  { %16078 = vmatprep.mubr.msk.f32.mxu1 %vm33_vm1, %v18468_v45 }
  0x8b   :  { %15845 = vmatmul.mubr.msk.f32.gmra.mrb[8].mxu0 %vm33_vm1, %v18478_v46 }
  0x8c   :  { %15847 = vmatprep.mubr.msk.f32.mxu0 %vm33_vm1, %v18482_v48 }
  0x8d   :  { %16079 = vmatmul.mubr.msk.f32.gmra.mrb[8].mxu1 %vm33_vm1, %v18480_v47 }
  0x8e   :  { %16081 = vmatprep.mubr.msk.f32.mxu1 %vm33_vm1, %v18484_v51 }
  0x8f   :  { %15848 = vmatmul.mubr.msk.f32.gmra.mrb[10].mxu0 %vm33_vm1, %v18494_v60 }
  0x90   :  { %15850 = vmatprep.mubr.msk.f32.mxu0 %vm33_vm1, %v18498_v8 }
  0x91   :  { %16082 = vmatmul.mubr.msk.f32.gmra.mrb[10].mxu1 %vm33_vm1, %v18496_v6 }
  0x92   :  { %16084 = vmatprep.mubr.msk.f32.mxu1 %vm33_vm1, %v18500_v18 }
  0x93   :  { %15851 = vmatmul.mubr.msk.f32.gmra.mrb[12].mxu0 %vm33_vm1, %v18510_v19 }
  0x94   :  { %15853 = vmatprep.mubr.msk.f32.mxu0 %vm33_vm1, %v18362_v7 }
  0x95   :  { %16085 = vmatmul.mubr.msk.f32.gmra.mrb[12].mxu1 %vm33_vm1, %v18512_v21 }
  0x96   :  { %16087 = vmatprep.mubr.msk.f32.mxu1 %vm33_vm1, %v18720_v2 }
  0x97   :  { %15854 = vmatmul.mubr.msk.f32.gmra.mrb[14].mxu0 %vm33_vm1, %v18371_v9 }
  0x98   :  { %15858 = vmatprep.mubr.msk.f32.mxu0 %vm33_vm1, %v18208_v31  ;;  %v21131_v31 = vld [vmem:[#allocation14_spill] sm:$0xff] }
  0x99   :  { %16088 = vmatmul.mubr.msk.f32.gmra.mrb[14].mxu1 %vm33_vm1, %v18730_v10 }
  0x9a   :  { %16092 = vmatprep.mubr.msk.f32.mxu1 %vm33_vm1, %v18210_v32  ;;  %v21132_v32 = vld [vmem:[#allocation15_spill] sm:$0xff] }
  0x9b   :  { %15859 = vmatmul.mubr.msk.f32.vlgmr.msra.gmra.mrb[0].mxu0 %vm33_vm1, %v18219_v33  ;;  %v18798_v33 = vld [vmem:[#allocation2 + $0x181] sm:$0xff] }
  0x9c   :  { %15883 = vmatpush3.msk.msra.mxu0 %vm272_vm0, %v14039_v20  ;;  %15861 = vmatprep.mubr.msk.f32.mxu0 %vm33_vm1, %v18225_v35  ;;  %v14430_v35 = vld [vmem:[%s21036_s0 + $0x1f0] sm:$0xff] }
  0x9d   :  { %16093 = vmatmul.mubr.msk.f32.vlgmr.msra.gmra.mrb[0].mxu1 %vm33_vm1, %v18221_v34  ;;  %15908 = vmatprep.subr.msk.mxu0 %vm272_vm0, %v14057_v14  ;;  %v18800_v34 = vld [vmem:[#allocation2 + $0x182] sm:$0xff]  ;;  %v21148_v20 = vld [vmem:[#allocation30_spill] sm:$0xff] }
  0x9e   :  { %16095 = vmatprep.mubr.msk.f32.mxu1 %vm33_vm1, %v18227_v36  ;;  %16117 = vmatpush3.msk.msra.mxu1 %vm272_vm0, %v14201_v4  ;;  %7133 = vst.msk [vmem:[#allocation2 + $0x181] sm:$0xff] %vm33_vm1, %v14430_v35  ;;  %v21133_v36 = vld [vmem:[#allocation16_spill] sm:$0xff]  ;;  %v21147_v4 = vld [vmem:[#allocation29_spill] sm:$0xff]  ;;  %v21153_v35 = vld [vmem:[#allocation35_spill] sm:$0xff] }
  0x9f   :  { %16142 = vmatprep.subr.msk.mxu1 %vm272_vm0, %v14219_v5  ;;  %15862 = vmatmul.mubr.msk.f32.gmra.mrb[2].mxu0 %vm33_vm1, %v18234_v37  ;;  %v21134_v37 = vld [vmem:[#allocation17_spill] sm:$0xff] }
  0xa0   :  { %15864 = vmatprep.mubr.msk.f32.mxu0 %vm33_vm1, %v18242_v39  ;;  %v18812_v39 = vld [vmem:[#allocation2 + $0x18a] sm:$0xff] }
  0xa1   :  { %16096 = vmatmul.mubr.msk.f32.gmra.mrb[2].mxu1 %vm33_vm1, %v18240_v38  ;;  %v18810_v38 = vld [vmem:[#allocation2 + $0x189] sm:$0xff] }
  0xa2   :  { %16098 = vmatprep.mubr.msk.f32.mxu1 %vm33_vm1, %v18244_v40  ;;  %v14431_v40 = vld [vmem:[%s21036_s0 + $0x1f8] sm:$0xff] }
  0xa3   :  { %15865 = vmatmul.mubr.msk.f32.gmra.mrb[4].mxu0 %vm33_vm1, %v18284_v49  ;;  %v21135_v49 = vld [vmem:[#allocation12_spill] sm:$0xff]  ;;  %7134 = vst.msk [vmem:[#allocation2 + $0x189] sm:$0xff] %vm33_vm1, %v14431_v40  ;;  %v21156_v40 = vld [vmem:[#allocation38_spill] sm:$0xff] }
  0xa4   :  { %15867 = vmatprep.mubr.msk.f32.mxu0 %vm33_vm1, %v18293_v52  ;;  %v21137_v52 = vld [vmem:[#allocation18_spill] sm:$0xff] }
  0xa5   :  { %16099 = vmatmul.mubr.msk.f32.gmra.mrb[4].mxu1 %vm33_vm1, %v18286_v50  ;;  %v21136_v50 = vld [vmem:[#allocation13_spill] sm:$0xff] }
  0xa6   :  { %16101 = vmatprep.mubr.msk.f32.mxu1 %vm33_vm1, %v18295_v53  ;;  %v21138_v53 = vld [vmem:[#allocation21_spill] sm:$0xff] }
  0xa7   :  { %15868 = vmatmul.mubr.msk.f32.gmra.mrb[6].mxu0 %vm33_vm1, %v18306_v54  ;;  %v21139_v54 = vmov 0.0  }
  0xa8   :  { %15870 = vmatprep.mubr.msk.f32.mxu0 %vm33_vm1, %v18310_v56  ;;  %80 = vst.msk [vmem:[#allocation3] sm:$0xff] %vm79_vm4, %v21139_v54  ;;  %84 = vst.msk [vmem:[#allocation3 + $0x90] sm:$0xff] %vm79_vm4, %v21139_v54  ;;  %v21141_v56 = vld [vmem:[#allocation23_spill] sm:$0xff]  ;;  %v21161_v54 = vld [vmem:[#allocation20_spill] sm:$0xff] }
  0xa9   :  { %16102 = vmatmul.mubr.msk.f32.gmra.mrb[6].mxu1 %vm33_vm1, %v18308_v55  ;;  %v21140_v55 = vld [vmem:[#allocation22_spill] sm:$0xff] }
  0xaa   :  { %16104 = vmatprep.mubr.msk.f32.mxu1 %vm33_vm1, %v18312_v57  ;;  %v14075_v57 = vld [vmem:[%s21037_s1 + $0x1c] sm:$0x7] }
  0xab   :  { %15871 = vmatmul.mubr.msk.f32.gmra.mrb[8].mxu0 %vm33_vm1, %v18322_v58  ;;  %v14237_v58 = vld [vmem:[%s21037_s1 + $0x1c] sm:$0x7] }
  0xac   :  { %15873 = vmatprep.mubr.msk.f32.mxu0 %vm33_vm1, %v18329_v61  ;;  %v21143_v61 = vld [vmem:[#allocation25_spill] sm:$0xff] }
  0xad   :  { %16105 = vmatmul.mubr.msk.f32.gmra.mrb[8].mxu1 %vm33_vm1, %v18324_v59  ;;  %v21142_v59 = vld [vmem:[#allocation24_spill] sm:$0xff] }
  0xae   :  { %16107 = vmatprep.mubr.msk.f32.mxu1 %vm33_vm1, %v18331_v62  ;;  %v21144_v62 = vld [vmem:[#allocation26_spill] sm:$0xff] }
  0xaf   :  { %15874 = vmatmul.mubr.msk.f32.gmra.mrb[10].mxu0 %vm33_vm1, %v18342_v63  ;;  %v21145_v63 = vld [vmem:[#allocation27_spill] sm:$0xff] }
  0xb0   :  { %15876 = vmatprep.mubr.msk.f32.mxu0 %vm33_vm1, %v21131_v31  ;;  %v21151_v31 = vld [vmem:[#allocation33_spill] sm:$0xff] }
  0xb1   :  { %16108 = vmatmul.mubr.msk.f32.gmra.mrb[10].mxu1 %vm33_vm1, %v18344_v0  ;;  %v21146_v0 = vld [vmem:[#allocation28_spill] sm:$0xff] }
  0xb2   :  { %16110 = vmatprep.mubr.msk.f32.mxu1 %vm33_vm1, %v21132_v32  ;;  %v21152_v32 = vld [vmem:[#allocation34_spill] sm:$0xff] }
  0xb3   :  { %15877 = vmatmul.mubr.msk.f32.gmra.mrb[12].mxu0 %vm33_vm1, %v21133_v36  ;;  %v21154_v36 = vld [vmem:[#allocation36_spill] sm:$0xff] }
  0xb4   :  { %15879 = vmatprep.mubr.msk.f32.mxu0 %vm33_vm1, %v21135_v49  ;;  %v21157_v49 = vld [vmem:[#allocation39_spill] sm:$0xff] }
  0xb5   :  { %16111 = vmatmul.mubr.msk.f32.gmra.mrb[12].mxu1 %vm33_vm1, %v21134_v37  ;;  %v21155_v37 = vld [vmem:[#allocation37_spill] sm:$0xff] }
  0xb6   :  { %16113 = vmatprep.mubr.msk.f32.mxu1 %vm33_vm1, %v18798_v33 }
  0xb7   :  { %15880 = vmatmul.mubr.msk.f32.gmra.mrb[14].mxu0 %vm33_vm1, %v21136_v50  ;;  %v21158_v50 = vld [vmem:[#allocation40_spill] sm:$0xff] }
  0xb8   :  { %15884 = vmatprep.mubr.msk.f32.mxu0 %vm33_vm1, %v21137_v52  ;;  %v21159_v52 = vld [vmem:[#allocation41_spill] sm:$0xff] }
  0xb9   :  { %16114 = vmatmul.mubr.msk.f32.gmra.mrb[14].mxu1 %vm33_vm1, %v18810_v38 }
  0xba   :  { %16118 = vmatprep.mubr.msk.f32.mxu1 %vm33_vm1, %v21138_v53  ;;  %v14255_v53 = vld [vmem:[%s21037_s1 + $0x20] sm:$0x7] }
  0xbb   :  { %15885 = vmatmul.mubr.msk.f32.vlgmr.msra.gmra.mrb[0].mxu0 %vm33_vm1, %v21140_v55  ;;  %v21160_v55 = vld [vmem:[#allocation19_spill] sm:$0xff] }
  0xbc   :  { %15909 = vmatpush3.msk.msra.mxu0 %vm272_vm0, %v14057_v14  ;;  %15887 = vmatprep.mubr.msk.f32.mxu0 %vm33_vm1, %v21142_v59  ;;  %v21149_v14 = vld [vmem:[#allocation31_spill] sm:$0xff] }
  0xbd   :  { %16119 = vmatmul.mubr.msk.f32.vlgmr.msra.gmra.mrb[0].mxu1 %vm33_vm1, %v21141_v56  ;;  %15934 = vmatprep.subr.msk.mxu0 %vm272_vm0, %v14075_v57  ;;  %v14093_v56 = vld [vmem:[%s21037_s1 + $0x20] sm:$0x7] }
  0xbe   :  { %16121 = vmatprep.mubr.msk.f32.mxu1 %vm33_vm1, %v21143_v61  ;;  %16143 = vmatpush3.msk.msra.mxu1 %vm272_vm0, %v14219_v5  ;;  %v21150_v5 = vld [vmem:[#allocation32_spill] sm:$0xff] }
  0xbf   :  { %16168 = vmatprep.subr.msk.mxu1 %vm272_vm0, %v14237_v58  ;;  %15888 = vmatmul.mubr.msk.f32.gmra.mrb[2].mxu0 %vm33_vm1, %v21144_v62 }
  0xc0   :  { %15890 = vmatprep.mubr.msk.f32.mxu0 %vm33_vm1, %v21146_v0 }
  0xc1   :  { %16122 = vmatmul.mubr.msk.f32.gmra.mrb[2].mxu1 %vm33_vm1, %v21145_v63 }
  0xc2   :  { %16124 = vmatprep.mubr.msk.f32.mxu1 %vm33_vm1, %v21147_v4 }
  0xc3   :  { %15891 = vmatmul.mubr.msk.f32.gmra.mrb[4].mxu0 %vm33_vm1, %v21148_v20 }
  0xc4   :  { %15893 = vmatprep.mubr.msk.f32.mxu0 %vm33_vm1, %v21150_v5 }
  0xc5   :  { %16125 = vmatmul.mubr.msk.f32.gmra.mrb[4].mxu1 %vm33_vm1, %v21149_v14 }
  0xc6   :  { %16127 = vmatprep.mubr.msk.f32.mxu1 %vm33_vm1, %v21151_v31 }
  0xc7   :  { %15894 = vmatmul.mubr.msk.f32.gmra.mrb[6].mxu0 %vm33_vm1, %v21152_v32 }
  0xc8   :  { %15896 = vmatprep.mubr.msk.f32.mxu0 %vm33_vm1, %v21154_v36 }
  0xc9   :  { %16128 = vmatmul.mubr.msk.f32.gmra.mrb[6].mxu1 %vm33_vm1, %v21153_v35 }
  0xca   :  { %16130 = vmatprep.mubr.msk.f32.mxu1 %vm33_vm1, %v21155_v37 }
  0xcb   :  { %15897 = vmatmul.mubr.msk.f32.gmra.mrb[8].mxu0 %vm33_vm1, %v18616_v28 }
  0xcc   :  { %15899 = vmatprep.mubr.msk.f32.mxu0 %vm33_vm1, %v21156_v40 }
  0xcd   :  { %16131 = vmatmul.mubr.msk.f32.gmra.mrb[8].mxu1 %vm33_vm1, %v18618_v30 }
  0xce   :  { %16133 = vmatprep.mubr.msk.f32.mxu1 %vm33_vm1, %v21157_v49 }
  0xcf   :  { %15900 = vmatmul.mubr.msk.f32.gmra.mrb[10].mxu0 %vm33_vm1, %v18632_v12 }
  0xd0   :  { %15902 = vmatprep.mubr.msk.f32.mxu0 %vm33_vm1, %v18636_v3 }
  0xd1   :  { %16134 = vmatmul.mubr.msk.f32.gmra.mrb[10].mxu1 %vm33_vm1, %v18634_v13 }
  0xd2   :  { %16136 = vmatprep.mubr.msk.f32.mxu1 %vm33_vm1, %v21158_v50 }
  0xd3   :  { %15903 = vmatmul.mubr.msk.f32.gmra.mrb[12].mxu0 %vm33_vm1, %v18648_v1 }
  0xd4   :  { %15905 = vmatprep.mubr.msk.f32.mxu0 %vm33_vm1, %v21160_v55 }
  0xd5   :  { %16137 = vmatmul.mubr.msk.f32.gmra.mrb[12].mxu1 %vm33_vm1, %v21159_v52 }
  0xd6   :  { %16139 = vmatprep.mubr.msk.f32.mxu1 %vm33_vm1, %v18800_v34 }
  0xd7   :  { %15906 = vmatmul.mubr.msk.f32.gmra.mrb[14].mxu0 %vm33_vm1, %v21161_v54 }
  0xd8   :  { %15910 = vmatprep.mubr.msk.f32.mxu0 %vm33_vm1, %v18399_v16  ;;  %v3698_v16 = vld [vmem:[#allocation2 + $0x198] sm:$0xff] }
  0xd9   :  { %16140 = vmatmul.mubr.msk.f32.gmra.mrb[14].mxu1 %vm33_vm1, %v18812_v39 }
  0xda   :  { %16144 = vmatprep.mubr.msk.f32.mxu1 %vm33_vm1, %v18401_v17  ;;  %v3699_v17 = vld [vmem:[#allocation2 + $0x1a0] sm:$0xff] }
  0xdb   :  { %15911 = vmatmul.mubr.msk.f32.vlgmr.msra.gmra.mrb[0].mxu0 %vm33_vm1, %v18429_v22  ;;  %v1768_v22 = vld [vmem:[#allocation2 + $0x31] sm:$0xff] }
  0xdc   :  { %15935 = vmatpush3.msk.msra.mxu0 %vm272_vm0, %v14075_v57  ;;  %15913 = vmatprep.mubr.msk.f32.mxu0 %vm33_vm1, %v18434_v24  ;;  %v1770_v24 = vld [vmem:[#allocation2 + $0x49] sm:$0xff] }
  0xdd   :  { %16145 = vmatmul.mubr.msk.f32.vlgmr.msra.gmra.mrb[0].mxu1 %vm33_vm1, %v18431_v23  ;;  %15960 = vmatprep.subr.msk.mxu0 %vm272_vm0, %v14093_v56  ;;  %v3913_v23 = vld [vmem:[#allocation2 + $0xf1] sm:$0xff] }
  0xde   :  { %16147 = vmatprep.mubr.msk.f32.mxu1 %vm33_vm1, %v18436_v25  ;;  %16169 = vmatpush3.msk.msra.mxu1 %vm272_vm0, %v14237_v58  ;;  %v3915_v25 = vld [vmem:[#allocation2 + $0x109] sm:$0xff] }
  0xdf   :  { %16194 = vmatprep.subr.msk.mxu1 %vm272_vm0, %v14255_v53  ;;  %15914 = vmatmul.mubr.msk.f32.gmra.mrb[2].mxu0 %vm33_vm1, %v18446_v26  ;;  %v1772_v26 = vld [vmem:[#allocation2 + $0x61] sm:$0xff] }
  0xe0   :  { %15916 = vmatprep.mubr.msk.f32.mxu0 %vm33_vm1, %v18450_v29  ;;  %v1773_v29 = vld [vmem:[#allocation2 + $0x69] sm:$0xff] }
  0xe1   :  { %16148 = vmatmul.mubr.msk.f32.gmra.mrb[2].mxu1 %vm33_vm1, %v18448_v27  ;;  %v3917_v27 = vld [vmem:[#allocation2 + $0x121] sm:$0xff] }
  0xe2   :  { %16150 = vmatprep.mubr.msk.f32.mxu1 %vm33_vm1, %v18452_v41  ;;  %v3918_v41 = vld [vmem:[#allocation2 + $0x129] sm:$0xff] }
  0xe3   :  { %15917 = vmatmul.mubr.msk.f32.gmra.mrb[4].mxu0 %vm33_vm1, %v18462_v42  ;;  %v1774_v42 = vld [vmem:[#allocation2 + $0x79] sm:$0xff] }
  0xe4   :  { %15919 = vmatprep.mubr.msk.f32.mxu0 %vm33_vm1, %v18466_v44  ;;  %v1775_v44 = vld [vmem:[#allocation2 + $0x81] sm:$0xff] }
  0xe5   :  { %16151 = vmatmul.mubr.msk.f32.gmra.mrb[4].mxu1 %vm33_vm1, %v18464_v43  ;;  %v3919_v43 = vld [vmem:[#allocation2 + $0x139] sm:$0xff] }
  0xe6   :  { %16153 = vmatprep.mubr.msk.f32.mxu1 %vm33_vm1, %v18468_v45  ;;  %v3920_v45 = vld [vmem:[#allocation2 + $0x141] sm:$0xff] }
  0xe7   :  { %15920 = vmatmul.mubr.msk.f32.gmra.mrb[6].mxu0 %vm33_vm1, %v18478_v46  ;;  %v1776_v46 = vld [vmem:[#allocation2 + $0x91] sm:$0xff] }
  0xe8   :  { %15922 = vmatprep.mubr.msk.f32.mxu0 %vm33_vm1, %v18482_v48  ;;  %v1777_v48 = vld [vmem:[#allocation2 + $0x99] sm:$0xff] }
  0xe9   :  { %16154 = vmatmul.mubr.msk.f32.gmra.mrb[6].mxu1 %vm33_vm1, %v18480_v47  ;;  %v3921_v47 = vld [vmem:[#allocation2 + $0x151] sm:$0xff] }
  0xea   :  { %16156 = vmatprep.mubr.msk.f32.mxu1 %vm33_vm1, %v18484_v51  ;;  %v3922_v51 = vld [vmem:[#allocation2 + $0x159] sm:$0xff] }
  0xeb   :  { %15923 = vmatmul.mubr.msk.f32.gmra.mrb[8].mxu0 %vm33_vm1, %v18494_v60  ;;  %v1778_v60 = vld [vmem:[#allocation2 + $0xa9] sm:$0xff] }
  0xec   :  { %15925 = vmatprep.mubr.msk.f32.mxu0 %vm33_vm1, %v18498_v8  ;;  %v1779_v8 = vld [vmem:[#allocation2 + $0xb1] sm:$0xff] }
  0xed   :  { %16157 = vmatmul.mubr.msk.f32.gmra.mrb[8].mxu1 %vm33_vm1, %v18496_v6  ;;  %v3923_v6 = vld [vmem:[#allocation2 + $0x169] sm:$0xff] }
  0xee   :  { %16159 = vmatprep.mubr.msk.f32.mxu1 %vm33_vm1, %v18500_v18  ;;  %v3924_v18 = vld [vmem:[#allocation2 + $0x171] sm:$0xff] }
  0xef   :  { %15926 = vmatmul.mubr.msk.f32.gmra.mrb[10].mxu0 %vm33_vm1, %v18510_v19  ;;  %v1780_v19 = vld [vmem:[#allocation2 + $0xc1] sm:$0xff] }
  0xf0   :  { %15928 = vmatprep.mubr.msk.f32.mxu0 %vm33_vm1, %v18362_v7  ;;  %v1769_v7 = vld [vmem:[#allocation2 + $0x39] sm:$0xff] }
  0xf1   :  { %16160 = vmatmul.mubr.msk.f32.gmra.mrb[10].mxu1 %vm33_vm1, %v18512_v21  ;;  %v1781_v21 = vld [vmem:[#allocation2 + $0xc9] sm:$0xff] }
  0xf2   :  { %16162 = vmatprep.mubr.msk.f32.mxu1 %vm33_vm1, %v18720_v2  ;;  %v1782_v2 = vld [vmem:[#allocation2 + $0xd9] sm:$0xff] }
  0xf3   :  { %15929 = vmatmul.mubr.msk.f32.gmra.mrb[12].mxu0 %vm33_vm1, %v18371_v9  ;;  %v3914_v9 = vld [vmem:[#allocation2 + $0xf9] sm:$0xff] }
  0xf4   :  { %15931 = vmatprep.mubr.msk.f32.mxu0 %vm33_vm1, %v18375_v11  ;;  %v1771_v11 = vld [vmem:[#allocation2 + $0x51] sm:$0xff] }
  0xf5   :  { %16163 = vmatmul.mubr.msk.f32.gmra.mrb[12].mxu1 %vm33_vm1, %v18730_v10  ;;  %v3927_v10 = vld [vmem:[#allocation2 + $0x199] sm:$0xff] }
  0xf6   :  { %16165 = vmatprep.mubr.msk.f32.mxu1 %vm33_vm1, %v3698_v16 }
  0xf7   :  { %15932 = vmatmul.mubr.msk.f32.gmra.mrb[14].mxu0 %vm33_vm1, %v18395_v15  ;;  %v3916_v15 = vld [vmem:[#allocation2 + $0x111] sm:$0xff] }
  0xf8   :  { %15936 = vmatprep.mubr.msk.f32.mxu0 %vm33_vm1, %v1768_v22 }
  0xf9   :  { %16166 = vmatmul.mubr.msk.f32.gmra.mrb[14].mxu1 %vm33_vm1, %v3699_v17 }
  0xfa   :  { %16170 = vmatprep.mubr.msk.f32.mxu1 %vm33_vm1, %v3913_v23 }
  0xfb   :  { %15937 = vmatmul.mubr.msk.f32.vlgmr.msra.gmra.mrb[0].mxu0 %vm33_vm1, %v1769_v7 }
  0xfc   :  { %15961 = vmatpush3.msk.msra.mxu0 %vm272_vm0, %v14093_v56  ;;  %15939 = vmatprep.mubr.msk.f32.mxu0 %vm33_vm1, %v1770_v24  ;;  %v3928_v56 = vld [vmem:[#allocation2 + $0x1a1] sm:$0xff] }
  0xfd   :  { %16171 = vmatmul.mubr.msk.f32.vlgmr.msra.gmra.mrb[0].mxu1 %vm33_vm1, %v3914_v9 }
  0xfe   :  { %16173 = vmatprep.mubr.msk.f32.mxu1 %vm33_vm1, %v3915_v25  ;;  %16195 = vmatpush3.msk.msra.mxu1 %vm272_vm0, %v14255_v53  ;;  %v1783_v53 = vld [vmem:[#allocation2 + $0xe1] sm:$0xff] }
  0xff   :  { %15940 = vmatmul.mubr.msk.f32.gmra.mrb[2].mxu0 %vm33_vm1, %v1771_v11 }
 0x100   :  { %15942 = vmatprep.mubr.msk.f32.mxu0 %vm33_vm1, %v1772_v26 }
 0x101   :  { %16174 = vmatmul.mubr.msk.f32.gmra.mrb[2].mxu1 %vm33_vm1, %v3916_v15 }
 0x102   :  { %16176 = vmatprep.mubr.msk.f32.mxu1 %vm33_vm1, %v3917_v27 }
 0x103   :  { %15943 = vmatmul.mubr.msk.f32.gmra.mrb[4].mxu0 %vm33_vm1, %v1773_v29 }
 0x104   :  { %15945 = vmatprep.mubr.msk.f32.mxu0 %vm33_vm1, %v1774_v42 }
 0x105   :  { %16177 = vmatmul.mubr.msk.f32.gmra.mrb[4].mxu1 %vm33_vm1, %v3918_v41 }
 0x106   :  { %16179 = vmatprep.mubr.msk.f32.mxu1 %vm33_vm1, %v3919_v43 }
 0x107   :  { %15946 = vmatmul.mubr.msk.f32.gmra.mrb[6].mxu0 %vm33_vm1, %v1775_v44 }
 0x108   :  { %15948 = vmatprep.mubr.msk.f32.mxu0 %vm33_vm1, %v1776_v46 }
 0x109   :  { %16180 = vmatmul.mubr.msk.f32.gmra.mrb[6].mxu1 %vm33_vm1, %v3920_v45 }
 0x10a   :  { %16182 = vmatprep.mubr.msk.f32.mxu1 %vm33_vm1, %v3921_v47 }
 0x10b   :  { %15949 = vmatmul.mubr.msk.f32.gmra.mrb[8].mxu0 %vm33_vm1, %v1777_v48 }
 0x10c   :  { %15951 = vmatprep.mubr.msk.f32.mxu0 %vm33_vm1, %v1778_v60 }
 0x10d   :  { %16183 = vmatmul.mubr.msk.f32.gmra.mrb[8].mxu1 %vm33_vm1, %v3922_v51 }
 0x10e   :  { %16185 = vmatprep.mubr.msk.f32.mxu1 %vm33_vm1, %v3923_v6 }
 0x10f   :  { %15952 = vmatmul.mubr.msk.f32.gmra.mrb[10].mxu0 %vm33_vm1, %v1779_v8 }
 0x110   :  { %15954 = vmatprep.mubr.msk.f32.mxu0 %vm33_vm1, %v1780_v19 }
 0x111   :  { %16186 = vmatmul.mubr.msk.f32.gmra.mrb[10].mxu1 %vm33_vm1, %v3924_v18 }
 0x112   :  { %16188 = vmatprep.mubr.msk.f32.mxu1 %vm33_vm1, %v18798_v33 }
 0x113   :  { %15955 = vmatmul.mubr.msk.f32.gmra.mrb[12].mxu0 %vm33_vm1, %v1781_v21 }
 0x114   :  { %15957 = vmatprep.mubr.msk.f32.mxu0 %vm33_vm1, %v1782_v2 }
 0x115   :  { %16189 = vmatmul.mubr.msk.f32.gmra.mrb[12].mxu1 %vm33_vm1, %v18810_v38  ;;  %v19129_v38 = vld [vmem:[%s21038_s2] ss:$0 sm:$0xff] }
 0x116   :  { %16191 = vmatprep.mubr.msk.f32.mxu1 %vm33_vm1, %v3927_v10 }
 0x117   :  { %15958 = vmatmul.mubr.msk.f32.gmra.mrb[14].mxu0 %vm33_vm1, %v1783_v53 }
 0x118   :  { %15962 = vmatprep.mubr.msk.f32.mxu0 %vm33_vm1, %v21142_v59 }
 0x119   :  { %16192 = vmatmul.mubr.msk.f32.gmra.mrb[14].mxu1 %vm33_vm1, %v3928_v56 }
 0x11a   :  { %16196 = vmatprep.mubr.msk.f32.mxu1 %vm33_vm1, %v21143_v61 }
 0x11b   :  { %15963 = vmatmul.mubr.msk.f32.vlgmr.msra.gmra.mrb[0].mxu0 %vm33_vm1, %v21144_v62 }
 0x11c   :  { %15965 = vmatprep.mubr.msk.f32.mxu0 %vm33_vm1, %v21146_v0 }
 0x11d   :  { %16197 = vmatmul.mubr.msk.f32.vlgmr.msra.gmra.mrb[0].mxu1 %vm33_vm1, %v21145_v63 }
 0x11e   :  { %16199 = vmatprep.mubr.msk.f32.mxu1 %vm33_vm1, %v21147_v4 }
 0x11f   :  { %15966 = vmatmul.mubr.msk.f32.gmra.mrb[2].mxu0 %vm33_vm1, %v21148_v20 }
 0x120   :  { %15968 = vmatprep.mubr.msk.f32.mxu0 %vm33_vm1, %v21150_v5 }
 0x121   :  { %16200 = vmatmul.mubr.msk.f32.gmra.mrb[2].mxu1 %vm33_vm1, %v21149_v14 }
 0x122   :  { %16202 = vmatprep.mubr.msk.f32.mxu1 %vm33_vm1, %v21151_v31 }
 0x123   :  { %15969 = vmatmul.mubr.msk.f32.gmra.mrb[4].mxu0 %vm33_vm1, %v21152_v32 }
 0x124   :  { %15971 = vmatprep.mubr.msk.f32.mxu0 %vm33_vm1, %v21154_v36 }
 0x125   :  { %16203 = vmatmul.mubr.msk.f32.gmra.mrb[4].mxu1 %vm33_vm1, %v21153_v35 }
 0x126   :  { %16205 = vmatprep.mubr.msk.f32.mxu1 %vm33_vm1, %v21155_v37 }
 0x127   :  { %15972 = vmatmul.mubr.msk.f32.gmra.mrb[6].mxu0 %vm33_vm1, %v18616_v28  ;;  %v21163_v28 = vld [vmem:[#allocation23_spill] sm:$0xff] }
 0x128   :  { %15974 = vmatprep.mubr.msk.f32.mxu0 %vm33_vm1, %v21156_v40 }
 0x129   :  { %16206 = vmatmul.mubr.msk.f32.gmra.mrb[6].mxu1 %vm33_vm1, %v18618_v30  ;;  %v4156_v30 = vld [vmem:[#allocation2 + $0x19a] sm:$0xff] }
 0x12a   :  { %16208 = vmatprep.mubr.msk.f32.mxu1 %vm33_vm1, %v21157_v49 }
 0x12b   :  { %15975 = vmatmul.mubr.msk.f32.gmra.mrb[8].mxu0 %vm33_vm1, %v18632_v12  ;;  %v21164_v12 = vmov 0.0  }
 0x12c   :  { %15977 = vmatprep.mubr.msk.f32.mxu0 %vm33_vm1, %v18636_v3  ;;  %v21162_v3 = vld [vmem:[#allocation21_spill] sm:$0xff]  ;;  %82 = vst.msk [vmem:[#allocation3 + $0x8] sm:$0x3] %vm81_vm5, %v21164_v12  ;;  %85 = vst.msk [vmem:[#allocation3 + $0x98] sm:$0x3] %vm81_vm5, %v21164_v12 }
 0x12d   :  { %16209 = vmatmul.mubr.msk.f32.gmra.mrb[8].mxu1 %vm33_vm1, %v18634_v13  ;;  %87 = vst.msk [vmem:[#allocation3] sm:$0x1] %vm86_vm6, %v21164_v12  ;;  %88 = vst.msk [vmem:[#allocation3 + $0x10] sm:$0x1] %vm86_vm6, %v21164_v12  ;;  %v14274_v13 = vld [vmem:[%s21039_s3 + $0x8] sm:$0xff] }
 0x12e   :  { %16211 = vmatprep.mubr.msk.f32.mxu1 %vm33_vm1, %v21158_v50  ;;  %89 = vst.msk [vmem:[#allocation3 + $0x20] sm:$0x1] %vm86_vm6, %v21164_v12  ;;  %90 = vst.msk [vmem:[#allocation3 + $0x30] sm:$0x1] %vm86_vm6, %v21164_v12  ;;  %16220 = vmatprep.subr.mxu0 %v14274_v13 }
 0x12f   :  { %15978 = vmatmul.mubr.msk.f32.gmra.mrb[10].mxu0 %vm33_vm1, %v18648_v1  ;;  %v4157_v1 = vld [vmem:[#allocation2 + $0x1a2] sm:$0xff]  ;;  %91 = vst.msk [vmem:[#allocation3 + $0x40] sm:$0x1] %vm86_vm6, %v21164_v12  ;;  %92 = vst.msk [vmem:[#allocation3 + $0x50] sm:$0x1] %vm86_vm6, %v21164_v12 }
 0x130   :  { %15980 = vmatprep.mubr.msk.f32.mxu0 %vm33_vm1, %v21160_v55  ;;  %93 = vst.msk [vmem:[#allocation3 + $0x60] sm:$0x1] %vm86_vm6, %v21164_v12  ;;  %94 = vst.msk [vmem:[#allocation3 + $0x70] sm:$0x1] %vm86_vm6, %v21164_v12  ;;  %16221 = vmatpush3.msra.mxu0 %v14274_v13 }
 0x131   :  { %16212 = vmatmul.mubr.msk.f32.gmra.mrb[10].mxu1 %vm33_vm1, %v21159_v52  ;;  %95 = vst.msk [vmem:[#allocation3 + $0x80] sm:$0x1] %vm86_vm6, %v21164_v12  ;;  %96 = vst.msk [vmem:[#allocation3 + $0x90] sm:$0x1] %vm86_vm6, %v21164_v12 }
 0x132   :  { %16214 = vmatprep.mubr.msk.f32.mxu1 %vm33_vm1, %v18800_v34  ;;  %97 = vst.msk [vmem:[#allocation3 + $0x9] sm:$0x1] %vm86_vm6, %v21164_v12  ;;  %98 = vst.msk [vmem:[#allocation3 + $0x19] sm:$0x1] %vm86_vm6, %v21164_v12  ;;  %v19123_v34 = vld [vmem:[%s21039_s3] sm:$0xff] }
 0x133   :  { %15981 = vmatmul.mubr.msk.f32.gmra.mrb[12].mxu0 %vm33_vm1, %v21161_v54  ;;  %99 = vst.msk [vmem:[#allocation3 + $0x29] sm:$0x1] %vm86_vm6, %v21164_v12  ;;  %100 = vst.msk [vmem:[#allocation3 + $0x39] sm:$0x1] %vm86_vm6, %v21164_v12  ;;  %v4476_v33 = vld [vmem:[#allocation3 + $0x1] sm:$0xff]  ;;  %16234 = vmatprep.subr.mxu0 %v19123_v34 }
 0x134   :  { %15983 = vmatprep.mubr.msk.f32.mxu0 %vm33_vm1, %v21162_v3  ;;  %101 = vst.msk [vmem:[#allocation3 + $0x49] sm:$0x1] %vm86_vm6, %v21164_v12  ;;  %102 = vst.msk [vmem:[#allocation3 + $0x59] sm:$0x1] %vm86_vm6, %v21164_v12 }
 0x135   :  { %16215 = vmatmul.mubr.msk.f32.gmra.mrb[12].mxu1 %vm33_vm1, %v18812_v39  ;;  %103 = vst.msk [vmem:[#allocation3 + $0x69] sm:$0x1] %vm86_vm6, %v21164_v12  ;;  %104 = vst.msk [vmem:[#allocation3 + $0x79] sm:$0x1] %vm86_vm6, %v21164_v12 }
 0x136   :  { %16217 = vmatprep.mubr.msk.f32.mxu1 %vm33_vm1, %v4156_v30  ;;  %105 = vst.msk [vmem:[#allocation3 + $0x89] sm:$0x1] %vm86_vm6, %v21164_v12  ;;  %106 = vst.msk [vmem:[#allocation3 + $0x99] sm:$0x1] %vm86_vm6, %v21164_v12 }
 0x137   :  { %15984 = vmatmul.mubr.msk.f32.gmra.mrb[14].mxu0 %vm33_vm1, %v21163_v28  ;;  %108 = vst.msk [vmem:[#allocation4] sm:$0x3f] %vm107_vm7, %v21164_v12  ;;  %110 = vst.msk [vmem:[#allocation4 + $0x28] sm:$0x3f] %vm107_vm7, %v21164_v12 }
 0x138   :  { %16222 = vmatprep.mubr.msk.f32.mxu0 %vm79_vm4, %v4476_v33  ;;  %112 = vst.msk [vmem:[#allocation4] sm:$0x1] %vm111_vm8, %v21164_v12  ;;  %113 = vst.msk [vmem:[#allocation4 + $0x8] sm:$0x1] %vm111_vm8, %v21164_v12 }
 0x139   :  { %16218 = vmatmul.mubr.msk.f32.gmra.mrb[14].mxu1 %vm33_vm1, %v4157_v1  ;;  %114 = vst.msk [vmem:[#allocation4 + $0x10] sm:$0x1] %vm111_vm8, %v21164_v12  ;;  %115 = vst.msk [vmem:[#allocation4 + $0x18] sm:$0x1] %vm111_vm8, %v21164_v12 }
 0x13a   :  { %116 = vst.msk [vmem:[#allocation4 + $0x20] sm:$0x1] %vm111_vm8, %v21164_v12  ;;  %117 = vst.msk [vmem:[#allocation4 + $0x28] sm:$0x1] %vm111_vm8, %v21164_v12 }
 0x13b   :  { %118 = vst.msk [vmem:[#allocation4 + $0x5] sm:$0x1] %vm111_vm8, %v21164_v12  ;;  %119 = vst.msk [vmem:[#allocation4 + $0xd] sm:$0x1] %vm111_vm8, %v21164_v12 }
 0x13c   :  { %120 = vst.msk [vmem:[#allocation4 + $0x15] sm:$0x1] %vm111_vm8, %v21164_v12  ;;  %121 = vst.msk [vmem:[#allocation4 + $0x1d] sm:$0x1] %vm111_vm8, %v21164_v12 }
 0x13d   :  { %122 = vst.msk [vmem:[#allocation4 + $0x25] sm:$0x1] %vm111_vm8, %v21164_v12  ;;  %123 = vst.msk [vmem:[#allocation4 + $0x2d] sm:$0x1] %vm111_vm8, %v21164_v12 }
 0x1ee   :  { %v15964_v39 = vpop.f32.mrb[0].mxu0 }
 0x1ef   :  { %v2236_v57 = vadd.f32 %v15964_v39, %v19129_v38  ;;  %v2133_v58 = vpop.f32.mrb[1].mxu0 }
 0x1f0   :  { %v16198_v54 = vpop.f32.mrb[0].mxu1  ;;  %v2235_v61 = vadd.f32 %v19129_v38, %v2133_v58 }
 0x1f1   :  { %v4276_v59 = vpop.f32.mrb[1].mxu1  ;;  %v2252_v62 = vmax.f32 %v2236_v57, 0.0  ;;  %v4379_v32 = vadd.f32 %v16198_v54, %v19129_v38 }
 0x1f2   :  { %v2251_v63 = vmax.f32 %v2235_v61, 0.0  ;;  %v15967_v0 = vpop.f32.mrb[2].mxu0  ;;  %v4378_v36 = vadd.f32 %v19129_v38, %v4276_v59 }
 0x1f3   :  { %2268 = vst.msk [vmem:[#allocation6 + $0x8] sm:$0xff] %vm79_vm4, %v2252_v62  ;;  %v2238_v20 = vadd.f32 %v15967_v0, %v19129_v38  ;;  %v2143_v14 = vpop.f32.mrb[3].mxu0  ;;  %v4395_v17 = vmax.f32 %v4379_v32, 0.0 }
 0x1f4   :  { %v16201_v4 = vpop.f32.mrb[2].mxu1  ;;  %2267 = vst.msk [vmem:[#allocation6] sm:$0xff] %vm79_vm4, %v2251_v63  ;;  %v2237_v31 = vadd.f32 %v19129_v38, %v2143_v14  ;;  %v4394_v23 = vmax.f32 %v4378_v36, 0.0 }
 0x1f5   :  { %v4286_v5 = vpop.f32.mrb[3].mxu1  ;;  %v2254_v35 = vmax.f32 %v2238_v20, 0.0  ;;  %v4381_v7 = vadd.f32 %v16201_v4, %v19129_v38 }
 0x1f6   :  { %v2253_v37 = vmax.f32 %v2237_v31, 0.0  ;;  %v15970_v40 = vpop.f32.mrb[4].mxu0  ;;  %v4380_v9 = vadd.f32 %v19129_v38, %v4286_v5 }
 0x1f7   :  { %2270 = vst.msk [vmem:[#allocation6 + $0x18] sm:$0xff] %vm79_vm4, %v2254_v35  ;;  %v2240_v50 = vadd.f32 %v15970_v40, %v19129_v38  ;;  %v2153_v52 = vpop.f32.mrb[5].mxu0  ;;  %v4397_v47 = vmax.f32 %v4381_v7, 0.0 }
 0x1f8   :  { %v16204_v49 = vpop.f32.mrb[4].mxu1  ;;  %2269 = vst.msk [vmem:[#allocation6 + $0x10] sm:$0xff] %vm79_vm4, %v2253_v37  ;;  %v2239_v16 = vadd.f32 %v19129_v38, %v2153_v52  ;;  %v4396_v48 = vmax.f32 %v4380_v9, 0.0 }
 0x1f9   :  { %v4296_v55 = vpop.f32.mrb[5].mxu1  ;;  %v2256_v22 = vmax.f32 %v2240_v50, 0.0  ;;  %v4383_v43 = vadd.f32 %v16204_v49, %v19129_v38 }
 0x1fa   :  { %v2255_v24 = vmax.f32 %v2239_v16, 0.0  ;;  %v15973_v25 = vpop.f32.mrb[6].mxu0  ;;  %v4382_v44 = vadd.f32 %v19129_v38, %v4296_v55 }
 0x1fb   :  { %v2283_v15 = vld [vmem:[#allocation6] ss:$2 sm:$0xff]  ;;  %v2299_v26 = vld [vmem:[#allocation6 + $0x1] ss:$2 sm:$0xff]  ;;  %2272 = vst.msk [vmem:[#allocation6 + $0x28] sm:$0xff] %vm79_vm4, %v2256_v22  ;;  %v2242_v27 = vadd.f32 %v15973_v25, %v19129_v38  ;;  %v2163_v29 = vpop.f32.mrb[7].mxu0 }
 0x1fc   :  { %v16207_v11 = vpop.f32.mrb[6].mxu1  ;;  %4410 = vst.msk [vmem:[#allocation6] sm:$0xff] %vm79_vm4, %v4394_v23  ;;  %4411 = vst.msk [vmem:[#allocation6 + $0x8] sm:$0xff] %vm79_vm4, %v4395_v17  ;;  %v2241_v42 = vadd.f32 %v19129_v38, %v2163_v29  ;;  %v2314_v46 = vmax.f32 %v2283_v15, %v2299_v26  ;;  %v4399_v56 = vmax.f32 %v4383_v43, 0.0  ;;  %v4398_v30 = vmax.f32 %v4382_v44, 0.0 }
 0x1fd   :  { %v4306_v41 = vpop.f32.mrb[7].mxu1  ;;  %2271 = vst.msk [vmem:[#allocation6 + $0x20] sm:$0xff] %vm79_vm4, %v2255_v24  ;;  %v2258_v45 = vmax.f32 %v2242_v27, 0.0  ;;  %v4385_v3 = vadd.f32 %v16207_v11, %v19129_v38 }
 0x1fe   :  { %v2257_v51 = vmax.f32 %v2241_v42, 0.0  ;;  %v15976_v60 = vpop.f32.mrb[8].mxu0  ;;  %v2322_v28 = vsel %vm79_vm4, %v2314_v46, -inf  ;;  %v4384_v33 = vadd.f32 %v19129_v38, %v4306_v41 }
 0x1ff   :  { %v2285_v8 = vld [vmem:[#allocation6 + $0x10] ss:$2 sm:$0xff]  ;;  %v2301_v18 = vld [vmem:[#allocation6 + $0x11] ss:$2 sm:$0xff]  ;;  %2274 = vst.msk [vmem:[#allocation6 + $0x38] sm:$0xff] %vm79_vm4, %v2258_v45  ;;  %v2244_v19 = vadd.f32 %v15976_v60, %v19129_v38  ;;  %v2173_v21 = vpop.f32.mrb[9].mxu0 }
 0x200   :  { %v16210_v6 = vpop.f32.mrb[8].mxu1  ;;  %v2315_v10 = vmax.f32 %v2285_v8, %v2301_v18  ;;  %4412 = vst.msk [vmem:[#allocation6 + $0x10] sm:$0xff] %vm79_vm4, %v4396_v48  ;;  %4413 = vst.msk [vmem:[#allocation6 + $0x18] sm:$0xff] %vm79_vm4, %v4397_v47  ;;  %v2243_v53 = vadd.f32 %v19129_v38, %v2173_v21  ;;  %v4401_v14 = vmax.f32 %v4385_v3, 0.0  ;;  %v4400_v32 = vmax.f32 %v4384_v33, 0.0 }
 0x201   :  { %v4316_v2 = vpop.f32.mrb[9].mxu1  ;;  %2273 = vst.msk [vmem:[#allocation6 + $0x30] sm:$0xff] %vm79_vm4, %v2257_v51  ;;  %v2260_v1 = vmax.f32 %v2244_v19, 0.0  ;;  %v4387_v35 = vadd.f32 %v16210_v6, %v19129_v38 }
 0x202   :  { %v2323_v13 = vsel %vm79_vm4, %v2315_v10, -inf  ;;  %v2259_v39 = vmax.f32 %v2243_v53, 0.0  ;;  %v15979_v54 = vpop.f32.mrb[10].mxu0  ;;  %v4386_v36 = vadd.f32 %v19129_v38, %v4316_v2 }
 0x203   :  { %v4426_v58 = vld [vmem:[#allocation6] ss:$2 sm:$0xff]  ;;  %v4434_v59 = vld [vmem:[#allocation6 + $0x1] ss:$2 sm:$0xff]  ;;  %v2324_v61 = vmax.f32 %v2322_v28, %v2323_v13  ;;  %2276 = vst.msk [vmem:[#allocation6 + $0x48] sm:$0xff] %vm79_vm4, %v2260_v1  ;;  %v2246_v63 = vadd.f32 %v15979_v54, %v19129_v38  ;;  %v2183_v4 = vpop.f32.mrb[11].mxu0 }
 0x204   :  { %v16213_v57 = vpop.f32.mrb[10].mxu1  ;;  %v2287_v62 = vld [vmem:[#allocation6 + $0x20] ss:$2 sm:$0xff]  ;;  %v2303_v0 = vld [vmem:[#allocation6 + $0x21] ss:$2 sm:$0xff]  ;;  %2275 = vst.msk [vmem:[#allocation6 + $0x40] sm:$0xff] %vm79_vm4, %v2259_v39  ;;  %v2245_v31 = vadd.f32 %v19129_v38, %v2183_v4  ;;  %v4442_v49 = vmax.f32 %v4426_v58, %v4434_v59 }
 0x205   :  { %v4326_v20 = vpop.f32.mrb[11].mxu1  ;;  %2335 = vst.msk [vmem:[#allocation3 + $0x11] sm:$0xff] %vm79_vm4, %v2324_v61  ;;  %4414 = vst.msk [vmem:[#allocation6 + $0x20] sm:$0xff] %vm79_vm4, %v4398_v30  ;;  %v2262_v5 = vmax.f32 %v2246_v63, 0.0  ;;  %v2316_v24 = vmax.f32 %v2287_v62, %v2303_v0  ;;  %v4403_v26 = vmax.f32 %v4387_v35, 0.0  ;;  %v4402_v27 = vmax.f32 %v4386_v36, 0.0 }
 0x206   :  { %4415 = vst.msk [vmem:[#allocation6 + $0x28] sm:$0xff] %vm79_vm4, %v4399_v56  ;;  %v15982_v37 = vpop.f32.mrb[12].mxu0  ;;  %v2261_v22 = vmax.f32 %v2245_v31, 0.0  ;;  %v4450_v42 = vsel %vm79_vm4, %v4442_v49, -inf  ;;  %v4389_v8 = vadd.f32 %v16213_v57, %v19129_v38  ;;  %v4388_v18 = vadd.f32 %v19129_v38, %v4326_v20  ;;  %v19196_v30 = vld [vmem:[%s21039_s3 + $0x10] sm:$0xff] }
 0x207   :  { %v4427_v50 = vld [vmem:[#allocation6 + $0x10] ss:$2 sm:$0xff]  ;;  %v4435_v52 = vld [vmem:[#allocation6 + $0x11] ss:$2 sm:$0xff]  ;;  %2278 = vst.msk [vmem:[#allocation6 + $0x58] sm:$0xff] %vm79_vm4, %v2262_v5  ;;  %v2248_v16 = vadd.f32 %v15982_v37, %v19129_v38  ;;  %v2193_v23 = vpop.f32.mrb[13].mxu0 }
 0x208   :  { %v16216_v40 = vpop.f32.mrb[12].mxu1  ;;  %v2289_v55 = vld [vmem:[#allocation6 + $0x30] ss:$2 sm:$0xff]  ;;  %v2305_v17 = vld [vmem:[#allocation6 + $0x31] ss:$2 sm:$0xff]  ;;  %v4443_v9 = vmax.f32 %v4427_v50, %v4435_v52  ;;  %v2247_v15 = vadd.f32 %v19129_v38, %v2193_v23  ;;  %2277 = vst.msk [vmem:[#allocation6 + $0x50] sm:$0xff] %vm79_vm4, %v2261_v22 }
 0x209   :  { %v4336_v7 = vpop.f32.mrb[13].mxu1  ;;  %v2317_v25 = vmax.f32 %v2289_v55, %v2305_v17  ;;  %4416 = vst.msk [vmem:[#allocation6 + $0x30] sm:$0xff] %vm79_vm4, %v4400_v32  ;;  %4417 = vst.msk [vmem:[#allocation6 + $0x38] sm:$0xff] %vm79_vm4, %v4401_v14  ;;  %v2264_v11 = vmax.f32 %v2248_v16, 0.0  ;;  %v2325_v53 = vsel %vm79_vm4, %v2316_v24, -inf  ;;  %v4391_v28 = vadd.f32 %v16216_v40, %v19129_v38 }
 0x20a   :  { %v15985_v29 = vpop.f32.mrb[14].mxu0  ;;  %v4451_v43 = vsel %vm79_vm4, %v4443_v9, -inf  ;;  %v2263_v46 = vmax.f32 %v2247_v15, 0.0  ;;  %v4390_v13 = vadd.f32 %v19129_v38, %v4336_v7  ;;  %v4405_v58 = vmax.f32 %v4389_v8, 0.0 }
 0x20b   :  { %v2291_v44 = vld [vmem:[#allocation6 + $0x40] ss:$2 sm:$0xff]  ;;  %v2307_v45 = vld [vmem:[#allocation6 + $0x41] ss:$2 sm:$0xff]  ;;  %2280 = vst.msk [vmem:[#allocation6 + $0x68] sm:$0xff] %vm79_vm4, %v2264_v11  ;;  %v2250_v47 = vadd.f32 %v15985_v29, %v19129_v38  ;;  %v2203_v48 = vpop.f32.mrb[15].mxu0  ;;  %v4452_v51 = vmax.f32 %v4450_v42, %v4451_v43 }
 0x20c   :  { %v16219_v41 = vpop.f32.mrb[14].mxu1  ;;  %4418 = vst.msk [vmem:[#allocation6 + $0x40] sm:$0xff] %vm79_vm4, %v4402_v27  ;;  %4419 = vst.msk [vmem:[#allocation6 + $0x48] sm:$0xff] %vm79_vm4, %v4403_v26  ;;  %v2249_v19 = vadd.f32 %v19129_v38, %v2203_v48  ;;  %v19188_v10 = vld [vmem:[#allocation3 + $0x11] sm:$0xff]  ;;  %v2326_v56 = vsel %vm79_vm4, %v2317_v25, -inf  ;;  %v2318_v57 = vmax.f32 %v2291_v44, %v2307_v45  ;;  %v4404_v59 = vmax.f32 %v4388_v18, 0.0 }
 0x20d   :  { %v4428_v60 = vld [vmem:[#allocation6 + $0x20] ss:$2 sm:$0xff]  ;;  %v4436_v6 = vld [vmem:[#allocation6 + $0x21] ss:$2 sm:$0xff]  ;;  %v4346_v21 = vpop.f32.mrb[15].mxu1  ;;  %2279 = vst.msk [vmem:[#allocation6 + $0x60] sm:$0xff] %vm79_vm4, %v2263_v46  ;;  %16223 = vmatmul.mubr.msk.f32.vlgmr.msra.gmra.mrb[16].mxu0 %vm79_vm4, %v19188_v10  ;;  %v2327_v1 = vmax.f32 %v2325_v53, %v2326_v56 }
 0x20e   :  { %v2266_v2 = vmax.f32 %v2250_v47, 0.0  ;;  %4463 = vst.msk [vmem:[#allocation3 + $0x51] sm:$0xff] %vm79_vm4, %v4452_v51  ;;  %v2265_v3 = vmax.f32 %v2249_v19, 0.0  ;;  %16235 = vmatpush3.msra.mxu0 %v19123_v34  ;;  %v4444_v33 = vmax.f32 %v4428_v60, %v4436_v6  ;;  %v4393_v34 = vadd.f32 %v16219_v41, %v19129_v38  ;;  %v4468_v56 = vld [vmem:[#allocation3 + $0x10] sm:$0xff] }
 0x20f   :  { %2336 = vst.msk [vmem:[#allocation3 + $0x21] sm:$0xff] %vm79_vm4, %v2327_v1  ;;  %16248 = vmatprep.subr.mxu0 %v19196_v30  ;;  %v2293_v61 = vld [vmem:[#allocation6 + $0x50] ss:$2 sm:$0xff]  ;;  %v2309_v62 = vld [vmem:[#allocation6 + $0x51] ss:$2 sm:$0xff]  ;;  %v4392_v4 = vadd.f32 %v19129_v38, %v4346_v21  ;;  %v4407_v20 = vmax.f32 %v4391_v28, 0.0 }
 0x210   :  { %2282 = vst.msk [vmem:[#allocation6 + $0x78] sm:$0xff] %vm79_vm4, %v2266_v2  ;;  %v4429_v39 = vld [vmem:[#allocation6 + $0x30] ss:$2 sm:$0xff]  ;;  %v4437_v54 = vld [vmem:[#allocation6 + $0x31] ss:$2 sm:$0xff]  ;;  %2281 = vst.msk [vmem:[#allocation6 + $0x70] sm:$0xff] %vm79_vm4, %v2265_v3  ;;  %v2319_v0 = vmax.f32 %v2293_v61, %v2309_v62 }
 0x211   :  { %v4445_v63 = vmax.f32 %v4429_v39, %v4437_v54  ;;  %4420 = vst.msk [vmem:[#allocation6 + $0x50] sm:$0xff] %vm79_vm4, %v4404_v59  ;;  %4421 = vst.msk [vmem:[#allocation6 + $0x58] sm:$0xff] %vm79_vm4, %v4405_v58  ;;  %v4406_v14 = vmax.f32 %v4390_v13, 0.0  ;;  %v4453_v5 = vsel %vm79_vm4, %v4444_v33, -inf  ;;  %v2328_v36 = vsel %vm79_vm4, %v2318_v57, -inf  ;;  %v4467_v2 = vld [vmem:[#allocation3] sm:$0xff] }
 0x212   :  { %v2329_v37 = vsel %vm79_vm4, %v2319_v0, -inf  ;;  %v4409_v55 = vmax.f32 %v4393_v34, 0.0  ;;  %v4408_v16 = vmax.f32 %v4392_v4, 0.0  ;;  %v14300_v3 = vld [vmem:[%s21039_s3 + $0x18] sm:$0xff]  ;;  %v4745_v57 = vld [vmem:[#allocation3 + $0x12] sm:$0xff] }
 0x213   :  { %v4454_v31 = vsel %vm79_vm4, %v4445_v63, -inf  ;;  %v4430_v49 = vld [vmem:[#allocation6 + $0x40] ss:$2 sm:$0xff]  ;;  %v4438_v50 = vld [vmem:[#allocation6 + $0x41] ss:$2 sm:$0xff]  ;;  %v2330_v38 = vmax.f32 %v2328_v36, %v2329_v37  ;;  %v14309_v58 = vld [vmem:[%s21039_s3 + $0x20] sm:$0xff] }
 0x214   :  { %v2295_v32 = vld [vmem:[#allocation6 + $0x60] ss:$2 sm:$0xff]  ;;  %v2311_v35 = vld [vmem:[#allocation6 + $0x61] ss:$2 sm:$0xff]  ;;  %v4455_v40 = vmax.f32 %v4453_v5, %v4454_v31  ;;  %v4446_v9 = vmax.f32 %v4430_v49, %v4438_v50  ;;  %v14318_v4 = vld [vmem:[%s21039_s3 + $0x28] sm:$0xff] }
 0x215   :  { %4422 = vst.msk [vmem:[#allocation6 + $0x60] sm:$0xff] %vm79_vm4, %v4406_v14  ;;  %4423 = vst.msk [vmem:[#allocation6 + $0x68] sm:$0xff] %vm79_vm4, %v4407_v20  ;;  %v2320_v52 = vmax.f32 %v2295_v32, %v2311_v35  ;;  %v19241_v19 = vld [vmem:[#allocation3 + $0x51] sm:$0xff]  ;;  %v4744_v39 = vld [vmem:[#allocation3 + $0x2] sm:$0xff] }
 0x216   :  { %4464 = vst.msk [vmem:[#allocation3 + $0x61] sm:$0xff] %vm79_vm4, %v4455_v40  ;;  %v19218_v23 = vld [vmem:[#allocation3 + $0x21] sm:$0xff]  ;;  %2337 = vst.msk [vmem:[#allocation3 + $0x31] sm:$0xff] %vm79_vm4, %v2330_v38  ;;  %v4456_v42 = vsel %vm79_vm4, %v4446_v9, -inf  ;;  %v19272_v33 = vld [vmem:[#allocation3 + $0x50] sm:$0xff] }
 0x217   :  { %v2297_v17 = vld [vmem:[#allocation6 + $0x70] ss:$2 sm:$0xff]  ;;  %v2313_v22 = vld [vmem:[#allocation6 + $0x71] ss:$2 sm:$0xff]  ;;  %16225 = vmatprep.mubr.msk.f32.mxu0 %vm79_vm4, %v19218_v23  ;;  %v2331_v11 = vsel %vm79_vm4, %v2320_v52, -inf  ;;  %v19259_v1 = vld [vmem:[#allocation3 + $0x20] sm:$0xff] }
 0x218   :  { %v2321_v7 = vmax.f32 %v2297_v17, %v2313_v22  ;;  %4424 = vst.msk [vmem:[#allocation6 + $0x70] sm:$0xff] %vm79_vm4, %v4408_v16  ;;  %4425 = vst.msk [vmem:[#allocation6 + $0x78] sm:$0xff] %vm79_vm4, %v4409_v55  ;;  %v4431_v24 = vld [vmem:[#allocation6 + $0x50] ss:$2 sm:$0xff]  ;;  %v4439_v25 = vld [vmem:[#allocation6 + $0x51] ss:$2 sm:$0xff] }
 0x219   :  { %v4447_v26 = vmax.f32 %v4431_v24, %v4439_v25  ;;  %v19289_v59 = vld [vmem:[#allocation3 + $0x22] sm:$0xff]  ;;  %v19301_v63 = vld [vmem:[#allocation3 + $0x52] sm:$0xff] }
 0x21a   :  { %v2332_v15 = vsel %vm79_vm4, %v2321_v7, -inf  ;;  %v14327_v14 = vld [vmem:[%s21039_s3 + $0x30] sm:$0xff]  ;;  %v14336_v5 = vld [vmem:[%s21039_s3 + $0x38] sm:$0xff]  ;;  %v14345_v32 = vld [vmem:[%s21039_s3 + $0x40] sm:$0xff] }
 0x21b   :  { %v2333_v27 = vmax.f32 %v2331_v11, %v2332_v15  ;;  %v4457_v43 = vsel %vm79_vm4, %v4447_v26, -inf  ;;  %v5340_v35 = vld [vmem:[#allocation3 + $0x90] sm:$0xff]  ;;  %v14355_v40 = vld [vmem:[%s21041_s5 + $0x10] sm:$0xff]  ;;  %v14356_v49 = vld [vmem:[%s21041_s5 + $0x18] sm:$0xff] }
 0x21c   :  { %v4432_v29 = vld [vmem:[#allocation6 + $0x60] ss:$2 sm:$0xff]  ;;  %v4440_v41 = vld [vmem:[#allocation6 + $0x61] ss:$2 sm:$0xff]  ;;  %v4458_v44 = vmax.f32 %v4456_v42, %v4457_v43  ;;  %v5487_v36 = vld [vmem:[#allocation3 + $0x91] sm:$0xff]  ;;  %v17122_v50 = vpack.c.bf16 %v14356_v49, %v14355_v40 }
 0x21d   :  { %2338 = vst.msk [vmem:[#allocation3 + $0x41] sm:$0xff] %vm79_vm4, %v2333_v27  ;;  %v19230_v45 = vld [vmem:[#allocation3 + $0x31] sm:$0xff]  ;;  %v4448_v46 = vmax.f32 %v4432_v29, %v4440_v41  ;;  %v19246_v21 = vld [vmem:[#allocation3 + $0x61] sm:$0xff] }
 0x21e   :  { %16226 = vmatmul.mubr.msk.f32.gmra.mrb[18].mxu0 %vm79_vm4, %v19230_v45  ;;  %4465 = vst.msk [vmem:[#allocation3 + $0x71] sm:$0xff] %vm79_vm4, %v4458_v44  ;;  %v19264_v28 = vld [vmem:[#allocation3 + $0x30] sm:$0xff]  ;;  %v19305_v0 = vld [vmem:[#allocation3 + $0x62] sm:$0xff]  ;;  %17123 = vmatprep.subr.bf16.mxu1 %v17122_v50  ;;  %v5868_v52 = vld [vmem:[%s21041_s5 + $0x8] sm:$0xff] }
 0x21f   :  { %v4433_v47 = vld [vmem:[#allocation6 + $0x70] ss:$2 sm:$0xff]  ;;  %v4441_v48 = vld [vmem:[#allocation6 + $0x71] ss:$2 sm:$0xff]  ;;  %v4459_v60 = vsel %vm79_vm4, %v4448_v46, -inf  ;;  %17125 = vmatpush3.bf16.msra.mxu1 %v17122_v50  ;;  %v14414_v17 = vld [vmem:[%s21036_s0 + $0x170] sm:$0xff] }
 0x220   :  { %v4449_v51 = vmax.f32 %v4433_v47, %v4441_v48  ;;  %v19293_v61 = vld [vmem:[#allocation3 + $0x32] sm:$0xff]  ;;  %v14415_v22 = vld [vmem:[%s21036_s0 + $0x178] sm:$0xff]  ;;  %7117 = vst.msk [vmem:[#allocation2 + $0xc1] sm:$0xff] %vm33_vm1, %v14414_v17  ;;  %v14418_v9 = vld [vmem:[%s21036_s0 + $0x190] sm:$0xff] }
 0x221   :  { %v5634_v37 = vld [vmem:[#allocation3 + $0x92] sm:$0xff]  ;;  %7118 = vst.msk [vmem:[#allocation2 + $0xc9] sm:$0xff] %vm33_vm1, %v14415_v22  ;;  %7121 = vst.msk [vmem:[#allocation2 + $0xf1] sm:$0xff] %vm33_vm1, %v14418_v9  ;;  %v14419_v24 = vld [vmem:[%s21036_s0 + $0x198] sm:$0xff] }
 0x222   :  { %v4460_v6 = vsel %vm79_vm4, %v4449_v51, -inf  ;;  %v5867_v38 = vld [vmem:[%s21041_s5] sm:$0xff]  ;;  %v14417_v7 = vld [vmem:[%s21036_s0 + $0x188] sm:$0xff]  ;;  %7122 = vst.msk [vmem:[#allocation2 + $0xf9] sm:$0xff] %vm33_vm1, %v14419_v24  ;;  %v14422_v15 = vld [vmem:[%s21036_s0 + $0x1b0] sm:$0xff] }
 0x223   :  { %v4461_v8 = vmax.f32 %v4459_v60, %v4460_v6  ;;  %v19436_v55 = vpack.c.bf16 %v5868_v52, %v5867_v38  ;;  %v14594_v16 = vld [vmem:[%s21037_s1 + $0x4] sm:$0x7]  ;;  %7120 = vst.msk [vmem:[#allocation2 + $0xe1] sm:$0xff] %vm33_vm1, %v14417_v7  ;;  %v14421_v11 = vld [vmem:[%s21036_s0 + $0x1a8] sm:$0xff]  ;;  %v14423_v26 = vld [vmem:[%s21036_s0 + $0x1b8] sm:$0xff] }
 0x224   :  { %v19237_v18 = vld [vmem:[#allocation3 + $0x41] sm:$0xff]  ;;  %v14420_v25 = vld [vmem:[%s21036_s0 + $0x1a0] sm:$0xff]  ;;  %7124 = vst.msk [vmem:[#allocation2 + $0x111] sm:$0xff] %vm33_vm1, %v14421_v11  ;;  %7125 = vst.msk [vmem:[#allocation2 + $0x121] sm:$0xff] %vm33_vm1, %v14422_v15 }
 0x225   :  { %16228 = vmatprep.mubr.msk.f32.mxu0 %vm79_vm4, %v19237_v18  ;;  %4466 = vst.msk [vmem:[#allocation3 + $0x81] sm:$0xff] %vm79_vm4, %v4461_v8  ;;  %v19250_v53 = vld [vmem:[#allocation3 + $0x71] sm:$0xff]  ;;  %v19268_v13 = vld [vmem:[#allocation3 + $0x40] sm:$0xff]  ;;  %17127 = vmatprep.subr.bf16.mxu1 %v19436_v55  ;;  %v14427_v42 = vld [vmem:[%s21036_s0 + $0x1d8] sm:$0xff] }
 0x226   :  { %16229 = vmatmul.mubr.msk.f32.gmra.mrb[20].mxu0 %vm79_vm4, %v19241_v19  ;;  %v19280_v54 = vld [vmem:[#allocation3 + $0x70] sm:$0xff]  ;;  %v19297_v62 = vld [vmem:[#allocation3 + $0x42] sm:$0xff]  ;;  %7123 = vst.msk [vmem:[#allocation2 + $0x109] sm:$0xff] %vm33_vm1, %v14420_v25  ;;  %7126 = vst.msk [vmem:[#allocation2 + $0x129] sm:$0xff] %vm33_vm1, %v14423_v26 }
 0x227   :  { %16231 = vmatprep.mubr.msk.f32.mxu0 %vm79_vm4, %v19246_v21  ;;  %v19309_v34 = vld [vmem:[#allocation3 + $0x72] sm:$0xff]  ;;  %v14426_v41 = vld [vmem:[%s21036_s0 + $0x1d0] sm:$0xff]  ;;  %7130 = vst.msk [vmem:[#allocation2 + $0x159] sm:$0xff] %vm33_vm1, %v14427_v42  ;;  %v19593_v9 = vld [vmem:[%s21037_s1 + $0xc] sm:$0x7] }
 0x228   :  { %v14424_v27 = vld [vmem:[%s21036_s0 + $0x1c0] sm:$0xff]  ;;  %v14425_v29 = vld [vmem:[%s21036_s0 + $0x1c8] sm:$0xff]  ;;  %7129 = vst.msk [vmem:[#allocation2 + $0x151] sm:$0xff] %vm33_vm1, %v14426_v41  ;;  %v19526_v6 = vld [vmem:[#allocation2 + $0xf1] sm:$0xff] }
 0x229   :  { %7127 = vst.msk [vmem:[#allocation2 + $0x139] sm:$0xff] %vm33_vm1, %v14424_v27  ;;  %7128 = vst.msk [vmem:[#allocation2 + $0x141] sm:$0xff] %vm33_vm1, %v14425_v29  ;;  %v14428_v43 = vld [vmem:[%s21036_s0 + $0x1e0] sm:$0xff]  ;;  %v14429_v44 = vld [vmem:[%s21036_s0 + $0x1e8] sm:$0xff] }
 0x22a   :  { %16232 = vmatmul.mubr.msk.f32.gmra.mrb[22].mxu0 %vm79_vm4, %v19250_v53  ;;  %7131 = vst.msk [vmem:[#allocation2 + $0x169] sm:$0xff] %vm33_vm1, %v14428_v43  ;;  %7132 = vst.msk [vmem:[#allocation2 + $0x171] sm:$0xff] %vm33_vm1, %v14429_v44  ;;  %v9276_v46 = vld [vmem:[#allocation2 + $0xc1] sm:$0xff]  ;;  %v9277_v47 = vld [vmem:[#allocation2 + $0xc9] sm:$0xff] }
 0x22b   :  { %16236 = vmatprep.mubr.msk.f32.mxu0 %vm79_vm4, %v4467_v2  ;;  %v19518_v51 = vld [vmem:[%s21037_s1 + $0x8] sm:$0x7]  ;;  %v19534_v8 = vld [vmem:[#allocation2 + $0xf9] sm:$0xff] }
 0x22c   :  { %v4898_v20 = vld [vmem:[#allocation3 + $0x80] sm:$0xff]  ;;  %v19523_v60 = vld [vmem:[#allocation2 + $0xe1] sm:$0xff] }
 0x22d   :  { %v5192_v31 = vld [vmem:[#allocation3 + $0x82] sm:$0xff]  ;;  %v19550_v2 = vld [vmem:[#allocation2 + $0x129] sm:$0xff] }
 0x22e   :  { %16237 = vmatmul.mubr.msk.f32.vlgmr.msra.gmra.mrb[16].mxu0 %vm79_vm4, %v4468_v56 }
 0x22f   :  { %16249 = vmatpush3.msra.mxu0 %v19196_v30  ;;  %16239 = vmatprep.mubr.msk.f32.mxu0 %vm79_vm4, %v19259_v1  ;;  %v19276_v30 = vld [vmem:[#allocation3 + $0x60] sm:$0xff] }
 0x230   :  { %16262 = vmatprep.subr.mxu0 %v14300_v3 }
 0x232   :  { %16240 = vmatmul.mubr.msk.f32.gmra.mrb[18].mxu0 %vm79_vm4, %v19264_v28 }
 0x233   :  { %16242 = vmatprep.mubr.msk.f32.mxu0 %vm79_vm4, %v19268_v13 }
 0x236   :  { %16243 = vmatmul.mubr.msk.f32.gmra.mrb[20].mxu0 %vm79_vm4, %v19272_v33 }
 0x237   :  { %16245 = vmatprep.mubr.msk.f32.mxu0 %vm79_vm4, %v19276_v30 }
 0x23a   :  { %16246 = vmatmul.mubr.msk.f32.gmra.mrb[22].mxu0 %vm79_vm4, %v19280_v54 }
 0x23b   :  { %16250 = vmatprep.mubr.msk.f32.mxu0 %vm79_vm4, %v4744_v39 }
 0x23e   :  { %16251 = vmatmul.mubr.msk.f32.vlgmr.msra.gmra.mrb[16].mxu0 %vm79_vm4, %v4745_v57 }
 0x23f   :  { %16263 = vmatpush3.msra.mxu0 %v14300_v3  ;;  %16253 = vmatprep.mubr.msk.f32.mxu0 %vm79_vm4, %v19289_v59 }
 0x240   :  { %16276 = vmatprep.subr.mxu0 %v14309_v58 }
 0x242   :  { %16254 = vmatmul.mubr.msk.f32.gmra.mrb[18].mxu0 %vm79_vm4, %v19293_v61 }
 0x243   :  { %16256 = vmatprep.mubr.msk.f32.mxu0 %vm79_vm4, %v19297_v62 }
 0x246   :  { %16257 = vmatmul.mubr.msk.f32.gmra.mrb[20].mxu0 %vm79_vm4, %v19301_v63 }
 0x247   :  { %16259 = vmatprep.mubr.msk.f32.mxu0 %vm79_vm4, %v19305_v0 }
 0x24a   :  { %16260 = vmatmul.mubr.msk.f32.gmra.mrb[22].mxu0 %vm79_vm4, %v19309_v34 }
 0x24b   :  { %16264 = vmatprep.mubr.msk.f32.mxu0 %vm79_vm4, %v4468_v56  ;;  %v19555_v56 = vld [vmem:[#allocation2 + $0x139] sm:$0xff] }
 0x24e   :  { %16265 = vmatmul.mubr.msk.f32.vlgmr.msra.gmra.mrb[16].mxu0 %vm79_vm4, %v19259_v1 }
 0x24f   :  { %16277 = vmatpush3.msra.mxu0 %v14309_v58  ;;  %16267 = vmatprep.mubr.msk.f32.mxu0 %vm79_vm4, %v19264_v28 }
 0x250   :  { %16290 = vmatprep.subr.mxu0 %v14318_v4 }
 0x252   :  { %16268 = vmatmul.mubr.msk.f32.gmra.mrb[18].mxu0 %vm79_vm4, %v19268_v13 }
 0x253   :  { %16270 = vmatprep.mubr.msk.f32.mxu0 %vm79_vm4, %v19272_v33 }
 0x256   :  { %16271 = vmatmul.mubr.msk.f32.gmra.mrb[20].mxu0 %vm79_vm4, %v19276_v30 }
 0x257   :  { %16273 = vmatprep.mubr.msk.f32.mxu0 %vm79_vm4, %v19280_v54 }
 0x25a   :  { %16274 = vmatmul.mubr.msk.f32.gmra.mrb[22].mxu0 %vm79_vm4, %v4898_v20 }
 0x25b   :  { %16278 = vmatprep.mubr.msk.f32.mxu0 %vm79_vm4, %v19188_v10  ;;  %v5045_v10 = vld [vmem:[#allocation3 + $0x81] sm:$0xff] }
 0x25e   :  { %16279 = vmatmul.mubr.msk.f32.vlgmr.msra.gmra.mrb[16].mxu0 %vm79_vm4, %v19218_v23 }
 0x25f   :  { %16291 = vmatpush3.msra.mxu0 %v14318_v4  ;;  %16281 = vmatprep.mubr.msk.f32.mxu0 %vm79_vm4, %v19230_v45 }
 0x260   :  { %16304 = vmatprep.subr.mxu0 %v14327_v14 }
 0x262   :  { %16282 = vmatmul.mubr.msk.f32.gmra.mrb[18].mxu0 %vm79_vm4, %v19237_v18 }
 0x263   :  { %16284 = vmatprep.mubr.msk.f32.mxu0 %vm79_vm4, %v19241_v19 }
 0x266   :  { %16285 = vmatmul.mubr.msk.f32.gmra.mrb[20].mxu0 %vm79_vm4, %v19246_v21 }
 0x267   :  { %16287 = vmatprep.mubr.msk.f32.mxu0 %vm79_vm4, %v19250_v53 }
 0x26a   :  { %16288 = vmatmul.mubr.msk.f32.gmra.mrb[22].mxu0 %vm79_vm4, %v5045_v10 }
 0x26b   :  { %16292 = vmatprep.mubr.msk.f32.mxu0 %vm79_vm4, %v4745_v57 }
 0x26e   :  { %16293 = vmatmul.mubr.msk.f32.vlgmr.msra.gmra.mrb[16].mxu0 %vm79_vm4, %v19289_v59 }
 0x26f   :  { %16305 = vmatpush3.msra.mxu0 %v14327_v14  ;;  %16295 = vmatprep.mubr.msk.f32.mxu0 %vm79_vm4, %v19293_v61 }
 0x270   :  { %16318 = vmatprep.subr.mxu0 %v14336_v5 }
 0x272   :  { %16296 = vmatmul.mubr.msk.f32.gmra.mrb[18].mxu0 %vm79_vm4, %v19297_v62 }
 0x273   :  { %16298 = vmatprep.mubr.msk.f32.mxu0 %vm79_vm4, %v19301_v63 }
 0x276   :  { %16299 = vmatmul.mubr.msk.f32.gmra.mrb[20].mxu0 %vm79_vm4, %v19305_v0 }
 0x277   :  { %16301 = vmatprep.mubr.msk.f32.mxu0 %vm79_vm4, %v19309_v34 }
 0x27a   :  { %16302 = vmatmul.mubr.msk.f32.gmra.mrb[22].mxu0 %vm79_vm4, %v5192_v31 }
 0x27b   :  { %16306 = vmatprep.mubr.msk.f32.mxu0 %vm79_vm4, %v19259_v1 }
 0x27e   :  { %16307 = vmatmul.mubr.msk.f32.vlgmr.msra.gmra.mrb[16].mxu0 %vm79_vm4, %v19264_v28 }
 0x27f   :  { %16319 = vmatpush3.msra.mxu0 %v14336_v5  ;;  %16309 = vmatprep.mubr.msk.f32.mxu0 %vm79_vm4, %v19268_v13  ;;  %v19561_v13 = vld [vmem:[#allocation2 + $0x141] sm:$0xff] }
 0x280   :  { %16332 = vmatprep.subr.mxu0 %v14345_v32 }
 0x282   :  { %16310 = vmatmul.mubr.msk.f32.gmra.mrb[18].mxu0 %vm79_vm4, %v19272_v33 }
 0x283   :  { %16312 = vmatprep.mubr.msk.f32.mxu0 %vm79_vm4, %v19276_v30  ;;  %v19563_v30 = vld [vmem:[#allocation2 + $0x151] sm:$0xff] }
 0x286   :  { %16313 = vmatmul.mubr.msk.f32.gmra.mrb[20].mxu0 %vm79_vm4, %v19280_v54 }
 0x287   :  { %16315 = vmatprep.mubr.msk.f32.mxu0 %vm79_vm4, %v4898_v20 }
 0x28a   :  { %16316 = vmatmul.mubr.msk.f32.gmra.mrb[22].mxu0 %vm79_vm4, %v5340_v35  ;;  %v9260_v35 = vld [vmem:[#allocation2 + $0xc8] sm:$0xff] }
 0x28b   :  { %16320 = vmatprep.mubr.msk.f32.mxu0 %vm79_vm4, %v19218_v23  ;;  %v14416_v23 = vld [vmem:[%s21036_s0 + $0x180] sm:$0xff] }
 0x28c   :  { %7119 = vst.msk [vmem:[#allocation2 + $0xd9] sm:$0xff] %vm33_vm1, %v14416_v23 }
 0x28e   :  { %16321 = vmatmul.mubr.msk.f32.vlgmr.msra.gmra.mrb[16].mxu0 %vm79_vm4, %v19230_v45  ;;  %v9275_v45 = vld [vmem:[%s21037_s1] sm:$0x7] }
 0x28f   :  { %16333 = vmatpush3.msra.mxu0 %v14345_v32  ;;  %16323 = vmatprep.mubr.msk.f32.mxu0 %vm79_vm4, %v19237_v18  ;;  %v19536_v18 = vld [vmem:[#allocation2 + $0x109] sm:$0xff] }
 0x290   :  { %16671 = vmatprep.subr.msk.mxu0 %vm272_vm0, %v14594_v16 }
 0x292   :  { %16324 = vmatmul.mubr.msk.f32.gmra.mrb[18].mxu0 %vm79_vm4, %v19241_v19  ;;  %v19542_v19 = vld [vmem:[#allocation2 + $0x111] sm:$0xff] }
 0x293   :  { %16326 = vmatprep.mubr.msk.f32.mxu0 %vm79_vm4, %v19246_v21  ;;  %v19513_v48 = vld [vmem:[#allocation2 + $0xd9] sm:$0xff]  ;;  %v19544_v21 = vld [vmem:[#allocation2 + $0x121] sm:$0xff] }
 0x294   :  { %v19587_v17 = vld [vmem:[#allocation2 + $0xd8] sm:$0xff]  ;;  %v19598_v15 = vld [vmem:[#allocation2 + $0xe0] sm:$0xff] }
 0x296   :  { %16327 = vmatmul.mubr.msk.f32.gmra.mrb[20].mxu0 %vm79_vm4, %v19250_v53  ;;  %v14354_v53 = vld [vmem:[%s21040_s4] ss:$0 sm:$0xff] }
 0x297   :  { %16329 = vmatprep.mubr.msk.f32.mxu0 %vm79_vm4, %v5045_v10  ;;  %v19580_v10 = vld [vmem:[#allocation2 + $0x171] sm:$0xff] }
 0x29a   :  { %16330 = vmatmul.mubr.msk.f32.gmra.mrb[22].mxu0 %vm79_vm4, %v5487_v36 }
 0x29b   :  { %16334 = vmatprep.mubr.msk.f32.mxu0 %vm79_vm4, %v19289_v59 }
 0x29e   :  { %16335 = vmatmul.mubr.msk.f32.vlgmr.msra.gmra.mrb[16].mxu0 %vm79_vm4, %v19293_v61  ;;  %v19570_v61 = vld [vmem:[#allocation2 + $0x159] sm:$0xff] }
 0x29f   :  { %16337 = vmatprep.mubr.msk.f32.mxu0 %vm79_vm4, %v19297_v62  ;;  %16672 = vmatpush3.msk.msra.mxu0 %vm272_vm0, %v14594_v16 }
 0x2a0   :  { %16697 = vmatprep.subr.msk.mxu0 %vm272_vm0, %v9275_v45 }
 0x2a2   :  { %16338 = vmatmul.mubr.msk.f32.gmra.mrb[18].mxu0 %vm79_vm4, %v19301_v63  ;;  %v19573_v63 = vld [vmem:[#allocation2 + $0x169] sm:$0xff] }
 0x2a3   :  { %16340 = vmatprep.mubr.msk.f32.mxu0 %vm79_vm4, %v19305_v0 }
 0x2a6   :  { %16341 = vmatmul.mubr.msk.f32.gmra.mrb[20].mxu0 %vm79_vm4, %v19309_v34 }
 0x2a7   :  { %16343 = vmatprep.mubr.msk.f32.mxu0 %vm79_vm4, %v5192_v31  ;;  %v9259_v31 = vld [vmem:[#allocation2 + $0xc0] sm:$0xff] }
 0x2aa   :  { %16344 = vmatmul.mubr.msk.f32.gmra.mrb[22].mxu0 %vm79_vm4, %v5634_v37 }
 0x2ab   :  { %16673 = vmatprep.mubr.msk.f32.mxu0 %vm33_vm1, %v9276_v46 }
 0x2ae   :  { %16674 = vmatmul.mubr.msk.f32.vlgmr.msra.gmra.mrb[24].mxu0 %vm33_vm1, %v9277_v47 }
 0x2af   :  { %16676 = vmatprep.mubr.msk.f32.mxu0 %vm33_vm1, %v19513_v48  ;;  %16698 = vmatpush3.msk.msra.mxu0 %vm272_vm0, %v9275_v45  ;;  %v19604_v45 = vld [vmem:[#allocation2 + $0xf0] sm:$0xff] }
 0x2b0   :  { %16723 = vmatprep.subr.msk.mxu0 %vm272_vm0, %v19518_v51 }
 0x2b2   :  { %16677 = vmatmul.mubr.msk.f32.gmra.mrb[26].mxu0 %vm33_vm1, %v19523_v60 }
 0x2b3   :  { %16679 = vmatprep.mubr.msk.f32.mxu0 %vm33_vm1, %v19526_v6 }
 0x2b6   :  { %16680 = vmatmul.mubr.msk.f32.gmra.mrb[28].mxu0 %vm33_vm1, %v19534_v8 }
 0x2b7   :  { %16682 = vmatprep.mubr.msk.f32.mxu0 %vm33_vm1, %v19536_v18 }
 0x2ba   :  { %16683 = vmatmul.mubr.msk.f32.gmra.mrb[30].mxu0 %vm33_vm1, %v19542_v19 }
 0x2bb   :  { %16685 = vmatprep.mubr.msk.f32.mxu0 %vm33_vm1, %v19544_v21 }
 0x2be   :  { %16686 = vmatmul.mubr.msk.f32.gmra.mrb[32].mxu0 %vm33_vm1, %v19550_v2 }
 0x2bf   :  { %16688 = vmatprep.mubr.msk.f32.mxu0 %vm33_vm1, %v19555_v56 }
 0x2c2   :  { %16689 = vmatmul.mubr.msk.f32.gmra.mrb[34].mxu0 %vm33_vm1, %v19561_v13 }
 0x2c3   :  { %16691 = vmatprep.mubr.msk.f32.mxu0 %vm33_vm1, %v19563_v30 }
 0x2c6   :  { %16692 = vmatmul.mubr.msk.f32.gmra.mrb[36].mxu0 %vm33_vm1, %v19570_v61 }
 0x2c7   :  { %16694 = vmatprep.mubr.msk.f32.mxu0 %vm33_vm1, %v19573_v63 }
 0x2ca   :  { %16695 = vmatmul.mubr.msk.f32.gmra.mrb[38].mxu0 %vm33_vm1, %v19580_v10 }
 0x2cb   :  { %16699 = vmatprep.mubr.msk.f32.mxu0 %vm33_vm1, %v9259_v31 }
 0x2ce   :  { %16700 = vmatmul.mubr.msk.f32.vlgmr.msra.gmra.mrb[24].mxu0 %vm33_vm1, %v9260_v35 }
 0x2cf   :  { %16702 = vmatprep.mubr.msk.f32.mxu0 %vm33_vm1, %v19587_v17  ;;  %16724 = vmatpush3.msk.msra.mxu0 %vm272_vm0, %v19518_v51 }
 0x2d0   :  { %16749 = vmatprep.subr.msk.mxu0 %vm272_vm0, %v19593_v9 }
 0x2d2   :  { %16703 = vmatmul.mubr.msk.f32.gmra.mrb[26].mxu0 %vm33_vm1, %v19598_v15 }
 0x2d3   :  { %16705 = vmatprep.mubr.msk.f32.mxu0 %vm33_vm1, %v19604_v45 }
 0x371   :  { %v16336_v3 = vpop.f32.mrb[16].mxu0 }
 0x372   :  { %v5782_v1 = vadd.f32 %v16336_v3, %v14354_v53  ;;  %v5727_v28 = vpop.f32.mrb[17].mxu0 }
 0x373   :  { %v5781_v33 = vadd.f32 %v14354_v53, %v5727_v28 }
 0x374   :  { %v5790_v39 = vmax.f32 %v5782_v1, 0.0  ;;  %v19617_v1 = vld [vmem:[#allocation2 + $0xf8] sm:$0xff] }
 0x375   :  { %v5789_v54 = vmax.f32 %v5781_v33, 0.0  ;;  %v16339_v57 = vpop.f32.mrb[18].mxu0  ;;  %16706 = vmatmul.mubr.msk.f32.gmra.mrb[28].mxu0 %vm33_vm1, %v19617_v1 }
 0x376   :  { %5799 = vst.msk [vmem:[#allocation7 + $0x8] sm:$0xff] %vm5797_vm9, %v5790_v39  ;;  %v5784_v58 = vadd.f32 %v16339_v57, %v14354_v53  ;;  %v5737_v59 = vpop.f32.mrb[19].mxu0  ;;  %v19619_v39 = vld [vmem:[#allocation2 + $0x108] sm:$0xff] }
 0x377   :  { %5798 = vst.msk [vmem:[#allocation7] sm:$0xff] %vm5797_vm9, %v5789_v54  ;;  %v5783_v62 = vadd.f32 %v14354_v53, %v5737_v59  ;;  %16708 = vmatprep.mubr.msk.f32.mxu0 %vm33_vm1, %v19619_v39 }
 0x378   :  { %v5792_v0 = vmax.f32 %v5784_v58, 0.0 }
 0x379   :  { %v5791_v34 = vmax.f32 %v5783_v62, 0.0  ;;  %v16342_v4 = vpop.f32.mrb[20].mxu0  ;;  %v19627_v62 = vld [vmem:[#allocation2 + $0x110] sm:$0xff] }
 0x37a   :  { %5801 = vst.msk [vmem:[#allocation7 + $0x18] sm:$0xff] %vm5797_vm9, %v5792_v0  ;;  %v5786_v20 = vadd.f32 %v16342_v4, %v14354_v53  ;;  %v5747_v14 = vpop.f32.mrb[21].mxu0  ;;  %v19630_v4 = vld [vmem:[#allocation2 + $0x120] sm:$0xff]  ;;  %16709 = vmatmul.mubr.msk.f32.gmra.mrb[30].mxu0 %vm33_vm1, %v19627_v62 }
 0x37b   :  { %5800 = vst.msk [vmem:[#allocation7 + $0x10] sm:$0xff] %vm5797_vm9, %v5791_v34  ;;  %v5785_v5 = vadd.f32 %v14354_v53, %v5747_v14  ;;  %16711 = vmatprep.mubr.msk.f32.mxu0 %vm33_vm1, %v19630_v4 }
 0x37c   :  { %v5794_v32 = vmax.f32 %v5786_v20, 0.0 }
 0x37d   :  { %v5808_v36 = vld [vmem:[#allocation7 + $0x8] ss:$2 sm:$0xf]  ;;  %v5824_v37 = vld [vmem:[#allocation7 + $0x9] ss:$2 sm:$0xf] }
 0x37e   :  { %v5838_v40 = vmax.f32 %v5808_v36, %v5824_v37  ;;  %v5806_v49 = vld [vmem:[#allocation7] ss:$2 sm:$0xf]  ;;  %v5822_v50 = vld [vmem:[#allocation7 + $0x1] ss:$2 sm:$0xf] }
 0x37f   :  { %5803 = vst.msk [vmem:[#allocation7 + $0x28] sm:$0xff] %vm5797_vm9, %v5794_v32  ;;  %v5837_v38 = vmax.f32 %v5806_v49, %v5822_v50  ;;  %v5793_v52 = vmax.f32 %v5785_v5, 0.0  ;;  %v16345_v16 = vpop.f32.mrb[22].mxu0  ;;  %v19638_v37 = vld [vmem:[#allocation2 + $0x128] sm:$0xff]  ;;  %v19641_v49 = vld [vmem:[#allocation2 + $0x138] sm:$0xff] }
 0x380   :  { %v5847_v22 = vsel %vm5845_vm10, %v5838_v40, -inf  ;;  %v5788_v23 = vadd.f32 %v16345_v16, %v14354_v53  ;;  %v5757_v7 = vpop.f32.mrb[23].mxu0  ;;  %v14362_v16 = vld [vmem:[%s21041_s5 + $0x28] sm:$0xff]  ;;  %16712 = vmatmul.mubr.msk.f32.gmra.mrb[32].mxu0 %vm33_vm1, %v19638_v37 }
 0x381   :  { %v5846_v24 = vsel %vm5845_vm10, %v5837_v38, -inf  ;;  %v5812_v25 = vld [vmem:[#allocation7 + $0x18] ss:$2 sm:$0xf]  ;;  %5802 = vst.msk [vmem:[#allocation7 + $0x20] sm:$0xff] %vm5797_vm9, %v5793_v52  ;;  %v5787_v11 = vadd.f32 %v14354_v53, %v5757_v7  ;;  %v14361_v38 = vld [vmem:[%s21041_s5 + $0x20] sm:$0xff]  ;;  %16714 = vmatprep.mubr.msk.f32.mxu0 %vm33_vm1, %v19641_v49 }
 0x382   :  { %v5848_v26 = vmax.f32 %v5846_v24, %v5847_v22  ;;  %v5828_v27 = vld [vmem:[#allocation7 + $0x19] ss:$2 sm:$0xf]  ;;  %v5810_v29 = vld [vmem:[#allocation7 + $0x10] ss:$2 sm:$0xf] }
 0x383   :  { %v5840_v41 = vmax.f32 %v5812_v25, %v5828_v27  ;;  %v5826_v42 = vld [vmem:[#allocation7 + $0x11] ss:$2 sm:$0xf]  ;;  %v5796_v43 = vmax.f32 %v5788_v23, 0.0  ;;  %v5795_v44 = vmax.f32 %v5787_v11, 0.0  ;;  %v19657_v23 = vld [vmem:[#allocation2 + $0x150] sm:$0xff]  ;;  %v17130_v25 = vpack.c.bf16 %v14362_v16, %v14361_v38 }
 0x384   :  { %5859 = vst.msk [vmem:[#allocation4 + $0x9] sm:$0xf] %vm5845_vm10, %v5848_v26  ;;  %v5839_v46 = vmax.f32 %v5810_v29, %v5826_v42  ;;  %v19654_v22 = vld [vmem:[#allocation2 + $0x140] sm:$0xff]  ;;  %v19659_v7 = vld [vmem:[#allocation2 + $0x158] sm:$0xff]  ;;  %v19665_v26 = vld [vmem:[#allocation2 + $0x168] sm:$0xff] }
 0x385   :  { %v5850_v47 = vsel %vm5845_vm10, %v5840_v41, -inf  ;;  %5805 = vst.msk [vmem:[#allocation7 + $0x38] sm:$0xff] %vm5797_vm9, %v5796_v43  ;;  %5804 = vst.msk [vmem:[#allocation7 + $0x30] sm:$0xff] %vm5797_vm9, %v5795_v44  ;;  %16715 = vmatmul.mubr.msk.f32.gmra.mrb[34].mxu0 %vm33_vm1, %v19654_v22  ;;  %v14365_v27 = vld [vmem:[%s21041_s5 + $0x30] sm:$0xff]  ;;  %v14366_v29 = vld [vmem:[%s21041_s5 + $0x38] sm:$0xff] }
 0x386   :  { %v5816_v53 = vld [vmem:[#allocation7 + $0x28] ss:$2 sm:$0xf]  ;;  %v5849_v51 = vsel %vm5845_vm10, %v5839_v46, -inf  ;;  %16717 = vmatprep.mubr.msk.f32.mxu0 %vm33_vm1, %v19657_v23  ;;  %v19680_v41 = vld [vmem:[#allocation2 + $0x170] sm:$0xff]  ;;  %v17134_v43 = vpack.c.bf16 %v14366_v29, %v14365_v27  ;;  %v19755_v38 = vld [vmem:[#allocation2 + $0x142] sm:$0xff] }
 0x387   :  { %v5832_v3 = vld [vmem:[#allocation7 + $0x29] ss:$2 sm:$0xf]  ;;  %v5851_v28 = vmax.f32 %v5849_v51, %v5850_v47  ;;  %v9686_v46 = vld [vmem:[#allocation2 + $0xca] sm:$0xff]  ;;  %v14369_v51 = vld [vmem:[%s21041_s5 + $0x40] sm:$0xff] }
 0x388   :  { %v5842_v33 = vmax.f32 %v5816_v53, %v5832_v3  ;;  %v5814_v54 = vld [vmem:[#allocation7 + $0x20] ss:$2 sm:$0xf]  ;;  %v5830_v57 = vld [vmem:[#allocation7 + $0x21] ss:$2 sm:$0xf] }
 0x389   :  { %5860 = vst.msk [vmem:[#allocation4 + $0x11] sm:$0xf] %vm5845_vm10, %v5851_v28  ;;  %v5841_v59 = vmax.f32 %v5814_v54, %v5830_v57  ;;  %16718 = vmatmul.mubr.msk.f32.gmra.mrb[36].mxu0 %vm33_vm1, %v19659_v7  ;;  %v19686_v47 = vld [vmem:[#allocation2 + $0xda] sm:$0xff]  ;;  %v19692_v53 = vld [vmem:[%s21037_s1 + $0x10] sm:$0x7]  ;;  %v14370_v3 = vld [vmem:[%s21041_s5 + $0x48] sm:$0xff] }
 0x38a   :  { %v5853_v58 = vsel %vm5845_vm10, %v5842_v33, -inf  ;;  %16720 = vmatprep.mubr.msk.f32.mxu0 %vm33_vm1, %v19665_v26  ;;  %v19703_v28 = vld [vmem:[#allocation2 + $0xe2] sm:$0xff]  ;;  %v19707_v33 = vld [vmem:[#allocation2 + $0xf2] sm:$0xff]  ;;  %v17138_v57 = vpack.c.bf16 %v14370_v3, %v14369_v51  ;;  %v19766_v27 = vld [vmem:[#allocation2 + $0x16a] sm:$0xff] }
 0x38b   :  { %v5852_v0 = vsel %vm5845_vm10, %v5841_v59, -inf  ;;  %v17894_v34 = vld [vmem:[#allocation4 + $0x1] ss:$8 sps:$4 sm:$0xff]   ;;  %v14385_v3 = vld [vmem:[%s21041_s5 + $0x80] sm:$0xff] }
 0x38c   :  { %v5854_v20 = vmax.f32 %v5852_v0, %v5853_v58  ;;  %v5820_v14 = vld [vmem:[#allocation7 + $0x38] ss:$2 sm:$0xf]  ;;  %v5836_v5 = vld [vmem:[#allocation7 + $0x39] ss:$2 sm:$0xf]  ;;  %16350 = vmatprep.mubr.msk.f32.mxu1 %vm5797_vm9, %v17894_v34 }
 0x38d   :  { %v5844_v31 = vmax.f32 %v5820_v14, %v5836_v5  ;;  %v5818_v32 = vld [vmem:[#allocation7 + $0x30] ss:$2 sm:$0xf]  ;;  %v5834_v35 = vld [vmem:[#allocation7 + $0x31] ss:$2 sm:$0xf]  ;;  %16721 = vmatmul.mubr.msk.f32.gmra.mrb[38].mxu0 %vm33_vm1, %v19680_v41 }
 0x38e   :  { %5861 = vst.msk [vmem:[#allocation4 + $0x19] sm:$0xf] %vm5845_vm10, %v5854_v20  ;;  %v5843_v36 = vmax.f32 %v5818_v32, %v5834_v35  ;;  %v17896_v11 = vld [vmem:[#allocation4] ss:$8 sps:$4 sm:$0xff]   ;;  %v19733_v14 = vld [vmem:[#allocation2 + $0x122] sm:$0xff] }
 0x38f   :  { %v5856_v40 = vsel %vm5845_vm10, %v5844_v31, -inf  ;;  %v17898_v44 = vld [vmem:[#allocation4 + $0x2] ss:$8 sps:$4 sm:$0xff]   ;;  %v19718_v0 = vld [vmem:[#allocation2 + $0x10a] sm:$0xff] }
 0x390   :  { %v5855_v50 = vsel %vm5845_vm10, %v5843_v36, -inf  ;;  %v17900_v58 = vld [vmem:[#allocation4 + $0x8] ss:$8 sps:$4 sm:$0xff]   ;;  %v19739_v35 = vld [vmem:[#allocation2 + $0x12a] sm:$0xff]  ;;  %v14683_v51 = vld [vmem:[%s21037_s1 + $0x14] sm:$0x7] }
 0x391   :  { %v5857_v52 = vmax.f32 %v5855_v50, %v5856_v40  ;;  %v19715_v59 = vld [vmem:[#allocation2 + $0xfa] sm:$0xff]  ;;  %v19731_v20 = vld [vmem:[#allocation2 + $0x112] sm:$0xff]  ;;  %v14378_v50 = vld [vmem:[%s21041_s5 + $0x68] sm:$0xff] }
 0x392   :  { %v14374_v34 = vld [vmem:[%s21041_s5 + $0x58] sm:$0xff]  ;;  %v14377_v40 = vld [vmem:[%s21041_s5 + $0x60] sm:$0xff]  ;;  %v14381_v29 = vld [vmem:[%s21041_s5 + $0x70] sm:$0xff] }
 0x393   :  { %5862 = vst.msk [vmem:[#allocation4 + $0x21] sm:$0xf] %vm5845_vm10, %v5857_v52  ;;  %v17902_v32 = vld [vmem:[#allocation4 + $0x9] ss:$8 sps:$4 sm:$0xff]  }
 0x394   :  { %v19742_v36 = vld [vmem:[#allocation2 + $0x13a] sm:$0xff]  ;;  %v19757_v52 = vld [vmem:[#allocation2 + $0x152] sm:$0xff] }
 0x395   :  { %v17895_v24 = vld [vmem:[#allocation4 + $0x11] ss:$8 sps:$4 sm:$0xff]  }
 0x396   :  { %16351 = vmatmul.mubr.msk.f32.vlgmr.msra.gmra.mrb[16].mxu1 %vm5797_vm9, %v17895_v24  ;;  %v17897_v42 = vld [vmem:[#allocation4 + $0x10] ss:$8 sps:$4 sm:$0xff]   ;;  %v17146_v24 = vpack.c.bf16 %v14378_v50, %v14377_v40 }
 0x397   :  { %17129 = vmatpush3.bf16.msra.mxu1 %v19436_v55  ;;  %16357 = vmatprep.mubr.msk.f32.mxu1 %vm5797_vm9, %v17896_v11  ;;  %v9685_v55 = vld [vmem:[#allocation2 + $0xc2] sm:$0xff]  ;;  %v19763_v11 = vld [vmem:[#allocation2 + $0x15a] sm:$0xff] }
 0x398   :  { %17131 = vmatprep.subr.bf16.mxu1 %v17130_v25  ;;  %16725 = vmatprep.mubr.msk.f32.mxu0 %vm33_vm1, %v9685_v55  ;;  %v17899_v54 = vld [vmem:[#allocation4 + $0x12] ss:$8 sps:$4 sm:$0xff]   ;;  %v14382_v55 = vld [vmem:[%s21041_s5 + $0x78] sm:$0xff] }
 0x399   :  { %16726 = vmatmul.mubr.msk.f32.vlgmr.msra.gmra.mrb[24].mxu0 %vm33_vm1, %v9686_v46  ;;  %v17906_v46 = vld [vmem:[#allocation4 + $0x10] ss:$8 sps:$4 sm:$0xff]  }
 0x39a   :  { %16728 = vmatprep.mubr.msk.f32.mxu0 %vm33_vm1, %v19686_v47  ;;  %16750 = vmatpush3.msk.msra.mxu0 %vm272_vm0, %v19593_v9  ;;  %v14373_v9 = vld [vmem:[%s21041_s5 + $0x50] sm:$0xff] }
 0x39b   :  { %16775 = vmatprep.subr.msk.mxu0 %vm272_vm0, %v19692_v53  ;;  %v17901_v5 = vld [vmem:[#allocation4 + $0x18] ss:$8 sps:$4 sm:$0xff]   ;;  %v17142_v31 = vpack.c.bf16 %v14374_v34, %v14373_v9  ;;  %v9928_v34 = vld [vmem:[#allocation2 + $0x180] sm:$0xff] }
 0x39c   :  { %v17903_v16 = vld [vmem:[#allocation4 + $0x19] ss:$8 sps:$4 sm:$0xff]  }
 0x39d   :  { %16729 = vmatmul.mubr.msk.f32.gmra.mrb[26].mxu0 %vm33_vm1, %v19703_v28  ;;  %v17911_v9 = vld [vmem:[#allocation4 + $0x22] ss:$8 sps:$4 sm:$0xff]  }
 0x39e   :  { %16358 = vmatmul.mubr.msk.f32.vlgmr.msra.gmra.mrb[16].mxu1 %vm5797_vm9, %v17897_v42  ;;  %16731 = vmatprep.mubr.msk.f32.mxu0 %vm33_vm1, %v19707_v33  ;;  %v19779_v42 = vld [vmem:[#allocation2 + $0x172] sm:$0xff] }
 0x39f   :  { %17133 = vmatpush3.bf16.msra.mxu1 %v17130_v25  ;;  %16364 = vmatprep.mubr.msk.f32.mxu1 %vm5797_vm9, %v17898_v44  ;;  %v17904_v25 = vld [vmem:[#allocation4 + $0xa] ss:$8 sps:$4 sm:$0xff]   ;;  %v17150_v44 = vpack.c.bf16 %v14382_v55, %v14381_v29 }
 0x3a0   :  { %17135 = vmatprep.subr.bf16.mxu1 %v17134_v43 }
 0x3a1   :  { %16732 = vmatmul.mubr.msk.f32.gmra.mrb[28].mxu0 %vm33_vm1, %v19715_v59 }
 0x3a2   :  { %16734 = vmatprep.mubr.msk.f32.mxu0 %vm33_vm1, %v19718_v0 }
 0x3a5   :  { %16735 = vmatmul.mubr.msk.f32.gmra.mrb[30].mxu0 %vm33_vm1, %v19731_v20 }
 0x3a6   :  { %16365 = vmatmul.mubr.msk.f32.vlgmr.msra.gmra.mrb[16].mxu1 %vm5797_vm9, %v17899_v54  ;;  %16737 = vmatprep.mubr.msk.f32.mxu0 %vm33_vm1, %v19733_v14  ;;  %v17907_v54 = vld [vmem:[#allocation4 + $0x20] ss:$8 sps:$4 sm:$0xff]  }
 0x3a7   :  { %17137 = vmatpush3.bf16.msra.mxu1 %v17134_v43  ;;  %16371 = vmatprep.mubr.msk.f32.mxu1 %vm5797_vm9, %v17900_v58  ;;  %v17905_v43 = vld [vmem:[#allocation4 + $0x1a] ss:$8 sps:$4 sm:$0xff]  }
 0x3a8   :  { %17139 = vmatprep.subr.bf16.mxu1 %v17138_v57  ;;  %v17910_v58 = vld [vmem:[#allocation4 + $0x12] ss:$8 sps:$4 sm:$0xff]  }
 0x3a9   :  { %16738 = vmatmul.mubr.msk.f32.gmra.mrb[32].mxu0 %vm33_vm1, %v19739_v35 }
 0x3aa   :  { %16740 = vmatprep.mubr.msk.f32.mxu0 %vm33_vm1, %v19742_v36 }
 0x3ad   :  { %16741 = vmatmul.mubr.msk.f32.gmra.mrb[34].mxu0 %vm33_vm1, %v19755_v38 }
 0x3ae   :  { %16372 = vmatmul.mubr.msk.f32.vlgmr.msra.gmra.mrb[16].mxu1 %vm5797_vm9, %v17901_v5  ;;  %16743 = vmatprep.mubr.msk.f32.mxu0 %vm33_vm1, %v19757_v52  ;;  %v9929_v5 = vld [vmem:[#allocation2 + $0x188] sm:$0xff] }
 0x3af   :  { %17141 = vmatpush3.bf16.msra.mxu1 %v17138_v57  ;;  %16378 = vmatprep.mubr.msk.f32.mxu1 %vm5797_vm9, %v17902_v32 }
 0x3b0   :  { %17143 = vmatprep.subr.bf16.mxu1 %v17142_v31 }
 0x3b1   :  { %16744 = vmatmul.mubr.msk.f32.gmra.mrb[36].mxu0 %vm33_vm1, %v19763_v11 }
 0x3b2   :  { %16746 = vmatprep.mubr.msk.f32.mxu0 %vm33_vm1, %v19766_v27 }
 0x3b5   :  { %16747 = vmatmul.mubr.msk.f32.gmra.mrb[38].mxu0 %vm33_vm1, %v19779_v42 }
 0x3b6   :  { %16379 = vmatmul.mubr.msk.f32.vlgmr.msra.gmra.mrb[16].mxu1 %vm5797_vm9, %v17903_v16  ;;  %16751 = vmatprep.mubr.msk.f32.mxu0 %vm33_vm1, %v19587_v17  ;;  %v14386_v17 = vld [vmem:[%s21041_s5 + $0x88] sm:$0xff] }
 0x3b7   :  { %17145 = vmatpush3.bf16.msra.mxu1 %v17142_v31  ;;  %16385 = vmatprep.mubr.msk.f32.mxu1 %vm5797_vm9, %v17904_v25  ;;  %v17154_v57 = vpack.c.bf16 %v14386_v17, %v14385_v3  ;;  %v14701_v31 = vld [vmem:[%s21037_s1 + $0x18] sm:$0x7] }
 0x3b8   :  { %17147 = vmatprep.subr.bf16.mxu1 %v17146_v24 }
 0x3b9   :  { %16752 = vmatmul.mubr.msk.f32.vlgmr.msra.gmra.mrb[24].mxu0 %vm33_vm1, %v19598_v15  ;;  %v17908_v15 = vld [vmem:[#allocation4 + $0x11] ss:$8 sps:$4 sm:$0xff]  }
 0x3ba   :  { %16754 = vmatprep.mubr.msk.f32.mxu0 %vm33_vm1, %v19604_v45  ;;  %16776 = vmatpush3.msk.msra.mxu0 %vm272_vm0, %v19692_v53  ;;  %v17909_v53 = vld [vmem:[#allocation4 + $0x21] ss:$8 sps:$4 sm:$0xff]  }
 0x3bb   :  { %16801 = vmatprep.subr.msk.mxu0 %vm272_vm0, %v14683_v51 }
 0x3bd   :  { %16755 = vmatmul.mubr.msk.f32.gmra.mrb[26].mxu0 %vm33_vm1, %v19617_v1 }
 0x3be   :  { %16386 = vmatmul.mubr.msk.f32.vlgmr.msra.gmra.mrb[16].mxu1 %vm5797_vm9, %v17905_v43  ;;  %16757 = vmatprep.mubr.msk.f32.mxu0 %vm33_vm1, %v19619_v39 }
 0x3bf   :  { %17149 = vmatpush3.bf16.msra.mxu1 %v17146_v24  ;;  %16392 = vmatprep.mubr.msk.f32.mxu1 %vm5797_vm9, %v17906_v46 }
 0x3c0   :  { %17151 = vmatprep.subr.bf16.mxu1 %v17150_v44 }
 0x3c1   :  { %16758 = vmatmul.mubr.msk.f32.gmra.mrb[28].mxu0 %vm33_vm1, %v19627_v62 }
 0x3c2   :  { %16760 = vmatprep.mubr.msk.f32.mxu0 %vm33_vm1, %v19630_v4 }
 0x3c5   :  { %16761 = vmatmul.mubr.msk.f32.gmra.mrb[30].mxu0 %vm33_vm1, %v19638_v37 }
 0x3c6   :  { %16393 = vmatmul.mubr.msk.f32.vlgmr.msra.gmra.mrb[16].mxu1 %vm5797_vm9, %v17907_v54  ;;  %16763 = vmatprep.mubr.msk.f32.mxu0 %vm33_vm1, %v19641_v49 }
 0x3c7   :  { %17153 = vmatpush3.bf16.msra.mxu1 %v17150_v44  ;;  %16399 = vmatprep.mubr.msk.f32.mxu1 %vm5797_vm9, %v17908_v15  ;;  %v6756_v15 = vld [vmem:[%s21043_s7] sm:$0xff] }
 0x3c8   :  { %17155 = vmatprep.subr.bf16.mxu1 %v17154_v57 }
 0x3c9   :  { %16764 = vmatmul.mubr.msk.f32.gmra.mrb[32].mxu0 %vm33_vm1, %v19654_v22 }
 0x3ca   :  { %16766 = vmatprep.mubr.msk.f32.mxu0 %vm33_vm1, %v19657_v23 }
 0x3cd   :  { %16767 = vmatmul.mubr.msk.f32.gmra.mrb[34].mxu0 %vm33_vm1, %v19659_v7 }
 0x3ce   :  { %16400 = vmatmul.mubr.msk.f32.vlgmr.msra.gmra.mrb[16].mxu1 %vm5797_vm9, %v17909_v53  ;;  %16769 = vmatprep.mubr.msk.f32.mxu0 %vm33_vm1, %v19665_v26  ;;  %v6757_v53 = vld [vmem:[%s21043_s7 + $0x8] sm:$0xff] }
 0x3cf   :  { %17157 = vmatpush3.bf16.msra.mxu1 %v17154_v57  ;;  %16406 = vmatprep.mubr.msk.f32.mxu1 %vm5797_vm9, %v17910_v58  ;;  %v17162_v58 = vpack.c.bf16 %v6757_v53, %v6756_v15 }
 0x3d1   :  { %16770 = vmatmul.mubr.msk.f32.gmra.mrb[36].mxu0 %vm33_vm1, %v19680_v41 }
 0x3d2   :  { %16772 = vmatprep.mubr.msk.f32.mxu0 %vm33_vm1, %v9928_v34 }
 0x3d5   :  { %16773 = vmatmul.mubr.msk.f32.gmra.mrb[38].mxu0 %vm33_vm1, %v9929_v5 }
 0x3d6   :  { %16407 = vmatmul.mubr.msk.f32.vlgmr.msra.gmra.mrb[16].mxu1 %vm5797_vm9, %v17911_v9  ;;  %16777 = vmatprep.mubr.msk.f32.mxu0 %vm33_vm1, %v19513_v48  ;;  %v19863_v48 = vld [vmem:[#allocation2 + $0x181] sm:$0xff] }
 0x3d7   :  { %16413 = vmatprep.mubr.msk.f32.mxu1 %vm17958_vm11, %v21164_v12  ;;  %v14394_v9 = vld [vmem:[%s21043_s7 + $0x20] sm:$0xff] }
 0x3d9   :  { %16778 = vmatmul.mubr.msk.f32.vlgmr.msra.gmra.mrb[24].mxu0 %vm33_vm1, %v19523_v60  ;;  %v19869_v60 = vld [vmem:[#allocation2 + $0x189] sm:$0xff] }
 0x3da   :  { %16780 = vmatprep.mubr.msk.f32.mxu0 %vm33_vm1, %v19526_v6  ;;  %16802 = vmatpush3.msk.msra.mxu0 %vm272_vm0, %v14683_v51 }
 0x3db   :  { %16827 = vmatprep.subr.msk.mxu0 %vm272_vm0, %v14701_v31 }
 0x3dd   :  { %16781 = vmatmul.mubr.msk.f32.gmra.mrb[26].mxu0 %vm33_vm1, %v19534_v8 }
 0x3de   :  { %16783 = vmatprep.mubr.msk.f32.mxu0 %vm33_vm1, %v19536_v18 }
 0x3e1   :  { %16784 = vmatmul.mubr.msk.f32.gmra.mrb[28].mxu0 %vm33_vm1, %v19542_v19 }
 0x3e2   :  { %16786 = vmatprep.mubr.msk.f32.mxu0 %vm33_vm1, %v19544_v21 }
 0x3e5   :  { %16787 = vmatmul.mubr.msk.f32.gmra.mrb[30].mxu0 %vm33_vm1, %v19550_v2 }
 0x3e6   :  { %16789 = vmatprep.mubr.msk.f32.mxu0 %vm33_vm1, %v19555_v56 }
 0x3e9   :  { %16790 = vmatmul.mubr.msk.f32.gmra.mrb[32].mxu0 %vm33_vm1, %v19561_v13 }
 0x3ea   :  { %16792 = vmatprep.mubr.msk.f32.mxu0 %vm33_vm1, %v19563_v30 }
 0x3ed   :  { %16793 = vmatmul.mubr.msk.f32.gmra.mrb[34].mxu0 %vm33_vm1, %v19570_v61 }
 0x3ee   :  { %16795 = vmatprep.mubr.msk.f32.mxu0 %vm33_vm1, %v19573_v63 }
 0x3f1   :  { %16796 = vmatmul.mubr.msk.f32.gmra.mrb[36].mxu0 %vm33_vm1, %v19580_v10 }
 0x3f2   :  { %16798 = vmatprep.mubr.msk.f32.mxu0 %vm33_vm1, %v19863_v48 }
 0x3f5   :  { %16799 = vmatmul.mubr.msk.f32.gmra.mrb[38].mxu0 %vm33_vm1, %v19869_v60 }
 0x3f6   :  { %16803 = vmatprep.mubr.msk.f32.mxu0 %vm33_vm1, %v19686_v47  ;;  %v19900_v47 = vld [vmem:[#allocation2 + $0x182] sm:$0xff] }
 0x3f9   :  { %16804 = vmatmul.mubr.msk.f32.vlgmr.msra.gmra.mrb[24].mxu0 %vm33_vm1, %v19703_v28  ;;  %v19906_v28 = vld [vmem:[#allocation2 + $0x18a] sm:$0xff] }
 0x3fa   :  { %16806 = vmatprep.mubr.msk.f32.mxu0 %vm33_vm1, %v19707_v33  ;;  %16828 = vmatpush3.msk.msra.mxu0 %vm272_vm0, %v14701_v31 }
 0x3fd   :  { %16807 = vmatmul.mubr.msk.f32.gmra.mrb[26].mxu0 %vm33_vm1, %v19715_v59 }
 0x3fe   :  { %16809 = vmatprep.mubr.msk.f32.mxu0 %vm33_vm1, %v19718_v0 }
 0x401   :  { %16810 = vmatmul.mubr.msk.f32.gmra.mrb[28].mxu0 %vm33_vm1, %v19731_v20 }
 0x402   :  { %16812 = vmatprep.mubr.msk.f32.mxu0 %vm33_vm1, %v19733_v14 }
 0x405   :  { %16813 = vmatmul.mubr.msk.f32.gmra.mrb[30].mxu0 %vm33_vm1, %v19739_v35 }
 0x406   :  { %16815 = vmatprep.mubr.msk.f32.mxu0 %vm33_vm1, %v19742_v36 }
 0x409   :  { %16816 = vmatmul.mubr.msk.f32.gmra.mrb[32].mxu0 %vm33_vm1, %v19755_v38 }
 0x40a   :  { %16818 = vmatprep.mubr.msk.f32.mxu0 %vm33_vm1, %v19757_v52 }
 0x40d   :  { %16819 = vmatmul.mubr.msk.f32.gmra.mrb[34].mxu0 %vm33_vm1, %v19763_v11 }
 0x40e   :  { %16821 = vmatprep.mubr.msk.f32.mxu0 %vm33_vm1, %v19766_v27 }
 0x411   :  { %16822 = vmatmul.mubr.msk.f32.gmra.mrb[36].mxu0 %vm33_vm1, %v19779_v42 }
 0x412   :  { %16824 = vmatprep.mubr.msk.f32.mxu0 %vm33_vm1, %v19900_v47 }
 0x415   :  { %16825 = vmatmul.mubr.msk.f32.gmra.mrb[38].mxu0 %vm33_vm1, %v19906_v28 }
 0x416   :  { %16829 = vmatprep.mubr.msk.f32.mxu0 %vm33_vm1, %v19604_v45  ;;  %v10615_v45 = vld [vmem:[#allocation2 + $0x198] sm:$0xff] }
 0x419   :  { %16830 = vmatmul.mubr.msk.f32.vlgmr.msra.gmra.mrb[24].mxu0 %vm33_vm1, %v19617_v1  ;;  %v10616_v1 = vld [vmem:[#allocation2 + $0x1a0] sm:$0xff] }
 0x41a   :  { %16832 = vmatprep.mubr.msk.f32.mxu0 %vm33_vm1, %v19619_v39  ;;  %v14719_v39 = vld [vmem:[%s21037_s1 + $0x1c] sm:$0x7] }
 0x41b   :  { %16853 = vmatprep.subr.msk.mxu0 %vm272_vm0, %v14719_v39 }
 0x41c   :  { %16854 = vmatpush3.msk.msra.mxu0 %vm272_vm0, %v14719_v39  ;;  %v7152_v39 = vld [vmem:[#allocation2 + $0x1] sm:$0xff] }
 0x41d   :  { %16833 = vmatmul.mubr.msk.f32.gmra.mrb[26].mxu0 %vm33_vm1, %v19627_v62  ;;  %v14390_v62 = vld [vmem:[%s21043_s7 + $0x10] sm:$0xff] }
 0x41e   :  { %16835 = vmatprep.mubr.msk.f32.mxu0 %vm33_vm1, %v19630_v4  ;;  %v14391_v4 = vld [vmem:[%s21043_s7 + $0x18] sm:$0xff] }
 0x421   :  { %16836 = vmatmul.mubr.msk.f32.gmra.mrb[28].mxu0 %vm33_vm1, %v19638_v37  ;;  %v17957_v37 = vmov 0.0|0.0  }
 0x422   :  { %16838 = vmatprep.mubr.msk.f32.mxu0 %vm33_vm1, %v19641_v49  ;;  %17158 = vmatprep.subr.bf16.mxu1 %v17957_v37  ;;  %v17159_v49 = vpack.c.bf16 %v14391_v4, %v14390_v62  ;;  %v7151_v4 = vld [vmem:[%s21037_s1] sm:$0x7] }
 0x424   :  { %17160 = vmatpush3.bf16.msra.mxu1 %v17159_v49  ;;  %v7153_v49 = vld [vmem:[#allocation2 + $0x9] sm:$0xff] }
 0x425   :  { %16839 = vmatmul.mubr.msk.f32.gmra.mrb[30].mxu0 %vm33_vm1, %v19654_v22  ;;  %17161 = vmatprep.subr.bf16.mxu1 %v17957_v37  ;;  %v14410_v22 = vld [vmem:[%s21036_s0 + $0x150] sm:$0xff] }
 0x426   :  { %16841 = vmatprep.mubr.msk.f32.mxu0 %vm33_vm1, %v19657_v23  ;;  %7113 = vst.msk [vmem:[#allocation2 + $0x91] sm:$0xff] %vm33_vm1, %v14410_v22  ;;  %v14411_v23 = vld [vmem:[%s21036_s0 + $0x158] sm:$0xff] }
 0x427   :  { %7114 = vst.msk [vmem:[#allocation2 + $0x99] sm:$0xff] %vm33_vm1, %v14411_v23 }
 0x429   :  { %16842 = vmatmul.mubr.msk.f32.gmra.mrb[32].mxu0 %vm33_vm1, %v19659_v7  ;;  %v14412_v7 = vld [vmem:[%s21036_s0 + $0x160] sm:$0xff] }
 0x42a   :  { %16844 = vmatprep.mubr.msk.f32.mxu0 %vm33_vm1, %v19665_v26  ;;  %7115 = vst.msk [vmem:[#allocation2 + $0xa9] sm:$0xff] %vm33_vm1, %v14412_v7  ;;  %v14413_v26 = vld [vmem:[%s21036_s0 + $0x168] sm:$0xff] }
 0x42b   :  { %7116 = vst.msk [vmem:[#allocation2 + $0xb1] sm:$0xff] %vm33_vm1, %v14413_v26  ;;  %v7135_v26 = vld [vmem:[#allocation2] sm:$0xff] }
 0x42d   :  { %16845 = vmatmul.mubr.msk.f32.gmra.mrb[34].mxu0 %vm33_vm1, %v19680_v41  ;;  %v11073_v41 = vld [vmem:[#allocation2 + $0x19a] sm:$0xff] }
 0x42e   :  { %16847 = vmatprep.mubr.msk.f32.mxu0 %vm33_vm1, %v9928_v34  ;;  %v14395_v34 = vld [vmem:[%s21043_s7 + $0x28] sm:$0xff]  ;;  %v20173_v22 = vld [vmem:[#allocation2 + $0x99] sm:$0xff] }
 0x42f   :  { %v17165_v31 = vpack.c.bf16 %v14395_v34, %v14394_v9  ;;  %v20293_v15 = vld [vmem:[#allocation2 + $0x92] sm:$0xff]  ;;  %v20299_v53 = vld [vmem:[#allocation2 + $0x9a] sm:$0xff] }
 0x430   :  { %v14521_v34 = vld [vmem:[%s21037_s1 + $0x14] sm:$0x7] }
 0x431   :  { %16848 = vmatmul.mubr.msk.f32.gmra.mrb[36].mxu0 %vm33_vm1, %v9929_v5  ;;  %v20175_v23 = vld [vmem:[#allocation2 + $0xa9] sm:$0xff] }
 0x432   :  { %16850 = vmatprep.mubr.msk.f32.mxu0 %vm33_vm1, %v10615_v45  ;;  %v20181_v7 = vld [vmem:[#allocation2 + $0xb1] sm:$0xff] }
 0x433   :  { %v20307_v9 = vld [vmem:[#allocation2 + $0xb2] sm:$0xff] }
 0x435   :  { %16851 = vmatmul.mubr.msk.f32.gmra.mrb[38].mxu0 %vm33_vm1, %v10616_v1  ;;  %v14432_v1 = vld [vmem:[%s21037_s1 + $0x4] sm:$0x7] }
 0x436   :  { %16855 = vmatprep.mubr.msk.f32.mxu0 %vm33_vm1, %v19526_v6  ;;  %v14401_v6 = vld [vmem:[%s21036_s0 + $0x108] sm:$0xff] }
 0x437   :  { %7104 = vst.msk [vmem:[#allocation2 + $0x21] sm:$0xff] %vm33_vm1, %v14401_v6  ;;  %v20123_v6 = vld [vmem:[#allocation2 + $0x19] sm:$0xff] }
 0x439   :  { %16856 = vmatmul.mubr.msk.f32.vlgmr.msra.gmra.mrb[24].mxu0 %vm33_vm1, %v19534_v8  ;;  %v14402_v8 = vld [vmem:[%s21036_s0 + $0x110] sm:$0xff] }
 0x43a   :  { %16858 = vmatprep.mubr.msk.f32.mxu0 %vm33_vm1, %v19536_v18  ;;  %7105 = vst.msk [vmem:[#allocation2 + $0x31] sm:$0xff] %vm33_vm1, %v14402_v8  ;;  %v14403_v18 = vld [vmem:[%s21036_s0 + $0x118] sm:$0xff]  ;;  %v14467_v8 = vld [vmem:[%s21037_s1 + $0x8] sm:$0x7] }
 0x43b   :  { %7106 = vst.msk [vmem:[#allocation2 + $0x39] sm:$0xff] %vm33_vm1, %v14403_v18 }
 0x43d   :  { %16859 = vmatmul.mubr.msk.f32.gmra.mrb[26].mxu0 %vm33_vm1, %v19542_v19  ;;  %v10844_v19 = vld [vmem:[#allocation2 + $0x199] sm:$0xff] }
 0x43e   :  { %16861 = vmatprep.mubr.msk.f32.mxu0 %vm33_vm1, %v19544_v21  ;;  %v14404_v21 = vld [vmem:[%s21036_s0 + $0x120] sm:$0xff] }
 0x43f   :  { %7107 = vst.msk [vmem:[#allocation2 + $0x49] sm:$0xff] %vm33_vm1, %v14404_v21  ;;  %v20132_v18 = vld [vmem:[#allocation2 + $0x21] sm:$0xff] }
 0x441   :  { %16862 = vmatmul.mubr.msk.f32.gmra.mrb[28].mxu0 %vm33_vm1, %v19550_v2  ;;  %v10845_v2 = vld [vmem:[#allocation2 + $0x1a1] sm:$0xff] }
 0x442   :  { %16864 = vmatprep.mubr.msk.f32.mxu0 %vm33_vm1, %v19555_v56  ;;  %v14737_v56 = vld [vmem:[%s21037_s1 + $0x20] sm:$0x7] }
 0x443   :  { %16879 = vmatprep.subr.msk.mxu0 %vm272_vm0, %v14737_v56  ;;  %v20141_v21 = vld [vmem:[#allocation2 + $0x39] sm:$0xff] }
 0x444   :  { %16880 = vmatpush3.msk.msra.mxu0 %vm272_vm0, %v14737_v56 }
 0x445   :  { %16865 = vmatmul.mubr.msk.f32.gmra.mrb[30].mxu0 %vm33_vm1, %v19561_v13  ;;  %v14405_v13 = vld [vmem:[%s21036_s0 + $0x128] sm:$0xff] }
 0x446   :  { %16867 = vmatprep.mubr.msk.f32.mxu0 %vm33_vm1, %v19563_v30  ;;  %7108 = vst.msk [vmem:[#allocation2 + $0x51] sm:$0xff] %vm33_vm1, %v14405_v13  ;;  %v14406_v30 = vld [vmem:[%s21036_s0 + $0x130] sm:$0xff] }
 0x447   :  { %7109 = vst.msk [vmem:[#allocation2 + $0x61] sm:$0xff] %vm33_vm1, %v14406_v30 }
 0x449   :  { %16868 = vmatmul.mubr.msk.f32.gmra.mrb[32].mxu0 %vm33_vm1, %v19570_v61  ;;  %v14407_v61 = vld [vmem:[%s21036_s0 + $0x138] sm:$0xff] }
 0x44a   :  { %16870 = vmatprep.mubr.msk.f32.mxu0 %vm33_vm1, %v19573_v63  ;;  %7110 = vst.msk [vmem:[#allocation2 + $0x69] sm:$0xff] %vm33_vm1, %v14407_v61  ;;  %v14408_v63 = vld [vmem:[%s21036_s0 + $0x140] sm:$0xff] }
 0x44b   :  { %7111 = vst.msk [vmem:[#allocation2 + $0x79] sm:$0xff] %vm33_vm1, %v14408_v63 }
 0x44d   :  { %16871 = vmatmul.mubr.msk.f32.gmra.mrb[34].mxu0 %vm33_vm1, %v19580_v10  ;;  %v14409_v10 = vld [vmem:[%s21036_s0 + $0x148] sm:$0xff]  ;;  %v20149_v56 = vld [vmem:[#allocation2 + $0x51] sm:$0xff] }
 0x44e   :  { %16873 = vmatprep.mubr.msk.f32.mxu0 %vm33_vm1, %v19863_v48  ;;  %7112 = vst.msk [vmem:[#allocation2 + $0x81] sm:$0xff] %vm33_vm1, %v14409_v10  ;;  %v14397_v48 = vld [vmem:[%s21043_s7 + $0x30] sm:$0xff]  ;;  %v20151_v13 = vld [vmem:[#allocation2 + $0x61] sm:$0xff] }
 0x44f   :  { %v20167_v10 = vld [vmem:[#allocation2 + $0x91] sm:$0xff] }
 0x451   :  { %16874 = vmatmul.mubr.msk.f32.gmra.mrb[36].mxu0 %vm33_vm1, %v19869_v60  ;;  %v14398_v60 = vld [vmem:[%s21043_s7 + $0x38] sm:$0xff]  ;;  %v20157_v30 = vld [vmem:[#allocation2 + $0x69] sm:$0xff] }
 0x452   :  { %16876 = vmatprep.mubr.msk.f32.mxu0 %vm33_vm1, %v10844_v19  ;;  %v20134_v19 = vld [vmem:[#allocation2 + $0x31] sm:$0xff]  ;;  %v20159_v61 = vld [vmem:[#allocation2 + $0x79] sm:$0xff] }
 0x455   :  { %16877 = vmatmul.mubr.msk.f32.gmra.mrb[38].mxu0 %vm33_vm1, %v10845_v2  ;;  %v20143_v2 = vld [vmem:[#allocation2 + $0x49] sm:$0xff]  ;;  %v20165_v63 = vld [vmem:[#allocation2 + $0x81] sm:$0xff] }
 0x456   :  { %16881 = vmatprep.mubr.msk.f32.mxu0 %vm33_vm1, %v19707_v33  ;;  %v11074_v33 = vld [vmem:[#allocation2 + $0x1a2] sm:$0xff] }
 0x459   :  { %16882 = vmatmul.mubr.msk.f32.vlgmr.msra.gmra.mrb[24].mxu0 %vm33_vm1, %v19715_v59  ;;  %v14389_v59 = vld [vmem:[%s21042_s6] ss:$0 sm:$0xff] }
 0x45a   :  { %16884 = vmatprep.mubr.msk.f32.mxu0 %vm33_vm1, %v19718_v0 }
 0x45d   :  { %16885 = vmatmul.mubr.msk.f32.gmra.mrb[26].mxu0 %vm33_vm1, %v19731_v20 }
 0x45e   :  { %16887 = vmatprep.mubr.msk.f32.mxu0 %vm33_vm1, %v19733_v14 }
 0x461   :  { %16888 = vmatmul.mubr.msk.f32.gmra.mrb[28].mxu0 %vm33_vm1, %v19739_v35 }
 0x462   :  { %16890 = vmatprep.mubr.msk.f32.mxu0 %vm33_vm1, %v19742_v36 }
 0x465   :  { %16891 = vmatmul.mubr.msk.f32.gmra.mrb[30].mxu0 %vm33_vm1, %v19755_v38 }
 0x466   :  { %16893 = vmatprep.mubr.msk.f32.mxu0 %vm33_vm1, %v19757_v52 }
 0x469   :  { %16894 = vmatmul.mubr.msk.f32.gmra.mrb[32].mxu0 %vm33_vm1, %v19763_v11 }
 0x46a   :  { %16896 = vmatprep.mubr.msk.f32.mxu0 %vm33_vm1, %v19766_v27 }
 0x46d   :  { %16897 = vmatmul.mubr.msk.f32.gmra.mrb[34].mxu0 %vm33_vm1, %v19779_v42 }
 0x46e   :  { %16899 = vmatprep.mubr.msk.f32.mxu0 %vm33_vm1, %v19900_v47 }
 0x471   :  { %16900 = vmatmul.mubr.msk.f32.gmra.mrb[36].mxu0 %vm33_vm1, %v19906_v28  ;;  %v17168_v28 = vpack.c.bf16 %v14398_v60, %v14397_v48 }
 0x472   :  { %16902 = vmatprep.mubr.msk.f32.mxu0 %vm33_vm1, %v11073_v41  ;;  %v7136_v41 = vld [vmem:[#allocation2 + $0x8] sm:$0xff] }
 0x475   :  { %16903 = vmatmul.mubr.msk.f32.gmra.mrb[38].mxu0 %vm33_vm1, %v11074_v33  ;;  %v20186_v33 = vld [vmem:[#allocation2 + $0x18] sm:$0xff] }
 0x4a9   :  { %v16408_v0 = vpop.f32.mrb[16].mxu1 }
 0x4aa   :  { %v6713_v20 = vadd.f32 %v16408_v0, %v14389_v59  ;;  %v6694_v14 = vpop.f32.mrb[17].mxu1  ;;  %v20195_v0 = vld [vmem:[#allocation2 + $0x20] sm:$0xff] }
 0x4ab   :  { %v6712_v32 = vadd.f32 %v14389_v59, %v6694_v14  ;;  %v14485_v59 = vld [vmem:[%s21037_s1 + $0xc] sm:$0x7]  ;;  %v20204_v14 = vld [vmem:[#allocation2 + $0x38] sm:$0xff] }
 0x4ac   :  { %v6715_v35 = vmax.f32 %v6713_v20, 0.0  ;;  %v20197_v20 = vld [vmem:[#allocation2 + $0x30] sm:$0xff] }
 0x4ad   :  { %v6714_v36 = vmax.f32 %v6712_v32, 0.0  ;;  %v20206_v32 = vld [vmem:[#allocation2 + $0x48] sm:$0xff] }
 0x4ae   :  { %v6719_v40 = vcombine.high %v6715_v35, %v6715_v35  ;;  %6724 = vst.msk [vmem:[#allocation8 + $0x8] sm:$0xf] %vm5845_vm10, %v6715_v35  ;;  %v20212_v35 = vld [vmem:[#allocation2 + $0x50] sm:$0xff] }
 0x4af   :  { %v6718_v50 = vcombine.high %v6714_v36, %v6714_v36  ;;  %6722 = vst.msk [vmem:[#allocation8] sm:$0xf] %vm5845_vm10, %v6714_v36  ;;  %v20214_v36 = vld [vmem:[#allocation2 + $0x60] sm:$0xff] }
 0x4b0   :  { %6725 = vst.msk [vmem:[#allocation8 + $0xc] sm:$0xf] %vm5845_vm10, %v6719_v40  ;;  %v20220_v40 = vld [vmem:[#allocation2 + $0x68] sm:$0xff] }
 0x4b1   :  { %6723 = vst.msk [vmem:[#allocation8 + $0x4] sm:$0xf] %vm5845_vm10, %v6718_v50  ;;  %v20222_v50 = vld [vmem:[#allocation2 + $0x78] sm:$0xff] }
 0x4b5   :  { %v6730_v38 = vld [vmem:[#allocation8 + $0x8] ss:$2 sm:$0x3]  ;;  %v6738_v52 = vld [vmem:[#allocation8 + $0x9] ss:$2 sm:$0x3] }
 0x4b6   :  { %v6743_v16 = vmax.f32 %v6730_v38, %v6738_v52  ;;  %v6726_v24 = vld [vmem:[#allocation8] ss:$2 sm:$0x3]  ;;  %v6734_v25 = vld [vmem:[#allocation8 + $0x1] ss:$2 sm:$0x3] }
 0x4b7   :  { %v6732_v11 = vld [vmem:[#allocation8 + $0xc] ss:$2 sm:$0x3]  ;;  %v6740_v27 = vld [vmem:[#allocation8 + $0xd] ss:$2 sm:$0x3]  ;;  %v6741_v42 = vmax.f32 %v6726_v24, %v6734_v25 }
 0x4b8   :  { %v6744_v29 = vmax.f32 %v6732_v11, %v6740_v27  ;;  %v6728_v55 = vld [vmem:[#allocation8 + $0x4] ss:$2 sm:$0x3]  ;;  %v6736_v43 = vld [vmem:[#allocation8 + $0x5] ss:$2 sm:$0x3] }
 0x4b9   :  { %v6749_v44 = vsel %vm6745_vm12, %v6743_v16, -inf  ;;  %v6742_v51 = vmax.f32 %v6728_v55, %v6736_v43  ;;  %v6746_v17 = vsel %vm6745_vm12, %v6741_v42, -inf  ;;  %v20228_v38 = vld [vmem:[#allocation2 + $0x80] sm:$0xff]  ;;  %v20230_v52 = vld [vmem:[#allocation2 + $0x90] sm:$0xff]  ;;  %v20236_v16 = vld [vmem:[#allocation2 + $0x98] sm:$0xff] }
 0x4ba   :  { %v6750_v46 = vsel %vm6745_vm12, %v6744_v29, -inf  ;;  %v20238_v24 = vld [vmem:[#allocation2 + $0xa8] sm:$0xff]  ;;  %v20244_v25 = vld [vmem:[#allocation2 + $0xb0] sm:$0xff]  ;;  %v20249_v29 = vld [vmem:[#allocation2 + $0x1a] sm:$0xff] }
 0x4bb   :  { %v6751_v3 = vmax.f32 %v6749_v44, %v6750_v46  ;;  %v6747_v54 = vsel %vm6745_vm12, %v6742_v51, -inf  ;;  %v7561_v11 = vld [vmem:[#allocation2 + $0x2] sm:$0xff]  ;;  %v7562_v27 = vld [vmem:[#allocation2 + $0xa] sm:$0xff]  ;;  %v20260_v43 = vld [vmem:[#allocation2 + $0x32] sm:$0xff] }
 0x4bc   :  { %v6748_v57 = vmax.f32 %v6746_v17, %v6747_v54  ;;  %v14503_v55 = vld [vmem:[%s21037_s1 + $0x10] sm:$0x7]  ;;  %v20258_v42 = vld [vmem:[#allocation2 + $0x22] sm:$0xff]  ;;  %v20267_v44 = vld [vmem:[#allocation2 + $0x3a] sm:$0xff] }
 0x4bd   :  { %6754 = vst.msk [vmem:[#allocation5 + $0x9] sm:$0x3] %vm6745_vm12, %v6751_v3  ;;  %v20269_v46 = vld [vmem:[#allocation2 + $0x4a] sm:$0xff]  ;;  %v20275_v51 = vld [vmem:[#allocation2 + $0x52] sm:$0xff]  ;;  %v20277_v3 = vld [vmem:[#allocation2 + $0x62] sm:$0xff] }
 0x4be   :  { %6753 = vst.msk [vmem:[#allocation5 + $0x5] sm:$0x3] %vm6745_vm12, %v6748_v57  ;;  %v20283_v17 = vld [vmem:[#allocation2 + $0x6a] sm:$0xff]  ;;  %v20285_v54 = vld [vmem:[#allocation2 + $0x7a] sm:$0xff]  ;;  %v20291_v57 = vld [vmem:[#allocation2 + $0x82] sm:$0xff] }
 0x4c4   :  { %v6909_v45 = vld [vmem:[#allocation5 + $0x9] sm:$0x1]  ;;  %v6987_v62 = vld [vmem:[#allocation5 + $0xa] sm:$0x1] }
 0x4c5   :  { %v6758_v5 = vld [vmem:[#allocation5 + $0x6] sm:$0x1]  ;;  %v6755_v47 = vld [vmem:[#allocation5 + $0x5] sm:$0x1] }
 0x4c6   :  { %16414 = vmatmul.mubr.msk.f32.vlgmr.msra.gmra.mrb[18].mxu1 %vm5797_vm9, %v6758_v5 }
 0x4c7   :  { %17163 = vmatpush3.bf16.msra.mxu1 %v17162_v58  ;;  %16420 = vmatprep.mubr.msk.f32.mxu1 %vm17958_vm11, %v21164_v12  ;;  %v20301_v58 = vld [vmem:[#allocation2 + $0xaa] sm:$0xff] }
 0x4c8   :  { %17164 = vmatprep.subr.bf16.mxu1 %v17957_v37 }
 0x4ca   :  { %16421 = vmatmul.mubr.msk.f32.vlgmr.msra.gmra.mrb[20].mxu1 %vm5797_vm9, %v6755_v47 }
 0x4cb   :  { %17166 = vmatpush3.bf16.msra.mxu1 %v17165_v31  ;;  %16427 = vmatprep.mubr.msk.f32.mxu1 %vm17958_vm11, %v21164_v12 }
 0x4cc   :  { %17167 = vmatprep.subr.bf16.mxu1 %v17957_v37 }
 0x4ce   :  { %16428 = vmatmul.mubr.msk.f32.vlgmr.msra.gmra.mrb[22].mxu1 %vm5797_vm9, %v6909_v45 }
 0x4cf   :  { %17169 = vmatpush3.bf16.msra.mxu1 %v17168_v28  ;;  %16434 = vmatprep.mubr.msk.f32.mxu1 %vm17958_vm11, %v21164_v12 }
 0x4d0   :  { %16437 = vmatprep.subr.msk.mxu1 %vm272_vm0, %v14432_v1 }
 0x4d2   :  { %16435 = vmatmul.mubr.msk.f32.vlgmr.msra.gmra.mrb[24].mxu1 %vm5797_vm9, %v6987_v62 }
 0x4d3   :  { %16438 = vmatpush3.msk.msra.mxu1 %vm272_vm0, %v14432_v1  ;;  %16439 = vmatprep.mubr.msk.f32.mxu1 %vm33_vm1, %v7152_v39 }
 0x4d4   :  { %16463 = vmatprep.subr.msk.mxu1 %vm272_vm0, %v7151_v4 }
 0x4d6   :  { %16440 = vmatmul.mubr.msk.f32.vlgmr.msra.gmra.mrb[26].mxu1 %vm33_vm1, %v7153_v49 }
 0x4d7   :  { %16464 = vmatpush3.msk.msra.mxu1 %vm272_vm0, %v7151_v4  ;;  %16442 = vmatprep.mubr.msk.f32.mxu1 %vm33_vm1, %v20123_v6 }
 0x4d8   :  { %16489 = vmatprep.subr.msk.mxu1 %vm272_vm0, %v14467_v8 }
 0x4da   :  { %16443 = vmatmul.mubr.msk.f32.gmra.mrb[28].mxu1 %vm33_vm1, %v20132_v18 }
 0x4db   :  { %16445 = vmatprep.mubr.msk.f32.mxu1 %vm33_vm1, %v20134_v19 }
 0x4de   :  { %16446 = vmatmul.mubr.msk.f32.gmra.mrb[30].mxu1 %vm33_vm1, %v20141_v21 }
 0x4df   :  { %16448 = vmatprep.mubr.msk.f32.mxu1 %vm33_vm1, %v20143_v2 }
 0x4e2   :  { %16449 = vmatmul.mubr.msk.f32.gmra.mrb[32].mxu1 %vm33_vm1, %v20149_v56 }
 0x4e3   :  { %16451 = vmatprep.mubr.msk.f32.mxu1 %vm33_vm1, %v20151_v13 }
 0x4e6   :  { %16452 = vmatmul.mubr.msk.f32.gmra.mrb[34].mxu1 %vm33_vm1, %v20157_v30 }
 0x4e7   :  { %16454 = vmatprep.mubr.msk.f32.mxu1 %vm33_vm1, %v20159_v61 }
 0x4ea   :  { %16455 = vmatmul.mubr.msk.f32.gmra.mrb[36].mxu1 %vm33_vm1, %v20165_v63 }
 0x4eb   :  { %16457 = vmatprep.mubr.msk.f32.mxu1 %vm33_vm1, %v20167_v10 }
 0x4ee   :  { %16458 = vmatmul.mubr.msk.f32.gmra.mrb[38].mxu1 %vm33_vm1, %v20173_v22 }
 0x4ef   :  { %16460 = vmatprep.mubr.msk.f32.mxu1 %vm33_vm1, %v20175_v23 }
 0x4f2   :  { %16461 = vmatmul.mubr.msk.f32.gmra.mrb[40].mxu1 %vm33_vm1, %v20181_v7 }
 0x4f3   :  { %16465 = vmatprep.mubr.msk.f32.mxu1 %vm33_vm1, %v7135_v26 }
 0x4f6   :  { %16466 = vmatmul.mubr.msk.f32.vlgmr.msra.gmra.mrb[26].mxu1 %vm33_vm1, %v7136_v41 }
 0x4f7   :  { %16490 = vmatpush3.msk.msra.mxu1 %vm272_vm0, %v14467_v8  ;;  %16468 = vmatprep.mubr.msk.f32.mxu1 %vm33_vm1, %v20186_v33  ;;  %v17930_v8 = vld [vmem:[#allocation2 + $0xc0] sm:$0xff] }
 0x4f8   :  { %16515 = vmatprep.subr.msk.mxu1 %vm272_vm0, %v14485_v59 }
 0x4fa   :  { %16469 = vmatmul.mubr.msk.f32.gmra.mrb[28].mxu1 %vm33_vm1, %v20195_v0 }
 0x4fb   :  { %16471 = vmatprep.mubr.msk.f32.mxu1 %vm33_vm1, %v20197_v20 }
 0x4fe   :  { %16472 = vmatmul.mubr.msk.f32.gmra.mrb[30].mxu1 %vm33_vm1, %v20204_v14 }
 0x4ff   :  { %16474 = vmatprep.mubr.msk.f32.mxu1 %vm33_vm1, %v20206_v32 }
 0x502   :  { %16475 = vmatmul.mubr.msk.f32.gmra.mrb[32].mxu1 %vm33_vm1, %v20212_v35 }
 0x503   :  { %16477 = vmatprep.mubr.msk.f32.mxu1 %vm33_vm1, %v20214_v36 }
 0x506   :  { %16478 = vmatmul.mubr.msk.f32.gmra.mrb[34].mxu1 %vm33_vm1, %v20220_v40 }
 0x507   :  { %16480 = vmatprep.mubr.msk.f32.mxu1 %vm33_vm1, %v20222_v50 }
 0x50a   :  { %16481 = vmatmul.mubr.msk.f32.gmra.mrb[36].mxu1 %vm33_vm1, %v20228_v38 }
 0x50b   :  { %16483 = vmatprep.mubr.msk.f32.mxu1 %vm33_vm1, %v20230_v52 }
 0x50e   :  { %16484 = vmatmul.mubr.msk.f32.gmra.mrb[38].mxu1 %vm33_vm1, %v20236_v16 }
 0x50f   :  { %16486 = vmatprep.mubr.msk.f32.mxu1 %vm33_vm1, %v20238_v24 }
 0x512   :  { %16487 = vmatmul.mubr.msk.f32.gmra.mrb[40].mxu1 %vm33_vm1, %v20244_v25 }
 0x513   :  { %16491 = vmatprep.mubr.msk.f32.mxu1 %vm33_vm1, %v7561_v11  ;;  %v14539_v11 = vld [vmem:[%s21037_s1 + $0x18] sm:$0x7] }
 0x516   :  { %16492 = vmatmul.mubr.msk.f32.vlgmr.msra.gmra.mrb[26].mxu1 %vm33_vm1, %v7562_v27  ;;  %v14557_v27 = vld [vmem:[%s21037_s1 + $0x1c] sm:$0x7] }
 0x517   :  { %16516 = vmatpush3.msk.msra.mxu1 %vm272_vm0, %v14485_v59  ;;  %16494 = vmatprep.mubr.msk.f32.mxu1 %vm33_vm1, %v20249_v29 }
 0x518   :  { %16541 = vmatprep.subr.msk.mxu1 %vm272_vm0, %v14503_v55 }
 0x51a   :  { %16495 = vmatmul.mubr.msk.f32.gmra.mrb[28].mxu1 %vm33_vm1, %v20258_v42 }
 0x51b   :  { %16497 = vmatprep.mubr.msk.f32.mxu1 %vm33_vm1, %v20260_v43 }
 0x51e   :  { %16498 = vmatmul.mubr.msk.f32.gmra.mrb[30].mxu1 %vm33_vm1, %v20267_v44 }
 0x51f   :  { %16500 = vmatprep.mubr.msk.f32.mxu1 %vm33_vm1, %v20269_v46 }
 0x522   :  { %16501 = vmatmul.mubr.msk.f32.gmra.mrb[32].mxu1 %vm33_vm1, %v20275_v51 }
 0x523   :  { %16503 = vmatprep.mubr.msk.f32.mxu1 %vm33_vm1, %v20277_v3 }
 0x526   :  { %16504 = vmatmul.mubr.msk.f32.gmra.mrb[34].mxu1 %vm33_vm1, %v20283_v17 }
 0x527   :  { %16506 = vmatprep.mubr.msk.f32.mxu1 %vm33_vm1, %v20285_v54 }
 0x52a   :  { %16507 = vmatmul.mubr.msk.f32.gmra.mrb[36].mxu1 %vm33_vm1, %v20291_v57 }
 0x52b   :  { %16509 = vmatprep.mubr.msk.f32.mxu1 %vm33_vm1, %v20293_v15 }
 0x52c   :  { %v20321_v5 = vpop.f32.mrb[24].mxu0 }
 0x52d   :  { %v20324_v31 = vpop.f32.mrb[25].mxu0 }
 0x52e   :  { %16510 = vmatmul.mubr.msk.f32.gmra.mrb[38].mxu1 %vm33_vm1, %v20299_v53 }
 0x52f   :  { %16512 = vmatprep.mubr.msk.f32.mxu1 %vm33_vm1, %v20301_v58 }
 0x530   :  { %v20330_v48 = vpop.f32.mrb[26].mxu0 }
 0x531   :  { %v20332_v60 = vpop.f32.mrb[27].mxu0 }
 0x532   :  { %16513 = vmatmul.mubr.msk.f32.gmra.mrb[40].mxu1 %vm33_vm1, %v20307_v9 }
 0x533   :  { %16517 = vmatprep.mubr.msk.f32.mxu1 %vm33_vm1, %v20186_v33  ;;  %v17931_v33 = vld [vmem:[#allocation2 + $0xc8] sm:$0xff] }
 0x534   :  { %v20338_v47 = vpop.f32.mrb[28].mxu0 }
 0x535   :  { %v20340_v28 = vpop.f32.mrb[29].mxu0 }
 0x536   :  { %16518 = vmatmul.mubr.msk.f32.vlgmr.msra.gmra.mrb[26].mxu1 %vm33_vm1, %v20195_v0 }
 0x537   :  { %16542 = vmatpush3.msk.msra.mxu1 %vm272_vm0, %v14503_v55  ;;  %16520 = vmatprep.mubr.msk.f32.mxu1 %vm33_vm1, %v20197_v20  ;;  %v20456_v55 = vld [vmem:[#allocation2 + $0xca] sm:$0xff] }
 0x538   :  { %16567 = vmatprep.subr.msk.mxu1 %vm272_vm0, %v14521_v34  ;;  %v20346_v45 = vpop.f32.mrb[30].mxu0 }
 0x539   :  { %v20348_v1 = vpop.f32.mrb[31].mxu0 }
 0x53a   :  { %16521 = vmatmul.mubr.msk.f32.gmra.mrb[28].mxu1 %vm33_vm1, %v20204_v14 }
 0x53b   :  { %16523 = vmatprep.mubr.msk.f32.mxu1 %vm33_vm1, %v20206_v32 }
 0x53c   :  { %v20354_v39 = vpop.f32.mrb[32].mxu0 }
 0x53d   :  { %v20356_v62 = vpop.f32.mrb[33].mxu0 }
 0x53e   :  { %16524 = vmatmul.mubr.msk.f32.gmra.mrb[30].mxu1 %vm33_vm1, %v20212_v35 }
 0x53f   :  { %16526 = vmatprep.mubr.msk.f32.mxu1 %vm33_vm1, %v20214_v36 }
 0x540   :  { %v20362_v4 = vpop.f32.mrb[34].mxu0 }
 0x541   :  { %v20364_v49 = vpop.f32.mrb[35].mxu0 }
 0x542   :  { %16527 = vmatmul.mubr.msk.f32.gmra.mrb[32].mxu1 %vm33_vm1, %v20220_v40 }
 0x543   :  { %16529 = vmatprep.mubr.msk.f32.mxu1 %vm33_vm1, %v20222_v50 }
 0x544   :  { %v20369_v26 = vpop.f32.mrb[36].mxu0 }
 0x545   :  { %v20371_v41 = vpop.f32.mrb[37].mxu0 }
 0x546   :  { %16530 = vmatmul.mubr.msk.f32.gmra.mrb[34].mxu1 %vm33_vm1, %v20228_v38 }
 0x547   :  { %16532 = vmatprep.mubr.msk.f32.mxu1 %vm33_vm1, %v20230_v52 }
 0x548   :  { %v20376_v59 = vpop.f32.mrb[38].mxu0 }
 0x549   :  { %v20378_v0 = vpop.f32.mrb[39].mxu0 }
 0x54a   :  { %16533 = vmatmul.mubr.msk.f32.gmra.mrb[36].mxu1 %vm33_vm1, %v20236_v16 }
 0x54b   :  { %16535 = vmatprep.mubr.msk.f32.mxu1 %vm33_vm1, %v20238_v24 }
 0x54e   :  { %16536 = vmatmul.mubr.msk.f32.gmra.mrb[38].mxu1 %vm33_vm1, %v20244_v25 }
 0x54f   :  { %16538 = vmatprep.mubr.msk.f32.mxu1 %vm33_vm1, %v17930_v8 }
 0x552   :  { %16539 = vmatmul.mubr.msk.f32.gmra.mrb[40].mxu1 %vm33_vm1, %v17931_v33 }
 0x553   :  { %16543 = vmatprep.mubr.msk.f32.mxu1 %vm33_vm1, %v20123_v6  ;;  %v20409_v6 = vld [vmem:[#allocation2 + $0xc1] sm:$0xff] }
 0x556   :  { %16544 = vmatmul.mubr.msk.f32.vlgmr.msra.gmra.mrb[26].mxu1 %vm33_vm1, %v20132_v18  ;;  %v20415_v18 = vld [vmem:[#allocation2 + $0xc9] sm:$0xff] }
 0x557   :  { %16568 = vmatpush3.msk.msra.mxu1 %vm272_vm0, %v14521_v34  ;;  %16546 = vmatprep.mubr.msk.f32.mxu1 %vm33_vm1, %v20134_v19 }
 0x558   :  { %16593 = vmatprep.subr.msk.mxu1 %vm272_vm0, %v14539_v11 }
 0x55a   :  { %16547 = vmatmul.mubr.msk.f32.gmra.mrb[28].mxu1 %vm33_vm1, %v20141_v21 }
 0x55b   :  { %16549 = vmatprep.mubr.msk.f32.mxu1 %vm33_vm1, %v20143_v2 }
 0x55e   :  { %16550 = vmatmul.mubr.msk.f32.gmra.mrb[30].mxu1 %vm33_vm1, %v20149_v56 }
 0x55f   :  { %16552 = vmatprep.mubr.msk.f32.mxu1 %vm33_vm1, %v20151_v13 }
 0x562   :  { %16553 = vmatmul.mubr.msk.f32.gmra.mrb[32].mxu1 %vm33_vm1, %v20157_v30 }
 0x563   :  { %16555 = vmatprep.mubr.msk.f32.mxu1 %vm33_vm1, %v20159_v61 }
 0x566   :  { %16556 = vmatmul.mubr.msk.f32.gmra.mrb[34].mxu1 %vm33_vm1, %v20165_v63 }
 0x567   :  { %16558 = vmatprep.mubr.msk.f32.mxu1 %vm33_vm1, %v20167_v10 }
 0x56a   :  { %16559 = vmatmul.mubr.msk.f32.gmra.mrb[36].mxu1 %vm33_vm1, %v20173_v22 }
 0x56b   :  { %16561 = vmatprep.mubr.msk.f32.mxu1 %vm33_vm1, %v20175_v23 }
 0x56e   :  { %16562 = vmatmul.mubr.msk.f32.gmra.mrb[38].mxu1 %vm33_vm1, %v20181_v7 }
 0x56f   :  { %16564 = vmatprep.mubr.msk.f32.mxu1 %vm33_vm1, %v20409_v6 }
 0x572   :  { %16565 = vmatmul.mubr.msk.f32.gmra.mrb[40].mxu1 %vm33_vm1, %v20415_v18 }
 0x573   :  { %16569 = vmatprep.mubr.msk.f32.mxu1 %vm33_vm1, %v20249_v29  ;;  %v20450_v29 = vld [vmem:[#allocation2 + $0xc2] sm:$0xff] }
 0x576   :  { %16570 = vmatmul.mubr.msk.f32.vlgmr.msra.gmra.mrb[26].mxu1 %vm33_vm1, %v20258_v42  ;;  %v14575_v42 = vld [vmem:[%s21037_s1 + $0x20] sm:$0x7]  ;;  %s17959_s1 = smov [#allocation9]  }
 0x577   :  { %16594 = vmatpush3.msk.msra.mxu1 %vm272_vm0, %v14539_v11  ;;  %16572 = vmatprep.mubr.msk.f32.mxu1 %vm33_vm1, %v20260_v43  ;;  %s13942_s10 = sshll.u32 %s17959_s1, 4  ;;  %s13943_s10 = int_to_ptr.vmem [resolvable:$true] %s13942_s10 }
 0x578   :  { %16619 = vmatprep.subr.msk.mxu1 %vm272_vm0, %v14557_v27  ;;  %s17932_s11 = scalar_lea.vmem %s13943_s10, 32  ;;  %p17937_p1 = scmp.lt.s32.totalorder %s13943_s10, %s13943_s10 }
 0x579   :  { %p17933_p0 = scmp.ne.s32.totalorder %s13943_s10, %s17932_s11  ;;  %p17938_p2 = scmp.lt.s32.totalorder %s17932_s11, %s17932_s11 }
 0x57a   :  { %16573 = vmatmul.mubr.msk.f32.gmra.mrb[28].mxu1 %vm33_vm1, %v20267_v44 }
 0x57b   :  { %16575 = vmatprep.mubr.msk.f32.mxu1 %vm33_vm1, %v20269_v46  ;;  %p17939_p3 = por %p17938_p2, %p17937_p1 }
 0x57d   :  { %p17940_p4 = pnand %p17939_p3, %p17933_p0 }
 0x57e   :  { %16576 = vmatmul.mubr.msk.f32.gmra.mrb[30].mxu1 %vm33_vm1, %v20275_v51 }
 0x57f   :  { %16578 = vmatprep.mubr.msk.f32.mxu1 %vm33_vm1, %v20277_v3 }
 0x582   :  { %16579 = vmatmul.mubr.msk.f32.gmra.mrb[32].mxu1 %vm33_vm1, %v20283_v17 }
 0x583   :  { %16581 = vmatprep.mubr.msk.f32.mxu1 %vm33_vm1, %v20285_v54 }
 0x586   :  { %16582 = vmatmul.mubr.msk.f32.gmra.mrb[34].mxu1 %vm33_vm1, %v20291_v57 }
 0x587   :  { %16584 = vmatprep.mubr.msk.f32.mxu1 %vm33_vm1, %v20293_v15 }
 0x58a   :  { %16585 = vmatmul.mubr.msk.f32.gmra.mrb[36].mxu1 %vm33_vm1, %v20299_v53 }
 0x58b   :  { %16587 = vmatprep.mubr.msk.f32.mxu1 %vm33_vm1, %v20301_v58 }
 0x58e   :  { %16588 = vmatmul.mubr.msk.f32.gmra.mrb[38].mxu1 %vm33_vm1, %v20307_v9 }
 0x58f   :  { %16590 = vmatprep.mubr.msk.f32.mxu1 %vm33_vm1, %v20450_v29 }
 0x592   :  { %16591 = vmatmul.mubr.msk.f32.gmra.mrb[40].mxu1 %vm33_vm1, %v20456_v55 }
 0x593   :  { %16595 = vmatprep.mubr.msk.f32.mxu1 %vm33_vm1, %v20197_v20 }
 0x596   :  { %16596 = vmatmul.mubr.msk.f32.vlgmr.msra.gmra.mrb[26].mxu1 %vm33_vm1, %v20204_v14 }
 0x597   :  { %16620 = vmatpush3.msk.msra.mxu1 %vm272_vm0, %v14557_v27  ;;  %16598 = vmatprep.mubr.msk.f32.mxu1 %vm33_vm1, %v20206_v32 }
 0x598   :  { %16645 = vmatprep.subr.msk.mxu1 %vm272_vm0, %v14575_v42 }
 0x599   :  { %v6831_v34 = vpop.f32.mrb[18].mxu1 }
 0x59a   :  { %v16415_v8 = vpop.f32.mrb[19].mxu1  ;;  %16599 = vmatmul.mubr.msk.f32.gmra.mrb[28].mxu1 %vm33_vm1, %v20212_v35 }
 0x59b   :  { %16601 = vmatprep.mubr.msk.f32.mxu1 %vm33_vm1, %v20214_v36  ;;  %v7065_v36 = vld [vmem:[%s21044_s8] sm:$0x1] }
 0x59d   :  { %v6904_v20 = vpop.f32.mrb[20].mxu1 }
 0x59e   :  { %v6905_v33 = vadd.f32 %v6904_v20, %v6831_v34  ;;  %v16422_v11 = vpop.f32.mrb[21].mxu1  ;;  %16602 = vmatmul.mubr.msk.f32.gmra.mrb[30].mxu1 %vm33_vm1, %v20220_v40  ;;  %v8491_v20 = vld [vmem:[#allocation2 + $0xd8] sm:$0xff] }
 0x59f   :  { %16604 = vmatprep.mubr.msk.f32.mxu1 %vm33_vm1, %v20222_v50  ;;  %v8489_v50 = vld [vmem:[#allocation2 + $0xc0] sm:$0xff] }
 0x5a1   :  { %v6982_v14 = vpop.f32.mrb[22].mxu1 }
 0x5a2   :  { %v6986_v32 = vadd.f32 %v6982_v14, %v6905_v33  ;;  %v16429_v27 = vpop.f32.mrb[23].mxu1  ;;  %16605 = vmatmul.mubr.msk.f32.gmra.mrb[32].mxu1 %vm33_vm1, %v20228_v38 }
 0x5a3   :  { %16607 = vmatprep.mubr.msk.f32.mxu1 %vm33_vm1, %v20230_v52  ;;  %v8490_v52 = vld [vmem:[#allocation2 + $0xc8] sm:$0xff] }
 0x5a5   :  { %v7060_v35 = vpop.f32.mrb[24].mxu1 }
 0x5a6   :  { %v7064_v34 = vadd.f32 %v7060_v35, %v6986_v32  ;;  %v16436_v8 = vpop.f32.mrb[25].mxu1  ;;  %16608 = vmatmul.mubr.msk.f32.gmra.mrb[34].mxu1 %vm33_vm1, %v20236_v16  ;;  %v8492_v16 = vld [vmem:[#allocation2 + $0xe0] sm:$0xff] }
 0x5a7   :  { %16610 = vmatprep.mubr.msk.f32.mxu1 %vm33_vm1, %v20238_v24 }
 0x5a8   :  { %v7066_v40 = vadd.f32 %v7065_v36, %v7064_v34 }
 0x5aa   :  { %v7067_v38 = vmax.f32 %v7066_v40, 0.0  ;;  %16611 = vmatmul.mubr.msk.f32.gmra.mrb[36].mxu1 %vm33_vm1, %v20244_v25 }
 0x5ab   :  { %16613 = vmatprep.mubr.msk.f32.mxu1 %vm33_vm1, %v8489_v50 }
 0x5ac   :  { %7069 = vst.msk [vmem:[#allocation9] sm:$0x1] %vm7068_vm13, %v7067_v38 }
 0x5ae   :  { %16614 = vmatmul.mubr.msk.f32.gmra.mrb[38].mxu1 %vm33_vm1, %v8490_v52 }
 0x5af   :  { %16616 = vmatprep.mubr.msk.f32.mxu1 %vm33_vm1, %v8491_v20 }
 0x5b2   :  { %16617 = vmatmul.mubr.msk.f32.gmra.mrb[40].mxu1 %vm33_vm1, %v8492_v16 }
 0x5b3   :  { %16621 = vmatprep.mubr.msk.f32.mxu1 %vm33_vm1, %v20134_v19  ;;  %v8720_v19 = vld [vmem:[#allocation2 + $0xd9] sm:$0xff] }
 0x5b6   :  { %16622 = vmatmul.mubr.msk.f32.vlgmr.msra.gmra.mrb[26].mxu1 %vm33_vm1, %v20141_v21  ;;  %v8721_v21 = vld [vmem:[#allocation2 + $0xe1] sm:$0xff] }
 0x5b7   :  { %16646 = vmatpush3.msk.msra.mxu1 %vm272_vm0, %v14575_v42  ;;  %16624 = vmatprep.mubr.msk.f32.mxu1 %vm33_vm1, %v20143_v2  ;;  %v8949_v2 = vld [vmem:[#allocation2 + $0xda] sm:$0xff] }
 0x5ba   :  { %16625 = vmatmul.mubr.msk.f32.gmra.mrb[28].mxu1 %vm33_vm1, %v20149_v56  ;;  %v8950_v56 = vld [vmem:[#allocation2 + $0xe2] sm:$0xff] }
 0x5bb   :  { %16627 = vmatprep.mubr.msk.f32.mxu1 %vm33_vm1, %v20151_v13  ;;  %v14756_v13 = vld [vmem:[%s21039_s3 + $0x8] sm:$0xff] }
 0x5bc   :  { %16905 = vmatprep.subr.mxu1 %v14756_v13 }
 0x5be   :  { %16628 = vmatmul.mubr.msk.f32.gmra.mrb[30].mxu1 %vm33_vm1, %v20157_v30  ;;  %v11392_v30 = vld [vmem:[#allocation3 + $0x1] sm:$0xff] }
 0x5bf   :  { %16630 = vmatprep.mubr.msk.f32.mxu1 %vm33_vm1, %v20159_v61  ;;  %v20565_v61 = vld [vmem:[%s21039_s3] sm:$0xff] }
 0x5c2   :  { %16631 = vmatmul.mubr.msk.f32.gmra.mrb[32].mxu1 %vm33_vm1, %v20165_v63  ;;  %v20571_v63 = vld [vmem:[%s21038_s2] ss:$0 sm:$0xff] }
 0x5c3   :  { %16633 = vmatprep.mubr.msk.f32.mxu1 %vm33_vm1, %v20167_v10  ;;  %v11299_v27 = vadd.f32 %v20571_v63, %v20340_v28 }
 0x5c6   :  { %16634 = vmatmul.mubr.msk.f32.gmra.mrb[34].mxu1 %vm33_vm1, %v20173_v22 }
 0x5c7   :  { %16636 = vmatprep.mubr.msk.f32.mxu1 %vm33_vm1, %v20175_v23 }
 0x5ca   :  { %16637 = vmatmul.mubr.msk.f32.gmra.mrb[36].mxu1 %vm33_vm1, %v20181_v7 }
 0x5cb   :  { %16639 = vmatprep.mubr.msk.f32.mxu1 %vm33_vm1, %v20409_v6 }
 0x5ce   :  { %16640 = vmatmul.mubr.msk.f32.gmra.mrb[38].mxu1 %vm33_vm1, %v20415_v18 }
 0x5cf   :  { %16642 = vmatprep.mubr.msk.f32.mxu1 %vm33_vm1, %v8720_v19 }
 0x5d2   :  { %16643 = vmatmul.mubr.msk.f32.gmra.mrb[40].mxu1 %vm33_vm1, %v8721_v21  ;;  %v11315_v21 = vmax.f32 %v11299_v27, 0.0 }
 0x5d3   :  { %16647 = vmatprep.mubr.msk.f32.mxu1 %vm33_vm1, %v20260_v43 }
 0x5d6   :  { %16648 = vmatmul.mubr.msk.f32.vlgmr.msra.gmra.mrb[26].mxu1 %vm33_vm1, %v20267_v44 }
 0x5d7   :  { %16650 = vmatprep.mubr.msk.f32.mxu1 %vm33_vm1, %v20269_v46  ;;  %16906 = vmatpush3.msra.mxu1 %v14756_v13  ;;  %v11301_v13 = vadd.f32 %v20571_v63, %v20348_v1  ;;  %v11303_v1 = vadd.f32 %v20571_v63, %v20356_v62 }
 0x5d8   :  { %16919 = vmatprep.subr.mxu1 %v20565_v61 }
 0x5da   :  { %16651 = vmatmul.mubr.msk.f32.gmra.mrb[28].mxu1 %vm33_vm1, %v20275_v51 }
 0x5db   :  { %16653 = vmatprep.mubr.msk.f32.mxu1 %vm33_vm1, %v20277_v3  ;;  %v11296_v3 = vadd.f32 %v20321_v5, %v20571_v63  ;;  %v11298_v5 = vadd.f32 %v20330_v48, %v20571_v63 }
 0x5dd   :  { %v11312_v6 = vmax.f32 %v11296_v3, 0.0  ;;  %v11314_v36 = vmax.f32 %v11298_v5, 0.0 }
 0x5de   :  { %16654 = vmatmul.mubr.msk.f32.gmra.mrb[30].mxu1 %vm33_vm1, %v20283_v17 }
 0x5df   :  { %16656 = vmatprep.mubr.msk.f32.mxu1 %vm33_vm1, %v20285_v54  ;;  %v11295_v54 = vadd.f32 %v20571_v63, %v20324_v31  ;;  %v11297_v31 = vadd.f32 %v20571_v63, %v20332_v60  ;;  %v11300_v60 = vadd.f32 %v20338_v47, %v20571_v63 }
 0x5e1   :  { %v11313_v34 = vmax.f32 %v11297_v31, 0.0  ;;  %v11316_v28 = vmax.f32 %v11300_v60, 0.0 }
 0x5e2   :  { %16657 = vmatmul.mubr.msk.f32.gmra.mrb[32].mxu1 %vm33_vm1, %v20291_v57 }
 0x5e3   :  { %16659 = vmatprep.mubr.msk.f32.mxu1 %vm33_vm1, %v20293_v15 }
 0x5e6   :  { %16660 = vmatmul.mubr.msk.f32.gmra.mrb[34].mxu1 %vm33_vm1, %v20299_v53 }
 0x5e7   :  { %16662 = vmatprep.mubr.msk.f32.mxu1 %vm33_vm1, %v20301_v58 }
 0x5ea   :  { %16663 = vmatmul.mubr.msk.f32.gmra.mrb[36].mxu1 %vm33_vm1, %v20307_v9 }
 0x5eb   :  { %16665 = vmatprep.mubr.msk.f32.mxu1 %vm33_vm1, %v20450_v29  ;;  %v11311_v29 = vmax.f32 %v11295_v54, 0.0  ;;  %v11317_v54 = vmax.f32 %v11301_v13, 0.0 }
 0x5ee   :  { %16666 = vmatmul.mubr.msk.f32.gmra.mrb[38].mxu1 %vm33_vm1, %v20456_v55 }
 0x5ef   :  { %16668 = vmatprep.mubr.msk.f32.mxu1 %vm33_vm1, %v8949_v2  ;;  %v11302_v2 = vadd.f32 %v20346_v45, %v20571_v63 }
 0x5f2   :  { %16669 = vmatmul.mubr.msk.f32.gmra.mrb[40].mxu1 %vm33_vm1, %v8950_v56 }
 0x5f3   :  { %16907 = vmatprep.mubr.msk.f32.mxu1 %vm79_vm4, %v11392_v30 }
 0x6a9   :  { %v16649_v10 = vpop.f32.mrb[26].mxu1 }
 0x6aa   :  { %v9172_v22 = vadd.f32 %v16649_v10, %v20571_v63  ;;  %v9069_v23 = vpop.f32.mrb[27].mxu1 }
 0x6ab   :  { %v9171_v7 = vadd.f32 %v20571_v63, %v9069_v23 }
 0x6ac   :  { %v9188_v24 = vmax.f32 %v9172_v22, 0.0 }
 0x6ad   :  { %v9187_v25 = vmax.f32 %v9171_v7, 0.0  ;;  %v16652_v43 = vpop.f32.mrb[28].mxu1  ;;  %v11304_v7 = vadd.f32 %v20354_v39, %v20571_v63 }
 0x6ae   :  { %9204 = vst.msk [vmem:[#allocation6 + $0x8] sm:$0xff] %vm79_vm4, %v9188_v24  ;;  %v9174_v44 = vadd.f32 %v16652_v43, %v20571_v63  ;;  %v9079_v46 = vpop.f32.mrb[29].mxu1 }
 0x6af   :  { %9203 = vst.msk [vmem:[#allocation6] sm:$0xff] %vm79_vm4, %v9187_v25  ;;  %v9173_v51 = vadd.f32 %v20571_v63, %v9079_v46 }
 0x6b0   :  { %v9190_v17 = vmax.f32 %v9174_v44, 0.0 }
 0x6b1   :  { %v9189_v57 = vmax.f32 %v9173_v51, 0.0  ;;  %v16655_v15 = vpop.f32.mrb[30].mxu1 }
 0x6b2   :  { %9206 = vst.msk [vmem:[#allocation6 + $0x18] sm:$0xff] %vm79_vm4, %v9190_v17  ;;  %v9176_v53 = vadd.f32 %v16655_v15, %v20571_v63  ;;  %v9089_v58 = vpop.f32.mrb[31].mxu1  ;;  %v11318_v17 = vmax.f32 %v11302_v2, 0.0  ;;  %v11308_v2 = vadd.f32 %v20369_v26, %v20571_v63 }
 0x6b3   :  { %9205 = vst.msk [vmem:[#allocation6 + $0x10] sm:$0xff] %vm79_vm4, %v9189_v57  ;;  %v9175_v9 = vadd.f32 %v20571_v63, %v9089_v58  ;;  %v11320_v58 = vmax.f32 %v11304_v7, 0.0 }
 0x6b4   :  { %v9192_v18 = vmax.f32 %v9176_v53, 0.0 }
 0x6b5   :  { %v9191_v55 = vmax.f32 %v9175_v9, 0.0  ;;  %v16658_v42 = vpop.f32.mrb[32].mxu1 }
 0x6b6   :  { %v9219_v33 = vld [vmem:[#allocation6] ss:$2 sm:$0xff]  ;;  %v9227_v11 = vld [vmem:[#allocation6 + $0x1] ss:$2 sm:$0xff]  ;;  %9208 = vst.msk [vmem:[#allocation6 + $0x28] sm:$0xff] %vm79_vm4, %v9192_v18  ;;  %v9178_v14 = vadd.f32 %v16658_v42, %v20571_v63  ;;  %v9099_v32 = vpop.f32.mrb[33].mxu1 }
 0x6b7   :  { %11327 = vst.msk [vmem:[#allocation6] sm:$0xff] %vm79_vm4, %v11311_v29  ;;  %11328 = vst.msk [vmem:[#allocation6 + $0x8] sm:$0xff] %vm79_vm4, %v11312_v6  ;;  %v9177_v48 = vadd.f32 %v20571_v63, %v9099_v32  ;;  %v9235_v8 = vmax.f32 %v9219_v33, %v9227_v11  ;;  %v11319_v29 = vmax.f32 %v11303_v1, 0.0  ;;  %v11306_v33 = vadd.f32 %v20362_v4, %v20571_v63 }
 0x6b8   :  { %9207 = vst.msk [vmem:[#allocation6 + $0x20] sm:$0xff] %vm79_vm4, %v9191_v55  ;;  %v9194_v35 = vmax.f32 %v9178_v14, 0.0  ;;  %v11309_v1 = vadd.f32 %v20571_v63, %v20378_v0 }
 0x6b9   :  { %v9193_v40 = vmax.f32 %v9177_v48, 0.0  ;;  %v16661_v50 = vpop.f32.mrb[34].mxu1  ;;  %v9243_v30 = vsel %vm79_vm4, %v9235_v8, -inf  ;;  %v11305_v48 = vadd.f32 %v20571_v63, %v20364_v49  ;;  %v11322_v13 = vmax.f32 %v11306_v33, 0.0 }
 0x6ba   :  { %v9220_v38 = vld [vmem:[#allocation6 + $0x10] ss:$2 sm:$0xff]  ;;  %v9228_v52 = vld [vmem:[#allocation6 + $0x11] ss:$2 sm:$0xff]  ;;  %9210 = vst.msk [vmem:[#allocation6 + $0x38] sm:$0xff] %vm79_vm4, %v9194_v35  ;;  %v9180_v20 = vadd.f32 %v16661_v50, %v20571_v63  ;;  %v9109_v16 = vpop.f32.mrb[35].mxu1 }
 0x6bb   :  { %v9236_v19 = vmax.f32 %v9220_v38, %v9228_v52  ;;  %11329 = vst.msk [vmem:[#allocation6 + $0x10] sm:$0xff] %vm79_vm4, %v11313_v34  ;;  %11330 = vst.msk [vmem:[#allocation6 + $0x18] sm:$0xff] %vm79_vm4, %v11314_v36  ;;  %v9179_v47 = vadd.f32 %v20571_v63, %v9109_v16  ;;  %v20640_v36 = vld [vmem:[%s21039_s3 + $0x10] sm:$0xff] }
 0x6bc   :  { %9209 = vst.msk [vmem:[#allocation6 + $0x30] sm:$0xff] %vm79_vm4, %v9193_v40  ;;  %v9196_v56 = vmax.f32 %v9180_v20, 0.0 }
 0x6bd   :  { %v9244_v10 = vsel %vm79_vm4, %v9236_v19, -inf  ;;  %v9195_v22 = vmax.f32 %v9179_v47, 0.0  ;;  %v16664_v23 = vpop.f32.mrb[36].mxu1 }
 0x6be   :  { %v11343_v24 = vld [vmem:[#allocation6] ss:$2 sm:$0xff]  ;;  %v11351_v25 = vld [vmem:[#allocation6 + $0x1] ss:$2 sm:$0xff]  ;;  %v9245_v43 = vmax.f32 %v9243_v30, %v9244_v10  ;;  %9212 = vst.msk [vmem:[#allocation6 + $0x48] sm:$0xff] %vm79_vm4, %v9196_v56  ;;  %v9182_v45 = vadd.f32 %v16664_v23, %v20571_v63  ;;  %v9119_v51 = vpop.f32.mrb[37].mxu1  ;;  %v11307_v56 = vadd.f32 %v20571_v63, %v20371_v41 }
 0x6bf   :  { %v9221_v44 = vld [vmem:[#allocation6 + $0x20] ss:$2 sm:$0xff]  ;;  %v9229_v46 = vld [vmem:[#allocation6 + $0x21] ss:$2 sm:$0xff]  ;;  %9211 = vst.msk [vmem:[#allocation6 + $0x40] sm:$0xff] %vm79_vm4, %v9195_v22  ;;  %v9181_v3 = vadd.f32 %v20571_v63, %v9119_v51  ;;  %v11359_v57 = vmax.f32 %v11343_v24, %v11351_v25  ;;  %v11321_v30 = vmax.f32 %v11305_v48, 0.0 }
 0x6c0   :  { %9255 = vst.msk [vmem:[#allocation3 + $0x11] sm:$0xff] %vm79_vm4, %v9245_v43  ;;  %11331 = vst.msk [vmem:[#allocation6 + $0x20] sm:$0xff] %vm79_vm4, %v11315_v21  ;;  %v9198_v39 = vmax.f32 %v9182_v45, 0.0  ;;  %v9237_v15 = vmax.f32 %v9221_v44, %v9229_v46  ;;  %v11324_v41 = vmax.f32 %v11308_v2, 0.0  ;;  %v11323_v44 = vmax.f32 %v11307_v56, 0.0  ;;  %v14782_v2 = vld [vmem:[%s21039_s3 + $0x18] sm:$0xff] }
 0x6c1   :  { %11332 = vst.msk [vmem:[#allocation6 + $0x28] sm:$0xff] %vm79_vm4, %v11316_v28  ;;  %v16667_v53 = vpop.f32.mrb[38].mxu1  ;;  %v9197_v6 = vmax.f32 %v9181_v3, 0.0  ;;  %v11367_v60 = vsel %vm79_vm4, %v11359_v57, -inf }
 0x6c2   :  { %v11344_v62 = vld [vmem:[#allocation6 + $0x10] ss:$2 sm:$0xff]  ;;  %v11352_v9 = vld [vmem:[#allocation6 + $0x11] ss:$2 sm:$0xff]  ;;  %9214 = vst.msk [vmem:[#allocation6 + $0x58] sm:$0xff] %vm79_vm4, %v9198_v39  ;;  %v9184_v18 = vadd.f32 %v16667_v53, %v20571_v63  ;;  %v9129_v42 = vpop.f32.mrb[39].mxu1 }
 0x6c3   :  { %v11360_v5 = vmax.f32 %v11344_v62, %v11352_v9  ;;  %v9222_v31 = vld [vmem:[#allocation6 + $0x30] ss:$2 sm:$0xff]  ;;  %v9230_v55 = vld [vmem:[#allocation6 + $0x31] ss:$2 sm:$0xff]  ;;  %9213 = vst.msk [vmem:[#allocation6 + $0x50] sm:$0xff] %vm79_vm4, %v9197_v6  ;;  %v9183_v32 = vadd.f32 %v20571_v63, %v9129_v42  ;;  %v9246_v35 = vsel %vm79_vm4, %v9237_v15, -inf }
 0x6c4   :  { %v9238_v11 = vmax.f32 %v9222_v31, %v9230_v55  ;;  %11333 = vst.msk [vmem:[#allocation6 + $0x30] sm:$0xff] %vm79_vm4, %v11317_v54  ;;  %11334 = vst.msk [vmem:[#allocation6 + $0x38] sm:$0xff] %vm79_vm4, %v11318_v17  ;;  %v9200_v14 = vmax.f32 %v9184_v18, 0.0 }
 0x6c5   :  { %v11368_v27 = vsel %vm79_vm4, %v11360_v5, -inf  ;;  %v16670_v4 = vpop.f32.mrb[40].mxu1  ;;  %v9199_v49 = vmax.f32 %v9183_v32, 0.0 }
 0x6c6   :  { %v11369_v34 = vmax.f32 %v11367_v60, %v11368_v27  ;;  %v9247_v8 = vsel %vm79_vm4, %v9238_v11, -inf  ;;  %v9223_v40 = vld [vmem:[#allocation6 + $0x40] ss:$2 sm:$0xff]  ;;  %v9231_v50 = vld [vmem:[#allocation6 + $0x41] ss:$2 sm:$0xff]  ;;  %9216 = vst.msk [vmem:[#allocation6 + $0x68] sm:$0xff] %vm79_vm4, %v9200_v14  ;;  %v9186_v38 = vadd.f32 %v16670_v4, %v20571_v63 }
 0x6c7   :  { %v9248_v16 = vmax.f32 %v9246_v35, %v9247_v8  ;;  %11335 = vst.msk [vmem:[#allocation6 + $0x40] sm:$0xff] %vm79_vm4, %v11319_v29  ;;  %11336 = vst.msk [vmem:[#allocation6 + $0x48] sm:$0xff] %vm79_vm4, %v11320_v58  ;;  %v9139_v19 = vpop.f32.mrb[41].mxu1  ;;  %v20647_v47 = vld [vmem:[#allocation3 + $0x11] sm:$0xff]  ;;  %v9239_v24 = vmax.f32 %v9223_v40, %v9231_v50 }
 0x6c8   :  { %v11345_v52 = vld [vmem:[#allocation6 + $0x20] ss:$2 sm:$0xff]  ;;  %v11353_v20 = vld [vmem:[#allocation6 + $0x21] ss:$2 sm:$0xff]  ;;  %11379 = vst.msk [vmem:[#allocation3 + $0x51] sm:$0xff] %vm79_vm4, %v11369_v34  ;;  %9215 = vst.msk [vmem:[#allocation6 + $0x60] sm:$0xff] %vm79_vm4, %v9199_v49  ;;  %v9185_v21 = vadd.f32 %v20571_v63, %v9139_v19  ;;  %16908 = vmatmul.mubr.msk.f32.vlgmr.msra.gmra.mrb[42].mxu1 %vm79_vm4, %v20647_v47 }
 0x6c9   :  { %v9202_v28 = vmax.f32 %v9186_v38, 0.0  ;;  %9256 = vst.msk [vmem:[#allocation3 + $0x21] sm:$0xff] %vm79_vm4, %v9248_v16  ;;  %16920 = vmatpush3.msra.mxu1 %v20565_v61  ;;  %v11361_v10 = vmax.f32 %v11345_v52, %v11353_v20  ;;  %v11310_v61 = vadd.f32 %v20376_v59, %v20571_v63  ;;  %v9249_v3 = vsel %vm79_vm4, %v9239_v24, -inf  ;;  %v11383_v19 = vld [vmem:[#allocation3] sm:$0xff]  ;;  %v14791_v24 = vld [vmem:[%s21039_s3 + $0x20] sm:$0xff] }
 0x6ca   :  { %v9201_v22 = vmax.f32 %v9185_v21, 0.0  ;;  %16933 = vmatprep.subr.mxu1 %v20640_v36  ;;  %v9224_v25 = vld [vmem:[#allocation6 + $0x50] ss:$2 sm:$0xff]  ;;  %v9232_v43 = vld [vmem:[#allocation6 + $0x51] ss:$2 sm:$0xff]  ;;  %v11325_v63 = vmax.f32 %v11309_v1, 0.0 }
 0x6cb   :  { %9218 = vst.msk [vmem:[#allocation6 + $0x78] sm:$0xff] %vm79_vm4, %v9202_v28  ;;  %v11346_v23 = vld [vmem:[#allocation6 + $0x30] ss:$2 sm:$0xff]  ;;  %v11354_v7 = vld [vmem:[#allocation6 + $0x31] ss:$2 sm:$0xff]  ;;  %v9240_v45 = vmax.f32 %v9224_v25, %v9232_v43  ;;  %11337 = vst.msk [vmem:[#allocation6 + $0x50] sm:$0xff] %vm79_vm4, %v11321_v30 }
 0x6cc   :  { %v11362_v26 = vmax.f32 %v11346_v23, %v11354_v7  ;;  %9217 = vst.msk [vmem:[#allocation6 + $0x70] sm:$0xff] %vm79_vm4, %v9201_v22  ;;  %11338 = vst.msk [vmem:[#allocation6 + $0x58] sm:$0xff] %vm79_vm4, %v11322_v13  ;;  %v11370_v46 = vsel %vm79_vm4, %v11361_v10, -inf  ;;  %v11326_v0 = vmax.f32 %v11310_v61, 0.0  ;;  %v11384_v21 = vld [vmem:[#allocation3 + $0x10] sm:$0xff]  ;;  %v11659_v22 = vld [vmem:[#allocation3 + $0x2] sm:$0xff] }
 0x6cd   :  { %v9250_v17 = vsel %vm79_vm4, %v9240_v45, -inf  ;;  %v11660_v7 = vld [vmem:[#allocation3 + $0x12] sm:$0xff] }
 0x6ce   :  { %v11371_v51 = vsel %vm79_vm4, %v11362_v26, -inf  ;;  %v11347_v15 = vld [vmem:[#allocation6 + $0x40] ss:$2 sm:$0xff]  ;;  %v11355_v53 = vld [vmem:[#allocation6 + $0x41] ss:$2 sm:$0xff]  ;;  %v9251_v58 = vmax.f32 %v9249_v3, %v9250_v17  ;;  %v14800_v61 = vld [vmem:[%s21039_s3 + $0x28] sm:$0xff] }
 0x6cf   :  { %v11372_v39 = vmax.f32 %v11370_v46, %v11371_v51  ;;  %v9225_v54 = vld [vmem:[#allocation6 + $0x60] ss:$2 sm:$0xff]  ;;  %v9233_v57 = vld [vmem:[#allocation6 + $0x61] ss:$2 sm:$0xff]  ;;  %v11363_v9 = vmax.f32 %v11347_v15, %v11355_v53  ;;  %v20699_v20 = vld [vmem:[#allocation3 + $0x51] sm:$0xff] }
 0x6d0   :  { %11339 = vst.msk [vmem:[#allocation6 + $0x60] sm:$0xff] %vm79_vm4, %v11323_v44  ;;  %11340 = vst.msk [vmem:[#allocation6 + $0x68] sm:$0xff] %vm79_vm4, %v11324_v41  ;;  %v20675_v59 = vld [vmem:[#allocation3 + $0x21] sm:$0xff]  ;;  %v9241_v62 = vmax.f32 %v9225_v54, %v9233_v57  ;;  %v20730_v10 = vld [vmem:[#allocation3 + $0x50] sm:$0xff] }
 0x6d1   :  { %11380 = vst.msk [vmem:[#allocation3 + $0x61] sm:$0xff] %vm79_vm4, %v11372_v39  ;;  %16910 = vmatprep.mubr.msk.f32.mxu1 %vm79_vm4, %v20675_v59  ;;  %9257 = vst.msk [vmem:[#allocation3 + $0x31] sm:$0xff] %vm79_vm4, %v9251_v58  ;;  %v11373_v11 = vsel %vm79_vm4, %v11363_v9, -inf  ;;  %v20717_v56 = vld [vmem:[#allocation3 + $0x20] sm:$0xff]  ;;  %v20759_v41 = vld [vmem:[#allocation3 + $0x52] sm:$0xff] }
 0x6d2   :  { %v9252_v42 = vsel %vm79_vm4, %v9241_v62, -inf  ;;  %v20747_v25 = vld [vmem:[#allocation3 + $0x22] sm:$0xff]  ;;  %v14827_v3 = vld [vmem:[%s21039_s3 + $0x40] sm:$0xff] }
 0x6d3   :  { %v9226_v6 = vld [vmem:[#allocation6 + $0x70] ss:$2 sm:$0xff]  ;;  %v9234_v18 = vld [vmem:[#allocation6 + $0x71] ss:$2 sm:$0xff]  ;;  %v14809_v46 = vld [vmem:[%s21039_s3 + $0x30] sm:$0xff] }
 0x6d4   :  { %v11348_v29 = vld [vmem:[#allocation6 + $0x50] ss:$2 sm:$0xff]  ;;  %v11356_v5 = vld [vmem:[#allocation6 + $0x51] ss:$2 sm:$0xff]  ;;  %v9242_v31 = vmax.f32 %v9226_v6, %v9234_v18  ;;  %11341 = vst.msk [vmem:[#allocation6 + $0x70] sm:$0xff] %vm79_vm4, %v11325_v63  ;;  %11342 = vst.msk [vmem:[#allocation6 + $0x78] sm:$0xff] %vm79_vm4, %v11326_v0 }
 0x6d5   :  { %v11364_v55 = vmax.f32 %v11348_v29, %v11356_v5  ;;  %v14818_v51 = vld [vmem:[%s21039_s3 + $0x38] sm:$0xff]  ;;  %v12250_v17 = vld [vmem:[#allocation3 + $0x90] sm:$0xff]  ;;  %v14837_v15 = vld [vmem:[%s21041_s5 + $0x10] sm:$0xff] }
 0x6d6   :  { %v9253_v33 = vsel %vm79_vm4, %v9242_v31, -inf  ;;  %v12396_v54 = vld [vmem:[#allocation3 + $0x91] sm:$0xff]  ;;  %v14838_v53 = vld [vmem:[%s21041_s5 + $0x18] sm:$0xff]  ;;  %v14836_v62 = vld [vmem:[%s21040_s4] ss:$0 sm:$0xff] }
 0x6d7   :  { %v11374_v14 = vsel %vm79_vm4, %v11364_v55, -inf  ;;  %v11349_v32 = vld [vmem:[#allocation6 + $0x60] ss:$2 sm:$0xff]  ;;  %v11357_v48 = vld [vmem:[#allocation6 + $0x61] ss:$2 sm:$0xff]  ;;  %v9254_v60 = vmax.f32 %v9252_v42, %v9253_v33  ;;  %v12542_v57 = vld [vmem:[#allocation3 + $0x92] sm:$0xff]  ;;  %v17170_v58 = vpack.c.bf16 %v14838_v53, %v14837_v15 }
 0x6d8   :  { %v11375_v27 = vmax.f32 %v11373_v11, %v11374_v14  ;;  %v20688_v35 = vld [vmem:[#allocation3 + $0x31] sm:$0xff]  ;;  %v11365_v4 = vmax.f32 %v11349_v32, %v11357_v48  ;;  %v20704_v16 = vld [vmem:[#allocation3 + $0x61] sm:$0xff] }
 0x6d9   :  { %9258 = vst.msk [vmem:[#allocation3 + $0x41] sm:$0xff] %vm79_vm4, %v9254_v60  ;;  %16911 = vmatmul.mubr.msk.f32.gmra.mrb[44].mxu1 %vm79_vm4, %v20688_v35  ;;  %v20722_v13 = vld [vmem:[#allocation3 + $0x30] sm:$0xff]  ;;  %v20763_v44 = vld [vmem:[#allocation3 + $0x62] sm:$0xff]  ;;  %17171 = vmatprep.subr.bf16.mxu0 %v17170_v58  ;;  %v12757_v0 = vld [vmem:[%s21041_s5 + $0x8] sm:$0xff] }
 0x6da   :  { %11381 = vst.msk [vmem:[#allocation3 + $0x71] sm:$0xff] %vm79_vm4, %v11375_v27  ;;  %v11376_v50 = vsel %vm79_vm4, %v11365_v4, -inf  ;;  %v20751_v26 = vld [vmem:[#allocation3 + $0x32] sm:$0xff]  ;;  %17173 = vmatpush3.bf16.msra.mxu0 %v17170_v58 }
 0x6db   :  { %v11350_v34 = vld [vmem:[#allocation6 + $0x70] ss:$2 sm:$0xff]  ;;  %v11358_v8 = vld [vmem:[#allocation6 + $0x71] ss:$2 sm:$0xff] }
 0x6dc   :  { %v11366_v40 = vmax.f32 %v11350_v34, %v11358_v8 }
 0x6de   :  { %v11377_v49 = vsel %vm79_vm4, %v11366_v40, -inf }
 0x6df   :  { %v11378_v38 = vmax.f32 %v11376_v50, %v11377_v49 }
 0x6e0   :  { %v20695_v52 = vld [vmem:[#allocation3 + $0x41] sm:$0xff] }
 0x6e1   :  { %16913 = vmatprep.mubr.msk.f32.mxu1 %vm79_vm4, %v20695_v52  ;;  %11382 = vst.msk [vmem:[#allocation3 + $0x81] sm:$0xff] %vm79_vm4, %v11378_v38  ;;  %v20708_v28 = vld [vmem:[#allocation3 + $0x71] sm:$0xff]  ;;  %v20726_v30 = vld [vmem:[#allocation3 + $0x40] sm:$0xff] }
 0x6e2   :  { %16914 = vmatmul.mubr.msk.f32.gmra.mrb[46].mxu1 %vm79_vm4, %v20699_v20  ;;  %v20738_v23 = vld [vmem:[#allocation3 + $0x70] sm:$0xff]  ;;  %v20755_v43 = vld [vmem:[#allocation3 + $0x42] sm:$0xff] }
 0x6e3   :  { %16916 = vmatprep.mubr.msk.f32.mxu1 %vm79_vm4, %v20704_v16  ;;  %v20767_v45 = vld [vmem:[#allocation3 + $0x72] sm:$0xff] }
 0x6e6   :  { %16917 = vmatmul.mubr.msk.f32.gmra.mrb[48].mxu1 %vm79_vm4, %v20708_v28 }
 0x6e7   :  { %16921 = vmatprep.mubr.msk.f32.mxu1 %vm79_vm4, %v11383_v19 }
 0x6e8   :  { %v11812_v1 = vld [vmem:[#allocation3 + $0x80] sm:$0xff] }
 0x6e9   :  { %v12104_v39 = vld [vmem:[#allocation3 + $0x82] sm:$0xff] }
 0x6ea   :  { %16922 = vmatmul.mubr.msk.f32.vlgmr.msra.gmra.mrb[42].mxu1 %vm79_vm4, %v11384_v21 }
 0x6eb   :  { %16934 = vmatpush3.msra.mxu1 %v20640_v36  ;;  %16924 = vmatprep.mubr.msk.f32.mxu1 %vm79_vm4, %v20717_v56  ;;  %v20734_v36 = vld [vmem:[#allocation3 + $0x60] sm:$0xff] }
 0x6ec   :  { %16947 = vmatprep.subr.mxu1 %v14782_v2 }
 0x6ee   :  { %16925 = vmatmul.mubr.msk.f32.gmra.mrb[44].mxu1 %vm79_vm4, %v20722_v13 }
 0x6ef   :  { %16927 = vmatprep.mubr.msk.f32.mxu1 %vm79_vm4, %v20726_v30 }
 0x6f2   :  { %16928 = vmatmul.mubr.msk.f32.gmra.mrb[46].mxu1 %vm79_vm4, %v20730_v10 }
 0x6f3   :  { %16930 = vmatprep.mubr.msk.f32.mxu1 %vm79_vm4, %v20734_v36 }
 0x6f6   :  { %16931 = vmatmul.mubr.msk.f32.gmra.mrb[48].mxu1 %vm79_vm4, %v20738_v23 }
 0x6f7   :  { %16935 = vmatprep.mubr.msk.f32.mxu1 %vm79_vm4, %v11659_v22 }
 0x6fa   :  { %16936 = vmatmul.mubr.msk.f32.vlgmr.msra.gmra.mrb[42].mxu1 %vm79_vm4, %v11660_v7 }
 0x6fb   :  { %16948 = vmatpush3.msra.mxu1 %v14782_v2  ;;  %16938 = vmatprep.mubr.msk.f32.mxu1 %vm79_vm4, %v20747_v25 }
 0x6fc   :  { %16961 = vmatprep.subr.mxu1 %v14791_v24 }
 0x6fe   :  { %16939 = vmatmul.mubr.msk.f32.gmra.mrb[44].mxu1 %vm79_vm4, %v20751_v26 }
 0x6ff   :  { %16941 = vmatprep.mubr.msk.f32.mxu1 %vm79_vm4, %v20755_v43 }
 0x702   :  { %16942 = vmatmul.mubr.msk.f32.gmra.mrb[46].mxu1 %vm79_vm4, %v20759_v41 }
 0x703   :  { %16944 = vmatprep.mubr.msk.f32.mxu1 %vm79_vm4, %v20763_v44 }
 0x706   :  { %16945 = vmatmul.mubr.msk.f32.gmra.mrb[48].mxu1 %vm79_vm4, %v20767_v45 }
 0x707   :  { %16949 = vmatprep.mubr.msk.f32.mxu1 %vm79_vm4, %v11384_v21 }
 0x70a   :  { %16950 = vmatmul.mubr.msk.f32.vlgmr.msra.gmra.mrb[42].mxu1 %vm79_vm4, %v20717_v56 }
 0x70b   :  { %16962 = vmatpush3.msra.mxu1 %v14791_v24  ;;  %16952 = vmatprep.mubr.msk.f32.mxu1 %vm79_vm4, %v20722_v13 }
 0x70c   :  { %16975 = vmatprep.subr.mxu1 %v14800_v61 }
 0x70e   :  { %16953 = vmatmul.mubr.msk.f32.gmra.mrb[44].mxu1 %vm79_vm4, %v20726_v30 }
 0x70f   :  { %16955 = vmatprep.mubr.msk.f32.mxu1 %vm79_vm4, %v20730_v10 }
 0x712   :  { %16956 = vmatmul.mubr.msk.f32.gmra.mrb[46].mxu1 %vm79_vm4, %v20734_v36 }
 0x713   :  { %16958 = vmatprep.mubr.msk.f32.mxu1 %vm79_vm4, %v20738_v23 }
 0x716   :  { %16959 = vmatmul.mubr.msk.f32.gmra.mrb[48].mxu1 %vm79_vm4, %v11812_v1 }
 0x717   :  { %16963 = vmatprep.mubr.msk.f32.mxu1 %vm79_vm4, %v20647_v47  ;;  %v11958_v47 = vld [vmem:[#allocation3 + $0x81] sm:$0xff] }
 0x71a   :  { %16964 = vmatmul.mubr.msk.f32.vlgmr.msra.gmra.mrb[42].mxu1 %vm79_vm4, %v20675_v59 }
 0x71b   :  { %16976 = vmatpush3.msra.mxu1 %v14800_v61  ;;  %16966 = vmatprep.mubr.msk.f32.mxu1 %vm79_vm4, %v20688_v35 }
 0x71c   :  { %16989 = vmatprep.subr.mxu1 %v14809_v46 }
 0x71e   :  { %16967 = vmatmul.mubr.msk.f32.gmra.mrb[44].mxu1 %vm79_vm4, %v20695_v52 }
 0x71f   :  { %16969 = vmatprep.mubr.msk.f32.mxu1 %vm79_vm4, %v20699_v20 }
 0x722   :  { %16970 = vmatmul.mubr.msk.f32.gmra.mrb[46].mxu1 %vm79_vm4, %v20704_v16 }
 0x723   :  { %16972 = vmatprep.mubr.msk.f32.mxu1 %vm79_vm4, %v20708_v28 }
 0x726   :  { %16973 = vmatmul.mubr.msk.f32.gmra.mrb[48].mxu1 %vm79_vm4, %v11958_v47 }
 0x727   :  { %16977 = vmatprep.mubr.msk.f32.mxu1 %vm79_vm4, %v11660_v7 }
 0x72a   :  { %16978 = vmatmul.mubr.msk.f32.vlgmr.msra.gmra.mrb[42].mxu1 %vm79_vm4, %v20747_v25 }
 0x72b   :  { %16990 = vmatpush3.msra.mxu1 %v14809_v46  ;;  %16980 = vmatprep.mubr.msk.f32.mxu1 %vm79_vm4, %v20751_v26 }
 0x72c   :  { %17003 = vmatprep.subr.mxu1 %v14818_v51 }
 0x72e   :  { %16981 = vmatmul.mubr.msk.f32.gmra.mrb[44].mxu1 %vm79_vm4, %v20755_v43 }
 0x72f   :  { %16983 = vmatprep.mubr.msk.f32.mxu1 %vm79_vm4, %v20759_v41 }
 0x732   :  { %16984 = vmatmul.mubr.msk.f32.gmra.mrb[46].mxu1 %vm79_vm4, %v20763_v44 }
 0x733   :  { %16986 = vmatprep.mubr.msk.f32.mxu1 %vm79_vm4, %v20767_v45 }
 0x736   :  { %16987 = vmatmul.mubr.msk.f32.gmra.mrb[48].mxu1 %vm79_vm4, %v12104_v39 }
 0x737   :  { %16991 = vmatprep.mubr.msk.f32.mxu1 %vm79_vm4, %v20717_v56 }
 0x73a   :  { %16992 = vmatmul.mubr.msk.f32.vlgmr.msra.gmra.mrb[42].mxu1 %vm79_vm4, %v20722_v13 }
 0x73b   :  { %17004 = vmatpush3.msra.mxu1 %v14818_v51  ;;  %16994 = vmatprep.mubr.msk.f32.mxu1 %vm79_vm4, %v20726_v30 }
 0x73c   :  { %17017 = vmatprep.subr.mxu1 %v14827_v3 }
 0x73e   :  { %16995 = vmatmul.mubr.msk.f32.gmra.mrb[44].mxu1 %vm79_vm4, %v20730_v10 }
 0x73f   :  { %16997 = vmatprep.mubr.msk.f32.mxu1 %vm79_vm4, %v20734_v36 }
 0x742   :  { %16998 = vmatmul.mubr.msk.f32.gmra.mrb[46].mxu1 %vm79_vm4, %v20738_v23 }
 0x743   :  { %17000 = vmatprep.mubr.msk.f32.mxu1 %vm79_vm4, %v11812_v1 }
 0x746   :  { %17001 = vmatmul.mubr.msk.f32.gmra.mrb[48].mxu1 %vm79_vm4, %v12250_v17 }
 0x747   :  { %17005 = vmatprep.mubr.msk.f32.mxu1 %vm79_vm4, %v20675_v59  ;;  %v12756_v59 = vld [vmem:[%s21041_s5] sm:$0xff] }
 0x748   :  { %v20880_v63 = vpack.c.bf16 %v12757_v0, %v12756_v59 }
 0x74a   :  { %17006 = vmatmul.mubr.msk.f32.vlgmr.msra.gmra.mrb[42].mxu1 %vm79_vm4, %v20688_v35  ;;  %17175 = vmatprep.subr.bf16.mxu0 %v20880_v63 }
 0x74b   :  { %17018 = vmatpush3.msra.mxu1 %v14827_v3  ;;  %17008 = vmatprep.mubr.msk.f32.mxu1 %vm79_vm4, %v20695_v52 }
 0x74e   :  { %17009 = vmatmul.mubr.msk.f32.gmra.mrb[44].mxu1 %vm79_vm4, %v20699_v20 }
 0x74f   :  { %17011 = vmatprep.mubr.msk.f32.mxu1 %vm79_vm4, %v20704_v16 }
 0x752   :  { %17012 = vmatmul.mubr.msk.f32.gmra.mrb[46].mxu1 %vm79_vm4, %v20708_v28 }
 0x753   :  { %17014 = vmatprep.mubr.msk.f32.mxu1 %vm79_vm4, %v11958_v47 }
 0x756   :  { %17015 = vmatmul.mubr.msk.f32.gmra.mrb[48].mxu1 %vm79_vm4, %v12396_v54 }
 0x757   :  { %17019 = vmatprep.mubr.msk.f32.mxu1 %vm79_vm4, %v20747_v25 }
 0x75a   :  { %17020 = vmatmul.mubr.msk.f32.vlgmr.msra.gmra.mrb[42].mxu1 %vm79_vm4, %v20751_v26 }
 0x75b   :  { %17022 = vmatprep.mubr.msk.f32.mxu1 %vm79_vm4, %v20755_v43 }
 0x75e   :  { %17023 = vmatmul.mubr.msk.f32.gmra.mrb[44].mxu1 %vm79_vm4, %v20759_v41 }
 0x75f   :  { %17025 = vmatprep.mubr.msk.f32.mxu1 %vm79_vm4, %v20763_v44 }
 0x762   :  { %17026 = vmatmul.mubr.msk.f32.gmra.mrb[46].mxu1 %vm79_vm4, %v20767_v45 }
 0x763   :  { %17028 = vmatprep.mubr.msk.f32.mxu1 %vm79_vm4, %v12104_v39 }
 0x766   :  { %17029 = vmatmul.mubr.msk.f32.gmra.mrb[48].mxu1 %vm79_vm4, %v12542_v57 }
 0x82d   :  { %v17021_v9 = vpop.f32.mrb[42].mxu1 }
 0x82e   :  { %v12689_v6 = vadd.f32 %v17021_v9, %v14836_v62  ;;  %v12634_v18 = vpop.f32.mrb[43].mxu1  ;;  %v14843_v9 = vld [vmem:[%s21041_s5 + $0x20] sm:$0xff] }
 0x82f   :  { %v12688_v29 = vadd.f32 %v14836_v62, %v12634_v18 }
 0x830   :  { %v12697_v5 = vmax.f32 %v12689_v6, 0.0  ;;  %v14844_v6 = vld [vmem:[%s21041_s5 + $0x28] sm:$0xff] }
 0x831   :  { %v12696_v31 = vmax.f32 %v12688_v29, 0.0  ;;  %v17024_v55 = vpop.f32.mrb[44].mxu1  ;;  %v17178_v29 = vpack.c.bf16 %v14844_v6, %v14843_v9 }
 0x832   :  { %12705 = vst.msk [vmem:[#allocation7 + $0x8] sm:$0xff] %vm5797_vm9, %v12697_v5  ;;  %v12691_v42 = vadd.f32 %v17024_v55, %v14836_v62  ;;  %v12644_v33 = vpop.f32.mrb[45].mxu1  ;;  %v14848_v55 = vld [vmem:[%s21041_s5 + $0x38] sm:$0xff] }
 0x833   :  { %12704 = vst.msk [vmem:[#allocation7] sm:$0xff] %vm5797_vm9, %v12696_v31  ;;  %v12690_v11 = vadd.f32 %v14836_v62, %v12644_v33  ;;  %v14847_v31 = vld [vmem:[%s21041_s5 + $0x30] sm:$0xff] }
 0x834   :  { %v12699_v14 = vmax.f32 %v12691_v42, 0.0  ;;  %v17182_v33 = vpack.c.bf16 %v14848_v55, %v14847_v31  ;;  %v13627_v55 = vld [vmem:[%s21043_s7] sm:$0xff] }
 0x835   :  { %v12698_v32 = vmax.f32 %v12690_v11, 0.0  ;;  %v17027_v48 = vpop.f32.mrb[46].mxu1 }
 0x836   :  { %12707 = vst.msk [vmem:[#allocation7 + $0x18] sm:$0xff] %vm5797_vm9, %v12699_v14  ;;  %v12693_v60 = vadd.f32 %v17027_v48, %v14836_v62  ;;  %v12654_v27 = vpop.f32.mrb[47].mxu1  ;;  %v14852_v14 = vld [vmem:[%s21041_s5 + $0x48] sm:$0xff] }
 0x837   :  { %12706 = vst.msk [vmem:[#allocation7 + $0x10] sm:$0xff] %vm5797_vm9, %v12698_v32  ;;  %v12692_v35 = vadd.f32 %v14836_v62, %v12654_v27  ;;  %v14855_v27 = vld [vmem:[%s21041_s5 + $0x50] sm:$0xff] }
 0x838   :  { %v12701_v4 = vmax.f32 %v12693_v60, 0.0 }
 0x839   :  { %v12713_v34 = vld [vmem:[#allocation7 + $0x8] ss:$2 sm:$0xf]  ;;  %v12721_v8 = vld [vmem:[#allocation7 + $0x9] ss:$2 sm:$0xf] }
 0x83a   :  { %v12729_v40 = vmax.f32 %v12713_v34, %v12721_v8  ;;  %v12712_v50 = vld [vmem:[#allocation7] ss:$2 sm:$0xf]  ;;  %v12720_v49 = vld [vmem:[#allocation7 + $0x1] ss:$2 sm:$0xf] }
 0x83b   :  { %12709 = vst.msk [vmem:[#allocation7 + $0x28] sm:$0xff] %vm5797_vm9, %v12701_v4  ;;  %v12728_v38 = vmax.f32 %v12712_v50, %v12720_v49  ;;  %v12700_v52 = vmax.f32 %v12692_v35, 0.0  ;;  %v17030_v20 = vpop.f32.mrb[48].mxu1  ;;  %v14856_v35 = vld [vmem:[%s21041_s5 + $0x58] sm:$0xff]  ;;  %v14860_v50 = vld [vmem:[%s21041_s5 + $0x68] sm:$0xff] }
 0x83c   :  { %v12737_v16 = vsel %vm5845_vm10, %v12729_v40, -inf  ;;  %v12695_v19 = vadd.f32 %v17030_v20, %v14836_v62  ;;  %v12664_v28 = vpop.f32.mrb[49].mxu1  ;;  %v17190_v34 = vpack.c.bf16 %v14856_v35, %v14855_v27  ;;  %v14859_v40 = vld [vmem:[%s21041_s5 + $0x60] sm:$0xff]  ;;  %v14863_v20 = vld [vmem:[%s21041_s5 + $0x70] sm:$0xff] }
 0x83d   :  { %v12736_v21 = vsel %vm5845_vm10, %v12728_v38, -inf  ;;  %v12715_v2 = vld [vmem:[#allocation7 + $0x18] ss:$2 sm:$0xf]  ;;  %12708 = vst.msk [vmem:[#allocation7 + $0x20] sm:$0xff] %vm5797_vm9, %v12700_v52  ;;  %v12694_v56 = vadd.f32 %v14836_v62, %v12664_v28  ;;  %v17194_v38 = vpack.c.bf16 %v14860_v50, %v14859_v40 }
 0x83e   :  { %v12738_v13 = vmax.f32 %v12736_v21, %v12737_v16  ;;  %v12723_v30 = vld [vmem:[#allocation7 + $0x19] ss:$2 sm:$0xf]  ;;  %v12714_v10 = vld [vmem:[#allocation7 + $0x10] ss:$2 sm:$0xf] }
 0x83f   :  { %v12731_v36 = vmax.f32 %v12715_v2, %v12723_v30  ;;  %v12722_v22 = vld [vmem:[#allocation7 + $0x11] ss:$2 sm:$0xf]  ;;  %v12703_v23 = vmax.f32 %v12695_v19, 0.0  ;;  %v12702_v7 = vmax.f32 %v12694_v56, 0.0  ;;  %v14864_v16 = vld [vmem:[%s21041_s5 + $0x78] sm:$0xff] }
 0x840   :  { %12748 = vst.msk [vmem:[#allocation4 + $0x9] sm:$0xf] %vm5845_vm10, %v12738_v13  ;;  %v12730_v24 = vmax.f32 %v12714_v10, %v12722_v22  ;;  %v17198_v28 = vpack.c.bf16 %v14864_v16, %v14863_v20  ;;  %v14867_v2 = vld [vmem:[%s21041_s5 + $0x80] sm:$0xff]  ;;  %v14868_v56 = vld [vmem:[%s21041_s5 + $0x88] sm:$0xff] }
 0x841   :  { %v12740_v25 = vsel %vm5845_vm10, %v12731_v36, -inf  ;;  %12711 = vst.msk [vmem:[#allocation7 + $0x38] sm:$0xff] %vm5797_vm9, %v12703_v23  ;;  %12710 = vst.msk [vmem:[#allocation7 + $0x30] sm:$0xff] %vm5797_vm9, %v12702_v7  ;;  %v17202_v30 = vpack.c.bf16 %v14868_v56, %v14867_v2  ;;  %v14872_v7 = vld [vmem:[%s21043_s7 + $0x10] sm:$0xff] }
 0x842   :  { %v12717_v26 = vld [vmem:[#allocation7 + $0x28] ss:$2 sm:$0xf]  ;;  %v12739_v43 = vsel %vm5845_vm10, %v12730_v24, -inf }
 0x843   :  { %v12725_v41 = vld [vmem:[#allocation7 + $0x29] ss:$2 sm:$0xf]  ;;  %v12741_v44 = vmax.f32 %v12739_v43, %v12740_v25 }
 0x844   :  { %v12733_v45 = vmax.f32 %v12717_v26, %v12725_v41  ;;  %v12716_v61 = vld [vmem:[#allocation7 + $0x20] ss:$2 sm:$0xf]  ;;  %v12724_v1 = vld [vmem:[#allocation7 + $0x21] ss:$2 sm:$0xf] }
 0x845   :  { %12749 = vst.msk [vmem:[#allocation4 + $0x11] sm:$0xf] %vm5845_vm10, %v12741_v44  ;;  %v12732_v47 = vmax.f32 %v12716_v61, %v12724_v1  ;;  %v14873_v24 = vld [vmem:[%s21043_s7 + $0x18] sm:$0xff]  ;;  %v14871_v26 = vld [vmem:[%s21042_s6] ss:$0 sm:$0xff] }
 0x846   :  { %v12743_v46 = vsel %vm5845_vm10, %v12733_v45, -inf  ;;  %v17207_v25 = vpack.c.bf16 %v14873_v24, %v14872_v7 }
 0x847   :  { %v12742_v51 = vsel %vm5845_vm10, %v12732_v47, -inf  ;;  %v17912_v39 = vld [vmem:[#allocation4 + $0x1] ss:$8 sps:$4 sm:$0xff]  }
 0x848   :  { %v12744_v3 = vmax.f32 %v12742_v51, %v12743_v46  ;;  %v12719_v17 = vld [vmem:[#allocation7 + $0x38] ss:$2 sm:$0xf]  ;;  %v12727_v54 = vld [vmem:[#allocation7 + $0x39] ss:$2 sm:$0xf]  ;;  %17035 = vmatprep.mubr.msk.f32.mxu0 %vm5797_vm9, %v17912_v39 }
 0x849   :  { %v12735_v57 = vmax.f32 %v12719_v17, %v12727_v54  ;;  %v12718_v15 = vld [vmem:[#allocation7 + $0x30] ss:$2 sm:$0xf]  ;;  %v12726_v53 = vld [vmem:[#allocation7 + $0x31] ss:$2 sm:$0xf] }
 0x84a   :  { %12750 = vst.msk [vmem:[#allocation4 + $0x19] sm:$0xf] %vm5845_vm10, %v12744_v3  ;;  %v12734_v58 = vmax.f32 %v12718_v15, %v12726_v53  ;;  %v17914_v5 = vld [vmem:[#allocation4] ss:$8 sps:$4 sm:$0xff]  }
 0x84b   :  { %v12746_v59 = vsel %vm5845_vm10, %v12735_v57, -inf  ;;  %v17916_v11 = vld [vmem:[#allocation4 + $0x2] ss:$8 sps:$4 sm:$0xff]  }
 0x84c   :  { %v12745_v0 = vsel %vm5845_vm10, %v12734_v58, -inf  ;;  %v17918_v60 = vld [vmem:[#allocation4 + $0x8] ss:$8 sps:$4 sm:$0xff]  }
 0x84d   :  { %v12747_v62 = vmax.f32 %v12745_v0, %v12746_v59  ;;  %v17920_v8 = vld [vmem:[#allocation4 + $0x9] ss:$8 sps:$4 sm:$0xff]  }
 0x84e   :  { %v17922_v52 = vld [vmem:[#allocation4 + $0xa] ss:$8 sps:$4 sm:$0xff]  }
 0x84f   :  { %12751 = vst.msk [vmem:[#allocation4 + $0x21] sm:$0xf] %vm5845_vm10, %v12747_v62 }
 0x851   :  { %v17913_v18 = vld [vmem:[#allocation4 + $0x11] ss:$8 sps:$4 sm:$0xff]  }
 0x852   :  { %17036 = vmatmul.mubr.msk.f32.vlgmr.msra.gmra.mrb[40].mxu0 %vm5797_vm9, %v17913_v18  ;;  %v17915_v42 = vld [vmem:[#allocation4 + $0x10] ss:$8 sps:$4 sm:$0xff]  }
 0x853   :  { %17177 = vmatpush3.bf16.msra.mxu0 %v20880_v63  ;;  %17042 = vmatprep.mubr.msk.f32.mxu0 %vm5797_vm9, %v17914_v5  ;;  %v14851_v63 = vld [vmem:[%s21041_s5 + $0x40] sm:$0xff] }
 0x854   :  { %17179 = vmatprep.subr.bf16.mxu0 %v17178_v29  ;;  %v17917_v32 = vld [vmem:[#allocation4 + $0x12] ss:$8 sps:$4 sm:$0xff]   ;;  %v17186_v48 = vpack.c.bf16 %v14852_v14, %v14851_v63 }
 0x855   :  { %v17924_v21 = vld [vmem:[#allocation4 + $0x10] ss:$8 sps:$4 sm:$0xff]  }
 0x856   :  { %v17919_v4 = vld [vmem:[#allocation4 + $0x18] ss:$8 sps:$4 sm:$0xff]  }
 0x857   :  { %v17921_v49 = vld [vmem:[#allocation4 + $0x19] ss:$8 sps:$4 sm:$0xff]  }
 0x858   :  { %v17923_v19 = vld [vmem:[#allocation4 + $0x1a] ss:$8 sps:$4 sm:$0xff]  }
 0x859   :  { %v17925_v13 = vld [vmem:[#allocation4 + $0x20] ss:$8 sps:$4 sm:$0xff]   ;;  %v17926_v10 = vld [vmem:[#allocation4 + $0x11] ss:$8 sps:$4 sm:$0xff]  }
 0x85a   :  { %17043 = vmatmul.mubr.msk.f32.vlgmr.msra.gmra.mrb[40].mxu0 %vm5797_vm9, %v17915_v42  ;;  %v17927_v36 = vld [vmem:[#allocation4 + $0x21] ss:$8 sps:$4 sm:$0xff]   ;;  %v17928_v22 = vld [vmem:[#allocation4 + $0x12] ss:$8 sps:$4 sm:$0xff]  }
 0x85b   :  { %17181 = vmatpush3.bf16.msra.mxu0 %v17178_v29  ;;  %17049 = vmatprep.mubr.msk.f32.mxu0 %vm5797_vm9, %v17916_v11  ;;  %v17929_v23 = vld [vmem:[#allocation4 + $0x22] ss:$8 sps:$4 sm:$0xff]   ;;  %v13628_v42 = vld [vmem:[%s21043_s7 + $0x8] sm:$0xff]  ;;  %v14876_v11 = vld [vmem:[%s21043_s7 + $0x20] sm:$0xff] }
 0x85c   :  { %17183 = vmatprep.subr.bf16.mxu0 %v17182_v33  ;;  %v14877_v63 = vld [vmem:[%s21043_s7 + $0x28] sm:$0xff] }
 0x862   :  { %17050 = vmatmul.mubr.msk.f32.vlgmr.msra.gmra.mrb[40].mxu0 %vm5797_vm9, %v17917_v32  ;;  %v17213_v32 = vpack.c.bf16 %v14877_v63, %v14876_v11 }
 0x863   :  { %17185 = vmatpush3.bf16.msra.mxu0 %v17182_v33  ;;  %17056 = vmatprep.mubr.msk.f32.mxu0 %vm5797_vm9, %v17918_v60  ;;  %v17210_v33 = vpack.c.bf16 %v13628_v42, %v13627_v55  ;;  %v14880_v60 = vld [vmem:[%s21043_s7 + $0x38] sm:$0xff] }
 0x864   :  { %17187 = vmatprep.subr.bf16.mxu0 %v17186_v48 }
 0x86a   :  { %17057 = vmatmul.mubr.msk.f32.vlgmr.msra.gmra.mrb[40].mxu0 %vm5797_vm9, %v17919_v4 }
 0x86b   :  { %17189 = vmatpush3.bf16.msra.mxu0 %v17186_v48  ;;  %17063 = vmatprep.mubr.msk.f32.mxu0 %vm5797_vm9, %v17920_v8  ;;  %v14879_v48 = vld [vmem:[%s21043_s7 + $0x30] sm:$0xff] }
 0x86c   :  { %17191 = vmatprep.subr.bf16.mxu0 %v17190_v34  ;;  %v17216_v35 = vpack.c.bf16 %v14880_v60, %v14879_v48 }
 0x872   :  { %17064 = vmatmul.mubr.msk.f32.vlgmr.msra.gmra.mrb[40].mxu0 %vm5797_vm9, %v17921_v49 }
 0x873   :  { %17193 = vmatpush3.bf16.msra.mxu0 %v17190_v34  ;;  %17070 = vmatprep.mubr.msk.f32.mxu0 %vm5797_vm9, %v17922_v52 }
 0x874   :  { %17195 = vmatprep.subr.bf16.mxu0 %v17194_v38 }
 0x87a   :  { %17071 = vmatmul.mubr.msk.f32.vlgmr.msra.gmra.mrb[40].mxu0 %vm5797_vm9, %v17923_v19 }
 0x87b   :  { %17197 = vmatpush3.bf16.msra.mxu0 %v17194_v38  ;;  %17077 = vmatprep.mubr.msk.f32.mxu0 %vm5797_vm9, %v17924_v21 }
 0x87c   :  { %17199 = vmatprep.subr.bf16.mxu0 %v17198_v28 }
 0x882   :  { %17078 = vmatmul.mubr.msk.f32.vlgmr.msra.gmra.mrb[40].mxu0 %vm5797_vm9, %v17925_v13 }
 0x883   :  { %17201 = vmatpush3.bf16.msra.mxu0 %v17198_v28  ;;  %17084 = vmatprep.mubr.msk.f32.mxu0 %vm5797_vm9, %v17926_v10 }
 0x884   :  { %17203 = vmatprep.subr.bf16.mxu0 %v17202_v30 }
 0x88a   :  { %17085 = vmatmul.mubr.msk.f32.vlgmr.msra.gmra.mrb[40].mxu0 %vm5797_vm9, %v17927_v36 }
 0x88b   :  { %17205 = vmatpush3.bf16.msra.mxu0 %v17202_v30  ;;  %17091 = vmatprep.mubr.msk.f32.mxu0 %vm5797_vm9, %v17928_v22 }
 0x88c   :  { %17206 = vmatprep.subr.bf16.mxu0 %v17957_v37 }
 0x892   :  { %17092 = vmatmul.mubr.msk.f32.vlgmr.msra.gmra.mrb[40].mxu0 %vm5797_vm9, %v17929_v23 }
 0x893   :  { %17098 = vmatprep.mubr.msk.f32.mxu0 %vm17958_vm11, %v21164_v12  ;;  %17208 = vmatpush3.bf16.msra.mxu0 %v17207_v25 }
 0x894   :  { %17209 = vmatprep.subr.bf16.mxu0 %v17957_v37 }
 0x965   :  { %v17093_v43 = vpop.f32.mrb[40].mxu0 }
 0x966   :  { %v13593_v41 = vadd.f32 %v17093_v43, %v14871_v26  ;;  %v13574_v44 = vpop.f32.mrb[41].mxu0 }
 0x967   :  { %v13592_v45 = vadd.f32 %v14871_v26, %v13574_v44 }
 0x968   :  { %v13595_v61 = vmax.f32 %v13593_v41, 0.0 }
 0x969   :  { %v13594_v1 = vmax.f32 %v13592_v45, 0.0 }
 0x96a   :  { %v13599_v46 = vcombine.high %v13595_v61, %v13595_v61  ;;  %13604 = vst.msk [vmem:[#allocation8 + $0x8] sm:$0xf] %vm5845_vm10, %v13595_v61 }
 0x96b   :  { %v13598_v47 = vcombine.high %v13594_v1, %v13594_v1  ;;  %13602 = vst.msk [vmem:[#allocation8] sm:$0xf] %vm5845_vm10, %v13594_v1 }
 0x96c   :  { %13605 = vst.msk [vmem:[#allocation8 + $0xc] sm:$0xf] %vm5845_vm10, %v13599_v46 }
 0x96d   :  { %13603 = vst.msk [vmem:[#allocation8 + $0x4] sm:$0xf] %vm5845_vm10, %v13598_v47 }
 0x971   :  { %v13608_v51 = vld [vmem:[#allocation8 + $0x8] ss:$2 sm:$0x3]  ;;  %v13612_v39 = vld [vmem:[#allocation8 + $0x9] ss:$2 sm:$0x3] }
 0x972   :  { %v13616_v3 = vmax.f32 %v13608_v51, %v13612_v39  ;;  %v13606_v17 = vld [vmem:[#allocation8] ss:$2 sm:$0x3]  ;;  %v13610_v54 = vld [vmem:[#allocation8 + $0x1] ss:$2 sm:$0x3] }
 0x973   :  { %v13609_v57 = vld [vmem:[#allocation8 + $0xc] ss:$2 sm:$0x3]  ;;  %v13613_v15 = vld [vmem:[#allocation8 + $0xd] ss:$2 sm:$0x3]  ;;  %v13614_v59 = vmax.f32 %v13606_v17, %v13610_v54 }
 0x974   :  { %v13617_v53 = vmax.f32 %v13609_v57, %v13613_v15  ;;  %v13607_v58 = vld [vmem:[#allocation8 + $0x4] ss:$2 sm:$0x3]  ;;  %v13611_v0 = vld [vmem:[#allocation8 + $0x5] ss:$2 sm:$0x3] }
 0x975   :  { %v13621_v62 = vsel %vm6745_vm12, %v13616_v3, -inf  ;;  %v13615_v6 = vmax.f32 %v13607_v58, %v13611_v0  ;;  %v13618_v29 = vsel %vm6745_vm12, %v13614_v59, -inf }
 0x976   :  { %v13622_v9 = vsel %vm6745_vm12, %v13617_v53, -inf }
 0x977   :  { %v13623_v18 = vmax.f32 %v13621_v62, %v13622_v9  ;;  %v13619_v5 = vsel %vm6745_vm12, %v13615_v6, -inf }
 0x978   :  { %v13620_v31 = vmax.f32 %v13618_v29, %v13619_v5 }
 0x979   :  { %13625 = vst.msk [vmem:[#allocation5 + $0x9] sm:$0x3] %vm6745_vm12, %v13623_v18 }
 0x97a   :  { %13624 = vst.msk [vmem:[#allocation5 + $0x5] sm:$0x3] %vm6745_vm12, %v13620_v31 }
 0x980   :  { %v13778_v4 = vld [vmem:[#allocation5 + $0x9] sm:$0x1]  ;;  %v13855_v34 = vld [vmem:[#allocation5 + $0xa] sm:$0x1] }
 0x981   :  { %v13629_v14 = vld [vmem:[#allocation5 + $0x6] sm:$0x1]  ;;  %v13626_v27 = vld [vmem:[#allocation5 + $0x5] sm:$0x1] }
 0x982   :  { %17099 = vmatmul.mubr.msk.f32.vlgmr.msra.gmra.mrb[42].mxu0 %vm5797_vm9, %v13629_v14 }
 0x983   :  { %17211 = vmatpush3.bf16.msra.mxu0 %v17210_v33  ;;  %17105 = vmatprep.mubr.msk.f32.mxu0 %vm17958_vm11, %v21164_v12 }
 0x984   :  { %17212 = vmatprep.subr.bf16.mxu0 %v17957_v37 }
 0x986   :  { %17106 = vmatmul.mubr.msk.f32.vlgmr.msra.gmra.mrb[44].mxu0 %vm5797_vm9, %v13626_v27 }
 0x987   :  { %17214 = vmatpush3.bf16.msra.mxu0 %v17213_v32  ;;  %17112 = vmatprep.mubr.msk.f32.mxu0 %vm17958_vm11, %v21164_v12 }
 0x988   :  { %17215 = vmatprep.subr.bf16.mxu0 %v17957_v37  ;;  %v13932_v37 = vld [vmem:[%s21044_s8] sm:$0x1] }
 0x98a   :  { %17113 = vmatmul.mubr.msk.f32.vlgmr.msra.gmra.mrb[46].mxu0 %vm5797_vm9, %v13778_v4 }
 0x98b   :  { %17217 = vmatpush3.bf16.msra.mxu0 %v17216_v35  ;;  %17119 = vmatprep.mubr.msk.f32.mxu0 %vm17958_vm11, %v21164_v12 }
 0x98e   :  { %17120 = vmatmul.mubr.msk.f32.vlgmr.msra.gmra.mrb[48].mxu0 %vm5797_vm9, %v13855_v34 }
 0xa55   :  { %v13701_v8 = vpop.f32.mrb[42].mxu0 }
 0xa56   :  { %v17100_v40 = vpop.f32.mrb[43].mxu0 }
 0xa59   :  { %v13774_v50 = vpop.f32.mrb[44].mxu0 }
 0xa5a   :  { %v13775_v49 = vadd.f32 %v13774_v50, %v13701_v8  ;;  %v17107_v38 = vpop.f32.mrb[45].mxu0 }
 0xa5d   :  { %v13850_v52 = vpop.f32.mrb[46].mxu0 }
 0xa5e   :  { %v13854_v20 = vadd.f32 %v13850_v52, %v13775_v49  ;;  %v17114_v16 = vpop.f32.mrb[47].mxu0 }
 0xa61   :  { %v13927_v19 = vpop.f32.mrb[48].mxu0 }
 0xa62   :  { %v13931_v28 = vadd.f32 %v13927_v19, %v13854_v20  ;;  %v17121_v21 = vpop.f32.mrb[49].mxu0 }
 0xa64   :  { %v13933_v12 = vadd.f32 %v13932_v37, %v13931_v28 }
 0xa66   :  { %v13934_v2 = vmax.f32 %v13933_v12, 0.0 }
 0xa68   :  { %13935 = vst.msk [vmem:[#allocation9 + $0x1] sm:$0x1] %vm7068_vm13, %v13934_v2 }
 0xa69   :  { %17943 = shalt.err (!%p17940_p4)
}
 0xa6a   :  { %s17944_s8 = scalar_lea.hbm %s21045_s9, 32 }
 0xa6b   :  { %p17945_p5 = scmp.ne.s32.totalorder %s21045_s9, %s17944_s8  ;;  %p17948_p6 = scmp.lt.u32.totalorder %s17944_s8, %s21045_s9 }
 0xa6d   :  { %p17950_p7 = pnand %p17948_p6, %p17945_p5 }
 0xa6f   :  { %17953 = shalt.err (!%p17950_p7)
}
 0xa70   :  { %13945 = dma.vmem_to_hbm [thread:$0]  %s13943_s10, 32, %s21045_s9, [#allocation10]  }
 0xa71   :  { %17954 = dma.done.wait [#allocation10], 32  }
 0xa72   :  { %17955 = vsyncadd [#allocation10], 4294967264 }
 0xa73   :  { %13949 = vsyncpa [#allocation10], 1 }

</bundles_post_ra>
